<compile_context>
chip_gen: v6e
topology: v6e:2x2x1
jax: 0.10.0
libtpu: 0.0.40
codegen_flags: <defaults>
</compile_context>

<pallas_src>
import numpy as np

import jax
import jax.numpy as jnp
from jax.experimental import pallas as pl
from jax.experimental.pallas import tpu as pltpu


# ------------------------------------------------------------------ helpers --
def _fold_bn(w_oihw, bn, eps=1e-3):
    """Fold eval-mode BN into conv weights; returns (folded_w, bias)."""
    gamma, beta, mean, var = bn
    scale = gamma / jnp.sqrt(var + eps)
    return w_oihw * scale[:, None, None, None], beta - mean * scale


def _w3x3_taps(w_oihw):
    """(Cout, Cin, 3, 3) -> (9, Cout, Cin), tap index t = dh * 3 + dw."""
    cout, cin = w_oihw.shape[0], w_oihw.shape[1]
    return jnp.transpose(w_oihw, (2, 3, 0, 1)).reshape(9, cout, cin)


def _tap_masks(n, h, w):
    """(9, n*h*w) 0/1 masks: mask[t, p] = 1 iff tap t of output pixel p is in-image."""
    m = np.zeros((9, n * h * w), np.float32)
    for dh in range(3):
        for dw in range(3):
            t = dh * 3 + dw
            for i in range(h):
                if not (0 <= i + dh - 1 < h):
                    continue
                for j in range(w):
                    if 0 <= j + dw - 1 < w:
                        for b in range(n):
                            m[t, b * h * w + i * w + j] = 1.0
    return m


def _subsample_t(n, h, w, s):
    """(n*h*w, n*ho*wo) right-multiply matrix selecting pixels (s*i, s*j)."""
    ho, wo = (h - 1) // s + 1, (w - 1) // s + 1
    mat = np.zeros((n * h * w, n * ho * wo), np.float32)
    for b in range(n):
        for i in range(ho):
            for j in range(wo):
                mat[b * h * w + (s * i) * w + s * j, b * ho * wo + i * wo + j] = 1.0
    return mat


def _upsample_t(n, hc, wc, f):
    """(n*hc*wc, n*hf*wf) right-multiply matrix for nearest-neighbour upsample."""
    hf, wf = hc * f, wc * f
    mat = np.zeros((n * hc * wc, n * hf * wf), np.float32)
    for b in range(n):
        for i in range(hf):
            for j in range(wf):
                mat[b * hc * wc + (i // f) * wc + j // f, b * hf * wf + i * wf + j] = 1.0
    return mat


# ------------------------------------------------------- fused forward build --
def build_forward(params, strides, x_shape):
    """Build a jitted forward(x_nchw) -> tuple of NCHW FPN outputs.

    Everything (both ResNet basic blocks + the FPN) runs in one grid-less
    pallas_call; activations are channel-major (C, N*H*W) inside the kernel.
    """
    N, cin0, H0, W0 = x_shape
    nf = params["fpn_lateral"][0][0].shape[0]
    f32 = jnp.float32

    flat = []  # kernel inputs after x (weights, biases, masks, selection mats)

    def add(arr):
        flat.append(jnp.asarray(arr, dtype=f32))
        return len(flat)  # ref index (x occupies ref slot 0)

    mask_cache, sub_cache, up_cache = {}, {}, {}

    def mask_idx(h, w):
        if (h, w) not in mask_cache:
            mask_cache[(h, w)] = add(_tap_masks(N, h, w))
        return mask_cache[(h, w)]

    def sub_idx(h, w, s):
        if (h, w, s) not in sub_cache:
            sub_cache[(h, w, s)] = add(_subsample_t(N, h, w, s))
        return sub_cache[(h, w, s)]

    def up_idx(h, w, f):
        if (h, w, f) not in up_cache:
            up_cache[(h, w, f)] = add(_upsample_t(N, h, w, f))
        return up_cache[(h, w, f)]

    scratch_map, scratch_shapes = {}, []

    def buf_idx(c, h, w):
        # Halo-padded row buffer: (C, N*h*w + 2*(w+1)); the (w+1)-wide halos stay
        # zero so every flat-shifted tap read is in-bounds.
        key = (c, h, w)
        if key not in scratch_map:
            scratch_map[key] = len(scratch_shapes)
            scratch_shapes.append(pltpu.VMEM((c, N * h * w + 2 * (w + 1)), f32))
        return scratch_map[key]

    # ------------------------------- static plan: ResNet backbone ------------
    stage_plan, feat_info = [], []
    c, h, w = cin0, H0, W0
    for blocks in params["stages"]:
        bplans = []
        for blk in blocks:
            s = blk["stride"]
            cout = blk["conv1"].shape[0]
            ho, wo = (h - 1) // s + 1, (w - 1) // s + 1
            w1, b1 = _fold_bn(blk["conv1"], blk["bn1"])
            w2, b2 = _fold_bn(blk["conv2"], blk["bn2"])
            bp = dict(
                s=s, in_hw=(h, w), out_hw=(ho, wo),
                w1=add(_w3x3_taps(w1)), b1=add(b1.reshape(cout, 1)),
                w2=add(_w3x3_taps(w2)), b2=add(b2.reshape(cout, 1)),
                m_in=mask_idx(h, w), m_out=mask_idx(ho, wo),
                buf1=buf_idx(c, h, w), buf2=buf_idx(cout, ho, wo),
            )
            if s != 1:
                bp["sub"] = sub_idx(h, w, s)
            if "down_conv" in blk:
                wd, bd = _fold_bn(blk["down_conv"], blk["down_bn"])
                bp["wd"] = add(wd.reshape(cout, c))
                bp["bd"] = add(bd.reshape(cout, 1))
            bplans.append(bp)
            c, h, w = cout, ho, wo
        stage_plan.append(bplans)
        feat_info.append((c, h, w))

    # ------------------------------- static plan: FPN ------------------------
    lat_plan, fconv_plan, upd_plan = [], [], []
    for i, (ci, hi, wi) in enumerate(feat_info):
        lw, lb = params["fpn_lateral"][i]          # 1x1 conv + bias (no norm)
        lat_plan.append(dict(w=add(lw.reshape(nf, ci)), b=add(lb.reshape(nf, 1))))
        fw, fb = params["fpn_conv"][i]             # 3x3 conv + bias (no norm)
        fconv_plan.append(dict(
            w=add(_w3x3_taps(fw)), b=add(fb.reshape(nf, 1)),
            m=mask_idx(hi, wi), buf=buf_idx(nf, hi, wi), hw=(hi, wi)))
    for i in range(len(feat_info) - 1, 0, -1):     # top-down pathway
        f = strides[i]
        _, hi, wi = feat_info[i]
        u = dict(src=i, dst=i - 1, f=f)
        if f != 1:
            u["up"] = up_idx(hi, wi, f)
        upd_plan.append(u)

    n_in = 1 + len(flat)
    n_out = len(feat_info)
    out_shapes = tuple(
        jax.ShapeDtypeStruct((nf, N * hi * wi), f32) for (_, hi, wi) in feat_info)

    # ------------------------------- the single fused kernel -----------------
    def kernel(*refs):
        in_refs = refs[:n_in]
        out_refs = refs[n_in:n_in + n_out]
        scratch = refs[n_in + n_out:]

        # Zero the halo scratch buffers once; interiors are fully overwritten
        # before every use, so the halos stay zero across reuse.
        for buf in scratch:
            buf[...] = jnp.zeros(buf.shape, buf.dtype)

        def conv3x3(x_cm, hw, w_i, b_i, m_i, slot):
            # x_cm: (Cin, N*h*w) channel-major activation (stride-1, pad=1 conv).
            h_, w_ = hw
            m = N * h_ * w_
            off0 = w_ + 1
            buf = scratch[slot]
            buf[:, off0:off0 + m] = x_cm          # stage into the halo buffer
            wt = in_refs[w_i][...]                # (9, Cout, Cin)
            mk = in_refs[m_i][...]                # (9, m) 0/1 tap masks
            acc = None
            for dh in range(3):
                for dw in range(3):
                    t = dh * 3 + dw
                    o = (dh - 1) * w_ + (dw - 1)  # flat pixel shift of this tap
                    tap = buf[:, off0 + o:off0 + o + m] * mk[t:t + 1, :]
                    y = jnp.dot(wt[t], tap, preferred_element_type=f32)
                    acc = y if acc is None else acc + y
            return acc + in_refs[b_i][...]        # fused (BN-folded) bias

        # ---------------- ResNet backbone (basic blocks) ----------------
        feats = []
        cur = in_refs[0][...]                     # (Cin0, N*H0*W0)
        for bplans in stage_plan:
            for bp in bplans:
                y = conv3x3(cur, bp["in_hw"], bp["w1"], bp["b1"],
                            bp["m_in"], bp["buf1"])
                if bp["s"] != 1:
                    st = in_refs[bp["sub"]][...]  # stride-2 column selector
                    y = jnp.dot(y, st, preferred_element_type=f32)
                    x_id = jnp.dot(cur, st, preferred_element_type=f32)
                else:
                    x_id = cur
                y = jnp.maximum(y, 0.0)
                y = conv3x3(y, bp["out_hw"], bp["w2"], bp["b2"],
                            bp["m_out"], bp["buf2"])
                if "wd" in bp:                    # 1x1 downsample branch
                    ident = jnp.dot(in_refs[bp["wd"]][...], x_id,
                                    preferred_element_type=f32) + in_refs[bp["bd"]][...]
                else:
                    ident = x_id
                cur = jnp.maximum(y + ident, 0.0)  # fused residual add + ReLU
            feats.append(cur)

        # ---------------- FPN neck ----------------
        lats = []
        for i, lp in enumerate(lat_plan):
            lats.append(jnp.dot(in_refs[lp["w"]][...], feats[i],
                                preferred_element_type=f32) + in_refs[lp["b"]][...])
        for u in upd_plan:                        # fused nearest-upsample + add
            if u["f"] != 1:
                ut = in_refs[u["up"]][...]
                lats[u["dst"]] = lats[u["dst"]] + jnp.dot(
                    lats[u["src"]], ut, preferred_element_type=f32)
            else:
                lats[u["dst"]] = lats[u["dst"]] + lats[u["src"]]
        for i, cp in enumerate(fconv_plan):
            o = conv3x3(lats[i], cp["hw"], cp["w"], cp["b"], cp["m"], cp["buf"])
            out_refs[i][...] = o                  # lane-dense (nf, N*h*w) store

    fused = pl.pallas_call(
        kernel,
        out_shape=out_shapes,
        scratch_shapes=scratch_shapes,
    )

    weights = tuple(flat)

    def forward(x_nchw):
        # NCHW -> channel-major (C, N*H*W); boundary layout glue only.
        x_cm = jnp.transpose(x_nchw.astype(f32), (1, 0, 2, 3)).reshape(
            cin0, N * H0 * W0)
        outs2d = fused(x_cm, *weights)
        outs = []
        for o2d, (_, hi, wi) in zip(outs2d, feat_info):
            outs.append(jnp.transpose(o2d.reshape(nf, N, hi, wi), (1, 0, 2, 3)))
        return tuple(outs)

    return jax.jit(forward)


# ------------------------------------------------------------ param builders --
def init_conv(key, cout, cin, k):
    fan = cin * k * k
    std = (2.0 / fan) ** 0.5
    return jax.random.normal(key, (cout, cin, k, k), jnp.float32) * std


def init_bn(key, c):
    k1, k2, k3, k4 = jax.random.split(key, 4)
    gamma = 1.0 + 0.1 * jax.random.normal(k1, (c,), jnp.float32)
    beta = 0.1 * jax.random.normal(k2, (c,), jnp.float32)
    mean = 0.1 * jax.random.normal(k3, (c,), jnp.float32)
    var = 1.0 + 0.1 * jnp.abs(jax.random.normal(k4, (c,), jnp.float32))
    return (gamma, beta, mean, var)


def build_params(key, num_input_features, layer_nums, strides, filters, fpn_filters):
    params = {"stages": [], "fpn_lateral": [], "fpn_conv": []}
    inplanes = num_input_features
    for nblk, stride, planes in zip(layer_nums, strides, filters):
        blocks = []
        for bi in range(nblk):
            s = stride if bi == 0 else 1
            cin = inplanes if bi == 0 else planes
            key, k1, k2, k3, k4, k5, k6 = jax.random.split(key, 7)
            blk = {
                "conv1": init_conv(k1, planes, cin, 3),
                "bn1": init_bn(k2, planes),
                "conv2": init_conv(k3, planes, planes, 3),
                "bn2": init_bn(k4, planes),
                "stride": s,
            }
            if s != 1 or cin != planes:
                blk["down_conv"] = init_conv(k5, planes, cin, 1)
                blk["down_bn"] = init_bn(k6, planes)
            blocks.append(blk)
        params["stages"].append(blocks)
        inplanes = planes
    # FPN ConvModules (no norm -> conv + bias, no activation)
    for c in filters:
        key, k1, k2 = jax.random.split(key, 3)
        params["fpn_lateral"].append(
            (init_conv(k1, fpn_filters, c, 1),
             0.1 * jax.random.normal(k2, (fpn_filters,), jnp.float32)))
    for _ in filters:
        key, k1, k2 = jax.random.split(key, 3)
        params["fpn_conv"].append(
            (init_conv(k1, fpn_filters, fpn_filters, 3),
             0.1 * jax.random.normal(k2, (fpn_filters,), jnp.float32)))
    return params


# ----------------------------------------------------------------------- main --
if __name__ == "__main__":
    layer_nums = [1, 1]
    ds_layer_strides = [1, 2]
    ds_num_filters = [8, 16]
    num_input_features = 4
    fpn_num_filters = 8

    key = jax.random.PRNGKey(0)
    kx, kp = jax.random.split(key)
    x = jax.random.normal(kx, (2, num_input_features, 16, 16), jnp.float32)  # NCHW
    params = build_params(kp, num_input_features, layer_nums, ds_layer_strides,
                          ds_num_filters, fpn_num_filters)

    fwd = build_forward(params, ds_layer_strides, x.shape)
    outs = fwd(x)
    outs = jax.block_until_ready(outs)

    assert outs[0].shape == (2, fpn_num_filters, 16, 16), outs[0].shape
    assert outs[1].shape == (2, fpn_num_filters, 8, 8), outs[1].shape
    assert all(bool(jnp.isfinite(o).all()) for o in outs)
    print("KERNEL_OK")
</pallas_src>

<mosaic_0001>
module attributes {stable_mosaic.version = 11 : i64} {
  func.func @kernel(%arg0: memref<4x512xf32, #tpu.memory_space<vmem>>, %arg1: memref<9x8x4xf32, #tpu.memory_space<vmem>>, %arg2: memref<8x1xf32, #tpu.memory_space<vmem>>, %arg3: memref<9x8x8xf32, #tpu.memory_space<vmem>>, %arg4: memref<8x1xf32, #tpu.memory_space<vmem>>, %arg5: memref<9x512xf32, #tpu.memory_space<vmem>>, %arg6: memref<8x4xf32, #tpu.memory_space<vmem>>, %arg7: memref<8x1xf32, #tpu.memory_space<vmem>>, %arg8: memref<9x16x8xf32, #tpu.memory_space<vmem>>, %arg9: memref<16x1xf32, #tpu.memory_space<vmem>>, %arg10: memref<9x16x16xf32, #tpu.memory_space<vmem>>, %arg11: memref<16x1xf32, #tpu.memory_space<vmem>>, %arg12: memref<9x128xf32, #tpu.memory_space<vmem>>, %arg13: memref<512x128xf32, #tpu.memory_space<vmem>>, %arg14: memref<16x8xf32, #tpu.memory_space<vmem>>, %arg15: memref<16x1xf32, #tpu.memory_space<vmem>>, %arg16: memref<8x8xf32, #tpu.memory_space<vmem>>, %arg17: memref<8x1xf32, #tpu.memory_space<vmem>>, %arg18: memref<9x8x8xf32, #tpu.memory_space<vmem>>, %arg19: memref<8x1xf32, #tpu.memory_space<vmem>>, %arg20: memref<8x16xf32, #tpu.memory_space<vmem>>, %arg21: memref<8x1xf32, #tpu.memory_space<vmem>>, %arg22: memref<9x8x8xf32, #tpu.memory_space<vmem>>, %arg23: memref<8x1xf32, #tpu.memory_space<vmem>>, %arg24: memref<128x512xf32, #tpu.memory_space<vmem>>, %arg25: memref<8x512xf32, #tpu.memory_space<vmem>>, %arg26: memref<8x128xf32, #tpu.memory_space<vmem>>, %arg27: memref<4x546xf32, #tpu.memory_space<vmem>>, %arg28: memref<8x546xf32, #tpu.memory_space<vmem>>, %arg29: memref<16x146xf32, #tpu.memory_space<vmem>>, %arg30: memref<8x146xf32, #tpu.memory_space<vmem>>) attributes {dimension_semantics = [], scalar_prefetch = 0 : i64, scratch_operands = 4 : i64, tpu.core_type = #tpu.core_type<tc>} {
    %cst = arith.constant 0.000000e+00 : f32
    %0 = vector.broadcast %cst : f32 to vector<4x546xf32>
    %c0 = arith.constant 0 : index
    %c0_0 = arith.constant 0 : index
    %1 = vector.load %arg27[%c0, %c0_0] : memref<4x546xf32, #tpu.memory_space<vmem>>, vector<4x546xf32>
    tpu.vector_store %arg27[%c0, %c0_0], %0 {strides = array<i32>} : memref<4x546xf32, #tpu.memory_space<vmem>>, vector<4x546xf32>,
    %cst_1 = arith.constant 0.000000e+00 : f32
    %2 = vector.broadcast %cst_1 : f32 to vector<8x546xf32>
    %c0_2 = arith.constant 0 : index
    %c0_3 = arith.constant 0 : index
    %3 = vector.load %arg28[%c0_2, %c0_3] : memref<8x546xf32, #tpu.memory_space<vmem>>, vector<8x546xf32>
    tpu.vector_store %arg28[%c0_2, %c0_3], %2 {strides = array<i32>} : memref<8x546xf32, #tpu.memory_space<vmem>>, vector<8x546xf32>,
    %cst_4 = arith.constant 0.000000e+00 : f32
    %4 = vector.broadcast %cst_4 : f32 to vector<16x146xf32>
    %c0_5 = arith.constant 0 : index
    %c0_6 = arith.constant 0 : index
    %5 = vector.load %arg29[%c0_5, %c0_6] : memref<16x146xf32, #tpu.memory_space<vmem>>, vector<16x146xf32>
    tpu.vector_store %arg29[%c0_5, %c0_6], %4 {strides = array<i32>} : memref<16x146xf32, #tpu.memory_space<vmem>>, vector<16x146xf32>,
    %cst_7 = arith.constant 0.000000e+00 : f32
    %6 = vector.broadcast %cst_7 : f32 to vector<8x146xf32>
    %c0_8 = arith.constant 0 : index
    %c0_9 = arith.constant 0 : index
    %7 = vector.load %arg30[%c0_8, %c0_9] : memref<8x146xf32, #tpu.memory_space<vmem>>, vector<8x146xf32>
    tpu.vector_store %arg30[%c0_8, %c0_9], %6 {strides = array<i32>} : memref<8x146xf32, #tpu.memory_space<vmem>>, vector<8x146xf32>,
    %c0_10 = arith.constant 0 : index
    %c0_11 = arith.constant 0 : index
    %8 = vector.load %arg0[%c0_10, %c0_11] : memref<4x512xf32, #tpu.memory_space<vmem>>, vector<4x512xf32>
    %c0_12 = arith.constant 0 : index
    %c17 = arith.constant 17 : index
    %9 = vector.load %arg27[%c0_12, %c17] : memref<4x546xf32, #tpu.memory_space<vmem>>, vector<4x512xf32>
    tpu.vector_store %arg27[%c0_12, %c17], %8 {strides = array<i32>} : memref<4x546xf32, #tpu.memory_space<vmem>>, vector<4x512xf32>,
    %c0_13 = arith.constant 0 : index
    %c0_14 = arith.constant 0 : index
    %c0_15 = arith.constant 0 : index
    %10 = vector.load %arg1[%c0_13, %c0_14, %c0_15] : memref<9x8x4xf32, #tpu.memory_space<vmem>>, vector<9x8x4xf32>
    %c0_16 = arith.constant 0 : index
    %c0_17 = arith.constant 0 : index
    %11 = vector.load %arg5[%c0_16, %c0_17] : memref<9x512xf32, #tpu.memory_space<vmem>>, vector<9x512xf32>
    %c0_18 = arith.constant 0 : index
    %c0_19 = arith.constant 0 : index
    %12 = vector.load %arg27[%c0_18, %c0_19] : memref<4x546xf32, #tpu.memory_space<vmem>>, vector<4x512xf32>
    %13 = vector.extract_strided_slice %11 {offsets = [0, 0], sizes = [1, 512], strides = [1, 1]} : vector<9x512xf32> to vector<1x512xf32>
    %14 = vector.broadcast %13 : vector<1x512xf32> to vector<4x512xf32>
    %15 = arith.mulf %12, %14 : vector<4x512xf32>
    %16 = vector.extract_strided_slice %10 {offsets = [0, 0, 0], sizes = [1, 8, 4], strides = [1, 1, 1]} : vector<9x8x4xf32> to vector<1x8x4xf32>
    %17 = vector.shape_cast %16 : vector<1x8x4xf32> to vector<8x4xf32>
    %cst_20 = arith.constant dense<0.000000e+00> : vector<8x512xf32>
    %18 = tpu.matmul %17, %15, %cst_20 {dimension_numbers = #tpu.dot_dimension_numbers<[1], [0], [0], [1], [0, 0, 1, 1], [], []>} : vector<8x4xf32>, vector<4x512xf32>, vector<8x512xf32> -> vector<8x512xf32>
    %c0_21 = arith.constant 0 : index
    %c1 = arith.constant 1 : index
    %19 = vector.load %arg27[%c0_21, %c1] : memref<4x546xf32, #tpu.memory_space<vmem>>, vector<4x512xf32>
    %20 = vector.extract_strided_slice %11 {offsets = [1, 0], sizes = [1, 512], strides = [1, 1]} : vector<9x512xf32> to vector<1x512xf32>
    %21 = vector.broadcast %20 : vector<1x512xf32> to vector<4x512xf32>
    %22 = arith.mulf %19, %21 : vector<4x512xf32>
    %23 = vector.extract_strided_slice %10 {offsets = [1, 0, 0], sizes = [1, 8, 4], strides = [1, 1, 1]} : vector<9x8x4xf32> to vector<1x8x4xf32>
    %24 = vector.shape_cast %23 : vector<1x8x4xf32> to vector<8x4xf32>
    %cst_22 = arith.constant dense<0.000000e+00> : vector<8x512xf32>
    %25 = tpu.matmul %24, %22, %cst_22 {dimension_numbers = #tpu.dot_dimension_numbers<[1], [0], [0], [1], [0, 0, 1, 1], [], []>} : vector<8x4xf32>, vector<4x512xf32>, vector<8x512xf32> -> vector<8x512xf32>
    %26 = arith.addf %18, %25 : vector<8x512xf32>
    %c0_23 = arith.constant 0 : index
    %c2 = arith.constant 2 : index
    %27 = vector.load %arg27[%c0_23, %c2] : memref<4x546xf32, #tpu.memory_space<vmem>>, vector<4x512xf32>
    %28 = vector.extract_strided_slice %11 {offsets = [2, 0], sizes = [1, 512], strides = [1, 1]} : vector<9x512xf32> to vector<1x512xf32>
    %29 = vector.broadcast %28 : vector<1x512xf32> to vector<4x512xf32>
    %30 = arith.mulf %27, %29 : vector<4x512xf32>
    %31 = vector.extract_strided_slice %10 {offsets = [2, 0, 0], sizes = [1, 8, 4], strides = [1, 1, 1]} : vector<9x8x4xf32> to vector<1x8x4xf32>
    %32 = vector.shape_cast %31 : vector<1x8x4xf32> to vector<8x4xf32>
    %cst_24 = arith.constant dense<0.000000e+00> : vector<8x512xf32>
    %33 = tpu.matmul %32, %30, %cst_24 {dimension_numbers = #tpu.dot_dimension_numbers<[1], [0], [0], [1], [0, 0, 1, 1], [], []>} : vector<8x4xf32>, vector<4x512xf32>, vector<8x512xf32> -> vector<8x512xf32>
    %34 = arith.addf %26, %33 : vector<8x512xf32>
    %c0_25 = arith.constant 0 : index
    %c16 = arith.constant 16 : index
    %35 = vector.load %arg27[%c0_25, %c16] : memref<4x546xf32, #tpu.memory_space<vmem>>, vector<4x512xf32>
    %36 = vector.extract_strided_slice %11 {offsets = [3, 0], sizes = [1, 512], strides = [1, 1]} : vector<9x512xf32> to vector<1x512xf32>
    %37 = vector.broadcast %36 : vector<1x512xf32> to vector<4x512xf32>
    %38 = arith.mulf %35, %37 : vector<4x512xf32>
    %39 = vector.extract_strided_slice %10 {offsets = [3, 0, 0], sizes = [1, 8, 4], strides = [1, 1, 1]} : vector<9x8x4xf32> to vector<1x8x4xf32>
    %40 = vector.shape_cast %39 : vector<1x8x4xf32> to vector<8x4xf32>
    %cst_26 = arith.constant dense<0.000000e+00> : vector<8x512xf32>
    %41 = tpu.matmul %40, %38, %cst_26 {dimension_numbers = #tpu.dot_dimension_numbers<[1], [0], [0], [1], [0, 0, 1, 1], [], []>} : vector<8x4xf32>, vector<4x512xf32>, vector<8x512xf32> -> vector<8x512xf32>
    %42 = arith.addf %34, %41 : vector<8x512xf32>
    %c0_27 = arith.constant 0 : index
    %c17_28 = arith.constant 17 : index
    %43 = vector.load %arg27[%c0_27, %c17_28] : memref<4x546xf32, #tpu.memory_space<vmem>>, vector<4x512xf32>
    %44 = vector.extract_strided_slice %11 {offsets = [4, 0], sizes = [1, 512], strides = [1, 1]} : vector<9x512xf32> to vector<1x512xf32>
    %45 = vector.broadcast %44 : vector<1x512xf32> to vector<4x512xf32>
    %46 = arith.mulf %43, %45 : vector<4x512xf32>
    %47 = vector.extract_strided_slice %10 {offsets = [4, 0, 0], sizes = [1, 8, 4], strides = [1, 1, 1]} : vector<9x8x4xf32> to vector<1x8x4xf32>
    %48 = vector.shape_cast %47 : vector<1x8x4xf32> to vector<8x4xf32>
    %cst_29 = arith.constant dense<0.000000e+00> : vector<8x512xf32>
    %49 = tpu.matmul %48, %46, %cst_29 {dimension_numbers = #tpu.dot_dimension_numbers<[1], [0], [0], [1], [0, 0, 1, 1], [], []>} : vector<8x4xf32>, vector<4x512xf32>, vector<8x512xf32> -> vector<8x512xf32>
    %50 = arith.addf %42, %49 : vector<8x512xf32>
    %c0_30 = arith.constant 0 : index
    %c18 = arith.constant 18 : index
    %51 = vector.load %arg27[%c0_30, %c18] : memref<4x546xf32, #tpu.memory_space<vmem>>, vector<4x512xf32>
    %52 = vector.extract_strided_slice %11 {offsets = [5, 0], sizes = [1, 512], strides = [1, 1]} : vector<9x512xf32> to vector<1x512xf32>
    %53 = vector.broadcast %52 : vector<1x512xf32> to vector<4x512xf32>
    %54 = arith.mulf %51, %53 : vector<4x512xf32>
    %55 = vector.extract_strided_slice %10 {offsets = [5, 0, 0], sizes = [1, 8, 4], strides = [1, 1, 1]} : vector<9x8x4xf32> to vector<1x8x4xf32>
    %56 = vector.shape_cast %55 : vector<1x8x4xf32> to vector<8x4xf32>
    %cst_31 = arith.constant dense<0.000000e+00> : vector<8x512xf32>
    %57 = tpu.matmul %56, %54, %cst_31 {dimension_numbers = #tpu.dot_dimension_numbers<[1], [0], [0], [1], [0, 0, 1, 1], [], []>} : vector<8x4xf32>, vector<4x512xf32>, vector<8x512xf32> -> vector<8x512xf32>
    %58 = arith.addf %50, %57 : vector<8x512xf32>
    %c0_32 = arith.constant 0 : index
    %c32 = arith.constant 32 : index
    %59 = vector.load %arg27[%c0_32, %c32] : memref<4x546xf32, #tpu.memory_space<vmem>>, vector<4x512xf32>
    %60 = vector.extract_strided_slice %11 {offsets = [6, 0], sizes = [1, 512], strides = [1, 1]} : vector<9x512xf32> to vector<1x512xf32>
    %61 = vector.broadcast %60 : vector<1x512xf32> to vector<4x512xf32>
    %62 = arith.mulf %59, %61 : vector<4x512xf32>
    %63 = vector.extract_strided_slice %10 {offsets = [6, 0, 0], sizes = [1, 8, 4], strides = [1, 1, 1]} : vector<9x8x4xf32> to vector<1x8x4xf32>
    %64 = vector.shape_cast %63 : vector<1x8x4xf32> to vector<8x4xf32>
    %cst_33 = arith.constant dense<0.000000e+00> : vector<8x512xf32>
    %65 = tpu.matmul %64, %62, %cst_33 {dimension_numbers = #tpu.dot_dimension_numbers<[1], [0], [0], [1], [0, 0, 1, 1], [], []>} : vector<8x4xf32>, vector<4x512xf32>, vector<8x512xf32> -> vector<8x512xf32>
    %66 = arith.addf %58, %65 : vector<8x512xf32>
    %c0_34 = arith.constant 0 : index
    %c33 = arith.constant 33 : index
    %67 = vector.load %arg27[%c0_34, %c33] : memref<4x546xf32, #tpu.memory_space<vmem>>, vector<4x512xf32>
    %68 = vector.extract_strided_slice %11 {offsets = [7, 0], sizes = [1, 512], strides = [1, 1]} : vector<9x512xf32> to vector<1x512xf32>
    %69 = vector.broadcast %68 : vector<1x512xf32> to vector<4x512xf32>
    %70 = arith.mulf %67, %69 : vector<4x512xf32>
    %71 = vector.extract_strided_slice %10 {offsets = [7, 0, 0], sizes = [1, 8, 4], strides = [1, 1, 1]} : vector<9x8x4xf32> to vector<1x8x4xf32>
    %72 = vector.shape_cast %71 : vector<1x8x4xf32> to vector<8x4xf32>
    %cst_35 = arith.constant dense<0.000000e+00> : vector<8x512xf32>
    %73 = tpu.matmul %72, %70, %cst_35 {dimension_numbers = #tpu.dot_dimension_numbers<[1], [0], [0], [1], [0, 0, 1, 1], [], []>} : vector<8x4xf32>, vector<4x512xf32>, vector<8x512xf32> -> vector<8x512xf32>
    %74 = arith.addf %66, %73 : vector<8x512xf32>
    %c0_36 = arith.constant 0 : index
    %c34 = arith.constant 34 : index
    %75 = vector.load %arg27[%c0_36, %c34] : memref<4x546xf32, #tpu.memory_space<vmem>>, vector<4x512xf32>
    %76 = vector.extract_strided_slice %11 {offsets = [8, 0], sizes = [1, 512], strides = [1, 1]} : vector<9x512xf32> to vector<1x512xf32>
    %77 = vector.broadcast %76 : vector<1x512xf32> to vector<4x512xf32>
    %78 = arith.mulf %75, %77 : vector<4x512xf32>
    %79 = vector.extract_strided_slice %10 {offsets = [8, 0, 0], sizes = [1, 8, 4], strides = [1, 1, 1]} : vector<9x8x4xf32> to vector<1x8x4xf32>
    %80 = vector.shape_cast %79 : vector<1x8x4xf32> to vector<8x4xf32>
    %cst_37 = arith.constant dense<0.000000e+00> : vector<8x512xf32>
    %81 = tpu.matmul %80, %78, %cst_37 {dimension_numbers = #tpu.dot_dimension_numbers<[1], [0], [0], [1], [0, 0, 1, 1], [], []>} : vector<8x4xf32>, vector<4x512xf32>, vector<8x512xf32> -> vector<8x512xf32>
    %82 = arith.addf %74, %81 : vector<8x512xf32>
    %c0_38 = arith.constant 0 : index
    %c0_39 = arith.constant 0 : index
    %83 = vector.load %arg2[%c0_38, %c0_39] : memref<8x1xf32, #tpu.memory_space<vmem>>, vector<8x1xf32>
    %84 = vector.broadcast %83 : vector<8x1xf32> to vector<8x512xf32>
    %85 = arith.addf %82, %84 : vector<8x512xf32>
    %cst_40 = arith.constant 0.000000e+00 : f32
    %86 = vector.broadcast %cst_40 : f32 to vector<8x512xf32>
    %87 = arith.maximumf %85, %86 : vector<8x512xf32>
    %c0_41 = arith.constant 0 : index
    %c17_42 = arith.constant 17 : index
    %88 = vector.load %arg28[%c0_41, %c17_42] : memref<8x546xf32, #tpu.memory_space<vmem>>, vector<8x512xf32>
    tpu.vector_store %arg28[%c0_41, %c17_42], %87 {strides = array<i32>} : memref<8x546xf32, #tpu.memory_space<vmem>>, vector<8x512xf32>,
    %c0_43 = arith.constant 0 : index
    %c0_44 = arith.constant 0 : index
    %c0_45 = arith.constant 0 : index
    %89 = vector.load %arg3[%c0_43, %c0_44, %c0_45] : memref<9x8x8xf32, #tpu.memory_space<vmem>>, vector<9x8x8xf32>
    %c0_46 = arith.constant 0 : index
    %c0_47 = arith.constant 0 : index
    %90 = vector.load %arg5[%c0_46, %c0_47] : memref<9x512xf32, #tpu.memory_space<vmem>>, vector<9x512xf32>
    %c0_48 = arith.constant 0 : index
    %c0_49 = arith.constant 0 : index
    %91 = vector.load %arg28[%c0_48, %c0_49] : memref<8x546xf32, #tpu.memory_space<vmem>>, vector<8x512xf32>
    %92 = vector.extract_strided_slice %90 {offsets = [0, 0], sizes = [1, 512], strides = [1, 1]} : vector<9x512xf32> to vector<1x512xf32>
    %93 = vector.broadcast %92 : vector<1x512xf32> to vector<8x512xf32>
    %94 = arith.mulf %91, %93 : vector<8x512xf32>
    %95 = vector.extract_strided_slice %89 {offsets = [0, 0, 0], sizes = [1, 8, 8], strides = [1, 1, 1]} : vector<9x8x8xf32> to vector<1x8x8xf32>
    %96 = vector.shape_cast %95 : vector<1x8x8xf32> to vector<8x8xf32>
    %cst_50 = arith.constant dense<0.000000e+00> : vector<8x512xf32>
    %97 = tpu.matmul %96, %94, %cst_50 {dimension_numbers = #tpu.dot_dimension_numbers<[1], [0], [0], [1], [0, 0, 1, 1], [], []>} : vector<8x8xf32>, vector<8x512xf32>, vector<8x512xf32> -> vector<8x512xf32>
    %c0_51 = arith.constant 0 : index
    %c1_52 = arith.constant 1 : index
    %98 = vector.load %arg28[%c0_51, %c1_52] : memref<8x546xf32, #tpu.memory_space<vmem>>, vector<8x512xf32>
    %99 = vector.extract_strided_slice %90 {offsets = [1, 0], sizes = [1, 512], strides = [1, 1]} : vector<9x512xf32> to vector<1x512xf32>
    %100 = vector.broadcast %99 : vector<1x512xf32> to vector<8x512xf32>
    %101 = arith.mulf %98, %100 : vector<8x512xf32>
    %102 = vector.extract_strided_slice %89 {offsets = [1, 0, 0], sizes = [1, 8, 8], strides = [1, 1, 1]} : vector<9x8x8xf32> to vector<1x8x8xf32>
    %103 = vector.shape_cast %102 : vector<1x8x8xf32> to vector<8x8xf32>
    %cst_53 = arith.constant dense<0.000000e+00> : vector<8x512xf32>
    %104 = tpu.matmul %103, %101, %cst_53 {dimension_numbers = #tpu.dot_dimension_numbers<[1], [0], [0], [1], [0, 0, 1, 1], [], []>} : vector<8x8xf32>, vector<8x512xf32>, vector<8x512xf32> -> vector<8x512xf32>
    %105 = arith.addf %97, %104 : vector<8x512xf32>
    %c0_54 = arith.constant 0 : index
    %c2_55 = arith.constant 2 : index
    %106 = vector.load %arg28[%c0_54, %c2_55] : memref<8x546xf32, #tpu.memory_space<vmem>>, vector<8x512xf32>
    %107 = vector.extract_strided_slice %90 {offsets = [2, 0], sizes = [1, 512], strides = [1, 1]} : vector<9x512xf32> to vector<1x512xf32>
    %108 = vector.broadcast %107 : vector<1x512xf32> to vector<8x512xf32>
    %109 = arith.mulf %106, %108 : vector<8x512xf32>
    %110 = vector.extract_strided_slice %89 {offsets = [2, 0, 0], sizes = [1, 8, 8], strides = [1, 1, 1]} : vector<9x8x8xf32> to vector<1x8x8xf32>
    %111 = vector.shape_cast %110 : vector<1x8x8xf32> to vector<8x8xf32>
    %cst_56 = arith.constant dense<0.000000e+00> : vector<8x512xf32>
    %112 = tpu.matmul %111, %109, %cst_56 {dimension_numbers = #tpu.dot_dimension_numbers<[1], [0], [0], [1], [0, 0, 1, 1], [], []>} : vector<8x8xf32>, vector<8x512xf32>, vector<8x512xf32> -> vector<8x512xf32>
    %113 = arith.addf %105, %112 : vector<8x512xf32>
    %c0_57 = arith.constant 0 : index
    %c16_58 = arith.constant 16 : index
    %114 = vector.load %arg28[%c0_57, %c16_58] : memref<8x546xf32, #tpu.memory_space<vmem>>, vector<8x512xf32>
    %115 = vector.extract_strided_slice %90 {offsets = [3, 0], sizes = [1, 512], strides = [1, 1]} : vector<9x512xf32> to vector<1x512xf32>
    %116 = vector.broadcast %115 : vector<1x512xf32> to vector<8x512xf32>
    %117 = arith.mulf %114, %116 : vector<8x512xf32>
    %118 = vector.extract_strided_slice %89 {offsets = [3, 0, 0], sizes = [1, 8, 8], strides = [1, 1, 1]} : vector<9x8x8xf32> to vector<1x8x8xf32>
    %119 = vector.shape_cast %118 : vector<1x8x8xf32> to vector<8x8xf32>
    %cst_59 = arith.constant dense<0.000000e+00> : vector<8x512xf32>
    %120 = tpu.matmul %119, %117, %cst_59 {dimension_numbers = #tpu.dot_dimension_numbers<[1], [0], [0], [1], [0, 0, 1, 1], [], []>} : vector<8x8xf32>, vector<8x512xf32>, vector<8x512xf32> -> vector<8x512xf32>
    %121 = arith.addf %113, %120 : vector<8x512xf32>
    %c0_60 = arith.constant 0 : index
    %c17_61 = arith.constant 17 : index
    %122 = vector.load %arg28[%c0_60, %c17_61] : memref<8x546xf32, #tpu.memory_space<vmem>>, vector<8x512xf32>
    %123 = vector.extract_strided_slice %90 {offsets = [4, 0], sizes = [1, 512], strides = [1, 1]} : vector<9x512xf32> to vector<1x512xf32>
    %124 = vector.broadcast %123 : vector<1x512xf32> to vector<8x512xf32>
    %125 = arith.mulf %122, %124 : vector<8x512xf32>
    %126 = vector.extract_strided_slice %89 {offsets = [4, 0, 0], sizes = [1, 8, 8], strides = [1, 1, 1]} : vector<9x8x8xf32> to vector<1x8x8xf32>
    %127 = vector.shape_cast %126 : vector<1x8x8xf32> to vector<8x8xf32>
    %cst_62 = arith.constant dense<0.000000e+00> : vector<8x512xf32>
    %128 = tpu.matmul %127, %125, %cst_62 {dimension_numbers = #tpu.dot_dimension_numbers<[1], [0], [0], [1], [0, 0, 1, 1], [], []>} : vector<8x8xf32>, vector<8x512xf32>, vector<8x512xf32> -> vector<8x512xf32>
    %129 = arith.addf %121, %128 : vector<8x512xf32>
    %c0_63 = arith.constant 0 : index
    %c18_64 = arith.constant 18 : index
    %130 = vector.load %arg28[%c0_63, %c18_64] : memref<8x546xf32, #tpu.memory_space<vmem>>, vector<8x512xf32>
    %131 = vector.extract_strided_slice %90 {offsets = [5, 0], sizes = [1, 512], strides = [1, 1]} : vector<9x512xf32> to vector<1x512xf32>
    %132 = vector.broadcast %131 : vector<1x512xf32> to vector<8x512xf32>
    %133 = arith.mulf %130, %132 : vector<8x512xf32>
    %134 = vector.extract_strided_slice %89 {offsets = [5, 0, 0], sizes = [1, 8, 8], strides = [1, 1, 1]} : vector<9x8x8xf32> to vector<1x8x8xf32>
    %135 = vector.shape_cast %134 : vector<1x8x8xf32> to vector<8x8xf32>
    %cst_65 = arith.constant dense<0.000000e+00> : vector<8x512xf32>
    %136 = tpu.matmul %135, %133, %cst_65 {dimension_numbers = #tpu.dot_dimension_numbers<[1], [0], [0], [1], [0, 0, 1, 1], [], []>} : vector<8x8xf32>, vector<8x512xf32>, vector<8x512xf32> -> vector<8x512xf32>
    %137 = arith.addf %129, %136 : vector<8x512xf32>
    %c0_66 = arith.constant 0 : index
    %c32_67 = arith.constant 32 : index
    %138 = vector.load %arg28[%c0_66, %c32_67] : memref<8x546xf32, #tpu.memory_space<vmem>>, vector<8x512xf32>
    %139 = vector.extract_strided_slice %90 {offsets = [6, 0], sizes = [1, 512], strides = [1, 1]} : vector<9x512xf32> to vector<1x512xf32>
    %140 = vector.broadcast %139 : vector<1x512xf32> to vector<8x512xf32>
    %141 = arith.mulf %138, %140 : vector<8x512xf32>
    %142 = vector.extract_strided_slice %89 {offsets = [6, 0, 0], sizes = [1, 8, 8], strides = [1, 1, 1]} : vector<9x8x8xf32> to vector<1x8x8xf32>
    %143 = vector.shape_cast %142 : vector<1x8x8xf32> to vector<8x8xf32>
    %cst_68 = arith.constant dense<0.000000e+00> : vector<8x512xf32>
    %144 = tpu.matmul %143, %141, %cst_68 {dimension_numbers = #tpu.dot_dimension_numbers<[1], [0], [0], [1], [0, 0, 1, 1], [], []>} : vector<8x8xf32>, vector<8x512xf32>, vector<8x512xf32> -> vector<8x512xf32>
    %145 = arith.addf %137, %144 : vector<8x512xf32>
    %c0_69 = arith.constant 0 : index
    %c33_70 = arith.constant 33 : index
    %146 = vector.load %arg28[%c0_69, %c33_70] : memref<8x546xf32, #tpu.memory_space<vmem>>, vector<8x512xf32>
    %147 = vector.extract_strided_slice %90 {offsets = [7, 0], sizes = [1, 512], strides = [1, 1]} : vector<9x512xf32> to vector<1x512xf32>
    %148 = vector.broadcast %147 : vector<1x512xf32> to vector<8x512xf32>
    %149 = arith.mulf %146, %148 : vector<8x512xf32>
    %150 = vector.extract_strided_slice %89 {offsets = [7, 0, 0], sizes = [1, 8, 8], strides = [1, 1, 1]} : vector<9x8x8xf32> to vector<1x8x8xf32>
    %151 = vector.shape_cast %150 : vector<1x8x8xf32> to vector<8x8xf32>
    %cst_71 = arith.constant dense<0.000000e+00> : vector<8x512xf32>
    %152 = tpu.matmul %151, %149, %cst_71 {dimension_numbers = #tpu.dot_dimension_numbers<[1], [0], [0], [1], [0, 0, 1, 1], [], []>} : vector<8x8xf32>, vector<8x512xf32>, vector<8x512xf32> -> vector<8x512xf32>
    %153 = arith.addf %145, %152 : vector<8x512xf32>
    %c0_72 = arith.constant 0 : index
    %c34_73 = arith.constant 34 : index
    %154 = vector.load %arg28[%c0_72, %c34_73] : memref<8x546xf32, #tpu.memory_space<vmem>>, vector<8x512xf32>
    %155 = vector.extract_strided_slice %90 {offsets = [8, 0], sizes = [1, 512], strides = [1, 1]} : vector<9x512xf32> to vector<1x512xf32>
    %156 = vector.broadcast %155 : vector<1x512xf32> to vector<8x512xf32>
    %157 = arith.mulf %154, %156 : vector<8x512xf32>
    %158 = vector.extract_strided_slice %89 {offsets = [8, 0, 0], sizes = [1, 8, 8], strides = [1, 1, 1]} : vector<9x8x8xf32> to vector<1x8x8xf32>
    %159 = vector.shape_cast %158 : vector<1x8x8xf32> to vector<8x8xf32>
    %cst_74 = arith.constant dense<0.000000e+00> : vector<8x512xf32>
    %160 = tpu.matmul %159, %157, %cst_74 {dimension_numbers = #tpu.dot_dimension_numbers<[1], [0], [0], [1], [0, 0, 1, 1], [], []>} : vector<8x8xf32>, vector<8x512xf32>, vector<8x512xf32> -> vector<8x512xf32>
    %161 = arith.addf %153, %160 : vector<8x512xf32>
    %c0_75 = arith.constant 0 : index
    %c0_76 = arith.constant 0 : index
    %162 = vector.load %arg4[%c0_75, %c0_76] : memref<8x1xf32, #tpu.memory_space<vmem>>, vector<8x1xf32>
    %163 = vector.broadcast %162 : vector<8x1xf32> to vector<8x512xf32>
    %164 = arith.addf %161, %163 : vector<8x512xf32>
    %c0_77 = arith.constant 0 : index
    %c0_78 = arith.constant 0 : index
    %165 = vector.load %arg6[%c0_77, %c0_78] : memref<8x4xf32, #tpu.memory_space<vmem>>, vector<8x4xf32>
    %cst_79 = arith.constant dense<0.000000e+00> : vector<8x512xf32>
    %166 = tpu.matmul %165, %8, %cst_79 {dimension_numbers = #tpu.dot_dimension_numbers<[1], [0], [0], [1], [0, 0, 1, 1], [], []>} : vector<8x4xf32>, vector<4x512xf32>, vector<8x512xf32> -> vector<8x512xf32>
    %c0_80 = arith.constant 0 : index
    %c0_81 = arith.constant 0 : index
    %167 = vector.load %arg7[%c0_80, %c0_81] : memref<8x1xf32, #tpu.memory_space<vmem>>, vector<8x1xf32>
    %168 = vector.broadcast %167 : vector<8x1xf32> to vector<8x512xf32>
    %169 = arith.addf %166, %168 : vector<8x512xf32>
    %170 = arith.addf %164, %169 : vector<8x512xf32>
    %cst_82 = arith.constant 0.000000e+00 : f32
    %171 = vector.broadcast %cst_82 : f32 to vector<8x512xf32>
    %172 = arith.maximumf %170, %171 : vector<8x512xf32>
    %c0_83 = arith.constant 0 : index
    %c17_84 = arith.constant 17 : index
    %173 = vector.load %arg28[%c0_83, %c17_84] : memref<8x546xf32, #tpu.memory_space<vmem>>, vector<8x512xf32>
    tpu.vector_store %arg28[%c0_83, %c17_84], %172 {strides = array<i32>} : memref<8x546xf32, #tpu.memory_space<vmem>>, vector<8x512xf32>,
    %c0_85 = arith.constant 0 : index
    %c0_86 = arith.constant 0 : index
    %c0_87 = arith.constant 0 : index
    %174 = vector.load %arg8[%c0_85, %c0_86, %c0_87] : memref<9x16x8xf32, #tpu.memory_space<vmem>>, vector<9x16x8xf32>
    %c0_88 = arith.constant 0 : index
    %c0_89 = arith.constant 0 : index
    %175 = vector.load %arg5[%c0_88, %c0_89] : memref<9x512xf32, #tpu.memory_space<vmem>>, vector<9x512xf32>
    %c0_90 = arith.constant 0 : index
    %c0_91 = arith.constant 0 : index
    %176 = vector.load %arg28[%c0_90, %c0_91] : memref<8x546xf32, #tpu.memory_space<vmem>>, vector<8x512xf32>
    %177 = vector.extract_strided_slice %175 {offsets = [0, 0], sizes = [1, 512], strides = [1, 1]} : vector<9x512xf32> to vector<1x512xf32>
    %178 = vector.broadcast %177 : vector<1x512xf32> to vector<8x512xf32>
    %179 = arith.mulf %176, %178 : vector<8x512xf32>
    %180 = vector.extract_strided_slice %174 {offsets = [0, 0, 0], sizes = [1, 16, 8], strides = [1, 1, 1]} : vector<9x16x8xf32> to vector<1x16x8xf32>
    %181 = vector.shape_cast %180 : vector<1x16x8xf32> to vector<16x8xf32>
    %cst_92 = arith.constant dense<0.000000e+00> : vector<16x512xf32>
    %182 = tpu.matmul %181, %179, %cst_92 {dimension_numbers = #tpu.dot_dimension_numbers<[1], [0], [0], [1], [0, 0, 1, 1], [], []>} : vector<16x8xf32>, vector<8x512xf32>, vector<16x512xf32> -> vector<16x512xf32>
    %c0_93 = arith.constant 0 : index
    %c1_94 = arith.constant 1 : index
    %183 = vector.load %arg28[%c0_93, %c1_94] : memref<8x546xf32, #tpu.memory_space<vmem>>, vector<8x512xf32>
    %184 = vector.extract_strided_slice %175 {offsets = [1, 0], sizes = [1, 512], strides = [1, 1]} : vector<9x512xf32> to vector<1x512xf32>
    %185 = vector.broadcast %184 : vector<1x512xf32> to vector<8x512xf32>
    %186 = arith.mulf %183, %185 : vector<8x512xf32>
    %187 = vector.extract_strided_slice %174 {offsets = [1, 0, 0], sizes = [1, 16, 8], strides = [1, 1, 1]} : vector<9x16x8xf32> to vector<1x16x8xf32>
    %188 = vector.shape_cast %187 : vector<1x16x8xf32> to vector<16x8xf32>
    %cst_95 = arith.constant dense<0.000000e+00> : vector<16x512xf32>
    %189 = tpu.matmul %188, %186, %cst_95 {dimension_numbers = #tpu.dot_dimension_numbers<[1], [0], [0], [1], [0, 0, 1, 1], [], []>} : vector<16x8xf32>, vector<8x512xf32>, vector<16x512xf32> -> vector<16x512xf32>
    %190 = arith.addf %182, %189 : vector<16x512xf32>
    %c0_96 = arith.constant 0 : index
    %c2_97 = arith.constant 2 : index
    %191 = vector.load %arg28[%c0_96, %c2_97] : memref<8x546xf32, #tpu.memory_space<vmem>>, vector<8x512xf32>
    %192 = vector.extract_strided_slice %175 {offsets = [2, 0], sizes = [1, 512], strides = [1, 1]} : vector<9x512xf32> to vector<1x512xf32>
    %193 = vector.broadcast %192 : vector<1x512xf32> to vector<8x512xf32>
    %194 = arith.mulf %191, %193 : vector<8x512xf32>
    %195 = vector.extract_strided_slice %174 {offsets = [2, 0, 0], sizes = [1, 16, 8], strides = [1, 1, 1]} : vector<9x16x8xf32> to vector<1x16x8xf32>
    %196 = vector.shape_cast %195 : vector<1x16x8xf32> to vector<16x8xf32>
    %cst_98 = arith.constant dense<0.000000e+00> : vector<16x512xf32>
    %197 = tpu.matmul %196, %194, %cst_98 {dimension_numbers = #tpu.dot_dimension_numbers<[1], [0], [0], [1], [0, 0, 1, 1], [], []>} : vector<16x8xf32>, vector<8x512xf32>, vector<16x512xf32> -> vector<16x512xf32>
    %198 = arith.addf %190, %197 : vector<16x512xf32>
    %c0_99 = arith.constant 0 : index
    %c16_100 = arith.constant 16 : index
    %199 = vector.load %arg28[%c0_99, %c16_100] : memref<8x546xf32, #tpu.memory_space<vmem>>, vector<8x512xf32>
    %200 = vector.extract_strided_slice %175 {offsets = [3, 0], sizes = [1, 512], strides = [1, 1]} : vector<9x512xf32> to vector<1x512xf32>
    %201 = vector.broadcast %200 : vector<1x512xf32> to vector<8x512xf32>
    %202 = arith.mulf %199, %201 : vector<8x512xf32>
    %203 = vector.extract_strided_slice %174 {offsets = [3, 0, 0], sizes = [1, 16, 8], strides = [1, 1, 1]} : vector<9x16x8xf32> to vector<1x16x8xf32>
    %204 = vector.shape_cast %203 : vector<1x16x8xf32> to vector<16x8xf32>
    %cst_101 = arith.constant dense<0.000000e+00> : vector<16x512xf32>
    %205 = tpu.matmul %204, %202, %cst_101 {dimension_numbers = #tpu.dot_dimension_numbers<[1], [0], [0], [1], [0, 0, 1, 1], [], []>} : vector<16x8xf32>, vector<8x512xf32>, vector<16x512xf32> -> vector<16x512xf32>
    %206 = arith.addf %198, %205 : vector<16x512xf32>
    %c0_102 = arith.constant 0 : index
    %c17_103 = arith.constant 17 : index
    %207 = vector.load %arg28[%c0_102, %c17_103] : memref<8x546xf32, #tpu.memory_space<vmem>>, vector<8x512xf32>
    %208 = vector.extract_strided_slice %175 {offsets = [4, 0], sizes = [1, 512], strides = [1, 1]} : vector<9x512xf32> to vector<1x512xf32>
    %209 = vector.broadcast %208 : vector<1x512xf32> to vector<8x512xf32>
    %210 = arith.mulf %207, %209 : vector<8x512xf32>
    %211 = vector.extract_strided_slice %174 {offsets = [4, 0, 0], sizes = [1, 16, 8], strides = [1, 1, 1]} : vector<9x16x8xf32> to vector<1x16x8xf32>
    %212 = vector.shape_cast %211 : vector<1x16x8xf32> to vector<16x8xf32>
    %cst_104 = arith.constant dense<0.000000e+00> : vector<16x512xf32>
    %213 = tpu.matmul %212, %210, %cst_104 {dimension_numbers = #tpu.dot_dimension_numbers<[1], [0], [0], [1], [0, 0, 1, 1], [], []>} : vector<16x8xf32>, vector<8x512xf32>, vector<16x512xf32> -> vector<16x512xf32>
    %214 = arith.addf %206, %213 : vector<16x512xf32>
    %c0_105 = arith.constant 0 : index
    %c18_106 = arith.constant 18 : index
    %215 = vector.load %arg28[%c0_105, %c18_106] : memref<8x546xf32, #tpu.memory_space<vmem>>, vector<8x512xf32>
    %216 = vector.extract_strided_slice %175 {offsets = [5, 0], sizes = [1, 512], strides = [1, 1]} : vector<9x512xf32> to vector<1x512xf32>
    %217 = vector.broadcast %216 : vector<1x512xf32> to vector<8x512xf32>
    %218 = arith.mulf %215, %217 : vector<8x512xf32>
    %219 = vector.extract_strided_slice %174 {offsets = [5, 0, 0], sizes = [1, 16, 8], strides = [1, 1, 1]} : vector<9x16x8xf32> to vector<1x16x8xf32>
    %220 = vector.shape_cast %219 : vector<1x16x8xf32> to vector<16x8xf32>
    %cst_107 = arith.constant dense<0.000000e+00> : vector<16x512xf32>
    %221 = tpu.matmul %220, %218, %cst_107 {dimension_numbers = #tpu.dot_dimension_numbers<[1], [0], [0], [1], [0, 0, 1, 1], [], []>} : vector<16x8xf32>, vector<8x512xf32>, vector<16x512xf32> -> vector<16x512xf32>
    %222 = arith.addf %214, %221 : vector<16x512xf32>
    %c0_108 = arith.constant 0 : index
    %c32_109 = arith.constant 32 : index
    %223 = vector.load %arg28[%c0_108, %c32_109] : memref<8x546xf32, #tpu.memory_space<vmem>>, vector<8x512xf32>
    %224 = vector.extract_strided_slice %175 {offsets = [6, 0], sizes = [1, 512], strides = [1, 1]} : vector<9x512xf32> to vector<1x512xf32>
    %225 = vector.broadcast %224 : vector<1x512xf32> to vector<8x512xf32>
    %226 = arith.mulf %223, %225 : vector<8x512xf32>
    %227 = vector.extract_strided_slice %174 {offsets = [6, 0, 0], sizes = [1, 16, 8], strides = [1, 1, 1]} : vector<9x16x8xf32> to vector<1x16x8xf32>
    %228 = vector.shape_cast %227 : vector<1x16x8xf32> to vector<16x8xf32>
    %cst_110 = arith.constant dense<0.000000e+00> : vector<16x512xf32>
    %229 = tpu.matmul %228, %226, %cst_110 {dimension_numbers = #tpu.dot_dimension_numbers<[1], [0], [0], [1], [0, 0, 1, 1], [], []>} : vector<16x8xf32>, vector<8x512xf32>, vector<16x512xf32> -> vector<16x512xf32>
    %230 = arith.addf %222, %229 : vector<16x512xf32>
    %c0_111 = arith.constant 0 : index
    %c33_112 = arith.constant 33 : index
    %231 = vector.load %arg28[%c0_111, %c33_112] : memref<8x546xf32, #tpu.memory_space<vmem>>, vector<8x512xf32>
    %232 = vector.extract_strided_slice %175 {offsets = [7, 0], sizes = [1, 512], strides = [1, 1]} : vector<9x512xf32> to vector<1x512xf32>
    %233 = vector.broadcast %232 : vector<1x512xf32> to vector<8x512xf32>
    %234 = arith.mulf %231, %233 : vector<8x512xf32>
    %235 = vector.extract_strided_slice %174 {offsets = [7, 0, 0], sizes = [1, 16, 8], strides = [1, 1, 1]} : vector<9x16x8xf32> to vector<1x16x8xf32>
    %236 = vector.shape_cast %235 : vector<1x16x8xf32> to vector<16x8xf32>
    %cst_113 = arith.constant dense<0.000000e+00> : vector<16x512xf32>
    %237 = tpu.matmul %236, %234, %cst_113 {dimension_numbers = #tpu.dot_dimension_numbers<[1], [0], [0], [1], [0, 0, 1, 1], [], []>} : vector<16x8xf32>, vector<8x512xf32>, vector<16x512xf32> -> vector<16x512xf32>
    %238 = arith.addf %230, %237 : vector<16x512xf32>
    %c0_114 = arith.constant 0 : index
    %c34_115 = arith.constant 34 : index
    %239 = vector.load %arg28[%c0_114, %c34_115] : memref<8x546xf32, #tpu.memory_space<vmem>>, vector<8x512xf32>
    %240 = vector.extract_strided_slice %175 {offsets = [8, 0], sizes = [1, 512], strides = [1, 1]} : vector<9x512xf32> to vector<1x512xf32>
    %241 = vector.broadcast %240 : vector<1x512xf32> to vector<8x512xf32>
    %242 = arith.mulf %239, %241 : vector<8x512xf32>
    %243 = vector.extract_strided_slice %174 {offsets = [8, 0, 0], sizes = [1, 16, 8], strides = [1, 1, 1]} : vector<9x16x8xf32> to vector<1x16x8xf32>
    %244 = vector.shape_cast %243 : vector<1x16x8xf32> to vector<16x8xf32>
    %cst_116 = arith.constant dense<0.000000e+00> : vector<16x512xf32>
    %245 = tpu.matmul %244, %242, %cst_116 {dimension_numbers = #tpu.dot_dimension_numbers<[1], [0], [0], [1], [0, 0, 1, 1], [], []>} : vector<16x8xf32>, vector<8x512xf32>, vector<16x512xf32> -> vector<16x512xf32>
    %246 = arith.addf %238, %245 : vector<16x512xf32>
    %c0_117 = arith.constant 0 : index
    %c0_118 = arith.constant 0 : index
    %247 = vector.load %arg9[%c0_117, %c0_118] : memref<16x1xf32, #tpu.memory_space<vmem>>, vector<16x1xf32>
    %248 = vector.broadcast %247 : vector<16x1xf32> to vector<16x512xf32>
    %249 = arith.addf %246, %248 : vector<16x512xf32>
    %c0_119 = arith.constant 0 : index
    %c0_120 = arith.constant 0 : index
    %250 = vector.load %arg13[%c0_119, %c0_120] : memref<512x128xf32, #tpu.memory_space<vmem>>, vector<512x128xf32>
    %cst_121 = arith.constant dense<0.000000e+00> : vector<16x128xf32>
    %251 = tpu.matmul %249, %250, %cst_121 {dimension_numbers = #tpu.dot_dimension_numbers<[1], [0], [0], [1], [0, 0, 1, 1], [], []>} : vector<16x512xf32>, vector<512x128xf32>, vector<16x128xf32> -> vector<16x128xf32>
    %cst_122 = arith.constant dense<0.000000e+00> : vector<8x128xf32>
    %252 = tpu.matmul %172, %250, %cst_122 {dimension_numbers = #tpu.dot_dimension_numbers<[1], [0], [0], [1], [0, 0, 1, 1], [], []>} : vector<8x512xf32>, vector<512x128xf32>, vector<8x128xf32> -> vector<8x128xf32>
    %cst_123 = arith.constant 0.000000e+00 : f32
    %253 = vector.broadcast %cst_123 : f32 to vector<16x128xf32>
    %254 = arith.maximumf %251, %253 : vector<16x128xf32>
    %c0_124 = arith.constant 0 : index
    %c9 = arith.constant 9 : index
    %255 = vector.load %arg29[%c0_124, %c9] : memref<16x146xf32, #tpu.memory_space<vmem>>, vector<16x128xf32>
    tpu.vector_store %arg29[%c0_124, %c9], %254 {strides = array<i32>} : memref<16x146xf32, #tpu.memory_space<vmem>>, vector<16x128xf32>,
    %c0_125 = arith.constant 0 : index
    %c0_126 = arith.constant 0 : index
    %c0_127 = arith.constant 0 : index
    %256 = vector.load %arg10[%c0_125, %c0_126, %c0_127] : memref<9x16x16xf32, #tpu.memory_space<vmem>>, vector<9x16x16xf32>
    %c0_128 = arith.constant 0 : index
    %c0_129 = arith.constant 0 : index
    %257 = vector.load %arg12[%c0_128, %c0_129] : memref<9x128xf32, #tpu.memory_space<vmem>>, vector<9x128xf32>
    %c0_130 = arith.constant 0 : index
    %c0_131 = arith.constant 0 : index
    %258 = vector.load %arg29[%c0_130, %c0_131] : memref<16x146xf32, #tpu.memory_space<vmem>>, vector<16x128xf32>
    %259 = vector.extract_strided_slice %257 {offsets = [0, 0], sizes = [1, 128], strides = [1, 1]} : vector<9x128xf32> to vector<1x128xf32>
    %260 = vector.broadcast %259 : vector<1x128xf32> to vector<16x128xf32>
    %261 = arith.mulf %258, %260 : vector<16x128xf32>
    %262 = vector.extract_strided_slice %256 {offsets = [0, 0, 0], sizes = [1, 16, 16], strides = [1, 1, 1]} : vector<9x16x16xf32> to vector<1x16x16xf32>
    %263 = vector.shape_cast %262 : vector<1x16x16xf32> to vector<16x16xf32>
    %cst_132 = arith.constant dense<0.000000e+00> : vector<16x128xf32>
    %264 = tpu.matmul %263, %261, %cst_132 {dimension_numbers = #tpu.dot_dimension_numbers<[1], [0], [0], [1], [0, 0, 1, 1], [], []>} : vector<16x16xf32>, vector<16x128xf32>, vector<16x128xf32> -> vector<16x128xf32>
    %c0_133 = arith.constant 0 : index
    %c1_134 = arith.constant 1 : index
    %265 = vector.load %arg29[%c0_133, %c1_134] : memref<16x146xf32, #tpu.memory_space<vmem>>, vector<16x128xf32>
    %266 = vector.extract_strided_slice %257 {offsets = [1, 0], sizes = [1, 128], strides = [1, 1]} : vector<9x128xf32> to vector<1x128xf32>
    %267 = vector.broadcast %266 : vector<1x128xf32> to vector<16x128xf32>
    %268 = arith.mulf %265, %267 : vector<16x128xf32>
    %269 = vector.extract_strided_slice %256 {offsets = [1, 0, 0], sizes = [1, 16, 16], strides = [1, 1, 1]} : vector<9x16x16xf32> to vector<1x16x16xf32>
    %270 = vector.shape_cast %269 : vector<1x16x16xf32> to vector<16x16xf32>
    %cst_135 = arith.constant dense<0.000000e+00> : vector<16x128xf32>
    %271 = tpu.matmul %270, %268, %cst_135 {dimension_numbers = #tpu.dot_dimension_numbers<[1], [0], [0], [1], [0, 0, 1, 1], [], []>} : vector<16x16xf32>, vector<16x128xf32>, vector<16x128xf32> -> vector<16x128xf32>
    %272 = arith.addf %264, %271 : vector<16x128xf32>
    %c0_136 = arith.constant 0 : index
    %c2_137 = arith.constant 2 : index
    %273 = vector.load %arg29[%c0_136, %c2_137] : memref<16x146xf32, #tpu.memory_space<vmem>>, vector<16x128xf32>
    %274 = vector.extract_strided_slice %257 {offsets = [2, 0], sizes = [1, 128], strides = [1, 1]} : vector<9x128xf32> to vector<1x128xf32>
    %275 = vector.broadcast %274 : vector<1x128xf32> to vector<16x128xf32>
    %276 = arith.mulf %273, %275 : vector<16x128xf32>
    %277 = vector.extract_strided_slice %256 {offsets = [2, 0, 0], sizes = [1, 16, 16], strides = [1, 1, 1]} : vector<9x16x16xf32> to vector<1x16x16xf32>
    %278 = vector.shape_cast %277 : vector<1x16x16xf32> to vector<16x16xf32>
    %cst_138 = arith.constant dense<0.000000e+00> : vector<16x128xf32>
    %279 = tpu.matmul %278, %276, %cst_138 {dimension_numbers = #tpu.dot_dimension_numbers<[1], [0], [0], [1], [0, 0, 1, 1], [], []>} : vector<16x16xf32>, vector<16x128xf32>, vector<16x128xf32> -> vector<16x128xf32>
    %280 = arith.addf %272, %279 : vector<16x128xf32>
    %c0_139 = arith.constant 0 : index
    %c8 = arith.constant 8 : index
    %281 = vector.load %arg29[%c0_139, %c8] : memref<16x146xf32, #tpu.memory_space<vmem>>, vector<16x128xf32>
    %282 = vector.extract_strided_slice %257 {offsets = [3, 0], sizes = [1, 128], strides = [1, 1]} : vector<9x128xf32> to vector<1x128xf32>
    %283 = vector.broadcast %282 : vector<1x128xf32> to vector<16x128xf32>
    %284 = arith.mulf %281, %283 : vector<16x128xf32>
    %285 = vector.extract_strided_slice %256 {offsets = [3, 0, 0], sizes = [1, 16, 16], strides = [1, 1, 1]} : vector<9x16x16xf32> to vector<1x16x16xf32>
    %286 = vector.shape_cast %285 : vector<1x16x16xf32> to vector<16x16xf32>
    %cst_140 = arith.constant dense<0.000000e+00> : vector<16x128xf32>
    %287 = tpu.matmul %286, %284, %cst_140 {dimension_numbers = #tpu.dot_dimension_numbers<[1], [0], [0], [1], [0, 0, 1, 1], [], []>} : vector<16x16xf32>, vector<16x128xf32>, vector<16x128xf32> -> vector<16x128xf32>
    %288 = arith.addf %280, %287 : vector<16x128xf32>
    %c0_141 = arith.constant 0 : index
    %c9_142 = arith.constant 9 : index
    %289 = vector.load %arg29[%c0_141, %c9_142] : memref<16x146xf32, #tpu.memory_space<vmem>>, vector<16x128xf32>
    %290 = vector.extract_strided_slice %257 {offsets = [4, 0], sizes = [1, 128], strides = [1, 1]} : vector<9x128xf32> to vector<1x128xf32>
    %291 = vector.broadcast %290 : vector<1x128xf32> to vector<16x128xf32>
    %292 = arith.mulf %289, %291 : vector<16x128xf32>
    %293 = vector.extract_strided_slice %256 {offsets = [4, 0, 0], sizes = [1, 16, 16], strides = [1, 1, 1]} : vector<9x16x16xf32> to vector<1x16x16xf32>
    %294 = vector.shape_cast %293 : vector<1x16x16xf32> to vector<16x16xf32>
    %cst_143 = arith.constant dense<0.000000e+00> : vector<16x128xf32>
    %295 = tpu.matmul %294, %292, %cst_143 {dimension_numbers = #tpu.dot_dimension_numbers<[1], [0], [0], [1], [0, 0, 1, 1], [], []>} : vector<16x16xf32>, vector<16x128xf32>, vector<16x128xf32> -> vector<16x128xf32>
    %296 = arith.addf %288, %295 : vector<16x128xf32>
    %c0_144 = arith.constant 0 : index
    %c10 = arith.constant 10 : index
    %297 = vector.load %arg29[%c0_144, %c10] : memref<16x146xf32, #tpu.memory_space<vmem>>, vector<16x128xf32>
    %298 = vector.extract_strided_slice %257 {offsets = [5, 0], sizes = [1, 128], strides = [1, 1]} : vector<9x128xf32> to vector<1x128xf32>
    %299 = vector.broadcast %298 : vector<1x128xf32> to vector<16x128xf32>
    %300 = arith.mulf %297, %299 : vector<16x128xf32>
    %301 = vector.extract_strided_slice %256 {offsets = [5, 0, 0], sizes = [1, 16, 16], strides = [1, 1, 1]} : vector<9x16x16xf32> to vector<1x16x16xf32>
    %302 = vector.shape_cast %301 : vector<1x16x16xf32> to vector<16x16xf32>
    %cst_145 = arith.constant dense<0.000000e+00> : vector<16x128xf32>
    %303 = tpu.matmul %302, %300, %cst_145 {dimension_numbers = #tpu.dot_dimension_numbers<[1], [0], [0], [1], [0, 0, 1, 1], [], []>} : vector<16x16xf32>, vector<16x128xf32>, vector<16x128xf32> -> vector<16x128xf32>
    %304 = arith.addf %296, %303 : vector<16x128xf32>
    %c0_146 = arith.constant 0 : index
    %c16_147 = arith.constant 16 : index
    %305 = vector.load %arg29[%c0_146, %c16_147] : memref<16x146xf32, #tpu.memory_space<vmem>>, vector<16x128xf32>
    %306 = vector.extract_strided_slice %257 {offsets = [6, 0], sizes = [1, 128], strides = [1, 1]} : vector<9x128xf32> to vector<1x128xf32>
    %307 = vector.broadcast %306 : vector<1x128xf32> to vector<16x128xf32>
    %308 = arith.mulf %305, %307 : vector<16x128xf32>
    %309 = vector.extract_strided_slice %256 {offsets = [6, 0, 0], sizes = [1, 16, 16], strides = [1, 1, 1]} : vector<9x16x16xf32> to vector<1x16x16xf32>
    %310 = vector.shape_cast %309 : vector<1x16x16xf32> to vector<16x16xf32>
    %cst_148 = arith.constant dense<0.000000e+00> : vector<16x128xf32>
    %311 = tpu.matmul %310, %308, %cst_148 {dimension_numbers = #tpu.dot_dimension_numbers<[1], [0], [0], [1], [0, 0, 1, 1], [], []>} : vector<16x16xf32>, vector<16x128xf32>, vector<16x128xf32> -> vector<16x128xf32>
    %312 = arith.addf %304, %311 : vector<16x128xf32>
    %c0_149 = arith.constant 0 : index
    %c17_150 = arith.constant 17 : index
    %313 = vector.load %arg29[%c0_149, %c17_150] : memref<16x146xf32, #tpu.memory_space<vmem>>, vector<16x128xf32>
    %314 = vector.extract_strided_slice %257 {offsets = [7, 0], sizes = [1, 128], strides = [1, 1]} : vector<9x128xf32> to vector<1x128xf32>
    %315 = vector.broadcast %314 : vector<1x128xf32> to vector<16x128xf32>
    %316 = arith.mulf %313, %315 : vector<16x128xf32>
    %317 = vector.extract_strided_slice %256 {offsets = [7, 0, 0], sizes = [1, 16, 16], strides = [1, 1, 1]} : vector<9x16x16xf32> to vector<1x16x16xf32>
    %318 = vector.shape_cast %317 : vector<1x16x16xf32> to vector<16x16xf32>
    %cst_151 = arith.constant dense<0.000000e+00> : vector<16x128xf32>
    %319 = tpu.matmul %318, %316, %cst_151 {dimension_numbers = #tpu.dot_dimension_numbers<[1], [0], [0], [1], [0, 0, 1, 1], [], []>} : vector<16x16xf32>, vector<16x128xf32>, vector<16x128xf32> -> vector<16x128xf32>
    %320 = arith.addf %312, %319 : vector<16x128xf32>
    %c0_152 = arith.constant 0 : index
    %c18_153 = arith.constant 18 : index
    %321 = vector.load %arg29[%c0_152, %c18_153] : memref<16x146xf32, #tpu.memory_space<vmem>>, vector<16x128xf32>
    %322 = vector.extract_strided_slice %257 {offsets = [8, 0], sizes = [1, 128], strides = [1, 1]} : vector<9x128xf32> to vector<1x128xf32>
    %323 = vector.broadcast %322 : vector<1x128xf32> to vector<16x128xf32>
    %324 = arith.mulf %321, %323 : vector<16x128xf32>
    %325 = vector.extract_strided_slice %256 {offsets = [8, 0, 0], sizes = [1, 16, 16], strides = [1, 1, 1]} : vector<9x16x16xf32> to vector<1x16x16xf32>
    %326 = vector.shape_cast %325 : vector<1x16x16xf32> to vector<16x16xf32>
    %cst_154 = arith.constant dense<0.000000e+00> : vector<16x128xf32>
    %327 = tpu.matmul %326, %324, %cst_154 {dimension_numbers = #tpu.dot_dimension_numbers<[1], [0], [0], [1], [0, 0, 1, 1], [], []>} : vector<16x16xf32>, vector<16x128xf32>, vector<16x128xf32> -> vector<16x128xf32>
    %328 = arith.addf %320, %327 : vector<16x128xf32>
    %c0_155 = arith.constant 0 : index
    %c0_156 = arith.constant 0 : index
    %329 = vector.load %arg11[%c0_155, %c0_156] : memref<16x1xf32, #tpu.memory_space<vmem>>, vector<16x1xf32>
    %330 = vector.broadcast %329 : vector<16x1xf32> to vector<16x128xf32>
    %331 = arith.addf %328, %330 : vector<16x128xf32>
    %c0_157 = arith.constant 0 : index
    %c0_158 = arith.constant 0 : index
    %332 = vector.load %arg14[%c0_157, %c0_158] : memref<16x8xf32, #tpu.memory_space<vmem>>, vector<16x8xf32>
    %cst_159 = arith.constant dense<0.000000e+00> : vector<16x128xf32>
    %333 = tpu.matmul %332, %252, %cst_159 {dimension_numbers = #tpu.dot_dimension_numbers<[1], [0], [0], [1], [0, 0, 1, 1], [], []>} : vector<16x8xf32>, vector<8x128xf32>, vector<16x128xf32> -> vector<16x128xf32>
    %c0_160 = arith.constant 0 : index
    %c0_161 = arith.constant 0 : index
    %334 = vector.load %arg15[%c0_160, %c0_161] : memref<16x1xf32, #tpu.memory_space<vmem>>, vector<16x1xf32>
    %335 = vector.broadcast %334 : vector<16x1xf32> to vector<16x128xf32>
    %336 = arith.addf %333, %335 : vector<16x128xf32>
    %337 = arith.addf %331, %336 : vector<16x128xf32>
    %cst_162 = arith.constant 0.000000e+00 : f32
    %338 = vector.broadcast %cst_162 : f32 to vector<16x128xf32>
    %339 = arith.maximumf %337, %338 : vector<16x128xf32>
    %c0_163 = arith.constant 0 : index
    %c0_164 = arith.constant 0 : index
    %340 = vector.load %arg16[%c0_163, %c0_164] : memref<8x8xf32, #tpu.memory_space<vmem>>, vector<8x8xf32>
    %cst_165 = arith.constant dense<0.000000e+00> : vector<8x512xf32>
    %341 = tpu.matmul %340, %172, %cst_165 {dimension_numbers = #tpu.dot_dimension_numbers<[1], [0], [0], [1], [0, 0, 1, 1], [], []>} : vector<8x8xf32>, vector<8x512xf32>, vector<8x512xf32> -> vector<8x512xf32>
    %c0_166 = arith.constant 0 : index
    %c0_167 = arith.constant 0 : index
    %342 = vector.load %arg17[%c0_166, %c0_167] : memref<8x1xf32, #tpu.memory_space<vmem>>, vector<8x1xf32>
    %343 = vector.broadcast %342 : vector<8x1xf32> to vector<8x512xf32>
    %344 = arith.addf %341, %343 : vector<8x512xf32>
    %c0_168 = arith.constant 0 : index
    %c0_169 = arith.constant 0 : index
    %345 = vector.load %arg20[%c0_168, %c0_169] : memref<8x16xf32, #tpu.memory_space<vmem>>, vector<8x16xf32>
    %cst_170 = arith.constant dense<0.000000e+00> : vector<8x128xf32>
    %346 = tpu.matmul %345, %339, %cst_170 {dimension_numbers = #tpu.dot_dimension_numbers<[1], [0], [0], [1], [0, 0, 1, 1], [], []>} : vector<8x16xf32>, vector<16x128xf32>, vector<8x128xf32> -> vector<8x128xf32>
    %c0_171 = arith.constant 0 : index
    %c0_172 = arith.constant 0 : index
    %347 = vector.load %arg21[%c0_171, %c0_172] : memref<8x1xf32, #tpu.memory_space<vmem>>, vector<8x1xf32>
    %348 = vector.broadcast %347 : vector<8x1xf32> to vector<8x128xf32>
    %349 = arith.addf %346, %348 : vector<8x128xf32>
    %c0_173 = arith.constant 0 : index
    %c0_174 = arith.constant 0 : index
    %350 = vector.load %arg24[%c0_173, %c0_174] : memref<128x512xf32, #tpu.memory_space<vmem>>, vector<128x512xf32>
    %cst_175 = arith.constant dense<0.000000e+00> : vector<8x512xf32>
    %351 = tpu.matmul %349, %350, %cst_175 {dimension_numbers = #tpu.dot_dimension_numbers<[1], [0], [0], [1], [0, 0, 1, 1], [], []>} : vector<8x128xf32>, vector<128x512xf32>, vector<8x512xf32> -> vector<8x512xf32>
    %352 = arith.addf %344, %351 : vector<8x512xf32>
    %c0_176 = arith.constant 0 : index
    %c17_177 = arith.constant 17 : index
    %353 = vector.load %arg28[%c0_176, %c17_177] : memref<8x546xf32, #tpu.memory_space<vmem>>, vector<8x512xf32>
    tpu.vector_store %arg28[%c0_176, %c17_177], %352 {strides = array<i32>} : memref<8x546xf32, #tpu.memory_space<vmem>>, vector<8x512xf32>,
    %c0_178 = arith.constant 0 : index
    %c0_179 = arith.constant 0 : index
    %c0_180 = arith.constant 0 : index
    %354 = vector.load %arg18[%c0_178, %c0_179, %c0_180] : memref<9x8x8xf32, #tpu.memory_space<vmem>>, vector<9x8x8xf32>
    %c0_181 = arith.constant 0 : index
    %c0_182 = arith.constant 0 : index
    %355 = vector.load %arg5[%c0_181, %c0_182] : memref<9x512xf32, #tpu.memory_space<vmem>>, vector<9x512xf32>
    %c0_183 = arith.constant 0 : index
    %c0_184 = arith.constant 0 : index
    %356 = vector.load %arg28[%c0_183, %c0_184] : memref<8x546xf32, #tpu.memory_space<vmem>>, vector<8x512xf32>
    %357 = vector.extract_strided_slice %355 {offsets = [0, 0], sizes = [1, 512], strides = [1, 1]} : vector<9x512xf32> to vector<1x512xf32>
    %358 = vector.broadcast %357 : vector<1x512xf32> to vector<8x512xf32>
    %359 = arith.mulf %356, %358 : vector<8x512xf32>
    %360 = vector.extract_strided_slice %354 {offsets = [0, 0, 0], sizes = [1, 8, 8], strides = [1, 1, 1]} : vector<9x8x8xf32> to vector<1x8x8xf32>
    %361 = vector.shape_cast %360 : vector<1x8x8xf32> to vector<8x8xf32>
    %cst_185 = arith.constant dense<0.000000e+00> : vector<8x512xf32>
    %362 = tpu.matmul %361, %359, %cst_185 {dimension_numbers = #tpu.dot_dimension_numbers<[1], [0], [0], [1], [0, 0, 1, 1], [], []>} : vector<8x8xf32>, vector<8x512xf32>, vector<8x512xf32> -> vector<8x512xf32>
    %c0_186 = arith.constant 0 : index
    %c1_187 = arith.constant 1 : index
    %363 = vector.load %arg28[%c0_186, %c1_187] : memref<8x546xf32, #tpu.memory_space<vmem>>, vector<8x512xf32>
    %364 = vector.extract_strided_slice %355 {offsets = [1, 0], sizes = [1, 512], strides = [1, 1]} : vector<9x512xf32> to vector<1x512xf32>
    %365 = vector.broadcast %364 : vector<1x512xf32> to vector<8x512xf32>
    %366 = arith.mulf %363, %365 : vector<8x512xf32>
    %367 = vector.extract_strided_slice %354 {offsets = [1, 0, 0], sizes = [1, 8, 8], strides = [1, 1, 1]} : vector<9x8x8xf32> to vector<1x8x8xf32>
    %368 = vector.shape_cast %367 : vector<1x8x8xf32> to vector<8x8xf32>
    %cst_188 = arith.constant dense<0.000000e+00> : vector<8x512xf32>
    %369 = tpu.matmul %368, %366, %cst_188 {dimension_numbers = #tpu.dot_dimension_numbers<[1], [0], [0], [1], [0, 0, 1, 1], [], []>} : vector<8x8xf32>, vector<8x512xf32>, vector<8x512xf32> -> vector<8x512xf32>
    %370 = arith.addf %362, %369 : vector<8x512xf32>
    %c0_189 = arith.constant 0 : index
    %c2_190 = arith.constant 2 : index
    %371 = vector.load %arg28[%c0_189, %c2_190] : memref<8x546xf32, #tpu.memory_space<vmem>>, vector<8x512xf32>
    %372 = vector.extract_strided_slice %355 {offsets = [2, 0], sizes = [1, 512], strides = [1, 1]} : vector<9x512xf32> to vector<1x512xf32>
    %373 = vector.broadcast %372 : vector<1x512xf32> to vector<8x512xf32>
    %374 = arith.mulf %371, %373 : vector<8x512xf32>
    %375 = vector.extract_strided_slice %354 {offsets = [2, 0, 0], sizes = [1, 8, 8], strides = [1, 1, 1]} : vector<9x8x8xf32> to vector<1x8x8xf32>
    %376 = vector.shape_cast %375 : vector<1x8x8xf32> to vector<8x8xf32>
    %cst_191 = arith.constant dense<0.000000e+00> : vector<8x512xf32>
    %377 = tpu.matmul %376, %374, %cst_191 {dimension_numbers = #tpu.dot_dimension_numbers<[1], [0], [0], [1], [0, 0, 1, 1], [], []>} : vector<8x8xf32>, vector<8x512xf32>, vector<8x512xf32> -> vector<8x512xf32>
    %378 = arith.addf %370, %377 : vector<8x512xf32>
    %c0_192 = arith.constant 0 : index
    %c16_193 = arith.constant 16 : index
    %379 = vector.load %arg28[%c0_192, %c16_193] : memref<8x546xf32, #tpu.memory_space<vmem>>, vector<8x512xf32>
    %380 = vector.extract_strided_slice %355 {offsets = [3, 0], sizes = [1, 512], strides = [1, 1]} : vector<9x512xf32> to vector<1x512xf32>
    %381 = vector.broadcast %380 : vector<1x512xf32> to vector<8x512xf32>
    %382 = arith.mulf %379, %381 : vector<8x512xf32>
    %383 = vector.extract_strided_slice %354 {offsets = [3, 0, 0], sizes = [1, 8, 8], strides = [1, 1, 1]} : vector<9x8x8xf32> to vector<1x8x8xf32>
    %384 = vector.shape_cast %383 : vector<1x8x8xf32> to vector<8x8xf32>
    %cst_194 = arith.constant dense<0.000000e+00> : vector<8x512xf32>
    %385 = tpu.matmul %384, %382, %cst_194 {dimension_numbers = #tpu.dot_dimension_numbers<[1], [0], [0], [1], [0, 0, 1, 1], [], []>} : vector<8x8xf32>, vector<8x512xf32>, vector<8x512xf32> -> vector<8x512xf32>
    %386 = arith.addf %378, %385 : vector<8x512xf32>
    %c0_195 = arith.constant 0 : index
    %c17_196 = arith.constant 17 : index
    %387 = vector.load %arg28[%c0_195, %c17_196] : memref<8x546xf32, #tpu.memory_space<vmem>>, vector<8x512xf32>
    %388 = vector.extract_strided_slice %355 {offsets = [4, 0], sizes = [1, 512], strides = [1, 1]} : vector<9x512xf32> to vector<1x512xf32>
    %389 = vector.broadcast %388 : vector<1x512xf32> to vector<8x512xf32>
    %390 = arith.mulf %387, %389 : vector<8x512xf32>
    %391 = vector.extract_strided_slice %354 {offsets = [4, 0, 0], sizes = [1, 8, 8], strides = [1, 1, 1]} : vector<9x8x8xf32> to vector<1x8x8xf32>
    %392 = vector.shape_cast %391 : vector<1x8x8xf32> to vector<8x8xf32>
    %cst_197 = arith.constant dense<0.000000e+00> : vector<8x512xf32>
    %393 = tpu.matmul %392, %390, %cst_197 {dimension_numbers = #tpu.dot_dimension_numbers<[1], [0], [0], [1], [0, 0, 1, 1], [], []>} : vector<8x8xf32>, vector<8x512xf32>, vector<8x512xf32> -> vector<8x512xf32>
    %394 = arith.addf %386, %393 : vector<8x512xf32>
    %c0_198 = arith.constant 0 : index
    %c18_199 = arith.constant 18 : index
    %395 = vector.load %arg28[%c0_198, %c18_199] : memref<8x546xf32, #tpu.memory_space<vmem>>, vector<8x512xf32>
    %396 = vector.extract_strided_slice %355 {offsets = [5, 0], sizes = [1, 512], strides = [1, 1]} : vector<9x512xf32> to vector<1x512xf32>
    %397 = vector.broadcast %396 : vector<1x512xf32> to vector<8x512xf32>
    %398 = arith.mulf %395, %397 : vector<8x512xf32>
    %399 = vector.extract_strided_slice %354 {offsets = [5, 0, 0], sizes = [1, 8, 8], strides = [1, 1, 1]} : vector<9x8x8xf32> to vector<1x8x8xf32>
    %400 = vector.shape_cast %399 : vector<1x8x8xf32> to vector<8x8xf32>
    %cst_200 = arith.constant dense<0.000000e+00> : vector<8x512xf32>
    %401 = tpu.matmul %400, %398, %cst_200 {dimension_numbers = #tpu.dot_dimension_numbers<[1], [0], [0], [1], [0, 0, 1, 1], [], []>} : vector<8x8xf32>, vector<8x512xf32>, vector<8x512xf32> -> vector<8x512xf32>
    %402 = arith.addf %394, %401 : vector<8x512xf32>
    %c0_201 = arith.constant 0 : index
    %c32_202 = arith.constant 32 : index
    %403 = vector.load %arg28[%c0_201, %c32_202] : memref<8x546xf32, #tpu.memory_space<vmem>>, vector<8x512xf32>
    %404 = vector.extract_strided_slice %355 {offsets = [6, 0], sizes = [1, 512], strides = [1, 1]} : vector<9x512xf32> to vector<1x512xf32>
    %405 = vector.broadcast %404 : vector<1x512xf32> to vector<8x512xf32>
    %406 = arith.mulf %403, %405 : vector<8x512xf32>
    %407 = vector.extract_strided_slice %354 {offsets = [6, 0, 0], sizes = [1, 8, 8], strides = [1, 1, 1]} : vector<9x8x8xf32> to vector<1x8x8xf32>
    %408 = vector.shape_cast %407 : vector<1x8x8xf32> to vector<8x8xf32>
    %cst_203 = arith.constant dense<0.000000e+00> : vector<8x512xf32>
    %409 = tpu.matmul %408, %406, %cst_203 {dimension_numbers = #tpu.dot_dimension_numbers<[1], [0], [0], [1], [0, 0, 1, 1], [], []>} : vector<8x8xf32>, vector<8x512xf32>, vector<8x512xf32> -> vector<8x512xf32>
    %410 = arith.addf %402, %409 : vector<8x512xf32>
    %c0_204 = arith.constant 0 : index
    %c33_205 = arith.constant 33 : index
    %411 = vector.load %arg28[%c0_204, %c33_205] : memref<8x546xf32, #tpu.memory_space<vmem>>, vector<8x512xf32>
    %412 = vector.extract_strided_slice %355 {offsets = [7, 0], sizes = [1, 512], strides = [1, 1]} : vector<9x512xf32> to vector<1x512xf32>
    %413 = vector.broadcast %412 : vector<1x512xf32> to vector<8x512xf32>
    %414 = arith.mulf %411, %413 : vector<8x512xf32>
    %415 = vector.extract_strided_slice %354 {offsets = [7, 0, 0], sizes = [1, 8, 8], strides = [1, 1, 1]} : vector<9x8x8xf32> to vector<1x8x8xf32>
    %416 = vector.shape_cast %415 : vector<1x8x8xf32> to vector<8x8xf32>
    %cst_206 = arith.constant dense<0.000000e+00> : vector<8x512xf32>
    %417 = tpu.matmul %416, %414, %cst_206 {dimension_numbers = #tpu.dot_dimension_numbers<[1], [0], [0], [1], [0, 0, 1, 1], [], []>} : vector<8x8xf32>, vector<8x512xf32>, vector<8x512xf32> -> vector<8x512xf32>
    %418 = arith.addf %410, %417 : vector<8x512xf32>
    %c0_207 = arith.constant 0 : index
    %c34_208 = arith.constant 34 : index
    %419 = vector.load %arg28[%c0_207, %c34_208] : memref<8x546xf32, #tpu.memory_space<vmem>>, vector<8x512xf32>
    %420 = vector.extract_strided_slice %355 {offsets = [8, 0], sizes = [1, 512], strides = [1, 1]} : vector<9x512xf32> to vector<1x512xf32>
    %421 = vector.broadcast %420 : vector<1x512xf32> to vector<8x512xf32>
    %422 = arith.mulf %419, %421 : vector<8x512xf32>
    %423 = vector.extract_strided_slice %354 {offsets = [8, 0, 0], sizes = [1, 8, 8], strides = [1, 1, 1]} : vector<9x8x8xf32> to vector<1x8x8xf32>
    %424 = vector.shape_cast %423 : vector<1x8x8xf32> to vector<8x8xf32>
    %cst_209 = arith.constant dense<0.000000e+00> : vector<8x512xf32>
    %425 = tpu.matmul %424, %422, %cst_209 {dimension_numbers = #tpu.dot_dimension_numbers<[1], [0], [0], [1], [0, 0, 1, 1], [], []>} : vector<8x8xf32>, vector<8x512xf32>, vector<8x512xf32> -> vector<8x512xf32>
    %426 = arith.addf %418, %425 : vector<8x512xf32>
    %c0_210 = arith.constant 0 : index
    %c0_211 = arith.constant 0 : index
    %427 = vector.load %arg19[%c0_210, %c0_211] : memref<8x1xf32, #tpu.memory_space<vmem>>, vector<8x1xf32>
    %428 = vector.broadcast %427 : vector<8x1xf32> to vector<8x512xf32>
    %429 = arith.addf %426, %428 : vector<8x512xf32>
    %c0_212 = arith.constant 0 : index
    %c0_213 = arith.constant 0 : index
    %430 = vector.load %arg25[%c0_212, %c0_213] : memref<8x512xf32, #tpu.memory_space<vmem>>, vector<8x512xf32>
    tpu.vector_store %arg25[%c0_212, %c0_213], %429 {strides = array<i32>} : memref<8x512xf32, #tpu.memory_space<vmem>>, vector<8x512xf32>,
    %c0_214 = arith.constant 0 : index
    %c9_215 = arith.constant 9 : index
    %431 = vector.load %arg30[%c0_214, %c9_215] : memref<8x146xf32, #tpu.memory_space<vmem>>, vector<8x128xf32>
    tpu.vector_store %arg30[%c0_214, %c9_215], %349 {strides = array<i32>} : memref<8x146xf32, #tpu.memory_space<vmem>>, vector<8x128xf32>,
    %c0_216 = arith.constant 0 : index
    %c0_217 = arith.constant 0 : index
    %c0_218 = arith.constant 0 : index
    %432 = vector.load %arg22[%c0_216, %c0_217, %c0_218] : memref<9x8x8xf32, #tpu.memory_space<vmem>>, vector<9x8x8xf32>
    %c0_219 = arith.constant 0 : index
    %c0_220 = arith.constant 0 : index
    %433 = vector.load %arg12[%c0_219, %c0_220] : memref<9x128xf32, #tpu.memory_space<vmem>>, vector<9x128xf32>
    %c0_221 = arith.constant 0 : index
    %c0_222 = arith.constant 0 : index
    %434 = vector.load %arg30[%c0_221, %c0_222] : memref<8x146xf32, #tpu.memory_space<vmem>>, vector<8x128xf32>
    %435 = vector.extract_strided_slice %433 {offsets = [0, 0], sizes = [1, 128], strides = [1, 1]} : vector<9x128xf32> to vector<1x128xf32>
    %436 = vector.broadcast %435 : vector<1x128xf32> to vector<8x128xf32>
    %437 = arith.mulf %434, %436 : vector<8x128xf32>
    %438 = vector.extract_strided_slice %432 {offsets = [0, 0, 0], sizes = [1, 8, 8], strides = [1, 1, 1]} : vector<9x8x8xf32> to vector<1x8x8xf32>
    %439 = vector.shape_cast %438 : vector<1x8x8xf32> to vector<8x8xf32>
    %cst_223 = arith.constant dense<0.000000e+00> : vector<8x128xf32>
    %440 = tpu.matmul %439, %437, %cst_223 {dimension_numbers = #tpu.dot_dimension_numbers<[1], [0], [0], [1], [0, 0, 1, 1], [], []>} : vector<8x8xf32>, vector<8x128xf32>, vector<8x128xf32> -> vector<8x128xf32>
    %c0_224 = arith.constant 0 : index
    %c1_225 = arith.constant 1 : index
    %441 = vector.load %arg30[%c0_224, %c1_225] : memref<8x146xf32, #tpu.memory_space<vmem>>, vector<8x128xf32>
    %442 = vector.extract_strided_slice %433 {offsets = [1, 0], sizes = [1, 128], strides = [1, 1]} : vector<9x128xf32> to vector<1x128xf32>
    %443 = vector.broadcast %442 : vector<1x128xf32> to vector<8x128xf32>
    %444 = arith.mulf %441, %443 : vector<8x128xf32>
    %445 = vector.extract_strided_slice %432 {offsets = [1, 0, 0], sizes = [1, 8, 8], strides = [1, 1, 1]} : vector<9x8x8xf32> to vector<1x8x8xf32>
    %446 = vector.shape_cast %445 : vector<1x8x8xf32> to vector<8x8xf32>
    %cst_226 = arith.constant dense<0.000000e+00> : vector<8x128xf32>
    %447 = tpu.matmul %446, %444, %cst_226 {dimension_numbers = #tpu.dot_dimension_numbers<[1], [0], [0], [1], [0, 0, 1, 1], [], []>} : vector<8x8xf32>, vector<8x128xf32>, vector<8x128xf32> -> vector<8x128xf32>
    %448 = arith.addf %440, %447 : vector<8x128xf32>
    %c0_227 = arith.constant 0 : index
    %c2_228 = arith.constant 2 : index
    %449 = vector.load %arg30[%c0_227, %c2_228] : memref<8x146xf32, #tpu.memory_space<vmem>>, vector<8x128xf32>
    %450 = vector.extract_strided_slice %433 {offsets = [2, 0], sizes = [1, 128], strides = [1, 1]} : vector<9x128xf32> to vector<1x128xf32>
    %451 = vector.broadcast %450 : vector<1x128xf32> to vector<8x128xf32>
    %452 = arith.mulf %449, %451 : vector<8x128xf32>
    %453 = vector.extract_strided_slice %432 {offsets = [2, 0, 0], sizes = [1, 8, 8], strides = [1, 1, 1]} : vector<9x8x8xf32> to vector<1x8x8xf32>
    %454 = vector.shape_cast %453 : vector<1x8x8xf32> to vector<8x8xf32>
    %cst_229 = arith.constant dense<0.000000e+00> : vector<8x128xf32>
    %455 = tpu.matmul %454, %452, %cst_229 {dimension_numbers = #tpu.dot_dimension_numbers<[1], [0], [0], [1], [0, 0, 1, 1], [], []>} : vector<8x8xf32>, vector<8x128xf32>, vector<8x128xf32> -> vector<8x128xf32>
    %456 = arith.addf %448, %455 : vector<8x128xf32>
    %c0_230 = arith.constant 0 : index
    %c8_231 = arith.constant 8 : index
    %457 = vector.load %arg30[%c0_230, %c8_231] : memref<8x146xf32, #tpu.memory_space<vmem>>, vector<8x128xf32>
    %458 = vector.extract_strided_slice %433 {offsets = [3, 0], sizes = [1, 128], strides = [1, 1]} : vector<9x128xf32> to vector<1x128xf32>
    %459 = vector.broadcast %458 : vector<1x128xf32> to vector<8x128xf32>
    %460 = arith.mulf %457, %459 : vector<8x128xf32>
    %461 = vector.extract_strided_slice %432 {offsets = [3, 0, 0], sizes = [1, 8, 8], strides = [1, 1, 1]} : vector<9x8x8xf32> to vector<1x8x8xf32>
    %462 = vector.shape_cast %461 : vector<1x8x8xf32> to vector<8x8xf32>
    %cst_232 = arith.constant dense<0.000000e+00> : vector<8x128xf32>
    %463 = tpu.matmul %462, %460, %cst_232 {dimension_numbers = #tpu.dot_dimension_numbers<[1], [0], [0], [1], [0, 0, 1, 1], [], []>} : vector<8x8xf32>, vector<8x128xf32>, vector<8x128xf32> -> vector<8x128xf32>
    %464 = arith.addf %456, %463 : vector<8x128xf32>
    %c0_233 = arith.constant 0 : index
    %c9_234 = arith.constant 9 : index
    %465 = vector.load %arg30[%c0_233, %c9_234] : memref<8x146xf32, #tpu.memory_space<vmem>>, vector<8x128xf32>
    %466 = vector.extract_strided_slice %433 {offsets = [4, 0], sizes = [1, 128], strides = [1, 1]} : vector<9x128xf32> to vector<1x128xf32>
    %467 = vector.broadcast %466 : vector<1x128xf32> to vector<8x128xf32>
    %468 = arith.mulf %465, %467 : vector<8x128xf32>
    %469 = vector.extract_strided_slice %432 {offsets = [4, 0, 0], sizes = [1, 8, 8], strides = [1, 1, 1]} : vector<9x8x8xf32> to vector<1x8x8xf32>
    %470 = vector.shape_cast %469 : vector<1x8x8xf32> to vector<8x8xf32>
    %cst_235 = arith.constant dense<0.000000e+00> : vector<8x128xf32>
    %471 = tpu.matmul %470, %468, %cst_235 {dimension_numbers = #tpu.dot_dimension_numbers<[1], [0], [0], [1], [0, 0, 1, 1], [], []>} : vector<8x8xf32>, vector<8x128xf32>, vector<8x128xf32> -> vector<8x128xf32>
    %472 = arith.addf %464, %471 : vector<8x128xf32>
    %c0_236 = arith.constant 0 : index
    %c10_237 = arith.constant 10 : index
    %473 = vector.load %arg30[%c0_236, %c10_237] : memref<8x146xf32, #tpu.memory_space<vmem>>, vector<8x128xf32>
    %474 = vector.extract_strided_slice %433 {offsets = [5, 0], sizes = [1, 128], strides = [1, 1]} : vector<9x128xf32> to vector<1x128xf32>
    %475 = vector.broadcast %474 : vector<1x128xf32> to vector<8x128xf32>
    %476 = arith.mulf %473, %475 : vector<8x128xf32>
    %477 = vector.extract_strided_slice %432 {offsets = [5, 0, 0], sizes = [1, 8, 8], strides = [1, 1, 1]} : vector<9x8x8xf32> to vector<1x8x8xf32>
    %478 = vector.shape_cast %477 : vector<1x8x8xf32> to vector<8x8xf32>
    %cst_238 = arith.constant dense<0.000000e+00> : vector<8x128xf32>
    %479 = tpu.matmul %478, %476, %cst_238 {dimension_numbers = #tpu.dot_dimension_numbers<[1], [0], [0], [1], [0, 0, 1, 1], [], []>} : vector<8x8xf32>, vector<8x128xf32>, vector<8x128xf32> -> vector<8x128xf32>
    %480 = arith.addf %472, %479 : vector<8x128xf32>
    %c0_239 = arith.constant 0 : index
    %c16_240 = arith.constant 16 : index
    %481 = vector.load %arg30[%c0_239, %c16_240] : memref<8x146xf32, #tpu.memory_space<vmem>>, vector<8x128xf32>
    %482 = vector.extract_strided_slice %433 {offsets = [6, 0], sizes = [1, 128], strides = [1, 1]} : vector<9x128xf32> to vector<1x128xf32>
    %483 = vector.broadcast %482 : vector<1x128xf32> to vector<8x128xf32>
    %484 = arith.mulf %481, %483 : vector<8x128xf32>
    %485 = vector.extract_strided_slice %432 {offsets = [6, 0, 0], sizes = [1, 8, 8], strides = [1, 1, 1]} : vector<9x8x8xf32> to vector<1x8x8xf32>
    %486 = vector.shape_cast %485 : vector<1x8x8xf32> to vector<8x8xf32>
    %cst_241 = arith.constant dense<0.000000e+00> : vector<8x128xf32>
    %487 = tpu.matmul %486, %484, %cst_241 {dimension_numbers = #tpu.dot_dimension_numbers<[1], [0], [0], [1], [0, 0, 1, 1], [], []>} : vector<8x8xf32>, vector<8x128xf32>, vector<8x128xf32> -> vector<8x128xf32>
    %488 = arith.addf %480, %487 : vector<8x128xf32>
    %c0_242 = arith.constant 0 : index
    %c17_243 = arith.constant 17 : index
    %489 = vector.load %arg30[%c0_242, %c17_243] : memref<8x146xf32, #tpu.memory_space<vmem>>, vector<8x128xf32>
    %490 = vector.extract_strided_slice %433 {offsets = [7, 0], sizes = [1, 128], strides = [1, 1]} : vector<9x128xf32> to vector<1x128xf32>
    %491 = vector.broadcast %490 : vector<1x128xf32> to vector<8x128xf32>
    %492 = arith.mulf %489, %491 : vector<8x128xf32>
    %493 = vector.extract_strided_slice %432 {offsets = [7, 0, 0], sizes = [1, 8, 8], strides = [1, 1, 1]} : vector<9x8x8xf32> to vector<1x8x8xf32>
    %494 = vector.shape_cast %493 : vector<1x8x8xf32> to vector<8x8xf32>
    %cst_244 = arith.constant dense<0.000000e+00> : vector<8x128xf32>
    %495 = tpu.matmul %494, %492, %cst_244 {dimension_numbers = #tpu.dot_dimension_numbers<[1], [0], [0], [1], [0, 0, 1, 1], [], []>} : vector<8x8xf32>, vector<8x128xf32>, vector<8x128xf32> -> vector<8x128xf32>
    %496 = arith.addf %488, %495 : vector<8x128xf32>
    %c0_245 = arith.constant 0 : index
    %c18_246 = arith.constant 18 : index
    %497 = vector.load %arg30[%c0_245, %c18_246] : memref<8x146xf32, #tpu.memory_space<vmem>>, vector<8x128xf32>
    %498 = vector.extract_strided_slice %433 {offsets = [8, 0], sizes = [1, 128], strides = [1, 1]} : vector<9x128xf32> to vector<1x128xf32>
    %499 = vector.broadcast %498 : vector<1x128xf32> to vector<8x128xf32>
    %500 = arith.mulf %497, %499 : vector<8x128xf32>
    %501 = vector.extract_strided_slice %432 {offsets = [8, 0, 0], sizes = [1, 8, 8], strides = [1, 1, 1]} : vector<9x8x8xf32> to vector<1x8x8xf32>
    %502 = vector.shape_cast %501 : vector<1x8x8xf32> to vector<8x8xf32>
    %cst_247 = arith.constant dense<0.000000e+00> : vector<8x128xf32>
    %503 = tpu.matmul %502, %500, %cst_247 {dimension_numbers = #tpu.dot_dimension_numbers<[1], [0], [0], [1], [0, 0, 1, 1], [], []>} : vector<8x8xf32>, vector<8x128xf32>, vector<8x128xf32> -> vector<8x128xf32>
    %504 = arith.addf %496, %503 : vector<8x128xf32>
    %c0_248 = arith.constant 0 : index
    %c0_249 = arith.constant 0 : index
    %505 = vector.load %arg23[%c0_248, %c0_249] : memref<8x1xf32, #tpu.memory_space<vmem>>, vector<8x1xf32>
    %506 = vector.broadcast %505 : vector<8x1xf32> to vector<8x128xf32>
    %507 = arith.addf %504, %506 : vector<8x128xf32>
    %c0_250 = arith.constant 0 : index
    %c0_251 = arith.constant 0 : index
    %508 = vector.load %arg26[%c0_250, %c0_251] : memref<8x128xf32, #tpu.memory_space<vmem>>, vector<8x128xf32>
    tpu.vector_store %arg26[%c0_250, %c0_251], %507 {strides = array<i32>} : memref<8x128xf32, #tpu.memory_space<vmem>>, vector<8x128xf32>,
    return
  }
}

</mosaic_0001>

<bundles_post_ra>
// kernel: forward.1
= control target key start
LH: loop header
LB: loop body
LE: loop exit
PB: predicated region body
PF: predicated region fallthrough
CT: control target
= control target key end

     0   :  { %s14952_s0 = inlined_call_operand.vmem [shape: f32[4,512], index: 0, kind: input, shape index: {}]   ;;  %s14953_s1 = inlined_call_operand.vmem [shape: f32[9,8,4], index: 1, kind: input, shape index: {}]   ;;  %s14954_s2 = inlined_call_operand.vmem [shape: f32[8,1], index: 2, kind: input, shape index: {}]   ;;  %s14955_s3 = inlined_call_operand.vmem [shape: f32[9,8,8], index: 3, kind: input, shape index: {}]   ;;  %s14956_s4 = inlined_call_operand.hbm [shape: f32[8,1], index: 4, kind: input, shape index: {}]   ;;  %s14957_s5 = inlined_call_operand.hbm [shape: f32[9,512], index: 5, kind: input, shape index: {}]   ;;  %s14958_s6 = inlined_call_operand.hbm [shape: f32[8,4], index: 6, kind: input, shape index: {}]   ;;  %s14959_s7 = inlined_call_operand.hbm [shape: f32[8,1], index: 7, kind: input, shape index: {}]   ;;  %s14960_s8 = inlined_call_operand.vmem [shape: f32[9,16,8], index: 8, kind: input, shape index: {}]   ;;  %s14961_s9 = inlined_call_operand.hbm [shape: f32[16,1], index: 9, kind: input, shape index: {}]   ;;  %s14962_s10 = inlined_call_operand.vmem [shape: f32[9,16,16], index: 10, kind: input, shape index: {}]   ;;  %s14963_s11 = inlined_call_operand.hbm [shape: f32[16,1], index: 11, kind: input, shape index: {}]   ;;  %s14964_s12 = inlined_call_operand.hbm [shape: f32[9,128], index: 12, kind: input, shape index: {}]   ;;  %s14965_s13 = inlined_call_operand.hbm [shape: f32[512,128], index: 13, kind: input, shape index: {}]   ;;  %s14966_s14 = inlined_call_operand.hbm [shape: f32[16,8], index: 14, kind: input, shape index: {}]   ;;  %s14967_s15 = inlined_call_operand.hbm [shape: f32[16,1], index: 15, kind: input, shape index: {}]   ;;  %s14968_s16 = inlined_call_operand.hbm [shape: f32[8,8], index: 16, kind: input, shape index: {}]   ;;  %s14969_s17 = inlined_call_operand.hbm [shape: f32[8,1], index: 17, kind: input, shape index: {}]   ;;  %s14970_s18 = inlined_call_operand.hbm [shape: f32[9,8,8], index: 18, kind: input, shape index: {}]   ;;  %s14971_s19 = inlined_call_operand.hbm [shape: f32[8,1], index: 19, kind: input, shape index: {}]   ;;  %s14972_s20 = inlined_call_operand.hbm [shape: f32[8,16], index: 20, kind: input, shape index: {}]   ;;  %s14973_s21 = inlined_call_operand.hbm [shape: f32[8,1], index: 21, kind: input, shape index: {}]   ;;  %s14974_s22 = inlined_call_operand.hbm [shape: f32[9,8,8], index: 22, kind: input, shape index: {}]   ;;  %s14975_s23 = inlined_call_operand.hbm [shape: f32[8,1], index: 23, kind: input, shape index: {}]   ;;  %s14976_s24 = inlined_call_operand.hbm [shape: f32[128,512], index: 24, kind: input, shape index: {}]   ;;  %s14977_s25 = inlined_call_operand.vmem [shape: f32[8,512], index: 25, kind: output, shape index: {0}]   ;;  %s14978_s26 = inlined_call_operand.vmem [shape: f32[8,128], index: 26, kind: output, shape index: {1}]  }
   0x1   :  { %15081 = sst [smem:[#allocation129_spill]] %s14952_s0 }
   0x2   :  { %15082 = sst [smem:[#allocation130_spill]] %s14953_s1 }
   0x3   :  { %15083 = sst [smem:[#allocation131_spill]] %s14954_s2 }
   0x4   :  { %15084 = sst [smem:[#allocation132_spill]] %s14955_s3 }
   0x5   :  { %15085 = sst [smem:[#allocation133_spill]] %s14956_s4 }
   0x6   :  { %15086 = sst [smem:[#allocation134_spill]] %s14957_s5 }
   0x7   :  { %15087 = sst [smem:[#allocation135_spill]] %s14958_s6 }
   0x8   :  { %15088 = sst [smem:[#allocation136_spill]] %s14959_s7 }
   0x9   :  { %15089 = sst [smem:[#allocation137_spill]] %s14960_s8 }
   0xa   :  { %15090 = sst [smem:[#allocation138_spill]] %s14961_s9 }
   0xb   :  { %15091 = sst [smem:[#allocation139_spill]] %s14962_s10 }
   0xc   :  { %15092 = sst [smem:[#allocation140_spill]] %s14978_s26 }
   0xd   :  { %32 = vsyncpa [#allocation7], 0 }
   0xe   :  { %33 = vsyncpa [#allocation9], 0 }
   0xf   :  { %34 = vsyncpa [#allocation12], 0 }
  0x10   :  { %35 = vsyncpa [#allocation15], 0 }
  0x11   :  { %36 = vsyncpa [#allocation18], 0 }
  0x12   :  { %37 = vsyncpa [#allocation21], 0 }
  0x13   :  { %38 = vsyncpa [#allocation24], 0 }
  0x14   :  { %39 = vsyncpa [#allocation27], 0 }
  0x15   :  { %40 = vsyncpa [#allocation30], 0 }
  0x16   :  { %41 = vsyncpa [#allocation33], 0  ;;  %s12194_s27 = smov [#allocation8]  }
  0x17   :  { %s65_s3 = sshll.u32 %s12194_s27, 4  ;;  %s66_s3 = int_to_ptr.vmem [resolvable:$true] %s65_s3 }
  0x18   :  { %s11802_s7 = scalar_lea.vmem %s66_s3, 1024  ;;  %p11807_p1 = scmp.lt.s32.totalorder %s66_s3, %s66_s3 }
  0x19   :  { %p11803_p0 = scmp.ne.s32.totalorder %s66_s3, %s11802_s7  ;;  %p11808_p2 = scmp.lt.s32.totalorder %s11802_s7, %s11802_s7 }
  0x1b   :  { %p11809_p3 = por %p11808_p2, %p11807_p1 }
  0x1d   :  { %p11810_p4 = pnand %p11809_p3, %p11803_p0 }
  0x1f   :  { %11813 = shalt.err (!%p11810_p4)
}
  0x20   :  { %s12195_s28 = smov 512   ;;  %s12196_s8 = smov 32  }
  0x21   :  { %s15093_s0 = sld [smem:[#allocation134_spill]]  ;;  %s12197_s9 = smov [#allocation11]  }
  0x22   :  { %s88_s30 = sshll.u32 %s12197_s9, 4  ;;  %s89_s30 = int_to_ptr.vmem [resolvable:$true] %s88_s30 }
  0x23   :  { %s11822_s2 = scalar_lea.vmem %s89_s30, 128  ;;  %p11827_p6 = scmp.lt.s32.totalorder %s89_s30, %s89_s30 }
  0x24   :  { %p11823_p5 = scmp.ne.s32.totalorder %s89_s30, %s11822_s2  ;;  %p11828_p7 = scmp.lt.s32.totalorder %s11822_s2, %s11822_s2 }
  0x26   :  { %p11829_p8 = por %p11828_p7, %p11827_p6 }
  0x27   :  { %71 = dma.hbm_to_vmem [thread:$0]  %s15093_s0, 1024, %s66_s3, [#allocation9], %s12195_s28, %s12195_s28, %s12196_s8  }
  0x28   :  { %p11830_p9 = pnand %p11829_p8, %p11823_p5 }
  0x2a   :  { %11833 = shalt.err (!%p11830_p9)
}
  0x2b   :  { %s15094_s6 = sld [smem:[#allocation136_spill]]  ;;  %s12198_s1 = smov [#allocation14]  }
  0x2c   :  { %s113_s27 = sshll.u32 %s12198_s1, 4  ;;  %s12199_s7 = smov [#allocation17]   ;;  %s114_s27 = int_to_ptr.vmem [resolvable:$true] %s113_s27 }
  0x2d   :  { %s137_s26 = sshll.u32 %s12199_s7, 4  ;;  %s11842_s3 = scalar_lea.vmem %s114_s27, 256  ;;  %s138_s26 = int_to_ptr.vmem [resolvable:$true] %s137_s26 }
  0x2e   :  { %p11843_p10 = scmp.ne.s32.totalorder %s114_s27, %s11842_s3  ;;  %p11847_p11 = scmp.lt.s32.totalorder %s114_s27, %s114_s27 }
  0x2f   :  { %p11848_p12 = scmp.lt.s32.totalorder %s11842_s3, %s11842_s3 }
  0x31   :  { %91 = dma.hbm_to_vmem [thread:$0]  %s15094_s6, 128, %s89_s30, [#allocation12]  }
  0x32   :  { %p11849_p13 = por %p11848_p12, %p11847_p11 }
  0x34   :  { %p11850_p0 = pnand %p11849_p13, %p11843_p10 }
  0x36   :  { %11853 = shalt.err (!%p11850_p0)
}
  0x37   :  { %s12200_s4 = smov 128   ;;  %s12201_s29 = smov 8  }
  0x38   :  { %119 = dma.hbm_to_vmem [thread:$0]  %s14963_s11, 256, %s114_s27, [#allocation15], %s12200_s4, %s12200_s4, %s12201_s29  }
  0x39   :  { %s11862_s30 = scalar_lea.vmem %s138_s26, 8192  ;;  %p11867_p2 = scmp.lt.s32.totalorder %s138_s26, %s138_s26 }
  0x3a   :  { %p11863_p1 = scmp.ne.s32.totalorder %s138_s26, %s11862_s30  ;;  %p11868_p3 = scmp.lt.s32.totalorder %s11862_s30, %s11862_s30 }
  0x3c   :  { %p11869_p4 = por %p11868_p3, %p11867_p2 }
  0x3e   :  { %p11870_p5 = pnand %p11869_p4, %p11863_p1 }
  0x40   :  { %11873 = shalt.err (!%p11870_p5)
}
  0x41   :  { %143 = dma.hbm_to_vmem [thread:$0]  %s14965_s13, 8192, %s138_s26, [#allocation18], %s12200_s4, %s12200_s4, %s12201_s29  }
  0x42   :  { %s12202_s10 = smov [#allocation20]   ;;  %s12203_s1 = smov [#allocation23]  }
  0x43   :  { %s161_s6 = sshll.u32 %s12202_s10, 4  ;;  %s184_s7 = sshll.u32 %s12203_s1, 4  ;;  %s162_s6 = int_to_ptr.vmem [resolvable:$true] %s161_s6  ;;  %s185_s7 = int_to_ptr.vmem [resolvable:$true] %s184_s7 }
  0x44   :  { %s11882_s11 = scalar_lea.vmem %s162_s6, 256  ;;  %p11887_p7 = scmp.lt.s32.totalorder %s162_s6, %s162_s6 }
  0x45   :  { %p11883_p6 = scmp.ne.s32.totalorder %s162_s6, %s11882_s11  ;;  %p11888_p8 = scmp.lt.s32.totalorder %s11882_s11, %s11882_s11 }
  0x47   :  { %p11889_p9 = por %p11888_p8, %p11887_p7 }
  0x49   :  { %p11890_p10 = pnand %p11889_p9, %p11883_p6 }
  0x4b   :  { %11893 = shalt.err (!%p11890_p10)
}
  0x4c   :  { %167 = dma.hbm_to_vmem [thread:$0]  %s14967_s15, 256, %s162_s6, [#allocation21], %s12200_s4, %s12200_s4, %s12201_s29  }
  0x4d   :  { %s11902_s13 = scalar_lea.vmem %s185_s7, 128  ;;  %p11907_p12 = scmp.lt.s32.totalorder %s185_s7, %s185_s7 }
  0x4e   :  { %p11903_p11 = scmp.ne.s32.totalorder %s185_s7, %s11902_s13  ;;  %p11908_p13 = scmp.lt.s32.totalorder %s11902_s13, %s11902_s13 }
  0x50   :  { %p11909_p0 = por %p11908_p13, %p11907_p12 }
  0x52   :  { %p11910_p1 = pnand %p11909_p0, %p11903_p11 }
  0x54   :  { %11913 = shalt.err (!%p11910_p1)
}
  0x55   :  { %187 = dma.hbm_to_vmem [thread:$0]  %s14969_s17, 128, %s185_s7, [#allocation24]  }
  0x56   :  { %s12204_s9 = smov [#allocation26]   ;;  %s12205_s2 = smov [#allocation29]  }
  0x57   :  { %s206_s30 = sshll.u32 %s12204_s9, 4  ;;  %s226_s5 = sshll.u32 %s12205_s2, 4  ;;  %s207_s30 = int_to_ptr.vmem [resolvable:$true] %s206_s30  ;;  %s227_s5 = int_to_ptr.vmem [resolvable:$true] %s226_s5 }
  0x58   :  { %s11922_s10 = scalar_lea.vmem %s207_s30, 128  ;;  %p11927_p3 = scmp.lt.s32.totalorder %s207_s30, %s207_s30 }
  0x59   :  { %p11923_p2 = scmp.ne.s32.totalorder %s207_s30, %s11922_s10  ;;  %p11928_p4 = scmp.lt.s32.totalorder %s11922_s10, %s11922_s10 }
  0x5b   :  { %p11929_p5 = por %p11928_p4, %p11927_p3 }
  0x5d   :  { %p11930_p6 = pnand %p11929_p5, %p11923_p2 }
  0x5f   :  { %11933 = shalt.err (!%p11930_p6)
}
  0x60   :  { %209 = dma.hbm_to_vmem [thread:$0]  %s14971_s19, 128, %s207_s30, [#allocation27]  }
  0x61   :  { %s11942_s1 = scalar_lea.vmem %s227_s5, 128  ;;  %p11947_p8 = scmp.lt.s32.totalorder %s227_s5, %s227_s5 }
  0x62   :  { %p11943_p7 = scmp.ne.s32.totalorder %s227_s5, %s11942_s1  ;;  %p11948_p9 = scmp.lt.s32.totalorder %s11942_s1, %s11942_s1 }
  0x64   :  { %p11949_p10 = por %p11948_p9, %p11947_p8 }
  0x66   :  { %p11950_p11 = pnand %p11949_p10, %p11943_p7 }
  0x68   :  { %11953 = shalt.err (!%p11950_p11)
}
  0x69   :  { %229 = dma.hbm_to_vmem [thread:$0]  %s14973_s21, 128, %s227_s5, [#allocation30]  }
  0x6a   :  { %s12206_s11 = smov [#allocation32]   ;;  %s12207_s3 = smov [#allocation6]  }
  0x6b   :  { %s248_s27 = sshll.u32 %s12206_s11, 4  ;;  %s56_s13 = sshll.u32 %s12207_s3, 4  ;;  %s249_s27 = int_to_ptr.vmem [resolvable:$true] %s248_s27  ;;  %s57_s13 = int_to_ptr.vmem [resolvable:$true] %s56_s13 }
  0x6c   :  { %s11962_s26 = scalar_lea.vmem %s249_s27, 128  ;;  %p11967_p13 = scmp.lt.s32.totalorder %s249_s27, %s249_s27 }
  0x6d   :  { %p11963_p12 = scmp.ne.s32.totalorder %s249_s27, %s11962_s26  ;;  %p11968_p0 = scmp.lt.s32.totalorder %s11962_s26, %s11962_s26 }
  0x6f   :  { %p11969_p1 = por %p11968_p0, %p11967_p13 }
  0x71   :  { %p11970_p2 = pnand %p11969_p1, %p11963_p12 }
  0x73   :  { %11973 = shalt.err (!%p11970_p2)
}
  0x74   :  { %251 = dma.hbm_to_vmem [thread:$0]  %s14975_s23, 128, %s249_s27, [#allocation33]  }
  0x75   :  { %s11982_s9 = scalar_lea.vmem %s57_s13, 128  ;;  %p11987_p4 = scmp.lt.s32.totalorder %s57_s13, %s57_s13 }
  0x76   :  { %p11983_p3 = scmp.ne.s32.totalorder %s57_s13, %s11982_s9  ;;  %p11988_p5 = scmp.lt.s32.totalorder %s11982_s9, %s11982_s9 }
  0x78   :  { %p11989_p6 = por %p11988_p5, %p11987_p4 }
  0x7a   :  { %p11990_p7 = pnand %p11989_p6, %p11983_p3 }
  0x7c   :  { %11993 = shalt.err (!%p11990_p7)
}
  0x7d   :  { %s15095_s2 = sld [smem:[#allocation133_spill]]  ;;  %s12208_s5 = smov [#allocation10]  }
  0x7e   :  { %s78_s10 = sshll.u32 %s12208_s5, 4  ;;  %s12209_s15 = smov [#allocation13]   ;;  %s79_s10 = int_to_ptr.vmem [resolvable:$true] %s78_s10 }
  0x7f   :  { %s99_s6 = sshll.u32 %s12209_s15, 4  ;;  %s12002_s1 = scalar_lea.vmem %s79_s10, 128  ;;  %s100_s6 = int_to_ptr.vmem [resolvable:$true] %s99_s6 }
  0x80   :  { %p12003_p8 = scmp.ne.s32.totalorder %s79_s10, %s12002_s1  ;;  %p12007_p9 = scmp.lt.s32.totalorder %s79_s10, %s79_s10 }
  0x81   :  { %p12008_p10 = scmp.lt.s32.totalorder %s12002_s1, %s12002_s1 }
  0x83   :  { %59 = dma.hbm_to_vmem [thread:$0]  %s15095_s2, 128, %s57_s13, [#allocation7]  }
  0x84   :  { %p12009_p11 = por %p12008_p10, %p12007_p9 }
  0x86   :  { %p12010_p12 = pnand %p12009_p11, %p12003_p8 }
  0x88   :  { %12013 = shalt.err (!%p12010_p12)
}
  0x89   :  { %s15096_s7 = sld [smem:[#allocation135_spill]]  ;;  %s12022_s11 = scalar_lea.vmem %s100_s6, 256 }
  0x8a   :  { %p12023_p13 = scmp.ne.s32.totalorder %s100_s6, %s12022_s11  ;;  %p12027_p0 = scmp.lt.s32.totalorder %s100_s6, %s100_s6 }
  0x8b   :  { %p12028_p1 = scmp.lt.s32.totalorder %s12022_s11, %s12022_s11 }
  0x8d   :  { %p12029_p2 = por %p12028_p1, %p12027_p0 }
  0x8f   :  { %81 = dma.hbm_to_vmem [thread:$0]  %s15096_s7, 128, %s79_s10, [#allocation9]  }
  0x90   :  { %p12030_p3 = pnand %p12029_p2, %p12023_p13 }
  0x92   :  { %12033 = shalt.err (!%p12030_p3)
}
  0x93   :  { %s15097_s13 = sld [smem:[#allocation138_spill]]  ;;  %s12210_s26 = smov [#allocation16]  }
  0x94   :  { %s125_s19 = sshll.u32 %s12210_s26, 4  ;;  %s12211_s0 = smov [#allocation19]   ;;  %s126_s19 = int_to_ptr.vmem [resolvable:$true] %s125_s19 }
  0x95   :  { %s149_s9 = sshll.u32 %s12211_s0, 4  ;;  %s12042_s21 = scalar_lea.vmem %s126_s19, 256  ;;  %s150_s9 = int_to_ptr.vmem [resolvable:$true] %s149_s9 }
  0x96   :  { %p12043_p4 = scmp.ne.s32.totalorder %s126_s19, %s12042_s21  ;;  %p12047_p5 = scmp.lt.s32.totalorder %s126_s19, %s126_s19 }
  0x97   :  { %p12048_p6 = scmp.lt.s32.totalorder %s12042_s21, %s12042_s21 }
  0x99   :  { %105 = dma.hbm_to_vmem [thread:$0]  %s15097_s13, 256, %s100_s6, [#allocation12], %s12200_s4, %s12200_s4, %s12201_s29  }
  0x9a   :  { %p12049_p7 = por %p12048_p6, %p12047_p5 }
  0x9c   :  { %p12050_p8 = pnand %p12049_p7, %p12043_p4 }
  0x9e   :  { %12053 = shalt.err (!%p12050_p8)
}
  0x9f   :  { %131 = dma.hbm_to_vmem [thread:$0]  %s14964_s12, 256, %s126_s19, [#allocation15], %s12200_s4, %s12200_s4, %s12201_s29  }
  0xa0   :  { %s12062_s5 = scalar_lea.vmem %s150_s9, 256  ;;  %p12067_p10 = scmp.lt.s32.totalorder %s150_s9, %s150_s9 }
  0xa1   :  { %p12063_p9 = scmp.ne.s32.totalorder %s150_s9, %s12062_s5  ;;  %p12068_p11 = scmp.lt.s32.totalorder %s12062_s5, %s12062_s5 }
  0xa3   :  { %p12069_p12 = por %p12068_p11, %p12067_p10 }
  0xa5   :  { %p12070_p13 = pnand %p12069_p12, %p12063_p9 }
  0xa7   :  { %12073 = shalt.err (!%p12070_p13)
}
  0xa8   :  { %155 = dma.hbm_to_vmem [thread:$0]  %s14966_s14, 256, %s150_s9, [#allocation18], %s12200_s4, %s12200_s4, %s12201_s29  }
  0xa9   :  { %s12212_s6 = smov [#allocation22]   ;;  %s12213_s23 = smov [#allocation25]  }
  0xaa   :  { %s174_s1 = sshll.u32 %s12212_s6, 4  ;;  %s193_s17 = sshll.u32 %s12213_s23, 4  ;;  %s175_s1 = int_to_ptr.vmem [resolvable:$true] %s174_s1  ;;  %s194_s17 = int_to_ptr.vmem [resolvable:$true] %s193_s17 }
  0xab   :  { %s12082_s12 = scalar_lea.vmem %s175_s1, 128  ;;  %p12087_p1 = scmp.lt.s32.totalorder %s175_s1, %s175_s1 }
  0xac   :  { %p12083_p0 = scmp.ne.s32.totalorder %s175_s1, %s12082_s12  ;;  %p12088_p2 = scmp.lt.s32.totalorder %s12082_s12, %s12082_s12 }
  0xae   :  { %p12089_p3 = por %p12088_p2, %p12087_p1 }
  0xb0   :  { %p12090_p4 = pnand %p12089_p3, %p12083_p0 }
  0xb2   :  { %12093 = shalt.err (!%p12090_p4)
}
  0xb3   :  { %177 = dma.hbm_to_vmem [thread:$0]  %s14968_s16, 128, %s175_s1, [#allocation21]  }
  0xb4   :  { %s12102_s27 = scalar_lea.vmem %s194_s17, 1152  ;;  %p12107_p6 = scmp.lt.s32.totalorder %s194_s17, %s194_s17 }
  0xb5   :  { %p12103_p5 = scmp.ne.s32.totalorder %s194_s17, %s12102_s27  ;;  %p12108_p7 = scmp.lt.s32.totalorder %s12102_s27, %s12102_s27 }
  0xb7   :  { %p12109_p8 = por %p12108_p7, %p12107_p6 }
  0xb9   :  { %p12110_p9 = pnand %p12109_p8, %p12103_p5 }
  0xbb   :  { %12113 = shalt.err (!%p12110_p9)
}
  0xbc   :  { %199 = dma.hbm_to_vmem [thread:$0]  %s14970_s18, 1152, %s194_s17, [#allocation24], %s12200_s4, %s12200_s4, %s12201_s29  }
  0xbd   :  { %s12214_s13 = smov [#allocation28]   ;;  %s12215_s19 = smov [#allocation31]  }
  0xbe   :  { %s216_s26 = sshll.u32 %s12214_s13, 4  ;;  %s235_s0 = sshll.u32 %s12215_s19, 4  ;;  %s217_s26 = int_to_ptr.vmem [resolvable:$true] %s216_s26  ;;  %s236_s0 = int_to_ptr.vmem [resolvable:$true] %s235_s0 }
  0xbf   :  { %s12122_s16 = scalar_lea.vmem %s217_s26, 128  ;;  %p12127_p11 = scmp.lt.s32.totalorder %s217_s26, %s217_s26 }
  0xc0   :  { %p12123_p10 = scmp.ne.s32.totalorder %s217_s26, %s12122_s16  ;;  %p12128_p12 = scmp.lt.s32.totalorder %s12122_s16, %s12122_s16 }
  0xc2   :  { %p12129_p13 = por %p12128_p12, %p12127_p11 }
  0xc4   :  { %p12130_p0 = pnand %p12129_p13, %p12123_p10 }
  0xc6   :  { %12133 = shalt.err (!%p12130_p0)
}
  0xc7   :  { %219 = dma.hbm_to_vmem [thread:$0]  %s14972_s20, 128, %s217_s26, [#allocation27]  }
  0xc8   :  { %s12142_s30 = scalar_lea.vmem %s236_s0, 1152  ;;  %p12147_p2 = scmp.lt.s32.totalorder %s236_s0, %s236_s0 }
  0xc9   :  { %p12143_p1 = scmp.ne.s32.totalorder %s236_s0, %s12142_s30  ;;  %p12148_p3 = scmp.lt.s32.totalorder %s12142_s30, %s12142_s30 }
  0xcb   :  { %p12149_p4 = por %p12148_p3, %p12147_p2 }
  0xcd   :  { %p12150_p5 = pnand %p12149_p4, %p12143_p1 }
  0xcf   :  { %12153 = shalt.err (!%p12150_p5)
}
  0xd0   :  { %241 = dma.hbm_to_vmem [thread:$0]  %s14974_s22, 1152, %s236_s0, [#allocation30], %s12200_s4, %s12200_s4, %s12201_s29  }
  0xd1   :  { %s12216_s5 = smov [#allocation34]  }
  0xd2   :  { %s257_s10 = sshll.u32 %s12216_s5, 4  ;;  %s258_s10 = int_to_ptr.vmem [resolvable:$true] %s257_s10 }
  0xd3   :  { %s12162_s15 = scalar_lea.vmem %s258_s10, 8192  ;;  %p12167_p7 = scmp.lt.s32.totalorder %s258_s10, %s258_s10 }
  0xd4   :  { %p12163_p6 = scmp.ne.s32.totalorder %s258_s10, %s12162_s15  ;;  %p12168_p8 = scmp.lt.s32.totalorder %s12162_s15, %s12162_s15 }
  0xd6   :  { %p12169_p9 = por %p12168_p8, %p12167_p7 }
  0xd8   :  { %p12170_p10 = pnand %p12169_p9, %p12163_p6 }
  0xda   :  { %12173 = shalt.err (!%p12170_p10)
}
  0xdb   :  { %263 = dma.hbm_to_vmem [thread:$0]  %s14976_s24, 8192, %s258_s10, [#allocation33], %s12195_s28, %s12195_s28, %s12196_s8  }
  0xdc   :  { %12174 = dma.done.wait [#allocation7], 128  }
  0xdd   :  { %12175 = vsyncadd [#allocation7], 4294967168 }
  0xde   :  { %12176 = dma.done.wait [#allocation9], 1152  }
  0xdf   :  { %12177 = vsyncadd [#allocation9], 4294966144 }
  0xe0   :  { %12178 = dma.done.wait [#allocation12], 384  }
  0xe1   :  { %12179 = vsyncadd [#allocation12], 4294966912 }
  0xe2   :  { %12180 = dma.done.wait [#allocation15], 512  }
  0xe3   :  { %12181 = vsyncadd [#allocation15], 4294966784 }
  0xe4   :  { %12182 = dma.done.wait [#allocation18], 8448  }
  0xe5   :  { %12183 = vsyncadd [#allocation18], 4294958848 }
  0xe6   :  { %12184 = dma.done.wait [#allocation21], 384  }
  0xe7   :  { %12185 = vsyncadd [#allocation21], 4294966912 }
  0xe8   :  { %12186 = dma.done.wait [#allocation24], 1280  }
  0xe9   :  { %12187 = vsyncadd [#allocation24], 4294966016 }
  0xea   :  { %12188 = dma.done.wait [#allocation27], 256  }
  0xeb   :  { %12189 = vsyncadd [#allocation27], 4294967040 }
  0xec   :  { %12190 = dma.done.wait [#allocation30], 1280  }
  0xed   :  { %12191 = vsyncadd [#allocation30], 4294966016 }
  0xee   :  { %12192 = dma.done.wait [#allocation33], 8320  }
  0xef   :  { %12193 = vsyncadd [#allocation33], 4294958976  ;;  %v382_v0 = vlaneseq  ;;  %v12217_v1 = vmov 0.0   ;;  %vm323_vm0 = vcmask 273408   ;;  %s15100_s28 = sld [smem:[#allocation129_spill]]  ;;  %v12481_v6 = vld [vmem:[#allocation8] sm:$0xff] }
  0xf0   :  { %321 = vst [vmem:[#allocation2] sm:$0xff] %v12217_v1  ;;  %325 = vst [vmem:[#allocation3] sm:$0xff] %v12217_v1  ;;  %543 = vmatprep.mubr.f32.mxu0 %v12217_v1  ;;  %614 = vmatprep.mubr.f32.mxu1 %v12217_v1  ;;  %v12483_v7 = vld [vmem:[#allocation8 + $0x8] sm:$0xff]  ;;  %s12218_s4 = smov 17   ;;  %v12497_v11 = vld [vmem:[#allocation8 + $0x10] sm:$0xff]  ;;  %s12219_s17 = smov 1  }
  0xf1   :  { %331 = vst [vmem:[#allocation4] sm:$0xff] %v12217_v1  ;;  %334 = vst [vmem:[#allocation4 + $0x10] sm:$0xff] %v12217_v1  ;;  %v12469_v2 = vshrl.u32 %v382_v0, 7  ;;  %v12499_v12 = vld [vmem:[#allocation8 + $0x18] sm:$0xff]  ;;  %s12220_s12 = smov 2   ;;  %vm332_vm1 = vcmask 146432  }
  0xf2   :  { %336 = vst [vmem:[#allocation5] sm:$0xff] %v12217_v1  ;;  %324 = vst.msk [vmem:[#allocation2 + $0x10] sm:$0xf] %vm323_vm0, %v12217_v1  ;;  %s12221_s7 = smov 16   ;;  %s12222_s11 = smov 18   ;;  %vm14987_vm2 = vcmask 277504  }
  0xf3   :  { %v12473_v3 = vsub.s32 1, %v12469_v2  ;;  %v12476_v4 = vsub.s32 2, %v12469_v2  ;;  %v12486_v8 = vsub.s32 3, %v12469_v2  ;;  %v12545_v25 = vsub.s32 4, %v12469_v2  ;;  %333 = vst.msk [vmem:[#allocation4 + $0x8] sm:$0xff] %vm332_vm1, %v12217_v1  ;;  %335 = vst.msk [vmem:[#allocation4 + $0x18] sm:$0xff] %vm332_vm1, %v12217_v1 }
  0xf4   :  { %v12558_v29 = vsub.s32 5, %v12469_v2  ;;  %337 = vst.msk [vmem:[#allocation5 + $0x8] sm:$0xff] %vm332_vm1, %v12217_v1  ;;  %v12601_v39 = vsub.s32 6, %v12469_v2  ;;  %v12622_v46 = vsub.s32 7, %v12469_v2  ;;  %v11270_v57 = vld [vmem:[#allocation8 + $0x20] ss:$0 sm:$0xff] }
  0xf5   :  { %15098 = vst [vmem:[#allocation45_spill] sm:$0xff] %v12473_v3  ;;  %15099 = vst [vmem:[#allocation46_spill] sm:$0xff] %v12476_v4  ;;  %v338_v5 = vld [vmem:[%s15100_s28] sm:$0xff]  ;;  %v12491_v9 = vrot.slane %v12481_v6, %v12473_v3  ;;  %v12495_v10 = vrot.slane %v12483_v7, %v12473_v3  ;;  %v12503_v13 = vrot.slane %v12481_v6, %v12476_v4  ;;  %v339_v14 = vld [vmem:[%s15100_s28 + $0x8] sm:$0xff]  ;;  %s12223_s27 = smov 33   ;;  %s12224_s14 = smov 34  }
  0xf6   :  { %15101 = vst [vmem:[#allocation47_spill] sm:$0xff] %v12486_v8  ;;  %342 = vrot.lane.b32.xlu0 %v338_v5, %s12218_s4  ;;  %v12510_v15 = vrot.slane %v12497_v11, %v12473_v3  ;;  %v12514_v16 = vrot.slane %v12499_v12, %v12473_v3  ;;  %v12518_v17 = vrot.slane %v12483_v7, %v12476_v4  ;;  %15102 = vst [vmem:[#allocation48_spill] sm:$0xff] %v12545_v25  ;;  %v11271_v58 = vld [vmem:[#allocation8 + $0x28] ss:$0 sm:$0xff]  ;;  %v11272_v61 = vld [vmem:[#allocation8 + $0x30] ss:$0 sm:$0xff] }
  0xf7   :  { %v429_v18 = vcombine.low %v12491_v9, %v12495_v10  ;;  %v12524_v19 = vrot.slane %v12497_v11, %v12476_v4  ;;  %v12528_v20 = vrot.slane %v12499_v12, %v12476_v4  ;;  %v12532_v21 = vrot.slane %v12481_v6, %v12486_v8  ;;  %15103 = vst [vmem:[#allocation49_spill] sm:$0xff] %v12558_v29  ;;  %v11273_v62 = vld [vmem:[#allocation8 + $0x38] ss:$0 sm:$0xff]  ;;  %s12225_s3 = smov 126   ;;  %s12226_s13 = smov 127  }
  0xf8   :  { %v430_v22 = vcombine.low %v12510_v15, %v12514_v16  ;;  %v801_v23 = vcombine.low %v12503_v13, %v12518_v17  ;;  %v12542_v24 = vrot.slane %v12483_v7, %v12486_v8  ;;  %v12551_v27 = vrot.slane %v12497_v11, %v12486_v8  ;;  %15104 = vst [vmem:[#allocation50_spill] sm:$0xff] %v12601_v39  ;;  %s12227_s26 = smov 112   ;;  %s12228_s19 = smov 111  }
  0xf9   :  { %431 = vrot.lane.b32.xlu1 %v429_v18, %s12219_s17  ;;  %v802_v26 = vcombine.low %v12524_v19, %v12528_v20  ;;  %v12555_v28 = vrot.slane %v12499_v12, %v12486_v8  ;;  %v12566_v31 = vrot.slane %v12481_v6, %v12545_v25  ;;  %v12570_v32 = vrot.slane %v12483_v7, %v12545_v25  ;;  %s12229_s0 = smov 110   ;;  %s12230_s16 = smov 96  }
  0xfa   :  { %344 = vrot.lane.b32.xlu0 %v339_v14, %s12218_s4  ;;  %v1019_v30 = vcombine.low %v12532_v21, %v12542_v24  ;;  %v12582_v34 = vrot.slane %v12497_v11, %v12545_v25  ;;  %v12586_v35 = vrot.slane %v12499_v12, %v12545_v25  ;;  %v12594_v37 = vrot.slane %v12481_v6, %v12558_v29  ;;  %s12231_s9 = smov 95   ;;  %s12233_s21 = smov 94  }
  0xfb   :  { %v1020_v33 = vcombine.low %v12551_v27, %v12555_v28  ;;  %v1237_v36 = vcombine.low %v12566_v31, %v12570_v32  ;;  %v12598_v38 = vrot.slane %v12483_v7, %v12558_v29  ;;  %v12607_v41 = vrot.slane %v12497_v11, %v12558_v29  ;;  %15105 = vst [vmem:[#allocation51_spill] sm:$0xff] %v12622_v46  ;;  %s15106_s2 = sld [smem:[#allocation131_spill]]  ;;  %s12237_s23 = smov 119  }
  0xfc   :  { %v1238_v40 = vcombine.low %v12582_v34, %v12586_v35  ;;  %v12611_v42 = vrot.slane %v12499_v12, %v12558_v29  ;;  %v1654_v44 = vrot.slane %v12481_v6, %v12601_v39  ;;  %v1658_v45 = vrot.slane %v12483_v7, %v12601_v39  ;;  %330 = vst.msk [vmem:[#allocation3 + $0x20] sm:$0xff] %vm14987_vm2, %v12217_v1  ;;  %s15108_s15 = sld [smem:[#allocation130_spill]]  ;;  %s12238_s18 = smov 118  }
  0xfd   :  { %433 = vrot.lane.b32.xlu1 %v430_v22, %s12219_s17  ;;  %v1454_v43 = vcombine.low %v12594_v37, %v12598_v38  ;;  %v1662_v48 = vrot.slane %v12497_v11, %v12601_v39  ;;  %v1666_v49 = vrot.slane %v12499_v12, %v12601_v39  ;;  %v1872_v51 = vrot.slane %v12481_v6, %v12622_v46  ;;  %s15109_s30 = sld [smem:[#allocation132_spill]] }
  0xfe   :  { %803 = vrot.lane.b32.xlu0 %v801_v23, %s12220_s12  ;;  %v1455_v47 = vcombine.low %v12607_v41, %v12611_v42  ;;  %v1671_v50 = vcombine.low %v1654_v44, %v1658_v45  ;;  %v1876_v52 = vrot.slane %v12483_v7, %v12622_v46  ;;  %v1880_v53 = vrot.slane %v12497_v11, %v12622_v46  ;;  %s15298_s10 = sld [smem:[#allocation139_spill]] }
  0xff   :  { %v1672_v54 = vcombine.low %v1662_v48, %v1666_v49  ;;  %v1884_v56 = vrot.slane %v12499_v12, %v12622_v46  ;;  %v2107_v60 = vcombine.low %v11270_v57, %v11271_v58  ;;  %v2108_v63 = vcombine.low %v11272_v61, %v11273_v62 }
 0x100   :  { %v1889_v55 = vcombine.low %v1872_v51, %v1876_v52  ;;  %vm356_vm3 = vcmask 1043592   ;;  %vm357_vm4 = vcmask 1047556   ;;  %vm348_vm5 = vcmask 138240  }
 0x101   :  { %805 = vrot.lane.b32.xlu1 %v802_v26, %s12220_s12  ;;  %v1890_v59 = vcombine.low %v1880_v53, %v1884_v56  ;;  %vm358_vm6 = vmor %vm357_vm4, %vm356_vm3  ;;  %vm350_vm7 = vcmask 1043456   ;;  %vm361_vm8 = vcmask 134144   ;;  %vm14990_vm9 = vcmask 7168  }
 0x102   :  { %1021 = vrot.lane.b32.xlu0 %v1019_v30, %s12221_s7  ;;  %vm809_vm10 = vcmask 15360   ;;  %vm1027_vm11 = vcmask 130048   ;;  %vm14989_vm12 = vcmask 261120   ;;  %vm14988_vm13 = vcmask 269312  }
 0x103   :  { %vm462_vm14 = vcmask 1039360   ;;  %vm14986_vm15 = vcmask 31744   ;;  %vm14984_vm0 = vcmask 1031168   ;;  %vm1052_vm3 = vcmask 916480  }
 0x104   :  { %vm14985_vm4 = vcmask 908288  }
 0x105   :  { %1023 = vrot.lane.b32.xlu1 %v1020_v33, %s12221_s7 }
 0x106   :  { %1239 = vrot.lane.b32.xlu0 %v1237_v36, %s12218_s4 }
 0x109   :  { %1241 = vrot.lane.b32.xlu1 %v1238_v40, %s12218_s4 }
 0x10a   :  { %1456 = vrot.lane.b32.xlu0 %v1454_v43, %s12222_s11 }
 0x10d   :  { %1458 = vrot.lane.b32.xlu1 %v1455_v47, %s12222_s11 }
 0x10e   :  { %1673 = vrot.lane.b32.xlu0 %v1671_v50, %s12196_s8 }
 0x111   :  { %1675 = vrot.lane.b32.xlu1 %v1672_v54, %s12196_s8 }
 0x112   :  { %1891 = vrot.lane.b32.xlu0 %v1889_v55, %s12223_s27 }
 0x115   :  { %1893 = vrot.lane.b32.xlu1 %v1890_v59, %s12223_s27 }
 0x116   :  { %2109 = vrot.lane.b32.xlu0 %v2107_v60, %s12224_s14 }
 0x119   :  { %2111 = vrot.lane.b32.xlu1 %v2108_v63, %s12224_s14 }
 0x168   :  { %v343_v0 = vpop.permute.xlu0 %342 }
 0x169   :  { %v346_v5 = vrot.slane %v343_v0, 4 }
 0x16b   :  { %v349_v14 = vsel %vm348_vm5, %v346_v5, %v343_v0  ;;  %v432_v18 = vpop.permute.xlu1 %431 }
 0x16c   :  { %359 = vst.msk [vmem:[#allocation2] sm:$0xff] %vm358_vm6, %v349_v14  ;;  %v345_v22 = vpop.permute.xlu0 %344  ;;  %v435_v58 = vrot.slane %v432_v18, 4  ;;  %vm1486_vm6 = vcmask 900096  }
 0x16d   :  { %v347_v23 = vrot.slane %v345_v22, 4 }
 0x16f   :  { %v351_v26 = vsel %vm350_vm7, %v346_v5, %v347_v23  ;;  %362 = vst.msk [vmem:[#allocation2 + $0x10] sm:$0xf] %vm361_vm8, %v347_v23  ;;  %v434_v33 = vpop.permute.xlu1 %433  ;;  %vm1704_vm8 = vcmask 785408  }
 0x170   :  { %v12652_v30 = vsel %vm348_vm5, %v351_v26, %v345_v22  ;;  %v804_v36 = vpop.permute.xlu0 %803  ;;  %v436_v43 = vrot.slane %v434_v33, 4  ;;  %v438_v22 = vsel %vm14990_vm9, %v435_v58, %v432_v18 }
 0x171   :  { %v807_v61 = vrot.slane %v804_v36, 4 }
 0x173   :  { %v806_v40 = vpop.permute.xlu1 %805  ;;  %v12657_v0 = vld [vmem:[#allocation2] sm:$0xff] }
 0x174   :  { %v808_v44 = vrot.slane %v806_v40, 4  ;;  %v1022_v45 = vpop.permute.xlu0 %1021 }
 0x175   :  { %v1025_v62 = vrot.slane %v1022_v45, 4 }
 0x176   :  { %v780_v47 = vld [vmem:[#allocation2 + $0x10] sm:$0xf] }
 0x177   :  { %v408_v48 = vld [vmem:[#allocation2 + $0x10] sm:$0xf]  ;;  %v818_v49 = vmul.f32 %v808_v44, %v780_v47  ;;  %v1024_v51 = vpop.permute.xlu1 %1023  ;;  %v444_v47 = vmul.f32 %v12657_v0, %v438_v22  ;;  %v439_v22 = vsel %vm350_vm7, %v435_v58, %v436_v43 }
 0x178   :  { %v446_v50 = vmul.f32 %v436_v43, %v408_v48  ;;  %v998_v52 = vld [vmem:[#allocation2 + $0x10] sm:$0xf]  ;;  %v1026_v53 = vrot.slane %v1024_v51, 4  ;;  %v1240_v54 = vpop.permute.xlu0 %1239  ;;  %v810_v48 = vsel %vm809_vm10, %v807_v61, %v804_v36  ;;  %v811_v36 = vsel %vm350_vm7, %v807_v61, %v808_v44 }
 0x179   :  { %832 = vrot.lane.b32.xlu0 %v818_v49, %s12225_s3  ;;  %v1216_v59 = vld [vmem:[#allocation2 + $0x10] sm:$0xf]  ;;  %v1028_v49 = vsel %vm1027_vm11, %v1025_v62, %v1022_v45 }
 0x17a   :  { %460 = vrot.lane.b32.xlu1 %v446_v50, %s12226_s13  ;;  %v1036_v55 = vmul.f32 %v1026_v53, %v998_v52  ;;  %v1433_v23 = vld [vmem:[#allocation2 + $0x10] sm:$0xf]  ;;  %v1243_v50 = vrot.slane %v1240_v54, 4 }
 0x17b   :  { %v1242_v56 = vpop.permute.xlu1 %1241 }
 0x17c   :  { %v1244_v57 = vrot.slane %v1242_v56, 4  ;;  %v1457_v5 = vpop.permute.xlu0 %1456  ;;  %v1245_v18 = vsel %vm348_vm5, %v1243_v50, %v1240_v54 }
 0x17d   :  { %v1460_v52 = vrot.slane %v1457_v5, 4 }
 0x17e   :  { %1050 = vrot.lane.b32.xlu1 %v1036_v55, %s12227_s26  ;;  %v1253_v60 = vmul.f32 %v1244_v57, %v1216_v59  ;;  %v816_v55 = vmul.f32 %v12657_v0, %v810_v48  ;;  %v1034_v59 = vmul.f32 %v12657_v0, %v1028_v49  ;;  %v440_v48 = vsel %vm14990_vm9, %v439_v22, %v434_v33 }
 0x17f   :  { %v1459_v63 = vpop.permute.xlu1 %1458  ;;  %v812_v49 = vsel %vm809_vm10, %v811_v36, %v806_v40  ;;  %v1246_v43 = vsel %vm350_vm7, %v1243_v50, %v1244_v57  ;;  %v445_v61 = vmul.f32 %v440_v48, %v12652_v30 }
 0x180   :  { %v1461_v14 = vrot.slane %v1459_v63, 4  ;;  %1267 = vrot.lane.b32.xlu0 %v1253_v60, %s12228_s19  ;;  %v1462_v60 = vsel %vm332_vm1, %v1460_v52, %v1457_v5  ;;  %v1674_v54 = vpop.permute.xlu0 %1673  ;;  %v1029_v5 = vsel %vm350_vm7, %v1025_v62, %v1026_v53  ;;  %v1247_v33 = vsel %vm348_vm5, %v1246_v43, %v1242_v56 }
 0x181   :  { %v1677_v44 = vrot.slane %v1674_v54, 4  ;;  %v1252_v62 = vmul.f32 %v1247_v33, %v12652_v30  ;;  %v1040_v48 = vcombine.high %v1034_v59, %v1034_v59 }
 0x182   :  { %v1470_v26 = vmul.f32 %v1461_v14, %v1433_v23  ;;  %v1251_v23 = vmul.f32 %v12657_v0, %v1245_v18  ;;  %v817_v18 = vmul.f32 %v812_v49, %v12652_v30  ;;  %v1463_v40 = vsel %vm350_vm7, %v1460_v52, %v1461_v14 }
 0x183   :  { %v1676_v45 = vpop.permute.xlu1 %1675  ;;  %v1464_v50 = vsel %vm332_vm1, %v1463_v40, %v1459_v63  ;;  %v822_v14 = vcombine.high %v816_v55, %v816_v55  ;;  %v450_v52 = vcombine.high %v444_v47, %v444_v47  ;;  %v1680_v36 = vsel %vm14989_vm12, %v1677_v44, %v1674_v54 }
 0x184   :  { %1484 = vrot.lane.b32.xlu1 %v1470_v26, %s12229_s0  ;;  %452 = vrot.lane.b32.xlu0 %v444_v47, %s12226_s13  ;;  %v1468_v26 = vmul.f32 %v12657_v0, %v1462_v60  ;;  %v1678_v58 = vrot.slane %v1676_v45, 4  ;;  %v1030_v60 = vsel %vm1027_vm11, %v1029_v5, %v1024_v51  ;;  %v1469_v51 = vmul.f32 %v1464_v50, %v12652_v30  ;;  %v1892_v49 = vpop.permute.xlu0 %1891 }
 0x185   :  { %v1035_v57 = vmul.f32 %v1030_v60, %v12652_v30  ;;  %v1686_v63 = vmul.f32 %v1680_v36, %v12657_v0  ;;  %v451_v54 = vcombine.high %v445_v61, %v445_v61 }
 0x186   :  { %v1681_v53 = vsel %vm350_vm7, %v1677_v44, %v1678_v58  ;;  %v1474_v60 = vcombine.high %v1468_v26, %v1468_v26 }
 0x187   :  { %v1682_v22 = vsel %vm14989_vm12, %v1681_v53, %v1676_v45  ;;  %v1257_v45 = vcombine.high %v1251_v23, %v1251_v23  ;;  %v1894_v5 = vpop.permute.xlu1 %1893  ;;  %v1692_v43 = vcombine.high %v1686_v63, %v1686_v63  ;;  %v1041_v36 = vcombine.high %v1035_v57, %v1035_v57 }
 0x188   :  { %824 = vrot.lane.b32.xlu1 %v816_v55, %s12225_s3  ;;  %1042 = vrot.lane.b32.xlu0 %v1034_v59, %s12227_s26  ;;  %v1687_v56 = vmul.f32 %v1682_v22, %v12652_v30  ;;  %v1895_v55 = vrot.slane %v1892_v49, 4  ;;  %v1896_v47 = vrot.slane %v1894_v5, 4  ;;  %v2110_v22 = vpop.permute.xlu0 %2109 }
 0x18a   :  { %v1898_v44 = vsel %vm14988_vm13, %v1895_v55, %v1892_v49  ;;  %v1899_v59 = vsel %vm350_vm7, %v1895_v55, %v1896_v47 }
 0x18b   :  { %v1904_v33 = vmul.f32 %v1898_v44, %v12657_v0  ;;  %v1900_v53 = vsel %vm14988_vm13, %v1899_v59, %v1894_v5  ;;  %v2301_v59 = vld [vmem:[%s15106_s2] sm:$0xff] }
 0x18c   :  { %1259 = vrot.lane.b32.xlu1 %v1251_v23, %s12228_s19  ;;  %1476 = vrot.lane.b32.xlu0 %v1468_v26, %s12229_s0  ;;  %v1650_v23 = vld [vmem:[#allocation2 + $0x10] sm:$0xf]  ;;  %v823_v26 = vcombine.high %v817_v18, %v817_v18 }
 0x18d   :  { %v1688_v40 = vmul.f32 %v1678_v58, %v1650_v23  ;;  %v1910_v50 = vcombine.high %v1904_v33, %v1904_v33 }
 0x190   :  { %456 = vrot.lane.b32.xlu1 %v445_v61, %s12226_s13  ;;  %828 = vrot.lane.b32.xlu0 %v817_v18, %s12225_s3  ;;  %v1905_v61 = vmul.f32 %v1900_v53, %v12652_v30  ;;  %v2113_v18 = vrot.slane %v2110_v22, 4 }
 0x194   :  { %1046 = vrot.lane.b32.xlu1 %v1035_v57, %s12227_s26  ;;  %1263 = vrot.lane.b32.xlu0 %v1252_v62, %s12228_s19  ;;  %v1475_v57 = vcombine.high %v1469_v51, %v1469_v51 }
 0x198   :  { %1480 = vrot.lane.b32.xlu1 %v1469_v51, %s12229_s0  ;;  %1698 = vrot.lane.b32.xlu0 %v1687_v56, %s12230_s16  ;;  %v2086_v51 = vld [vmem:[#allocation2 + $0x10] sm:$0xf] }
 0x19c   :  { %826 = vrot.lane.b32.xlu1 %v822_v14, %s12225_s3  ;;  %454 = vrot.lane.b32.xlu0 %v450_v52, %s12226_s13  ;;  %v2112_v14 = vpop.permute.xlu1 %2111  ;;  %v1258_v52 = vcombine.high %v1252_v62, %v1252_v62  ;;  %v1693_v62 = vcombine.high %v1687_v56, %v1687_v56  ;;  %v1911_v56 = vcombine.high %v1905_v61, %v1905_v61 }
 0x19d   :  { %v2114_v58 = vrot.slane %v2112_v14, 4 }
 0x19f   :  { %v2116_v49 = vsel %vm350_vm7, %v2113_v18, %v2114_v58  ;;  %v2123_v44 = vmul.f32 %v2114_v58, %v2086_v51 }
 0x1a0   :  { %1261 = vrot.lane.b32.xlu1 %v1257_v45, %s12228_s19  ;;  %1044 = vrot.lane.b32.xlu0 %v1040_v48, %s12227_s26  ;;  %v2115_v48 = vsel %vm14987_vm2, %v2113_v18, %v2110_v22 }
 0x1a1   :  { %v2121_v5 = vmul.f32 %v2115_v48, %v12657_v0 }
 0x1a4   :  { %1696 = vrot.lane.b32.xlu1 %v1692_v43, %s12230_s16  ;;  %1478 = vrot.lane.b32.xlu0 %v1474_v60, %s12229_s0  ;;  %v2117_v43 = vsel %vm14987_vm2, %v2116_v49, %v2112_v14  ;;  %v2127_v60 = vcombine.high %v2121_v5, %v2121_v5  ;;  %v365_v49 = vld [vmem:[%s15108_s15 + $0x10] sm:$0xff] }
 0x1a5   :  { %v2122_v55 = vmul.f32 %v2117_v43, %v12652_v30 }
 0x1a8   :  { %1694 = vrot.lane.b32.xlu1 %v1686_v63, %s12230_s16  ;;  %458 = vrot.lane.b32.xlu0 %v451_v54, %s12226_s13  ;;  %v1868_v63 = vld [vmem:[#allocation2 + $0x10] sm:$0xf]  ;;  %v2128_v54 = vcombine.high %v2122_v55, %v2122_v55 }
 0x1a9   :  { %v1906_v45 = vmul.f32 %v1896_v47, %v1868_v63  ;;  %v12232_v47 = vmov 0  }
 0x1aa   :  { %11776 = vset.pattern.permute.xlu0 %v12232_v47  ;;  %11777 = vset.pattern.permute.xlu1 %v12232_v47 }
 0x1ac   :  { %830 = vrot.lane.b32.xlu1 %v823_v26, %s12225_s3  ;;  %1702 = vrot.lane.b32.xlu0 %v1688_v40, %s12230_s16 }
 0x1b0   :  { %1916 = vrot.lane.b32.xlu1 %v1905_v61, %s12231_s9  ;;  %1914 = vrot.lane.b32.xlu0 %v1910_v50, %s12231_s9 }
 0x1b4   :  { %1265 = vrot.lane.b32.xlu1 %v1258_v52, %s12228_s19  ;;  %1048 = vrot.lane.b32.xlu0 %v1041_v36, %s12227_s26 }
 0x1b8   :  { %1920 = vrot.lane.b32.xlu1 %v1906_v45, %s12231_s9  ;;  %1912 = vrot.lane.b32.xlu0 %v1904_v33, %s12231_s9 }
 0x1bc   :  { %1700 = vrot.lane.b32.xlu1 %v1693_v62, %s12230_s16  ;;  %1482 = vrot.lane.b32.xlu0 %v1475_v57, %s12229_s0 }
 0x1c0   :  { %2131 = vrot.lane.b32.xlu1 %v2127_v60, %s12233_s21  ;;  %2133 = vrot.lane.b32.xlu0 %v2122_v55, %s12233_s21 }
 0x1c4   :  { %2135 = vrot.lane.b32.xlu1 %v2128_v54, %s12233_s21  ;;  %1918 = vrot.lane.b32.xlu0 %v1911_v56, %s12231_s9  ;;  %v366_v54 = vld [vmem:[%s15108_s15 + $0x18] sm:$0xff] }
 0x1c8   :  { %2129 = vrot.lane.b32.xlu1 %v2121_v5, %s12233_s21  ;;  %2137 = vrot.lane.b32.xlu0 %v2123_v44, %s12233_s21 }
 0x1cc   :  { %2304 = vperm.xlu0 %11776, %v2301_v59   ;;  %2405 = vrot.lane.b32.xlu1 %v12495_v10, %s12219_s17 }
 0x1d0   :  { %2403 = vrot.lane.b32.xlu0 %v12491_v9, %s12219_s17  ;;  %2409 = vrot.lane.b32.xlu1 %v12514_v16, %s12219_s17 }
 0x1d4   :  { %2407 = vrot.lane.b32.xlu0 %v12510_v15, %s12219_s17  ;;  %2760 = vrot.lane.b32.xlu1 %v12518_v17, %s12220_s12 }
 0x1d8   :  { %2758 = vrot.lane.b32.xlu0 %v12503_v13, %s12220_s12  ;;  %2764 = vrot.lane.b32.xlu1 %v12528_v20, %s12220_s12 }
 0x1dc   :  { %2762 = vrot.lane.b32.xlu0 %v12524_v19, %s12220_s12  ;;  %2973 = vrot.lane.b32.xlu1 %v12542_v24, %s12221_s7 }
 0x1e0   :  { %2971 = vrot.lane.b32.xlu0 %v12532_v21, %s12221_s7  ;;  %2977 = vrot.lane.b32.xlu1 %v12555_v28, %s12221_s7 }
 0x1e4   :  { %2975 = vrot.lane.b32.xlu0 %v12551_v27, %s12221_s7  ;;  %3186 = vrot.lane.b32.xlu1 %v12570_v32, %s12218_s4  ;;  %v12786_v27 = vsub.s32 0, %v12469_v2 }
 0x1e6   :  { %15107 = vst [vmem:[#allocation52_spill] sm:$0xff] %v12786_v27  ;;  %v385_v32 = vrot.slane %v12481_v6, %v12786_v27  ;;  %v393_v22 = vrot.slane %v12497_v11, %v12786_v27  ;;  %v397_v14 = vrot.slane %v12499_v12, %v12786_v27  ;;  %v363_v12 = vld [vmem:[%s15108_s15] sm:$0xff] }
 0x1e8   :  { %3184 = vrot.lane.b32.xlu0 %v12566_v31, %s12218_s4  ;;  %v403_v18 = vcombine.low %v393_v22, %v397_v14  ;;  %v370_v22 = vld [vmem:[%s15108_s15 + $0x38] sm:$0xff]  ;;  %3190 = vrot.lane.b32.xlu1 %v12586_v35, %s12218_s4 }
 0x1ea   :  { %v407_v5 = vmul.f32 %v403_v18, %v12652_v30 }
 0x1eb   :  { %v12771_v10 = vpop.permute.xlu0 %832 }
 0x1ec   :  { %v12767_v9 = vpop.permute.xlu1 %460  ;;  %3188 = vrot.lane.b32.xlu0 %v12582_v34, %s12218_s4  ;;  %v389_v34 = vrot.slane %v12483_v7, %v12786_v27  ;;  %v364_v7 = vld [vmem:[%s15108_s15 + $0x8] sm:$0xff]  ;;  %v624_v30 = vcombine.high %v407_v5, %v407_v5  ;;  %3399 = vrot.lane.b32.xlu1 %v12598_v38, %s12222_s11 }
 0x1ee   :  { %v402_v33 = vcombine.low %v385_v32, %v389_v34 }
 0x1f0   :  { %3397 = vrot.lane.b32.xlu0 %v12594_v37, %s12222_s11  ;;  %v12775_v13 = vpop.permute.xlu1 %1050  ;;  %v406_v2 = vmul.f32 %v12657_v0, %v402_v33  ;;  %3403 = vrot.lane.b32.xlu1 %v12611_v42, %s12222_s11 }
 0x1f2   :  { %v12777_v15 = vpop.permute.xlu0 %1267  ;;  %v623_v0 = vcombine.high %v406_v2, %v406_v2 }
 0x1f4   :  { %3401 = vrot.lane.b32.xlu0 %v12607_v41, %s12222_s11 }
 0x1f6   :  { %v12779_v16 = vpop.permute.xlu1 %1484  ;;  %v453_v17 = vpop.permute.xlu0 %452 }
 0x1fa   :  { %v825_v19 = vpop.permute.xlu1 %824  ;;  %v1043_v20 = vpop.permute.xlu0 %1042 }
 0x1fe   :  { %v12781_v21 = vpop.permute.xlu1 %1259  ;;  %v12783_v24 = vpop.permute.xlu0 %1476 }
 0x202   :  { %v457_v28 = vpop.permute.xlu1 %456  ;;  %v12788_v31 = vpop.permute.xlu0 %828 }
 0x206   :  { %v12794_v37 = vpop.permute.xlu1 %1046  ;;  %v12796_v23 = vpop.permute.xlu0 %1263 }
 0x20a   :  { %v12798_v26 = vpop.permute.xlu1 %1480  ;;  %v12800_v40 = vpop.permute.xlu0 %1698 }
 0x20e   :  { %v827_v53 = vpop.permute.xlu1 %826  ;;  %v455_v61 = vpop.permute.xlu0 %454 }
 0x20f   :  { %v464_v50 = vsel %vm462_vm14, %v455_v61, %v457_v28  ;;  %v463_v6 = vsel %vm462_vm14, %v453_v17, %v455_v61  ;;  %v836_v11 = vsel %vm14984_vm0, %v827_v53, %v12788_v31  ;;  %v835_v58 = vsel %vm14984_vm0, %v825_v19, %v827_v53  ;;  %v367_v17 = vld [vmem:[%s15108_s15 + $0x20] sm:$0xff]  ;;  %v369_v61 = vld [vmem:[%s15108_s15 + $0x30] sm:$0xff] }
 0x210   :  { %11222 = vmatprep.subr.msk.mxu0 %vm350_vm7, %v464_v50 }
 0x211   :  { %11223 = vmatpush1.msk.msra.mxu0 %vm350_vm7, %v463_v6 }
 0x212   :  { %v1262_v52 = vpop.permute.xlu1 %1261  ;;  %11224 = vmatmul.mubr.msk.f32.vlgmr.msra.gmra.mxu0 %vm14986_vm15, %v364_v7  ;;  %v1045_v36 = vpop.permute.xlu0 %1044  ;;  %11228 = vmatprep.subr.msk.mxu0 %vm350_vm7, %v623_v0 }
 0x213   :  { %11229 = vmatpush1.msk.msra.mxu0 %vm350_vm7, %v406_v2  ;;  %700 = vmatprep.mubr.f32.mxu0 %v12217_v1  ;;  %v1054_v48 = vsel %vm1052_vm3, %v1045_v36, %v12794_v37  ;;  %v1053_v62 = vsel %vm1052_vm3, %v1043_v20, %v1045_v36  ;;  %v1271_v60 = vsel %vm14985_vm4, %v1262_v52, %v12796_v23 }
 0x214   :  { %11234 = vmatprep.subr.msk.mxu0 %vm350_vm7, %v836_v11  ;;  %v1270_v44 = vsel %vm14985_vm4, %v12781_v21, %v1262_v52 }
 0x216   :  { %v1697_v63 = vpop.permute.xlu1 %1696  ;;  %v1479_v45 = vpop.permute.xlu0 %1478  ;;  %11230 = vmatmul.mubr.msk.f32.vlgmr.msra.gmra.mxu0 %vm14986_vm15, %v363_v12 }
 0x217   :  { %11235 = vmatpush1.msk.msra.mxu0 %vm350_vm7, %v835_v58  ;;  %914 = vmatprep.mubr.f32.mxu0 %v12217_v1  ;;  %v1487_v21 = vsel %vm1486_vm6, %v12783_v24, %v1479_v45 }
 0x218   :  { %11240 = vmatprep.subr.msk.mxu0 %vm350_vm7, %v1054_v48  ;;  %v371_v48 = vld [vmem:[%s15108_s15 + $0x40] sm:$0xff] }
 0x21a   :  { %v1695_v57 = vpop.permute.xlu1 %1694  ;;  %v459_v43 = vpop.permute.xlu0 %458  ;;  %11236 = vmatmul.mubr.msk.f32.vlgmr.msra.gmra.mxu0 %vm14986_vm15, %v365_v49 }
 0x21b   :  { %11241 = vmatpush1.msk.msra.mxu0 %vm350_vm7, %v1053_v62  ;;  %v466_v55 = vsel %vm462_vm14, %v459_v43, %v12767_v9  ;;  %v465_v47 = vsel %vm462_vm14, %v457_v28, %v459_v43  ;;  %1132 = vmatprep.mubr.f32.mxu0 %v12217_v1  ;;  %v1488_v9 = vsel %vm1486_vm6, %v1479_v45, %v12798_v26 }
 0x21c   :  { %11246 = vmatprep.subr.msk.mxu0 %vm350_vm7, %v1271_v60  ;;  %11225 = vmatprep.subr.msk.mxu1 %vm350_vm7, %v466_v55  ;;  %v1706_v28 = vsel %vm1704_vm8, %v1697_v63, %v12800_v40  ;;  %v1705_v34 = vsel %vm1704_vm8, %v1695_v57, %v1697_v63 }
 0x21d   :  { %11226 = vmatpush1.msk.msra.mxu1 %vm350_vm7, %v465_v47 }
 0x21e   :  { %v831_v56 = vpop.permute.xlu1 %830  ;;  %11227 = vmatmul.mubr.msk.f32.vlgmr.msra.gmra.mxu1 %vm14986_vm15, %v364_v7  ;;  %11231 = vmatprep.subr.msk.mxu1 %vm350_vm7, %v624_v30  ;;  %v12852_v51 = vpop.permute.xlu0 %1702 }
 0x21f   :  { %11242 = vmatmul.mubr.msk.f32.vlgmr.msra.gmra.mxu0 %vm14986_vm15, %v366_v54  ;;  %11232 = vmatpush1.msk.msra.mxu1 %vm350_vm7, %v407_v5  ;;  %v838_v59 = vsel %vm14984_vm0, %v831_v56, %v12771_v10  ;;  %v837_v19 = vsel %vm14984_vm0, %v12788_v31, %v831_v56  ;;  %v368_v31 = vld [vmem:[%s15108_s15 + $0x28] sm:$0xff]  ;;  %vm1922_vm0 = vcmask 777216   ;;  %s15133_s15 = sld [smem:[#allocation137_spill]] }
 0x220   :  { %11247 = vmatpush1.msk.msra.mxu0 %vm350_vm7, %v1270_v44  ;;  %11237 = vmatprep.subr.msk.mxu1 %vm350_vm7, %v838_v59 }
 0x221   :  { %11252 = vmatprep.subr.msk.mxu0 %vm350_vm7, %v1488_v9  ;;  %771 = vmatprep.mubr.f32.mxu1 %v12217_v1 }
 0x222   :  { %1349 = vmatprep.mubr.f32.mxu0 %v12217_v1  ;;  %v12872_v10 = vpop.permute.xlu1 %1916  ;;  %11233 = vmatmul.mubr.msk.f32.vlgmr.msra.gmra.mxu1 %vm14986_vm15, %v363_v12  ;;  %v1915_v20 = vpop.permute.xlu0 %1914 }
 0x223   :  { %11238 = vmatpush1.msk.msra.mxu1 %vm350_vm7, %v837_v19  ;;  %11248 = vmatmul.mubr.msk.f32.vlgmr.msra.gmra.mxu0 %vm14986_vm15, %v367_v17  ;;  %v1924_v53 = vsel %vm1922_vm0, %v1915_v20, %v12872_v10 }
 0x224   :  { %11253 = vmatpush1.msk.msra.mxu0 %vm350_vm7, %v1487_v21  ;;  %985 = vmatprep.mubr.f32.mxu1 %v12217_v1 }
 0x225   :  { %11258 = vmatprep.subr.msk.mxu0 %vm350_vm7, %v1706_v28  ;;  %1566 = vmatprep.mubr.f32.mxu0 %v12217_v1 }
 0x226   :  { %v1266_v24 = vpop.permute.xlu1 %1265  ;;  %11239 = vmatmul.mubr.msk.f32.vlgmr.msra.gmra.mxu1 %vm14986_vm15, %v365_v49  ;;  %v1049_v32 = vpop.permute.xlu0 %1048 }
 0x227   :  { %v1055_v33 = vsel %vm1052_vm3, %v12794_v37, %v1049_v32  ;;  %11254 = vmatmul.mubr.msk.f32.vlgmr.msra.gmra.mxu0 %vm14986_vm15, %v368_v31  ;;  %v1056_v2 = vsel %vm1052_vm3, %v1049_v32, %v12775_v13  ;;  %1203 = vmatprep.mubr.f32.mxu1 %v12217_v1  ;;  %v1273_v37 = vsel %vm14985_vm4, %v1266_v24, %v12777_v15 }
 0x228   :  { %11259 = vmatpush1.msk.msra.mxu0 %vm350_vm7, %v1705_v34  ;;  %11243 = vmatprep.subr.msk.mxu1 %vm350_vm7, %v1056_v2  ;;  %v1272_v6 = vsel %vm14985_vm4, %v12796_v23, %v1266_v24  ;;  %vm15077_vm4 = vcmask 769024  }
 0x229   :  { %11264 = vmatprep.subr.msk.mxu0 %vm350_vm7, %v1924_v53  ;;  %11244 = vmatpush1.msk.msra.mxu1 %vm350_vm7, %v1055_v33 }
 0x22a   :  { %1784 = vmatprep.mubr.f32.mxu0 %v12217_v1  ;;  %v1921_v13 = vpop.permute.xlu1 %1920  ;;  %11245 = vmatmul.mubr.msk.f32.vlgmr.msra.gmra.mxu1 %vm14986_vm15, %v366_v54  ;;  %v1913_v50 = vpop.permute.xlu0 %1912 }
 0x22b   :  { %11249 = vmatprep.subr.msk.mxu1 %vm350_vm7, %v1273_v37  ;;  %v1923_v7 = vsel %vm1922_vm0, %v1913_v50, %v1915_v20  ;;  %11260 = vmatmul.mubr.msk.f32.vlgmr.msra.gmra.mxu0 %vm14986_vm15, %v369_v61 }
 0x22c   :  { %11250 = vmatpush1.msk.msra.mxu1 %vm350_vm7, %v1272_v6  ;;  %11265 = vmatpush1.msk.msra.mxu0 %vm350_vm7, %v1923_v7 }
 0x22d   :  { %1420 = vmatprep.mubr.f32.mxu1 %v12217_v1  ;;  %2002 = vmatprep.mubr.f32.mxu0 %v12217_v1 }
 0x22e   :  { %v1701_v15 = vpop.permute.xlu1 %1700  ;;  %11251 = vmatmul.mubr.msk.f32.vlgmr.msra.gmra.mxu1 %vm14986_vm15, %v367_v17  ;;  %v1483_v23 = vpop.permute.xlu0 %1482 }
 0x22f   :  { %v1489_v14 = vsel %vm1486_vm6, %v12798_v26, %v1483_v23  ;;  %11266 = vmatmul.mubr.msk.f32.vlgmr.msra.gmra.mxu0 %vm14986_vm15, %v370_v22  ;;  %v1490_v0 = vsel %vm1486_vm6, %v1483_v23, %v12779_v16  ;;  %1637 = vmatprep.mubr.f32.mxu1 %v12217_v1  ;;  %v1708_v52 = vsel %vm1704_vm8, %v1701_v15, %v12852_v51 }
 0x230   :  { %11255 = vmatprep.subr.msk.mxu1 %vm350_vm7, %v1490_v0  ;;  %2219 = vmatprep.mubr.f32.mxu0 %v12217_v1  ;;  %v1707_v26 = vsel %vm1704_vm8, %v12800_v40, %v1701_v15 }
 0x231   :  { %11256 = vmatpush1.msk.msra.mxu1 %vm350_vm7, %v1489_v14 }
 0x232   :  { %v2132_v36 = vpop.permute.xlu1 %2131  ;;  %11257 = vmatmul.mubr.msk.f32.vlgmr.msra.gmra.mxu1 %vm14986_vm15, %v368_v31  ;;  %11261 = vmatprep.subr.msk.mxu1 %vm350_vm7, %v1708_v52  ;;  %v2134_v16 = vpop.permute.xlu0 %2133 }
 0x233   :  { %11262 = vmatpush1.msk.msra.mxu1 %vm350_vm7, %v1707_v26  ;;  %v2141_v11 = vsel %vm15077_vm4, %v2132_v36, %v2134_v16  ;;  %1855 = vmatprep.mubr.f32.mxu1 %v12217_v1 }
 0x234   :  { %11274 = vmatprep.subr.msk.mxu0 %vm350_vm7, %v2141_v11 }
 0x236   :  { %v2136_v12 = vpop.permute.xlu1 %2135  ;;  %11263 = vmatmul.mubr.msk.f32.vlgmr.msra.gmra.mxu1 %vm14986_vm15, %v369_v61  ;;  %v1919_v18 = vpop.permute.xlu0 %1918 }
 0x237   :  { %v1925_v40 = vsel %vm1922_vm0, %v12872_v10, %v1919_v18  ;;  %v1926_v58 = vsel %vm1922_vm0, %v1919_v18, %v1921_v13  ;;  %2073 = vmatprep.mubr.f32.mxu1 %v12217_v1  ;;  %v2142_v62 = vsel %vm15077_vm4, %v2134_v16, %v2136_v12 }
 0x238   :  { %11267 = vmatprep.subr.msk.mxu1 %vm350_vm7, %v1926_v58 }
 0x239   :  { %11268 = vmatpush1.msk.msra.mxu1 %vm350_vm7, %v1925_v40 }
 0x23a   :  { %v2130_v63 = vpop.permute.xlu1 %2129  ;;  %11269 = vmatmul.mubr.msk.f32.vlgmr.msra.gmra.mxu1 %vm14986_vm15, %v370_v22  ;;  %v2138_v45 = vpop.permute.xlu0 %2137 }
 0x23b   :  { %v2140_v49 = vsel %vm15077_vm4, %v2130_v63, %v2132_v36  ;;  %v2143_v5 = vsel %vm15077_vm4, %v2136_v12, %v2138_v45  ;;  %2290 = vmatprep.mubr.f32.mxu1 %v12217_v1 }
 0x23c   :  { %11275 = vmatpush1.msk.msra.mxu0 %vm350_vm7, %v2140_v49  ;;  %11277 = vmatprep.subr.msk.mxu1 %vm350_vm7, %v2143_v5 }
 0x23d   :  { %11276 = vmatmul.mubr.msk.f32.vlgmr.msra.gmra.mxu0 %vm14986_vm15, %v371_v48  ;;  %11278 = vmatpush1.msk.msra.mxu1 %vm350_vm7, %v2142_v62 }
 0x23e   :  { %11279 = vmatmul.mubr.msk.f32.vlgmr.msra.gmra.mxu1 %vm14986_vm15, %v371_v48  ;;  %2515 = vmatprep.mubr.f32.mxu0 %v12217_v1  ;;  %vm2335_vm15 = vcmask 1047688  }
 0x23f   :  { %2586 = vmatprep.mubr.f32.mxu1 %v12217_v1 }
 0x2d2   :  { %v545_v57 = vpop.f32.mrf.mxu0 }
 0x2d4   :  { %v547_v43 = vpop.f32.mrf.mxu0 }
 0x2d6   :  { %v702_v60 = vpop.f32.mrf.mxu0 }
 0x2d7   :  { %v703_v41 = vadd.f32 %v702_v60, %v545_v57  ;;  %v2305_v60 = vpop.permute.xlu0 %2304 }
 0x2d8   :  { %v704_v55 = vpop.f32.mrf.mxu0 }
 0x2d9   :  { %v705_v21 = vadd.f32 %v704_v55, %v547_v43 }
 0x2da   :  { %v916_v47 = vpop.f32.mrf.mxu0 }
 0x2db   :  { %v992_v28 = vadd.f32 %v916_v47, %v703_v41 }
 0x2dc   :  { %v918_v30 = vpop.f32.mrf.mxu0 }
 0x2dd   :  { %v993_v33 = vadd.f32 %v918_v30, %v705_v21 }
 0x2de   :  { %v616_v54 = vpop.f32.mrf.mxu1 }
 0x2df   :  { %v1134_v1 = vpop.f32.mrf.mxu0 }
 0x2e0   :  { %v618_v56 = vpop.f32.mrf.mxu1  ;;  %v1210_v2 = vadd.f32 %v1134_v1, %v992_v28  ;;  %v12979_v28 = vld [vmem:[#allocation8 + $0x10] sm:$0xff] }
 0x2e1   :  { %v1136_v51 = vpop.f32.mrf.mxu0 }
 0x2e2   :  { %v773_v35 = vpop.f32.mrf.mxu1  ;;  %v1211_v6 = vadd.f32 %v1136_v51, %v993_v33 }
 0x2e3   :  { %v1351_v44 = vpop.f32.mrf.mxu0  ;;  %v774_v42 = vadd.f32 %v773_v35, %v616_v54 }
 0x2e4   :  { %v775_v59 = vpop.f32.mrf.mxu1  ;;  %v1427_v7 = vadd.f32 %v1351_v44, %v1210_v2  ;;  %v12992_v2 = vld [vmem:[#allocation8 + $0x18] sm:$0xff] }
 0x2e5   :  { %v1353_v38 = vpop.f32.mrf.mxu0  ;;  %v776_v53 = vadd.f32 %v775_v59, %v618_v56 }
 0x2e6   :  { %v987_v9 = vpop.f32.mrf.mxu1  ;;  %v1428_v52 = vadd.f32 %v1353_v38, %v1211_v6  ;;  %v13010_v6 = vld [vmem:[#allocation8 + $0x30] ss:$0 sm:$0xff] }
 0x2e7   :  { %v1568_v17 = vpop.f32.mrf.mxu0  ;;  %v994_v32 = vadd.f32 %v987_v9, %v774_v42 }
 0x2e8   :  { %v989_v19 = vpop.f32.mrf.mxu1  ;;  %v1644_v26 = vadd.f32 %v1568_v17, %v1427_v7  ;;  %v13015_v7 = vld [vmem:[#allocation8 + $0x28] ss:$0 sm:$0xff] }
 0x2e9   :  { %v1570_v20 = vpop.f32.mrf.mxu0  ;;  %v995_v22 = vadd.f32 %v989_v19, %v776_v53  ;;  %v3605_v53 = vrot.slane %v12992_v2, %v12601_v39 }
 0x2ea   :  { %v1205_v10 = vpop.f32.mrf.mxu1  ;;  %v1645_v12 = vadd.f32 %v1570_v20, %v1428_v52 }
 0x2eb   :  { %v1786_v34 = vpop.f32.mrf.mxu0  ;;  %v1212_v37 = vadd.f32 %v1205_v10, %v994_v32  ;;  %v12973_v10 = vld [vmem:[#allocation8] sm:$0xff]  ;;  %v12984_v32 = vld [vmem:[#allocation8 + $0x8] sm:$0xff] }
 0x2ec   :  { %v1207_v31 = vpop.f32.mrf.mxu1  ;;  %v1862_v18 = vadd.f32 %v1786_v34, %v1644_v26  ;;  %v3593_v42 = vrot.slane %v12973_v10, %v12601_v39  ;;  %v3597_v34 = vrot.slane %v12984_v32, %v12601_v39  ;;  %v3806_v33 = vrot.slane %v12973_v10, %v12622_v46 }
 0x2ed   :  { %v1788_v50 = vpop.f32.mrf.mxu0  ;;  %v1213_v36 = vadd.f32 %v1207_v31, %v995_v22  ;;  %v3601_v31 = vrot.slane %v12979_v28, %v12601_v39  ;;  %v13019_v22 = vld [vmem:[#allocation8 + $0x38] ss:$0 sm:$0xff] }
 0x2ee   :  { %v1422_v24 = vpop.f32.mrf.mxu1  ;;  %v1863_v48 = vadd.f32 %v1788_v50, %v1645_v12  ;;  %v3818_v50 = vrot.slane %v12992_v2, %v12622_v46 }
 0x2ef   :  { %v1429_v14 = vadd.f32 %v1422_v24, %v1212_v37  ;;  %v2004_v0 = vpop.f32.mrf.mxu0  ;;  %v13003_v37 = vld [vmem:[#allocation8 + $0x20] ss:$0 sm:$0xff] }
 0x2f0   :  { %v1424_v61 = vpop.f32.mrf.mxu1  ;;  %v2080_v49 = vadd.f32 %v2004_v0, %v1862_v18  ;;  %v2404_v0 = vpop.permute.xlu0 %2403 }
 0x2f1   :  { %v1430_v40 = vadd.f32 %v1424_v61, %v1213_v36  ;;  %v2006_v63 = vpop.f32.mrf.mxu0  ;;  %v3814_v61 = vrot.slane %v12979_v28, %v12622_v46 }
 0x2f2   :  { %v1639_v13 = vpop.f32.mrf.mxu1  ;;  %v2081_v55 = vadd.f32 %v2006_v63, %v1863_v48 }
 0x2f3   :  { %v1646_v11 = vadd.f32 %v1639_v13, %v1429_v14  ;;  %v3810_v13 = vrot.slane %v12984_v32, %v12622_v46 }
 0x2f4   :  { %v1641_v15 = vpop.f32.mrf.mxu1  ;;  %v13027_v26 = vpop.permute.xlu0 %2407 }
 0x2f5   :  { %v1647_v5 = vadd.f32 %v1641_v15, %v1430_v40  ;;  %v2406_v15 = vpop.permute.xlu1 %2405 }
 0x2f6   :  { %v1857_v23 = vpop.f32.mrf.mxu1 }
 0x2f7   :  { %v1864_v45 = vadd.f32 %v1857_v23, %v1646_v11 }
 0x2f8   :  { %v1859_v16 = vpop.f32.mrf.mxu1 }
 0x2f9   :  { %v1865_v47 = vadd.f32 %v1859_v16, %v1647_v5  ;;  %v13023_v23 = vpop.permute.xlu1 %2409  ;;  %v2759_v16 = vpop.permute.xlu0 %2758 }
 0x2fa   :  { %v2075_v58 = vpop.f32.mrf.mxu1 }
 0x2fb   :  { %v2082_v57 = vadd.f32 %v2075_v58, %v1864_v45 }
 0x2fc   :  { %v2077_v62 = vpop.f32.mrf.mxu1 }
 0x2fd   :  { %v2221_v43 = vpop.f32.mrf.mxu0  ;;  %v2083_v51 = vadd.f32 %v2077_v62, %v1865_v47  ;;  %v2761_v14 = vpop.permute.xlu1 %2760 }
 0x2fe   :  { %v2297_v30 = vadd.f32 %v2221_v43, %v2080_v49  ;;  %v2292_v54 = vpop.f32.mrf.mxu1  ;;  %v13031_v12 = vpop.permute.xlu0 %2762 }
 0x2ff   :  { %v2299_v1 = vadd.f32 %v2292_v54, %v2082_v57  ;;  %v2223_v56 = vpop.f32.mrf.mxu0 }
 0x300   :  { %v2298_v35 = vadd.f32 %v2223_v56, %v2081_v55  ;;  %v2294_v44 = vpop.f32.mrf.mxu1  ;;  %v2307_v59 = vadd.f32 %v2305_v60, %v2297_v30 }
 0x301   :  { %v2309_v38 = vadd.f32 %v2305_v60, %v2299_v1  ;;  %v2300_v17 = vadd.f32 %v2294_v44, %v2083_v51  ;;  %v13025_v52 = vpop.permute.xlu1 %2764  ;;  %v2412_v44 = vsel %vm14990_vm9, %v2406_v15, %v13027_v26 }
 0x302   :  { %v2308_v9 = vadd.f32 %v2305_v60, %v2298_v35  ;;  %v2311_v41 = vmax.f32 %v2307_v59, 0.0  ;;  %v2972_v40 = vpop.permute.xlu0 %2971 }
 0x303   :  { %v2313_v19 = vmax.f32 %v2309_v38, 0.0  ;;  %v2310_v21 = vadd.f32 %v2305_v60, %v2300_v17 }
 0x304   :  { %2319 = vrot.lane.b32.xlu1 %v2311_v41, %s12218_s4  ;;  %v2312_v20 = vmax.f32 %v2308_v9, 0.0  ;;  %v2411_v41 = vsel %vm14990_vm9, %v2404_v0, %v2406_v15 }
 0x305   :  { %2323 = vrot.lane.b32.xlu0 %v2313_v19, %s12218_s4  ;;  %v2314_v24 = vmax.f32 %v2310_v21, 0.0  ;;  %v2974_v36 = vpop.permute.xlu1 %2973  ;;  %v2767_v21 = vsel %vm809_vm10, %v2761_v14, %v13031_v12 }
 0x306   :  { %v13035_v63 = vpop.permute.xlu0 %2975 }
 0x308   :  { %2321 = vrot.lane.b32.xlu1 %v2312_v20, %s12218_s4  ;;  %v2766_v20 = vsel %vm809_vm10, %v2759_v16, %v2761_v14 }
 0x309   :  { %3610 = vrot.lane.b32.xlu0 %v3593_v42, %s12196_s8  ;;  %v13029_v11 = vpop.permute.xlu1 %2977 }
 0x30a   :  { %v3185_v48 = vpop.permute.xlu0 %3184 }
 0x30c   :  { %2325 = vrot.lane.b32.xlu1 %v2314_v24, %s12218_s4 }
 0x30d   :  { %3614 = vrot.lane.b32.xlu0 %v3601_v31, %s12196_s8  ;;  %v3187_v18 = vpop.permute.xlu1 %3186 }
 0x30e   :  { %v13041_v5 = vpop.permute.xlu0 %3188  ;;  %v3192_v15 = vsel %vm348_vm5, %v3185_v48, %v3187_v18 }
 0x30f   :  { %v3193_v14 = vsel %vm348_vm5, %v3187_v18, %v13041_v5 }
 0x310   :  { %3612 = vrot.lane.b32.xlu1 %v3597_v34, %s12196_s8  ;;  %v2980_v34 = vsel %vm1027_vm11, %v2974_v36, %v13035_v63 }
 0x311   :  { %3823 = vrot.lane.b32.xlu0 %v3806_v33, %s12223_s27  ;;  %v13033_v58 = vpop.permute.xlu1 %3190 }
 0x312   :  { %v3398_v57 = vpop.permute.xlu0 %3397 }
 0x314   :  { %3616 = vrot.lane.b32.xlu1 %v3605_v53, %s12196_s8 }
 0x315   :  { %3827 = vrot.lane.b32.xlu0 %v3814_v61, %s12223_s27  ;;  %v13037_v45 = vpop.permute.xlu1 %3399  ;;  %v2979_v61 = vsel %vm1027_vm11, %v2972_v40, %v2974_v36 }
 0x316   :  { %v13048_v47 = vpop.permute.xlu0 %3401  ;;  %v3405_v18 = vsel %vm332_vm1, %v3398_v57, %v13037_v45 }
 0x317   :  { %v3406_v36 = vsel %vm332_vm1, %v13037_v45, %v13048_v47 }
 0x318   :  { %3825 = vrot.lane.b32.xlu1 %v3810_v13, %s12223_s27 }
 0x319   :  { %4036 = vrot.lane.b32.xlu0 %v13003_v37, %s12224_s14  ;;  %v13039_v49 = vpop.permute.xlu1 %3403 }
 0x31c   :  { %3829 = vrot.lane.b32.xlu1 %v3818_v50, %s12223_s27 }
 0x31d   :  { %4040 = vrot.lane.b32.xlu0 %v13010_v6, %s12224_s14 }
 0x320   :  { %4038 = vrot.lane.b32.xlu1 %v13015_v7, %s12224_s14 }
 0x324   :  { %4042 = vrot.lane.b32.xlu1 %v13019_v22, %s12224_s14 }
 0x376   :  { %v2320_v62 = vpop.permute.xlu1 %2319 }
 0x377   :  { %2336 = vst.msk [vmem:[#allocation3] sm:$0xff] %vm2335_vm15, %v2320_v62  ;;  %v2324_v1 = vpop.permute.xlu0 %2323 }
 0x37a   :  { %v2322_v43 = vpop.permute.xlu1 %2321 }
 0x37b   :  { %v13059_v35 = vsel %vm348_vm5, %v2322_v43, %v2324_v1  ;;  %v13068_v9 = vsel %vm348_vm5, %v2320_v62, %v2322_v43  ;;  %v3611_v62 = vpop.permute.xlu0 %3610 }
 0x37c   :  { %v2421_v38 = vmul.f32 %v2412_v44, %v13059_v35  ;;  %v2420_v19 = vmul.f32 %v2411_v41, %v13068_v9  ;;  %v2776_v31 = vmul.f32 %v2767_v21, %v13059_v35  ;;  %v2775_v24 = vmul.f32 %v2766_v20, %v13068_v9 }
 0x37d   :  { %v2989_v53 = vmul.f32 %v2980_v34, %v13059_v35  ;;  %v2988_v13 = vmul.f32 %v2979_v61, %v13068_v9 }
 0x37e   :  { %v13044_v60 = vld [vmem:[#allocation3] sm:$0xff]  ;;  %v13046_v55 = vpop.permute.xlu1 %2325 }
 0x37f   :  { %2340 = vst.msk [vmem:[#allocation3 + $0x20] sm:$0xff] %vm348_vm5, %v13046_v55  ;;  %v2774_v30 = vmul.f32 %v2759_v16, %v13044_v60  ;;  %v2419_v54 = vmul.f32 %v2404_v0, %v13044_v60  ;;  %v3200_v56 = vmul.f32 %v3185_v48, %v13044_v60  ;;  %v2987_v51 = vmul.f32 %v2972_v40, %v13044_v60 }
 0x380   :  { %v3413_v59 = vmul.f32 %v3398_v57, %v13044_v60  ;;  %v3202_v0 = vmul.f32 %v3193_v14, %v13059_v35  ;;  %v3201_v16 = vmul.f32 %v3192_v15, %v13068_v9  ;;  %v3415_v48 = vmul.f32 %v3406_v36, %v13059_v35 }
 0x381   :  { %2784 = vrot.lane.b32.xlu1 %v2774_v30, %s12225_s3  ;;  %2429 = vrot.lane.b32.xlu0 %v2419_v54, %s12226_s13  ;;  %v3615_v30 = vpop.permute.xlu0 %3614  ;;  %v3414_v54 = vmul.f32 %v3405_v18, %v13068_v9  ;;  %v13128_v45 = vsel %vm348_vm5, %v2324_v1, %v13046_v55  ;;  %v2768_v55 = vsel %vm809_vm10, %v13031_v12, %v13025_v52 }
 0x382   :  { %v3613_v43 = vpop.permute.xlu1 %3612  ;;  %v3194_v12 = vsel %vm348_vm5, %v13041_v5, %v13033_v58 }
 0x383   :  { %v3619_v44 = vsel %vm14989_vm12, %v3613_v43, %v3615_v30  ;;  %v3203_v61 = vmul.f32 %v3194_v12, %v13128_v45  ;;  %v13231_v12 = vld [vmem:[%s15109_s30 + $0x10] sm:$0xff] }
 0x385   :  { %3210 = vrot.lane.b32.xlu1 %v3200_v56, %s12228_s19  ;;  %2997 = vrot.lane.b32.xlu0 %v2987_v51, %s12227_s26  ;;  %v3618_v51 = vsel %vm14989_vm12, %v3611_v62, %v3613_v43  ;;  %v3824_v57 = vpop.permute.xlu0 %3823 }
 0x386   :  { %v13070_v17 = vld [vmem:[#allocation3 + $0x20] sm:$0xff]  ;;  %v3617_v41 = vpop.permute.xlu1 %3616  ;;  %v3839_v15 = vmul.f32 %v3824_v57, %v13044_v60 }
 0x387   :  { %v2423_v42 = vmul.f32 %v13023_v23, %v13070_v17  ;;  %v2778_v33 = vmul.f32 %v13025_v52, %v13070_v17  ;;  %v2991_v50 = vmul.f32 %v13029_v11, %v13070_v17  ;;  %v3204_v40 = vmul.f32 %v13033_v58, %v13070_v17 }
 0x388   :  { %v3417_v56 = vmul.f32 %v13039_v49, %v13070_v17  ;;  %v3630_v1 = vmul.f32 %v3617_v41, %v13070_v17  ;;  %v2981_v52 = vsel %vm1027_vm11, %v13035_v63, %v13029_v11  ;;  %v3620_v11 = vsel %vm14989_vm12, %v3615_v30, %v3617_v41 }
 0x389   :  { %3423 = vrot.lane.b32.xlu0 %v3413_v59, %s12229_s0  ;;  %2433 = vrot.lane.b32.xlu1 %v2421_v38, %s12226_s13  ;;  %v3627_v59 = vmul.f32 %v3618_v51, %v13068_v9  ;;  %v3628_v38 = vmul.f32 %v3619_v44, %v13059_v35  ;;  %v3407_v58 = vsel %vm332_vm1, %v13048_v47, %v13039_v49  ;;  %v4229_v51 = vld [vmem:[#allocation6] sm:$0xff]  ;;  %v4240_v44 = vld [vmem:[#allocation11] sm:$0xff] }
 0x38a   :  { %v3826_v21 = vpop.permute.xlu1 %3825  ;;  %v3629_v5 = vmul.f32 %v3620_v11, %v13128_v45 }
 0x38d   :  { %2431 = vrot.lane.b32.xlu0 %v2420_v19, %s12226_s13  ;;  %2437 = vrot.lane.b32.xlu1 %v2423_v42, %s12226_s13  ;;  %v2413_v19 = vsel %vm14990_vm9, %v13027_v26, %v13023_v23  ;;  %v3626_v42 = vmul.f32 %v3611_v62, %v13044_v60  ;;  %v3831_v23 = vsel %vm14988_vm13, %v3824_v57, %v3826_v21 }
 0x38e   :  { %v2422_v20 = vmul.f32 %v2413_v19, %v13128_v45  ;;  %v3840_v34 = vmul.f32 %v3831_v23, %v13068_v9 }
 0x391   :  { %2788 = vrot.lane.b32.xlu0 %v2776_v31, %s12225_s3  ;;  %2786 = vrot.lane.b32.xlu1 %v2775_v24, %s12225_s3  ;;  %v3828_v31 = vpop.permute.xlu0 %3827  ;;  %v2777_v24 = vmul.f32 %v2768_v55, %v13128_v45 }
 0x392   :  { %v3832_v26 = vsel %vm14988_vm13, %v3826_v21, %v3828_v31 }
 0x395   :  { %2792 = vrot.lane.b32.xlu0 %v2778_v33, %s12225_s3  ;;  %3001 = vrot.lane.b32.xlu1 %v2989_v53, %s12227_s26  ;;  %v3841_v33 = vmul.f32 %v3832_v26, %v13059_v35  ;;  %v3830_v53 = vpop.permute.xlu1 %3829 }
 0x396   :  { %v3843_v14 = vmul.f32 %v3830_v53, %v13070_v17  ;;  %v3833_v18 = vsel %vm14988_vm13, %v3828_v31, %v3830_v53  ;;  %vm15110_vm13 = vcmask 1031168  }
 0x397   :  { %v3842_v47 = vmul.f32 %v3833_v18, %v13128_v45  ;;  %vm15111_vm12 = vmmov %vm15110_vm13  ;;  %v13272_v18 = vld [vmem:[%s15109_s30 + $0x28] sm:$0xff] }
 0x399   :  { %2999 = vrot.lane.b32.xlu0 %v2988_v13, %s12227_s26  ;;  %3005 = vrot.lane.b32.xlu1 %v2991_v50, %s12227_s26  ;;  %v2990_v13 = vmul.f32 %v2981_v52, %v13128_v45  ;;  %v4037_v50 = vpop.permute.xlu0 %4036 }
 0x39d   :  { %3214 = vrot.lane.b32.xlu0 %v3202_v0, %s12228_s19  ;;  %3212 = vrot.lane.b32.xlu1 %v3201_v16, %s12228_s19  ;;  %v4039_v0 = vpop.permute.xlu1 %4038  ;;  %v4041_v63 = vpop.permute.xlu0 %4040  ;;  %v3416_v16 = vmul.f32 %v3407_v58, %v13128_v45 }
 0x39e   :  { %v4044_v62 = vsel %vm14987_vm2, %v4037_v50, %v4039_v0  ;;  %v4045_v36 = vsel %vm14987_vm2, %v4039_v0, %v4041_v63 }
 0x39f   :  { %v4054_v43 = vmul.f32 %v4045_v36, %v13059_v35 }
 0x3a1   :  { %3218 = vrot.lane.b32.xlu0 %v3204_v40, %s12228_s19  ;;  %3427 = vrot.lane.b32.xlu1 %v3415_v48, %s12229_s0  ;;  %v4043_v40 = vpop.permute.xlu1 %4042  ;;  %v4053_v48 = vmul.f32 %v4044_v62, %v13068_v9 }
 0x3a2   :  { %v4046_v49 = vsel %vm14987_vm2, %v4041_v63, %v4043_v40  ;;  %vm2447_vm2 = vcmask 64512  }
 0x3a3   :  { %v4055_v30 = vmul.f32 %v4046_v49, %v13128_v45 }
 0x3a5   :  { %3425 = vrot.lane.b32.xlu0 %v3414_v54, %s12229_s0  ;;  %3431 = vrot.lane.b32.xlu1 %v3417_v56, %s12229_s0  ;;  %v4052_v54 = vmul.f32 %v4037_v50, %v13044_v60  ;;  %v4056_v56 = vmul.f32 %v4043_v40, %v13070_v17  ;;  %v2365_v17 = vrot.slane %v12973_v10, %v12786_v27 }
 0x3a7   :  { %v2378_v10 = vmul.f32 %v2365_v17, %v13044_v60 }
 0x3a9   :  { %3640 = vrot.lane.b32.xlu0 %v3628_v38, %s12230_s16  ;;  %3638 = vrot.lane.b32.xlu1 %v3627_v59, %s12230_s16 }
 0x3ad   :  { %2435 = vrot.lane.b32.xlu0 %v2422_v20, %s12226_s13  ;;  %3636 = vrot.lane.b32.xlu1 %v3626_v42, %s12230_s16  ;;  %v2369_v20 = vrot.slane %v12984_v32, %v12786_v27 }
 0x3af   :  { %v2379_v32 = vmul.f32 %v2369_v20, %v13068_v9  ;;  %v13220_v9 = vld [vmem:[%s15109_s30] sm:$0xff] }
 0x3b1   :  { %2790 = vrot.lane.b32.xlu1 %v2777_v24, %s12225_s3  ;;  %3644 = vrot.lane.b32.xlu0 %v3630_v1, %s12230_s16  ;;  %v13204_v24 = vld [vmem:[%s15109_s30 + $0x8] sm:$0xff] }
 0x3b5   :  { %3853 = vrot.lane.b32.xlu1 %v3841_v33, %s12231_s9  ;;  %3851 = vrot.lane.b32.xlu0 %v3840_v34, %s12231_s9  ;;  %v13214_v33 = vld [vmem:[#allocation4] sm:$0xff] }
 0x3b9   :  { %3216 = vrot.lane.b32.xlu1 %v3203_v61, %s12228_s19  ;;  %3003 = vrot.lane.b32.xlu0 %v2990_v13, %s12227_s26 }
 0x3bd   :  { %3849 = vrot.lane.b32.xlu0 %v3839_v15, %s12231_s9  ;;  %3857 = vrot.lane.b32.xlu1 %v3843_v14, %s12231_s9  ;;  %v13244_v14 = vld [vmem:[%s15109_s30 + $0x18] sm:$0xff] }
 0x3c1   :  { %3429 = vrot.lane.b32.xlu0 %v3416_v16, %s12229_s0  ;;  %3642 = vrot.lane.b32.xlu1 %v3629_v5, %s12230_s16  ;;  %v13257_v5 = vld [vmem:[%s15109_s30 + $0x20] sm:$0xff] }
 0x3c5   :  { %4066 = vrot.lane.b32.xlu0 %v4054_v43, %s12233_s21  ;;  %4064 = vrot.lane.b32.xlu1 %v4053_v48, %s12233_s21 }
 0x3c9   :  { %3855 = vrot.lane.b32.xlu0 %v3842_v47, %s12231_s9  ;;  %4068 = vrot.lane.b32.xlu1 %v4055_v30, %s12233_s21 }
 0x3cd   :  { %4070 = vrot.lane.b32.xlu0 %v4056_v56, %s12233_s21  ;;  %4062 = vrot.lane.b32.xlu1 %v4052_v54, %s12233_s21  ;;  %v2377_v54 = vrot.slane %v12992_v2, %v12786_v27  ;;  %v2373_v56 = vrot.slane %v12979_v28, %v12786_v27 }
 0x3cf   :  { %v2381_v2 = vmul.f32 %v2377_v54, %v13128_v45  ;;  %v2380_v28 = vmul.f32 %v2373_v56, %v13059_v35  ;;  %v13374_v54 = vld [vmem:[#allocation8] sm:$0xff] }
 0x3d0   :  { %v4488_v56 = vrot.slane %v13374_v54, %v12473_v3 }
 0x3d1   :  { %4232 = vperm.xlu0 %11776, %v4229_v51   ;;  %4243 = vperm.xlu1 %11777, %v4240_v44  }
 0x3d5   :  { %4505 = vrot.lane.b32.xlu0 %v4488_v56, %s12219_s17 }
 0x3f3   :  { %v2430_v59 = vpop.permute.xlu0 %2429  ;;  %v2785_v38 = vpop.permute.xlu1 %2784 }
 0x3f7   :  { %v2998_v41 = vpop.permute.xlu0 %2997  ;;  %v3211_v57 = vpop.permute.xlu1 %3210 }
 0x3fb   :  { %v3424_v19 = vpop.permute.xlu0 %3423  ;;  %v13190_v42 = vpop.permute.xlu1 %2433 }
 0x3ff   :  { %v2432_v21 = vpop.permute.xlu0 %2431  ;;  %v13196_v55 = vpop.permute.xlu1 %2437 }
 0x400   :  { %v2440_v1 = vsel %vm462_vm14, %v2432_v21, %v13190_v42  ;;  %v2439_v31 = vsel %vm462_vm14, %v2430_v59, %v2432_v21  ;;  %v13288_v59 = vld [vmem:[%s15109_s30 + $0x30] sm:$0xff] }
 0x401   :  { %2481 = vmatprep.subr.mxu0 %v2440_v1 }
 0x402   :  { %2482 = vmatpush1.msra.mxu0 %v2439_v31 }
 0x403   :  { %v13208_v23 = vpop.permute.xlu0 %2788  ;;  %11280 = vmatmul.mubr.msk.f32.vlgmr.msra.gmra.mxu0 %vm2447_vm2, %v13204_v24  ;;  %2626 = vmatprep.subr.mxu0 %v2379_v32  ;;  %v2787_v26 = vpop.permute.xlu1 %2786 }
 0x404   :  { %2627 = vmatpush1.msra.mxu0 %v2378_v10  ;;  %v2795_v34 = vsel %vm15110_vm13, %v2787_v26, %v13208_v23  ;;  %2660 = vmatprep.mubr.f32.mxu0 %v13214_v33  ;;  %v2794_v53 = vsel %vm15111_vm12, %v2785_v38, %v2787_v26  ;;  %vm15112_vm12 = vcmask 908288  }
 0x405   :  { %2835 = vmatprep.subr.mxu0 %v2795_v34  ;;  %vm15113_vm13 = vmmov %vm15112_vm12  ;;  %v2348_v34 = vld [vmem:[%s15109_s30 + $0x38] sm:$0xff] }
 0x407   :  { %v2793_v60 = vpop.permute.xlu0 %2792  ;;  %11282 = vmatmul.mubr.msk.f32.vlgmr.msra.gmra.mxu0 %vm2447_vm2, %v13220_v9  ;;  %v13225_v52 = vpop.permute.xlu1 %3001 }
 0x408   :  { %2836 = vmatpush1.msra.mxu0 %v2794_v53  ;;  %2869 = vmatprep.mubr.f32.mxu0 %v13214_v33 }
 0x40b   :  { %v3000_v61 = vpop.permute.xlu0 %2999  ;;  %v13233_v13 = vpop.permute.xlu1 %3005  ;;  %11284 = vmatmul.mubr.msk.f32.vlgmr.msra.gmra.mxu0 %vm2447_vm2, %v13231_v12 }
 0x40c   :  { %v3008_v50 = vsel %vm1052_vm3, %v3000_v61, %v13225_v52  ;;  %v3007_v15 = vsel %vm1052_vm3, %v2998_v41, %v3000_v61  ;;  %3082 = vmatprep.mubr.f32.mxu0 %v13214_v33 }
 0x40d   :  { %3048 = vmatprep.subr.mxu0 %v3008_v50 }
 0x40e   :  { %3049 = vmatpush1.msra.mxu0 %v3007_v15 }
 0x40f   :  { %v13246_v0 = vpop.permute.xlu0 %3214  ;;  %v3213_v11 = vpop.permute.xlu1 %3212  ;;  %11286 = vmatmul.mubr.msk.f32.vlgmr.msra.gmra.mxu0 %vm2447_vm2, %v13244_v14 }
 0x410   :  { %v3221_v63 = vsel %vm15112_vm12, %v3213_v11, %v13246_v0  ;;  %v3220_v58 = vsel %vm15113_vm13, %v3211_v57, %v3213_v11  ;;  %3295 = vmatprep.mubr.f32.mxu0 %v13214_v33  ;;  %vm15114_vm12 = vcmask 1031168  }
 0x411   :  { %3261 = vmatprep.subr.mxu0 %v3221_v63  ;;  %vm15115_vm13 = vmmov %vm15114_vm12 }
 0x412   :  { %3262 = vmatpush1.msra.mxu0 %v3220_v58 }
 0x413   :  { %v3219_v16 = vpop.permute.xlu0 %3218  ;;  %v13259_v62 = vpop.permute.xlu1 %3427  ;;  %11288 = vmatmul.mubr.msk.f32.vlgmr.msra.gmra.mxu0 %vm2447_vm2, %v13257_v5 }
 0x414   :  { %3508 = vmatprep.mubr.f32.mxu0 %v13214_v33 }
 0x417   :  { %v3426_v36 = vpop.permute.xlu0 %3425  ;;  %v13264_v40 = vpop.permute.xlu1 %3431 }
 0x418   :  { %v3434_v48 = vsel %vm1486_vm6, %v3426_v36, %v13259_v62  ;;  %v3433_v43 = vsel %vm1486_vm6, %v3424_v19, %v3426_v36 }
 0x419   :  { %3474 = vmatprep.subr.mxu0 %v3434_v48 }
 0x41a   :  { %3475 = vmatpush1.msra.mxu0 %v3433_v43 }
 0x41b   :  { %v13274_v49 = vpop.permute.xlu0 %3640  ;;  %v3639_v47 = vpop.permute.xlu1 %3638  ;;  %11290 = vmatmul.mubr.msk.f32.vlgmr.msra.gmra.mxu0 %vm2447_vm2, %v13272_v18 }
 0x41c   :  { %v3647_v30 = vsel %vm1704_vm8, %v3639_v47, %v13274_v49  ;;  %3721 = vmatprep.mubr.f32.mxu0 %v13214_v33 }
 0x41d   :  { %3687 = vmatprep.subr.mxu0 %v3647_v30  ;;  %v4239_v30 = vld [vmem:[#allocation10] sm:$0xff] }
 0x41f   :  { %v2436_v51 = vpop.permute.xlu0 %2435  ;;  %v3637_v44 = vpop.permute.xlu1 %3636 }
 0x420   :  { %v3646_v38 = vsel %vm1704_vm8, %v3637_v44, %v3639_v47  ;;  %v2442_v41 = vsel %vm462_vm14, %v2436_v51, %v13196_v55  ;;  %v2441_v57 = vsel %vm462_vm14, %v13190_v42, %v2436_v51  ;;  %v13379_v51 = vld [vmem:[#allocation8 + $0x8] sm:$0xff] }
 0x421   :  { %2552 = vmatprep.subr.mxu1 %v2442_v41  ;;  %3688 = vmatpush1.msra.mxu0 %v3646_v38  ;;  %v4492_v44 = vrot.slane %v13379_v51, %v12473_v3  ;;  %v13389_v41 = vld [vmem:[#allocation8 + $0x18] sm:$0xff] }
 0x422   :  { %2553 = vmatpush1.msra.mxu1 %v2441_v57  ;;  %11292 = vmatmul.mubr.msk.f32.vlgmr.msra.gmra.mxu0 %vm2447_vm2, %v13288_v59  ;;  %v4500_v57 = vrot.slane %v13389_v41, %v12473_v3 }
 0x423   :  { %v3645_v19 = vpop.permute.xlu0 %3644  ;;  %11281 = vmatmul.mubr.msk.f32.vlgmr.msra.gmra.mxu1 %vm2447_vm2, %v13204_v24  ;;  %2697 = vmatprep.subr.mxu1 %v2381_v2  ;;  %v2791_v20 = vpop.permute.xlu1 %2790 }
 0x424   :  { %2698 = vmatpush1.msra.mxu1 %v2380_v28  ;;  %v2797_v17 = vsel %vm15114_vm12, %v2791_v20, %v2793_v60  ;;  %2731 = vmatprep.mubr.f32.mxu1 %v13214_v33  ;;  %v2796_v35 = vsel %vm15115_vm13, %v13208_v23, %v2791_v20  ;;  %vm15116_vm12 = vcmask 908288  }
 0x425   :  { %2906 = vmatprep.subr.mxu1 %v2797_v17  ;;  %3934 = vmatprep.mubr.f32.mxu0 %v13214_v33  ;;  %vm15117_vm13 = vmmov %vm15116_vm12 }
 0x426   :  { %4507 = vrot.lane.b32.xlu1 %v4492_v44, %s12219_s17 }
 0x427   :  { %v3852_v45 = vpop.permute.xlu0 %3851  ;;  %11283 = vmatmul.mubr.msk.f32.vlgmr.msra.gmra.mxu1 %vm2447_vm2, %v13220_v9  ;;  %v3854_v42 = vpop.permute.xlu1 %3853 }
 0x428   :  { %2907 = vmatpush1.msra.mxu1 %v2796_v35  ;;  %v3860_v21 = vsel %vm1922_vm0, %v3852_v45, %v3854_v42  ;;  %2940 = vmatprep.mubr.f32.mxu1 %v13214_v33 }
 0x429   :  { %3900 = vmatprep.subr.mxu0 %v3860_v21 }
 0x42a   :  { %4511 = vrot.lane.b32.xlu1 %v4500_v57, %s12219_s17 }
 0x42b   :  { %v3004_v55 = vpop.permute.xlu0 %3003  ;;  %11285 = vmatmul.mubr.msk.f32.vlgmr.msra.gmra.mxu1 %vm2447_vm2, %v13231_v12  ;;  %v3217_v1 = vpop.permute.xlu1 %3216 }
 0x42c   :  { %v3010_v31 = vsel %vm1052_vm3, %v3004_v55, %v13233_v13  ;;  %v3009_v24 = vsel %vm1052_vm3, %v13225_v52, %v3004_v55  ;;  %3153 = vmatprep.mubr.f32.mxu1 %v13214_v33  ;;  %v3223_v32 = vsel %vm15116_vm12, %v3217_v1, %v3219_v16  ;;  %v3222_v26 = vsel %vm15117_vm13, %v13246_v0, %v3217_v1 }
 0x42d   :  { %3119 = vmatprep.subr.mxu1 %v3010_v31  ;;  %vm15118_vm12 = vcmask 31744  }
 0x42e   :  { %3120 = vmatpush1.msra.mxu1 %v3009_v24  ;;  %vm15119_vm13 = vmmov %vm15118_vm12 }
 0x42f   :  { %v3850_v10 = vpop.permute.xlu0 %3849  ;;  %11287 = vmatmul.mubr.msk.f32.vlgmr.msra.gmra.mxu1 %vm2447_vm2, %v13244_v14  ;;  %3332 = vmatprep.subr.mxu1 %v3223_v32  ;;  %v3858_v23 = vpop.permute.xlu1 %3857 }
 0x430   :  { %v3859_v9 = vsel %vm1922_vm0, %v3850_v10, %v3852_v45  ;;  %3333 = vmatpush1.msra.mxu1 %v3222_v26  ;;  %3366 = vmatprep.mubr.f32.mxu1 %v13214_v33 }
 0x431   :  { %3901 = vmatpush1.msra.mxu0 %v3859_v9 }
 0x432   :  { %11294 = vmatmul.mubr.msk.f32.vlgmr.msra.gmra.mxu0 %vm2447_vm2, %v2348_v34 }
 0x433   :  { %v3430_v60 = vpop.permute.xlu0 %3429  ;;  %11289 = vmatmul.mubr.msk.f32.vlgmr.msra.gmra.mxu1 %vm2447_vm2, %v13257_v5  ;;  %v3643_v53 = vpop.permute.xlu1 %3642  ;;  %4147 = vmatprep.mubr.f32.mxu0 %v13214_v33  ;;  %v11785_v5 = vld [vmem:[%s15100_s28] sm:$0xff] }
 0x434   :  { %v3436_v52 = vsel %vm1486_vm6, %v3430_v60, %v13264_v40  ;;  %v3435_v12 = vsel %vm1486_vm6, %v13259_v62, %v3430_v60  ;;  %3579 = vmatprep.mubr.f32.mxu1 %v13214_v33  ;;  %v3649_v61 = vsel %vm1704_vm8, %v3643_v53, %v3645_v19  ;;  %v3648_v15 = vsel %vm1704_vm8, %v13274_v49, %v3643_v53  ;;  %v2349_v40 = vld [vmem:[%s15109_s30 + $0x40] sm:$0xff]  ;;  %s12236_s30 = smov 120  }
 0x435   :  { %3545 = vmatprep.subr.mxu1 %v3436_v52  ;;  %v4246_v16 = vcombine.high %v11785_v5, %v11785_v5 }
 0x436   :  { %3546 = vmatpush1.msra.mxu1 %v3435_v12 }
 0x437   :  { %v4067_v13 = vpop.permute.xlu0 %4066  ;;  %11291 = vmatmul.mubr.msk.f32.vlgmr.msra.gmra.mxu1 %vm2447_vm2, %v13272_v18  ;;  %3758 = vmatprep.subr.mxu1 %v3649_v61  ;;  %v4065_v50 = vpop.permute.xlu1 %4064  ;;  %v11786_v18 = vld [vmem:[%s15100_s28 + $0x8] sm:$0xff]  ;;  %s12235_s28 = smov 10  }
 0x438   :  { %3759 = vmatpush1.msra.mxu1 %v3648_v15  ;;  %v4073_v14 = vsel %vm15077_vm4, %v4065_v50, %v4067_v13  ;;  %3792 = vmatprep.mubr.f32.mxu1 %v13214_v33  ;;  %v4247_v49 = vcombine.high %v11786_v18, %v11786_v18 }
 0x439   :  { %4113 = vmatprep.subr.mxu0 %v4073_v14 }
 0x43b   :  { %v3856_v0 = vpop.permute.xlu0 %3855  ;;  %11293 = vmatmul.mubr.msk.f32.vlgmr.msra.gmra.mxu1 %vm2447_vm2, %v13288_v59  ;;  %v4069_v11 = vpop.permute.xlu1 %4068  ;;  %v13383_v59 = vld [vmem:[#allocation8 + $0x10] sm:$0xff] }
 0x43c   :  { %v3862_v63 = vsel %vm1922_vm0, %v3856_v0, %v3858_v23  ;;  %v3861_v58 = vsel %vm1922_vm0, %v3854_v42, %v3856_v0  ;;  %4005 = vmatprep.mubr.f32.mxu1 %v13214_v33  ;;  %v4074_v47 = vsel %vm15077_vm4, %v4067_v13, %v4069_v11  ;;  %v4496_v38 = vrot.slane %v13383_v59, %v12473_v3  ;;  %v13949_v3 = vld [vmem:[#allocation17 + $0x108] sm:$0xff] }
 0x43d   :  { %3971 = vmatprep.subr.mxu1 %v3862_v63  ;;  %15197 = vst [vmem:[#allocation112_spill] sm:$0xff] %v13949_v3 }
 0x43e   :  { %3972 = vmatpush1.msra.mxu1 %v3861_v58  ;;  %4509 = vrot.lane.b32.xlu0 %v4496_v38, %s12219_s17 }
 0x43f   :  { %v4071_v62 = vpop.permute.xlu0 %4070  ;;  %11295 = vmatmul.mubr.msk.f32.vlgmr.msra.gmra.mxu1 %vm2447_vm2, %v2348_v34  ;;  %v4063_v36 = vpop.permute.xlu1 %4062 }
 0x440   :  { %v4072_v48 = vsel %vm15077_vm4, %v4063_v36, %v4065_v50  ;;  %v4075_v43 = vsel %vm15077_vm4, %v4069_v11, %v4071_v62  ;;  %4218 = vmatprep.mubr.f32.mxu1 %v13214_v33 }
 0x441   :  { %4114 = vmatpush1.msra.mxu0 %v4072_v48  ;;  %4184 = vmatprep.subr.mxu1 %v4075_v43 }
 0x442   :  { %11300 = vmatmul.mubr.msk.f32.vlgmr.msra.gmra.mxu0 %vm2447_vm2, %v2349_v40  ;;  %4185 = vmatpush1.msra.mxu1 %v4074_v47 }
 0x443   :  { %11301 = vmatmul.mubr.msk.f32.vlgmr.msra.gmra.mxu1 %vm2447_vm2, %v2349_v40  ;;  %11302 = vmatprep.subr.msk.mxu0 %vm350_vm7, %v4246_v16 }
 0x444   :  { %11303 = vmatpush1.msk.msra.mxu0 %vm350_vm7, %v11785_v5  ;;  %4323 = vmatprep.mubr.f32.mxu0 %v13214_v33 }
 0x445   :  { %11305 = vmatprep.subr.msk.mxu1 %vm350_vm7, %v4247_v49  ;;  %4394 = vmatprep.mubr.f32.mxu1 %v13214_v33 }
 0x446   :  { %11304 = vmatmul.mubr.msk.f32.vlgmr.msra.gmra.mxu0 %vm15118_vm12, %v4239_v30  ;;  %11306 = vmatpush1.msk.msra.mxu1 %vm350_vm7, %v11786_v18  ;;  %vm15124_vm7 = vcmask 261120  }
 0x447   :  { %11307 = vmatmul.mubr.msk.f32.vlgmr.msra.gmra.mxu1 %vm15119_vm13, %v4239_v30  ;;  %4619 = vmatprep.mubr.f32.mxu0 %v13214_v33  ;;  %vm15125_vm12 = vmmov %vm15124_vm7 }
 0x448   :  { %4696 = vmatprep.mubr.f32.mxu1 %v13214_v33  ;;  %vm15126_vm13 = vmmov %vm15124_vm7 }
 0x4c3   :  { %v2517_v2 = vpop.f32.mrf.mxu0 }
 0x4c5   :  { %v2519_v28 = vpop.f32.mrf.mxu0 }
 0x4c7   :  { %v2662_v19 = vpop.f32.mrf.mxu0 }
 0x4c8   :  { %v2663_v10 = vadd.f32 %v2662_v19, %v2517_v2 }
 0x4c9   :  { %v2664_v20 = vpop.f32.mrf.mxu0 }
 0x4ca   :  { %v2665_v26 = vadd.f32 %v2664_v20, %v2519_v28 }
 0x4cb   :  { %v2871_v17 = vpop.f32.mrf.mxu0 }
 0x4cc   :  { %v2947_v60 = vadd.f32 %v2871_v17, %v2663_v10 }
 0x4cd   :  { %v2873_v45 = vpop.f32.mrf.mxu0 }
 0x4ce   :  { %v2948_v52 = vadd.f32 %v2873_v45, %v2665_v26  ;;  %v4244_v26 = vpop.permute.xlu1 %4243 }
 0x4cf   :  { %v3084_v35 = vpop.f32.mrf.mxu0 }
 0x4d0   :  { %v3160_v13 = vadd.f32 %v3084_v35, %v2947_v60 }
 0x4d1   :  { %v3086_v42 = vpop.f32.mrf.mxu0 }
 0x4d2   :  { %v3161_v15 = vadd.f32 %v3086_v42, %v2948_v52  ;;  %v4233_v52 = vpop.permute.xlu0 %4232 }
 0x4d3   :  { %v3297_v1 = vpop.f32.mrf.mxu0 }
 0x4d4   :  { %v3373_v11 = vadd.f32 %v3297_v1, %v3160_v13 }
 0x4d5   :  { %v3299_v32 = vpop.f32.mrf.mxu0 }
 0x4d6   :  { %v3374_v5 = vadd.f32 %v3299_v32, %v3161_v15 }
 0x4db   :  { %v3510_v9 = vpop.f32.mrf.mxu0 }
 0x4dc   :  { %v3586_v48 = vadd.f32 %v3510_v9, %v3373_v11 }
 0x4dd   :  { %v3512_v61 = vpop.f32.mrf.mxu0 }
 0x4de   :  { %v3587_v30 = vadd.f32 %v3512_v61, %v3374_v5 }
 0x4e2   :  { %v3723_v0 = vpop.f32.mrf.mxu0 }
 0x4e3   :  { %v2588_v21 = vpop.f32.mrf.mxu1  ;;  %v3799_v57 = vadd.f32 %v3723_v0, %v3586_v48 }
 0x4e4   :  { %v3725_v40 = vpop.f32.mrf.mxu0 }
 0x4e5   :  { %v2590_v55 = vpop.f32.mrf.mxu1  ;;  %v3800_v17 = vadd.f32 %v3725_v40, %v3587_v30 }
 0x4e7   :  { %v2733_v31 = vpop.f32.mrf.mxu1 }
 0x4e8   :  { %v2734_v63 = vadd.f32 %v2733_v31, %v2588_v21 }
 0x4e9   :  { %v2735_v24 = vpop.f32.mrf.mxu1 }
 0x4ea   :  { %v2736_v16 = vadd.f32 %v2735_v24, %v2590_v55 }
 0x4eb   :  { %v2942_v23 = vpop.f32.mrf.mxu1 }
 0x4ec   :  { %v2949_v62 = vadd.f32 %v2942_v23, %v2734_v63 }
 0x4ed   :  { %v2944_v34 = vpop.f32.mrf.mxu1 }
 0x4ee   :  { %v2950_v43 = vadd.f32 %v2944_v34, %v2736_v16 }
 0x4ef   :  { %v3155_v53 = vpop.f32.mrf.mxu1 }
 0x4f0   :  { %v3162_v18 = vadd.f32 %v3155_v53, %v2949_v62 }
 0x4f1   :  { %v3157_v12 = vpop.f32.mrf.mxu1 }
 0x4f2   :  { %v3936_v47 = vpop.f32.mrf.mxu0  ;;  %v3163_v56 = vadd.f32 %v3157_v12, %v2950_v43 }
 0x4f3   :  { %v3368_v50 = vpop.f32.mrf.mxu1  ;;  %v4012_v45 = vadd.f32 %v3936_v47, %v3799_v57  ;;  %v4884_v57 = vrot.slane %v13389_v41, %v12476_v4 }
 0x4f4   :  { %v3375_v44 = vadd.f32 %v3368_v50, %v3162_v18  ;;  %v3938_v20 = vpop.f32.mrf.mxu0 }
 0x4f5   :  { %v3370_v14 = vpop.f32.mrf.mxu1  ;;  %v4013_v1 = vadd.f32 %v3938_v20, %v3800_v17  ;;  %v5116_v20 = vrot.slane %v13389_v41, %v12486_v8  ;;  %v5336_v17 = vrot.slane %v13374_v54, %v12545_v25 }
 0x4f6   :  { %v3376_v2 = vadd.f32 %v3370_v14, %v3163_v56  ;;  %v4872_v56 = vrot.slane %v13374_v54, %v12476_v4 }
 0x4f7   :  { %v3581_v58 = vpop.f32.mrf.mxu1 }
 0x4f8   :  { %v3588_v28 = vadd.f32 %v3581_v58, %v3375_v44  ;;  %v4876_v44 = vrot.slane %v13379_v51, %v12476_v4 }
 0x4f9   :  { %v3583_v36 = vpop.f32.mrf.mxu1 }
 0x4fa   :  { %v3589_v35 = vadd.f32 %v3583_v36, %v3376_v2  ;;  %v5104_v2 = vrot.slane %v13374_v54, %v12486_v8 }
 0x4fb   :  { %v3794_v49 = vpop.f32.mrf.mxu1 }
 0x4fc   :  { %v3801_v42 = vadd.f32 %v3794_v49, %v3588_v28  ;;  %v5108_v28 = vrot.slane %v13379_v51, %v12486_v8 }
 0x4fd   :  { %v3796_v38 = vpop.f32.mrf.mxu1 }
 0x4fe   :  { %v3802_v31 = vadd.f32 %v3796_v38, %v3589_v35  ;;  %v4880_v38 = vrot.slane %v13383_v59, %v12476_v4  ;;  %v5344_v35 = vrot.slane %v13383_v59, %v12545_v25  ;;  %v13955_v4 = vld [vmem:[#allocation17 + $0x180] sm:$0xff] }
 0x4ff   :  { %v4007_v19 = vpop.f32.mrf.mxu1  ;;  %15199 = vst [vmem:[#allocation114_spill] sm:$0xff] %v13955_v4 }
 0x500   :  { %v4014_v24 = vadd.f32 %v4007_v19, %v3801_v42  ;;  %v5112_v19 = vrot.slane %v13383_v59, %v12486_v8  ;;  %v5348_v42 = vrot.slane %v13389_v41, %v12545_v25  ;;  %v13943_v8 = vld [vmem:[#allocation17 + $0x188] sm:$0xff] }
 0x501   :  { %v4009_v21 = vpop.f32.mrf.mxu1  ;;  %15195 = vst [vmem:[#allocation110_spill] sm:$0xff] %v13943_v8 }
 0x502   :  { %v4149_v55 = vpop.f32.mrf.mxu0  ;;  %v4015_v34 = vadd.f32 %v4009_v21, %v3802_v31  ;;  %v5568_v21 = vrot.slane %v13374_v54, %v12558_v29  ;;  %v5580_v31 = vrot.slane %v13389_v41, %v12558_v29 }
 0x503   :  { %v4225_v32 = vadd.f32 %v4149_v55, %v4012_v45  ;;  %v4220_v10 = vpop.f32.mrf.mxu1  ;;  %v5340_v45 = vrot.slane %v13379_v51, %v12545_v25  ;;  %v5572_v55 = vrot.slane %v13379_v51, %v12558_v29  ;;  %v13952_v25 = vld [vmem:[#allocation17 + $0x88] sm:$0xff] }
 0x504   :  { %v4151_v23 = vpop.f32.mrf.mxu0  ;;  %v4227_v9 = vadd.f32 %v4220_v10, %v4014_v24  ;;  %v5800_v24 = vrot.slane %v13374_v54, %v12601_v39  ;;  %v5808_v10 = vrot.slane %v13383_v59, %v12601_v39  ;;  %15198 = vst [vmem:[#allocation113_spill] sm:$0xff] %v13952_v25 }
 0x505   :  { %v4226_v60 = vadd.f32 %v4151_v23, %v4013_v1  ;;  %v4222_v53 = vpop.f32.mrf.mxu1  ;;  %v4235_v61 = vadd.f32 %v4233_v52, %v4225_v32  ;;  %v5576_v1 = vrot.slane %v13383_v59, %v12558_v29  ;;  %v5804_v32 = vrot.slane %v13379_v51, %v12601_v39  ;;  %v13940_v29 = vld [vmem:[#allocation17 + $0x90] sm:$0xff] }
 0x506   :  { %v4325_v12 = vpop.f32.mrf.mxu0  ;;  %v4228_v13 = vadd.f32 %v4222_v53, %v4015_v34  ;;  %v4237_v11 = vadd.f32 %v4233_v52, %v4227_v9  ;;  %v5812_v23 = vrot.slane %v13389_v41, %v12601_v39  ;;  %v6036_v34 = vrot.slane %v13379_v51, %v12622_v46  ;;  %v4506_v53 = vpop.permute.xlu0 %4505  ;;  %15194 = vst [vmem:[#allocation109_spill] sm:$0xff] %v13940_v29  ;;  %v13946_v39 = vld [vmem:[#allocation17 + $0x10] sm:$0xff] }
 0x507   :  { %v4326_v50 = vadd.f32 %v4325_v12, %v4244_v26  ;;  %v4396_v15 = vpop.f32.mrf.mxu1  ;;  %v4236_v63 = vadd.f32 %v4233_v52, %v4226_v60  ;;  %v6040_v9 = vrot.slane %v13383_v59, %v12622_v46  ;;  %v6044_v60 = vrot.slane %v13389_v41, %v12622_v46  ;;  %15196 = vst [vmem:[#allocation111_spill] sm:$0xff] %v13946_v39 }
 0x508   :  { %v4397_v14 = vadd.f32 %v4396_v15, %v4244_v26  ;;  %v4327_v0 = vpop.f32.mrf.mxu0  ;;  %v4238_v36 = vadd.f32 %v4233_v52, %v4228_v13  ;;  %v4508_v52 = vpop.permute.xlu1 %4507 }
 0x509   :  { %v4328_v58 = vadd.f32 %v4327_v0, %v4244_v26  ;;  %v4398_v5 = vpop.f32.mrf.mxu1  ;;  %v4401_v16 = vadd.f32 %v4326_v50, %v4235_v61 }
 0x50a   :  { %v4399_v62 = vadd.f32 %v4398_v5, %v4244_v26  ;;  %v4403_v40 = vadd.f32 %v4397_v14, %v4237_v11  ;;  %v6032_v26 = vrot.slane %v13374_v54, %v12622_v46  ;;  %v4510_v12 = vpop.permute.xlu0 %4509  ;;  %v4513_v5 = vsel %vm14990_vm9, %v4506_v53, %v4508_v52  ;;  %v13937_v46 = vld [vmem:[#allocation17 + $0x110] sm:$0xff] }
 0x50b   :  { %v4402_v48 = vadd.f32 %v4328_v58, %v4236_v63  ;;  %v13394_v43 = vmax.f32 %v4401_v16, 0.0  ;;  %15193 = vst [vmem:[#allocation108_spill] sm:$0xff] %v13937_v46 }
 0x50c   :  { %v4404_v49 = vadd.f32 %v4399_v62, %v4238_v36  ;;  %v13400_v47 = vmax.f32 %v4403_v40, 0.0  ;;  %v4512_v61 = vpop.permute.xlu1 %4511 }
 0x50d   :  { %15120 = vst [vmem:[#allocation53_spill] sm:$0xff] %v13394_v43  ;;  %v13396_v18 = vmax.f32 %v4402_v48, 0.0  ;;  %4413 = vrot.lane.b32.xlu0 %v13394_v43, %s12218_s4  ;;  %v13958_v43 = vld [vmem:[#allocation17 + $0x8] sm:$0xff] }
 0x50e   :  { %15122 = vst [vmem:[#allocation55_spill] sm:$0xff] %v13400_v47  ;;  %v13404_v30 = vmax.f32 %v4404_v49, 0.0  ;;  %15200 = vst [vmem:[#allocation115_spill] sm:$0xff] %v13958_v43 }
 0x50f   :  { %15121 = vst [vmem:[#allocation54_spill] sm:$0xff] %v13396_v18  ;;  %4415 = vrot.lane.b32.xlu1 %v13396_v18, %s12218_s4 }
 0x510   :  { %15123 = vst [vmem:[#allocation56_spill] sm:$0xff] %v13404_v30 }
 0x511   :  { %4417 = vrot.lane.b32.xlu0 %v13400_v47, %s12218_s4  ;;  %v13961_v47 = vld [vmem:[#allocation17 + $0x100] sm:$0xff] }
 0x512   :  { %15201 = vst [vmem:[#allocation116_spill] sm:$0xff] %v13961_v47 }
 0x513   :  { %4419 = vrot.lane.b32.xlu1 %v13404_v30, %s12218_s4 }
 0x515   :  { %4889 = vrot.lane.b32.xlu0 %v4872_v56, %s12220_s12 }
 0x517   :  { %4891 = vrot.lane.b32.xlu1 %v4876_v44, %s12220_s12 }
 0x519   :  { %4893 = vrot.lane.b32.xlu0 %v4880_v38, %s12220_s12 }
 0x51b   :  { %4895 = vrot.lane.b32.xlu1 %v4884_v57, %s12220_s12 }
 0x51d   :  { %5121 = vrot.lane.b32.xlu0 %v5104_v2, %s12221_s7 }
 0x51f   :  { %5123 = vrot.lane.b32.xlu1 %v5108_v28, %s12221_s7 }
 0x521   :  { %5125 = vrot.lane.b32.xlu0 %v5112_v19, %s12221_s7  ;;  %v4515_v19 = vsel %vm14990_vm9, %v4510_v12, %v4512_v61 }
 0x523   :  { %5127 = vrot.lane.b32.xlu1 %v5116_v20, %s12221_s7 }
 0x525   :  { %5353 = vrot.lane.b32.xlu0 %v5336_v17, %s12218_s4 }
 0x527   :  { %5355 = vrot.lane.b32.xlu1 %v5340_v45, %s12218_s4 }
 0x529   :  { %5357 = vrot.lane.b32.xlu0 %v5344_v35, %s12218_s4 }
 0x52b   :  { %5359 = vrot.lane.b32.xlu1 %v5348_v42, %s12218_s4 }
 0x52d   :  { %5585 = vrot.lane.b32.xlu0 %v5568_v21, %s12222_s11 }
 0x52f   :  { %5587 = vrot.lane.b32.xlu1 %v5572_v55, %s12222_s11 }
 0x531   :  { %5589 = vrot.lane.b32.xlu0 %v5576_v1, %s12222_s11 }
 0x533   :  { %5591 = vrot.lane.b32.xlu1 %v5580_v31, %s12222_s11 }
 0x535   :  { %5817 = vrot.lane.b32.xlu0 %v5800_v24, %s12196_s8 }
 0x537   :  { %5819 = vrot.lane.b32.xlu1 %v5804_v32, %s12196_s8 }
 0x539   :  { %5821 = vrot.lane.b32.xlu0 %v5808_v10, %s12196_s8 }
 0x53b   :  { %5823 = vrot.lane.b32.xlu1 %v5812_v23, %s12196_s8 }
 0x53d   :  { %6049 = vrot.lane.b32.xlu0 %v6032_v26, %s12223_s27 }
 0x53f   :  { %6051 = vrot.lane.b32.xlu1 %v6036_v34, %s12223_s27 }
 0x541   :  { %6053 = vrot.lane.b32.xlu0 %v6040_v9, %s12223_s27 }
 0x543   :  { %6055 = vrot.lane.b32.xlu1 %v6044_v60, %s12223_s27 }
 0x545   :  { %6283 = vrot.lane.b32.xlu0 %v13015_v7, %s12224_s14  ;;  %v4514_v7 = vsel %vm14990_vm9, %v4508_v52, %v4510_v12 }
 0x547   :  { %6281 = vrot.lane.b32.xlu1 %v13003_v37, %s12224_s14 }
 0x549   :  { %6287 = vrot.lane.b32.xlu0 %v13019_v22, %s12224_s14 }
 0x54b   :  { %6285 = vrot.lane.b32.xlu1 %v13010_v6, %s12224_s14 }
 0x57f   :  { %v4414_v13 = vpop.permute.xlu0 %4413 }
 0x580   :  { %4429 = vst.msk [vmem:[#allocation3] sm:$0xff] %vm2335_vm15, %v4414_v13 }
 0x581   :  { %v4416_v50 = vpop.permute.xlu1 %4415 }
 0x582   :  { %v13502_v63 = vsel %vm348_vm5, %v4414_v13, %v4416_v50 }
 0x583   :  { %v4418_v15 = vpop.permute.xlu0 %4417  ;;  %v4522_v62 = vmul.f32 %v4513_v5, %v13502_v63 }
 0x584   :  { %v13493_v14 = vsel %vm348_vm5, %v4416_v50, %v4418_v15 }
 0x585   :  { %v4420_v37 = vpop.permute.xlu1 %4419  ;;  %v4523_v22 = vmul.f32 %v4514_v7, %v13493_v14 }
 0x586   :  { %4433 = vst.msk [vmem:[#allocation3 + $0x20] sm:$0xff] %vm348_vm5, %v4420_v37  ;;  %v13516_v57 = vsel %vm348_vm5, %v4418_v15, %v4420_v37 }
 0x587   :  { %v13497_v6 = vld [vmem:[#allocation3] sm:$0xff]  ;;  %v4890_v0 = vpop.permute.xlu0 %4889  ;;  %4535 = vrot.lane.b32.xlu1 %v4523_v22, %s12226_s13  ;;  %v4524_v17 = vmul.f32 %v4515_v19, %v13516_v57 }
 0x588   :  { %v4521_v11 = vmul.f32 %v4506_v53, %v13497_v6  ;;  %v4905_v35 = vmul.f32 %v4890_v0, %v13497_v6 }
 0x589   :  { %v4892_v58 = vpop.permute.xlu1 %4891 }
 0x58a   :  { %4531 = vrot.lane.b32.xlu0 %v4521_v11, %s12226_s13  ;;  %v4897_v56 = vsel %vm809_vm10, %v4890_v0, %v4892_v58 }
 0x58b   :  { %v4894_v16 = vpop.permute.xlu0 %4893  ;;  %v4906_v28 = vmul.f32 %v4897_v56, %v13502_v63 }
 0x58c   :  { %v4898_v36 = vsel %vm809_vm10, %v4892_v58, %v4894_v16 }
 0x58d   :  { %v13508_v40 = vld [vmem:[#allocation3 + $0x20] sm:$0xff]  ;;  %v4896_v48 = vpop.permute.xlu1 %4895  ;;  %v4907_v38 = vmul.f32 %v4898_v36, %v13493_v14 }
 0x58e   :  { %4533 = vrot.lane.b32.xlu0 %v4522_v62, %s12226_s13  ;;  %v4525_v49 = vmul.f32 %v4512_v61, %v13508_v40  ;;  %v4909_v55 = vmul.f32 %v4896_v48, %v13508_v40  ;;  %v4899_v34 = vsel %vm809_vm10, %v4894_v16, %v4896_v48 }
 0x58f   :  { %v5122_v44 = vpop.permute.xlu0 %5121  ;;  %v4908_v12 = vmul.f32 %v4899_v34, %v13516_v57 }
 0x590   :  { %4539 = vrot.lane.b32.xlu1 %v4525_v49, %s12226_s13  ;;  %v5137_v9 = vmul.f32 %v5122_v44, %v13497_v6 }
 0x591   :  { %v5124_v2 = vpop.permute.xlu1 %5123 }
 0x592   :  { %4919 = vrot.lane.b32.xlu0 %v4907_v38, %s12225_s3  ;;  %v5129_v1 = vsel %vm1027_vm11, %v5122_v44, %v5124_v2 }
 0x593   :  { %v5126_v20 = vpop.permute.xlu0 %5125  ;;  %v5138_v10 = vmul.f32 %v5129_v1, %v13502_v63 }
 0x594   :  { %4917 = vrot.lane.b32.xlu1 %v4906_v28, %s12225_s3  ;;  %v5130_v42 = vsel %vm1027_vm11, %v5124_v2, %v5126_v20 }
 0x595   :  { %v5128_v45 = vpop.permute.xlu1 %5127  ;;  %v5139_v24 = vmul.f32 %v5130_v42, %v13493_v14 }
 0x596   :  { %4537 = vrot.lane.b32.xlu0 %v4524_v17, %s12226_s13  ;;  %v5141_v26 = vmul.f32 %v5128_v45, %v13508_v40  ;;  %v5131_v22 = vsel %vm1027_vm11, %v5126_v20, %v5128_v45 }
 0x597   :  { %v5354_v21 = vpop.permute.xlu0 %5353  ;;  %v5140_v58 = vmul.f32 %v5131_v22, %v13516_v57 }
 0x598   :  { %4915 = vrot.lane.b32.xlu1 %v4905_v35, %s12225_s3  ;;  %v5369_v0 = vmul.f32 %v5354_v21, %v13497_v6 }
 0x599   :  { %v5356_v31 = vpop.permute.xlu1 %5355 }
 0x59a   :  { %4923 = vrot.lane.b32.xlu0 %v4909_v55, %s12225_s3  ;;  %v5361_v61 = vsel %vm348_vm5, %v5354_v21, %v5356_v31 }
 0x59b   :  { %v5358_v32 = vpop.permute.xlu0 %5357  ;;  %v5370_v50 = vmul.f32 %v5361_v61, %v13502_v63 }
 0x59c   :  { %5151 = vrot.lane.b32.xlu1 %v5139_v24, %s12227_s26  ;;  %v5362_v53 = vsel %vm348_vm5, %v5356_v31, %v5358_v32 }
 0x59d   :  { %v5360_v23 = vpop.permute.xlu1 %5359  ;;  %v5371_v13 = vmul.f32 %v5362_v53, %v13493_v14 }
 0x59e   :  { %5149 = vrot.lane.b32.xlu0 %v5138_v10, %s12227_s26  ;;  %v5373_v37 = vmul.f32 %v5360_v23, %v13508_v40  ;;  %v5363_v48 = vsel %vm348_vm5, %v5358_v32, %v5360_v23 }
 0x59f   :  { %v5586_v60 = vpop.permute.xlu0 %5585  ;;  %v5372_v56 = vmul.f32 %v5363_v48, %v13516_v57  ;;  %v6494_v48 = vld [vmem:[#allocation13 + $0x8] sm:$0xff] }
 0x5a0   :  { %5155 = vrot.lane.b32.xlu1 %v5141_v26, %s12227_s26  ;;  %v5601_v2 = vmul.f32 %v5586_v60, %v13497_v6 }
 0x5a1   :  { %v5588_v52 = vpop.permute.xlu1 %5587 }
 0x5a2   :  { %5147 = vrot.lane.b32.xlu0 %v5137_v9, %s12227_s26  ;;  %v5593_v62 = vsel %vm332_vm1, %v5586_v60, %v5588_v52 }
 0x5a3   :  { %v5590_v15 = vpop.permute.xlu0 %5589  ;;  %v5602_v49 = vmul.f32 %v5593_v62, %v13502_v63 }
 0x5a4   :  { %4921 = vrot.lane.b32.xlu1 %v4908_v12, %s12225_s3  ;;  %v5594_v11 = vsel %vm332_vm1, %v5588_v52, %v5590_v15 }
 0x5a5   :  { %v5592_v7 = vpop.permute.xlu1 %5591  ;;  %v5603_v36 = vmul.f32 %v5594_v11, %v13493_v14 }
 0x5a6   :  { %5383 = vrot.lane.b32.xlu0 %v5371_v13, %s12228_s19  ;;  %v5605_v19 = vmul.f32 %v5592_v7, %v13508_v40  ;;  %v5595_v35 = vsel %vm332_vm1, %v5590_v15, %v5592_v7 }
 0x5a7   :  { %v5818_v5 = vpop.permute.xlu0 %5817  ;;  %v5604_v55 = vmul.f32 %v5595_v35, %v13516_v57 }
 0x5a8   :  { %5381 = vrot.lane.b32.xlu1 %v5370_v50, %s12228_s19  ;;  %v5833_v1 = vmul.f32 %v5818_v5, %v13497_v6 }
 0x5a9   :  { %v5820_v16 = vpop.permute.xlu1 %5819 }
 0x5aa   :  { %5387 = vrot.lane.b32.xlu0 %v5373_v37, %s12228_s19  ;;  %v5825_v20 = vsel %vm15125_vm12, %v5818_v5, %v5820_v16 }
 0x5ab   :  { %v5822_v44 = vpop.permute.xlu0 %5821  ;;  %v5834_v42 = vmul.f32 %v5825_v20, %v13502_v63 }
 0x5ac   :  { %5379 = vrot.lane.b32.xlu1 %v5369_v0, %s12228_s19  ;;  %v5826_v28 = vsel %vm15124_vm7, %v5820_v16, %v5822_v44  ;;  %vm15127_vm7 = vcmask 269312  }
 0x5ad   :  { %v5824_v38 = vpop.permute.xlu1 %5823  ;;  %v5835_v17 = vmul.f32 %v5826_v28, %v13493_v14  ;;  %vm15128_vm12 = vmmov %vm15127_vm7 }
 0x5ae   :  { %5153 = vrot.lane.b32.xlu0 %v5140_v58, %s12227_s26  ;;  %v5827_v24 = vsel %vm15126_vm13, %v5822_v44, %v5824_v38  ;;  %v5837_v32 = vmul.f32 %v5824_v38, %v13508_v40  ;;  %vm15129_vm13 = vmmov %vm15127_vm7  ;;  %v4471_v44 = vrot.slane %v13379_v51, %v12786_v27 }
 0x5af   :  { %v6050_v21 = vpop.permute.xlu0 %6049  ;;  %v5836_v26 = vmul.f32 %v5827_v24, %v13516_v57 }
 0x5b0   :  { %5615 = vrot.lane.b32.xlu1 %v5603_v36, %s12229_s0  ;;  %v6065_v52 = vmul.f32 %v6050_v21, %v13497_v6  ;;  %v6493_v36 = vld [vmem:[#allocation13] sm:$0xff]  ;;  %v4481_v20 = vmul.f32 %v4471_v44, %v13502_v63 }
 0x5b1   :  { %v6052_v45 = vpop.permute.xlu1 %6051  ;;  %v4443_v44 = vld [vmem:[%s15133_s15 + $0x48] sm:$0xff] }
 0x5b2   :  { %5613 = vrot.lane.b32.xlu0 %v5602_v49, %s12229_s0  ;;  %v6057_v23 = vsel %vm15127_vm7, %v6050_v21, %v6052_v45  ;;  %vm15130_vm7 = vcmask 277504  }
 0x5b3   :  { %v6054_v10 = vpop.permute.xlu0 %6053  ;;  %v6066_v9 = vmul.f32 %v6057_v23, %v13502_v63  ;;  %vm15132_vm9 = vmmov %vm15130_vm7 }
 0x5b4   :  { %5385 = vrot.lane.b32.xlu1 %v5372_v56, %s12228_s19  ;;  %v6058_v34 = vsel %vm15128_vm12, %v6052_v45, %v6054_v10  ;;  %vm15131_vm12 = vmmov %vm15130_vm7 }
 0x5b5   :  { %v6056_v31 = vpop.permute.xlu1 %6055  ;;  %v6067_v53 = vmul.f32 %v6058_v34, %v13493_v14  ;;  %v4438_v34 = vld [vmem:[%s15133_s15 + $0x20] sm:$0xff] }
 0x5b6   :  { %5611 = vrot.lane.b32.xlu0 %v5601_v2, %s12229_s0  ;;  %v6059_v61 = vsel %vm15129_vm13, %v6054_v10, %v6056_v31  ;;  %v6069_v13 = vmul.f32 %v6056_v31, %v13508_v40 }
 0x5b7   :  { %v6284_v12 = vpop.permute.xlu0 %6283  ;;  %v6068_v7 = vmul.f32 %v6059_v61, %v13516_v57 }
 0x5b8   :  { %5619 = vrot.lane.b32.xlu1 %v5605_v19, %s12229_s0  ;;  %v4436_v19 = vld [vmem:[%s15133_s15 + $0x10] sm:$0xff] }
 0x5b9   :  { %v6282_v60 = vpop.permute.xlu1 %6281 }
 0x5ba   :  { %5847 = vrot.lane.b32.xlu0 %v5835_v17, %s12230_s16  ;;  %v6289_v15 = vsel %vm15130_vm7, %v6282_v60, %v6284_v12  ;;  %v6297_v62 = vmul.f32 %v6282_v60, %v13497_v6 }
 0x5bb   :  { %v6298_v22 = vmul.f32 %v6289_v15, %v13502_v63  ;;  %v6288_v0 = vpop.permute.xlu0 %6287  ;;  %v4440_v15 = vld [vmem:[%s15133_s15 + $0x30] sm:$0xff] }
 0x5bc   :  { %5845 = vrot.lane.b32.xlu1 %v5834_v42, %s12230_s16  ;;  %v6301_v16 = vmul.f32 %v6288_v0, %v13508_v40  ;;  %v4467_v40 = vrot.slane %v13374_v54, %v12786_v27  ;;  %v4437_v54 = vld [vmem:[%s15133_s15 + $0x18] sm:$0xff]  ;;  %v4479_v42 = vrot.slane %v13389_v41, %v12786_v27  ;;  %v4434_v41 = vld [vmem:[%s15133_s15] sm:$0xff] }
 0x5bd   :  { %v6286_v50 = vpop.permute.xlu1 %6285 }
 0x5be   :  { %5617 = vrot.lane.b32.xlu0 %v5604_v55, %s12229_s0  ;;  %v6290_v37 = vsel %vm15131_vm12, %v6284_v12, %v6286_v50  ;;  %v6291_v11 = vsel %vm15132_vm9, %v6286_v50, %v6288_v0  ;;  %v4480_v45 = vmul.f32 %v4467_v40, %v13497_v6  ;;  %vm15134_vm9 = vcmask 1031168   ;;  %v4441_v0 = vld [vmem:[%s15133_s15 + $0x38] sm:$0xff] }
 0x5bf   :  { %v6299_v58 = vmul.f32 %v6290_v37, %v13493_v14  ;;  %v6300_v5 = vmul.f32 %v6291_v11, %v13516_v57  ;;  %v4475_v6 = vrot.slane %v13383_v59, %v12786_v27  ;;  %v4483_v31 = vmul.f32 %v4479_v42, %v13516_v57  ;;  %vm15135_vm13 = vmmov %vm15134_vm9  ;;  %v4435_v57 = vld [vmem:[%s15133_s15 + $0x8] sm:$0xff] }
 0x5c0   :  { %5843 = vrot.lane.b32.xlu1 %v5833_v1, %s12230_s16  ;;  %vm15136_vm7 = vmmov %vm15134_vm9  ;;  %v13934_v27 = vld [vmem:[#allocation17 + $0x18] sm:$0xff] }
 0x5c1   :  { %v4482_v59 = vmul.f32 %v4475_v6, %v13493_v14  ;;  %vm15137_vm12 = vmmov %vm15136_vm7  ;;  %15192 = vst [vmem:[#allocation107_spill] sm:$0xff] %v13934_v27 }
 0x5c2   :  { %5851 = vrot.lane.b32.xlu0 %v5837_v32, %s12230_s16 }
 0x5c4   :  { %5849 = vrot.lane.b32.xlu1 %v5836_v26, %s12230_s16 }
 0x5c6   :  { %6077 = vrot.lane.b32.xlu0 %v6066_v9, %s12231_s9 }
 0x5c8   :  { %6079 = vrot.lane.b32.xlu1 %v6067_v53, %s12231_s9 }
 0x5ca   :  { %6075 = vrot.lane.b32.xlu0 %v6065_v52, %s12231_s9  ;;  %v13658_v52 = vld [vmem:[#allocation4] sm:$0xff] }
 0x5cc   :  { %6083 = vrot.lane.b32.xlu1 %v6069_v13, %s12231_s9 }
 0x5ce   :  { %6081 = vrot.lane.b32.xlu0 %v6068_v7, %s12231_s9 }
 0x5d0   :  { %6309 = vrot.lane.b32.xlu1 %v6298_v22, %s12233_s21 }
 0x5d2   :  { %6311 = vrot.lane.b32.xlu0 %v6299_v58, %s12233_s21 }
 0x5d4   :  { %6313 = vrot.lane.b32.xlu1 %v6300_v5, %s12233_s21 }
 0x5d6   :  { %6315 = vrot.lane.b32.xlu0 %v6301_v16, %s12233_s21 }
 0x5d8   :  { %6307 = vrot.lane.b32.xlu1 %v6297_v62, %s12233_s21 }
 0x5da   :  { %6497 = vperm.xlu0 %11776, %v6493_v36   ;;  %v4442_v36 = vld [vmem:[%s15133_s15 + $0x40] sm:$0xff] }
 0x5dc   :  { %6502 = vperm.xlu1 %11777, %v6494_v48  }
 0x5f9   :  { %v4536_v56 = vpop.permute.xlu1 %4535 }
 0x5fc   :  { %v4532_v49 = vpop.permute.xlu0 %4531 }
 0x600   :  { %v4534_v38 = vpop.permute.xlu0 %4533 }
 0x601   :  { %v4542_v2 = vsel %vm462_vm14, %v4534_v38, %v4536_v56  ;;  %v4541_v28 = vsel %vm462_vm14, %v4532_v49, %v4534_v38 }
 0x602   :  { %4585 = vmatprep.subr.mxu0 %v4542_v2  ;;  %v4540_v17 = vpop.permute.xlu1 %4539 }
 0x603   :  { %4586 = vmatpush1.msra.mxu0 %v4541_v28 }
 0x604   :  { %v4920_v51 = vpop.permute.xlu0 %4919  ;;  %11308 = vmatmul.mubr.msk.f32.vlgmr.msra.gmra.mxu0 %vm2447_vm2, %v4436_v19  ;;  %4745 = vmatprep.subr.mxu0 %v4481_v20  ;;  %v4444_v20 = vld [vmem:[%s15133_s15 + $0x50] sm:$0xff] }
 0x605   :  { %4746 = vmatpush1.msra.mxu0 %v4480_v45  ;;  %4625 = vmatprep.mubr.f32.mxu0 %v13214_v33 }
 0x606   :  { %v4918_v35 = vpop.permute.xlu1 %4917 }
 0x607   :  { %v4926_v63 = vsel %vm15134_vm9, %v4918_v35, %v4920_v51  ;;  %vm15138_vm9 = vcmask 908288  }
 0x608   :  { %v4538_v21 = vpop.permute.xlu0 %4537  ;;  %11309 = vmatmul.mubr.msk.f32.gmra.mxu0 %vm2447_vm2, %v4437_v54  ;;  %4969 = vmatprep.subr.mxu0 %v4926_v63 }
 0x609   :  { %v4544_v55 = vsel %vm462_vm14, %v4538_v21, %v4540_v17  ;;  %v4543_v1 = vsel %vm462_vm14, %v4536_v56, %v4538_v21  ;;  %4779 = vmatprep.mubr.f32.mxu0 %v13214_v33 }
 0x60a   :  { %4662 = vmatprep.subr.mxu1 %v4544_v55  ;;  %v4916_v24 = vpop.permute.xlu1 %4915  ;;  %v4446_v55 = vld [vmem:[%s15133_s15 + $0x60] sm:$0xff] }
 0x60b   :  { %4663 = vmatpush1.msra.mxu1 %v4543_v1  ;;  %v4925_v32 = vsel %vm15135_vm13, %v4916_v24, %v4918_v35  ;;  %vm15139_vm13 = vmmov %vm15138_vm9  ;;  %v4447_v24 = vld [vmem:[%s15133_s15 + $0x68] sm:$0xff] }
 0x60c   :  { %v4924_v10 = vpop.permute.xlu0 %4923  ;;  %11310 = vmatmul.mubr.msk.f32.vlgmr.msra.gmra.mxu1 %vm2447_vm2, %v4436_v19  ;;  %4822 = vmatprep.subr.mxu1 %v4483_v31 }
 0x60d   :  { %11312 = vmatmul.mubr.msk.f32.vlgmr.msra.gmra.mxu0 %vm2447_vm2, %v4434_v41  ;;  %4823 = vmatpush1.msra.mxu1 %v4482_v59 }
 0x60e   :  { %4702 = vmatprep.mubr.f32.mxu1 %v13214_v33  ;;  %4970 = vmatpush1.msra.mxu0 %v4925_v32  ;;  %v5152_v23 = vpop.permute.xlu1 %5151 }
 0x60f   :  { %4785 = vmatprep.mubr.f32.mxu0 %v13214_v33 }
 0x610   :  { %v5150_v14 = vpop.permute.xlu0 %5149  ;;  %11311 = vmatmul.mubr.msk.f32.gmra.mxu1 %vm2447_vm2, %v4437_v54 }
 0x611   :  { %11313 = vmatmul.mubr.msk.f32.gmra.mxu0 %vm2447_vm2, %v4435_v57  ;;  %4856 = vmatprep.mubr.f32.mxu1 %v13214_v33  ;;  %v5158_v26 = vsel %vm1052_vm3, %v5150_v14, %v5152_v23 }
 0x612   :  { %5201 = vmatprep.subr.mxu0 %v5158_v26  ;;  %5003 = vmatprep.mubr.f32.mxu0 %v13214_v33  ;;  %v5156_v9 = vpop.permute.xlu1 %5155  ;;  %v4439_v33 = vld [vmem:[%s15133_s15 + $0x28] sm:$0xff]  ;;  %v4448_v26 = vld [vmem:[%s15133_s15 + $0x70] sm:$0xff] }
 0x614   :  { %v5148_v60 = vpop.permute.xlu0 %5147  ;;  %11314 = vmatmul.mubr.msk.f32.vlgmr.msra.gmra.mxu1 %vm2447_vm2, %v4434_v41 }
 0x615   :  { %v5157_v53 = vsel %vm1052_vm3, %v5148_v60, %v5150_v14  ;;  %11316 = vmatmul.mubr.msk.f32.vlgmr.msra.gmra.mxu0 %vm2447_vm2, %v4438_v34  ;;  %4862 = vmatprep.mubr.f32.mxu1 %v13658_v52 }
 0x616   :  { %5202 = vmatpush1.msra.mxu0 %v5157_v53  ;;  %5009 = vmatprep.mubr.f32.mxu0 %v13658_v52  ;;  %v4922_v12 = vpop.permute.xlu1 %4921  ;;  %v4449_v53 = vld [vmem:[%s15133_s15 + $0x78] sm:$0xff] }
 0x617   :  { %v4928_v61 = vsel %vm15136_vm7, %v4922_v12, %v4924_v10  ;;  %v4927_v13 = vsel %vm15137_vm12, %v4920_v51, %v4922_v12  ;;  %vm15140_vm7 = vmmov %vm15138_vm9  ;;  %v4445_v51 = vld [vmem:[%s15133_s15 + $0x58] sm:$0xff] }
 0x618   :  { %v5384_v50 = vpop.permute.xlu0 %5383  ;;  %11315 = vmatmul.mubr.msk.f32.gmra.mxu1 %vm2447_vm2, %v4435_v57  ;;  %5046 = vmatprep.subr.mxu1 %v4928_v61  ;;  %vm15141_vm12 = vmmov %vm15140_vm7 }
 0x619   :  { %11317 = vmatmul.mubr.msk.f32.gmra.mxu0 %vm2447_vm2, %v4439_v33  ;;  %5047 = vmatpush1.msra.mxu1 %v4927_v13 }
 0x61a   :  { %5080 = vmatprep.mubr.f32.mxu1 %v13658_v52  ;;  %5235 = vmatprep.mubr.f32.mxu0 %v13658_v52  ;;  %v5382_v7 = vpop.permute.xlu1 %5381 }
 0x61b   :  { %v5390_v37 = vsel %vm15138_vm9, %v5382_v7, %v5384_v50  ;;  %vm6877_vm9 = vcmask 1047624  }
 0x61c   :  { %v5388_v22 = vpop.permute.xlu0 %5387  ;;  %11318 = vmatmul.mubr.msk.f32.vlgmr.msra.gmra.mxu1 %vm2447_vm2, %v4438_v34  ;;  %5433 = vmatprep.subr.mxu0 %v5390_v37 }
 0x61d   :  { %11320 = vmatmul.mubr.msk.f32.vlgmr.msra.gmra.mxu0 %vm2447_vm2, %v4440_v15  ;;  %5086 = vmatprep.mubr.f32.mxu1 %v13658_v52 }
 0x61e   :  { %5241 = vmatprep.mubr.f32.mxu0 %v13658_v52  ;;  %v5380_v11 = vpop.permute.xlu1 %5379 }
 0x61f   :  { %v5389_v58 = vsel %vm15139_vm13, %v5380_v11, %v5382_v7  ;;  %vm6879_vm13 = vcmask 72704  }
 0x620   :  { %v5154_v5 = vpop.permute.xlu0 %5153  ;;  %11319 = vmatmul.mubr.msk.f32.gmra.mxu1 %vm2447_vm2, %v4439_v33  ;;  %5434 = vmatpush1.msra.mxu0 %v5389_v58 }
 0x621   :  { %11321 = vmatmul.mubr.msk.f32.gmra.mxu0 %vm2447_vm2, %v4441_v0  ;;  %v5160_v16 = vsel %vm1052_vm3, %v5154_v5, %v5156_v9  ;;  %v5159_v62 = vsel %vm1052_vm3, %v5152_v23, %v5154_v5  ;;  %5312 = vmatprep.mubr.f32.mxu1 %v13658_v52  ;;  %v4451_v5 = vld [vmem:[%s15133_s15 + $0x88] sm:$0xff] }
 0x622   :  { %5278 = vmatprep.subr.mxu1 %v5160_v16  ;;  %5467 = vmatprep.mubr.f32.mxu0 %v13658_v52  ;;  %v5616_v48 = vpop.permute.xlu1 %5615  ;;  %v13779_v16 = vld [vmem:[#allocation17 + $0x1f8] sm:$0xff] }
 0x623   :  { %5279 = vmatpush1.msra.mxu1 %v5159_v62  ;;  %v13782_v62 = vld [vmem:[#allocation17 + $0x178] sm:$0xff] }
 0x624   :  { %v5614_v49 = vpop.permute.xlu0 %5613  ;;  %11322 = vmatmul.mubr.msk.f32.vlgmr.msra.gmra.mxu1 %vm2447_vm2, %v4440_v15  ;;  %15142 = vst [vmem:[#allocation57_spill] sm:$0xff] %v13782_v62 }
 0x625   :  { %11324 = vmatmul.mubr.msk.f32.vlgmr.msra.gmra.mxu0 %vm2447_vm2, %v4442_v36  ;;  %v5622_v56 = vsel %vm1486_vm6, %v5614_v49, %v5616_v48  ;;  %5318 = vmatprep.mubr.f32.mxu1 %v13658_v52 }
 0x626   :  { %5665 = vmatprep.subr.mxu0 %v5622_v56  ;;  %5473 = vmatprep.mubr.f32.mxu0 %v13658_v52  ;;  %v5386_v40 = vpop.permute.xlu1 %5385  ;;  %v13795_v56 = vld [vmem:[#allocation17 + $0x1e8] sm:$0xff] }
 0x627   :  { %v5392_v38 = vsel %vm15140_vm7, %v5386_v40, %v5388_v22  ;;  %v5391_v2 = vsel %vm15141_vm12, %v5384_v50, %v5386_v40  ;;  %v4450_v22 = vld [vmem:[%s15133_s15 + $0x80] sm:$0xff]  ;;  %15146 = vst [vmem:[#allocation61_spill] sm:$0xff] %v13795_v56  ;;  %s12234_s15 = smov 9   ;;  %vm15299_vm7 = vcmask 1031168  }
 0x628   :  { %v5612_v28 = vpop.permute.xlu0 %5611  ;;  %11323 = vmatmul.mubr.msk.f32.gmra.mxu1 %vm2447_vm2, %v4441_v0  ;;  %5510 = vmatprep.subr.mxu1 %v5392_v38  ;;  %v13803_v40 = vld [vmem:[#allocation17 + $0x168] sm:$0xff]  ;;  %v13805_v38 = vld [vmem:[#allocation17 + $0x70] sm:$0xff]  ;;  %vm15300_vm12 = vmmov %vm15299_vm7 }
 0x629   :  { %v5621_v19 = vsel %vm1486_vm6, %v5612_v28, %v5614_v49  ;;  %11325 = vmatmul.mubr.msk.f32.gmra.mxu0 %vm2447_vm2, %v4443_v44  ;;  %5511 = vmatpush1.msra.mxu1 %v5391_v2  ;;  %v13793_v49 = vld [vmem:[#allocation17 + $0x78] sm:$0xff]  ;;  %15148 = vst [vmem:[#allocation63_spill] sm:$0xff] %v13803_v40  ;;  %15149 = vst [vmem:[#allocation64_spill] sm:$0xff] %v13805_v38  ;;  %v13807_v2 = vld [vmem:[#allocation17 + $0x1e0] sm:$0xff] }
 0x62a   :  { %5666 = vmatpush1.msra.mxu0 %v5621_v19  ;;  %5544 = vmatprep.mubr.f32.mxu1 %v13658_v52  ;;  %v5620_v17 = vpop.permute.xlu1 %5619  ;;  %15145 = vst [vmem:[#allocation60_spill] sm:$0xff] %v13793_v49  ;;  %15150 = vst [vmem:[#allocation65_spill] sm:$0xff] %v13807_v2  ;;  %v13811_v28 = vld [vmem:[#allocation17 + $0xe8] sm:$0xff]  ;;  %v13815_v19 = vld [vmem:[#allocation17 + $0x160] sm:$0xff] }
 0x62b   :  { %5699 = vmatprep.mubr.f32.mxu0 %v13658_v52  ;;  %15151 = vst [vmem:[#allocation66_spill] sm:$0xff] %v13811_v28  ;;  %15152 = vst [vmem:[#allocation67_spill] sm:$0xff] %v13815_v19 }
 0x62c   :  { %v5848_v45 = vpop.permute.xlu0 %5847  ;;  %11326 = vmatmul.mubr.msk.f32.vlgmr.msra.gmra.mxu1 %vm2447_vm2, %v4442_v36  ;;  %v13784_v36 = vld [vmem:[#allocation17 + $0x1f0] sm:$0xff] }
 0x62d   :  { %11328 = vmatmul.mubr.msk.f32.vlgmr.msra.gmra.mxu0 %vm2447_vm2, %v4444_v20  ;;  %5550 = vmatprep.mubr.f32.mxu1 %v13658_v52  ;;  %15143 = vst [vmem:[#allocation58_spill] sm:$0xff] %v13784_v36 }
 0x62e   :  { %5705 = vmatprep.mubr.f32.mxu0 %v13658_v52  ;;  %v5846_v54 = vpop.permute.xlu1 %5845 }
 0x62f   :  { %v5854_v35 = vsel %vm1704_vm8, %v5846_v54, %v5848_v45 }
 0x630   :  { %v5618_v42 = vpop.permute.xlu0 %5617  ;;  %11327 = vmatmul.mubr.msk.f32.gmra.mxu1 %vm2447_vm2, %v4443_v44  ;;  %5897 = vmatprep.subr.mxu0 %v5854_v35  ;;  %v13799_v44 = vld [vmem:[#allocation17 + $0xf0] sm:$0xff] }
 0x631   :  { %11329 = vmatmul.mubr.msk.f32.gmra.mxu0 %vm2447_vm2, %v4445_v51  ;;  %v5624_v63 = vsel %vm1486_vm6, %v5618_v42, %v5620_v17  ;;  %v5623_v6 = vsel %vm1486_vm6, %v5616_v48, %v5618_v42  ;;  %5776 = vmatprep.mubr.f32.mxu1 %v13658_v52  ;;  %v13787_v48 = vld [vmem:[#allocation17 + $0xf8] sm:$0xff]  ;;  %15147 = vst [vmem:[#allocation62_spill] sm:$0xff] %v13799_v44  ;;  %v13831_v35 = vld [vmem:[#allocation17 + $0x1d0] sm:$0xff] }
 0x632   :  { %5742 = vmatprep.subr.mxu1 %v5624_v63  ;;  %v5844_v21 = vpop.permute.xlu1 %5843  ;;  %5931 = vmatprep.mubr.f32.mxu0 %v13658_v52  ;;  %v13819_v17 = vld [vmem:[#allocation17 + $0x1d8] sm:$0xff]  ;;  %15158 = vst [vmem:[#allocation73_spill] sm:$0xff] %v13831_v35  ;;  %v13839_v63 = vld [vmem:[#allocation17 + $0x150] sm:$0xff] }
 0x633   :  { %5743 = vmatpush1.msra.mxu1 %v5623_v6  ;;  %v5853_v1 = vsel %vm1704_vm8, %v5844_v21, %v5846_v54  ;;  %15154 = vst [vmem:[#allocation69_spill] sm:$0xff] %v13819_v17  ;;  %v13829_v54 = vld [vmem:[#allocation17 + $0x60] sm:$0xff]  ;;  %v13835_v42 = vld [vmem:[#allocation17 + $0xd8] sm:$0xff]  ;;  %15160 = vst [vmem:[#allocation75_spill] sm:$0xff] %v13839_v63 }
 0x634   :  { %v5852_v31 = vpop.permute.xlu0 %5851  ;;  %11330 = vmatmul.mubr.msk.f32.vlgmr.msra.gmra.mxu1 %vm2447_vm2, %v4444_v20  ;;  %5898 = vmatpush1.msra.mxu0 %v5853_v1  ;;  %v13817_v20 = vld [vmem:[#allocation17 + $0x68] sm:$0xff]  ;;  %15157 = vst [vmem:[#allocation72_spill] sm:$0xff] %v13829_v54  ;;  %15159 = vst [vmem:[#allocation74_spill] sm:$0xff] %v13835_v42  ;;  %v13841_v6 = vld [vmem:[#allocation17 + $0x58] sm:$0xff] }
 0x635   :  { %5782 = vmatprep.mubr.f32.mxu1 %v13658_v52  ;;  %11332 = vmatmul.mubr.msk.f32.vlgmr.msra.gmra.mxu0 %vm2447_vm2, %v4446_v55  ;;  %15153 = vst [vmem:[#allocation68_spill] sm:$0xff] %v13817_v20  ;;  %15161 = vst [vmem:[#allocation76_spill] sm:$0xff] %v13841_v6  ;;  %v13843_v21 = vld [vmem:[#allocation17 + $0x1c8] sm:$0xff] }
 0x636   :  { %v5850_v41 = vpop.permute.xlu1 %5849  ;;  %5937 = vmatprep.mubr.f32.mxu0 %v13658_v52  ;;  %15162 = vst [vmem:[#allocation77_spill] sm:$0xff] %v13843_v21  ;;  %v13851_v1 = vld [vmem:[#allocation17 + $0x148] sm:$0xff] }
 0x637   :  { %v5856_v59 = vsel %vm1704_vm8, %v5850_v41, %v5852_v31  ;;  %v5855_v32 = vsel %vm1704_vm8, %v5848_v45, %v5850_v41  ;;  %v13823_v45 = vld [vmem:[#allocation17 + $0xe0] sm:$0xff]  ;;  %15164 = vst [vmem:[#allocation79_spill] sm:$0xff] %v13851_v1  ;;  %v13853_v31 = vld [vmem:[#allocation17 + $0x50] sm:$0xff] }
 0x638   :  { %v6078_v10 = vpop.permute.xlu0 %6077  ;;  %11331 = vmatmul.mubr.msk.f32.gmra.mxu1 %vm2447_vm2, %v4445_v51  ;;  %5974 = vmatprep.subr.mxu1 %v5856_v59  ;;  %15155 = vst [vmem:[#allocation70_spill] sm:$0xff] %v13823_v45  ;;  %v13827_v51 = vld [vmem:[#allocation17 + $0x158] sm:$0xff]  ;;  %15165 = vst [vmem:[#allocation80_spill] sm:$0xff] %v13853_v31  ;;  %v13855_v41 = vld [vmem:[#allocation17 + $0x1c0] sm:$0xff] }
 0x639   :  { %11333 = vmatmul.mubr.msk.f32.gmra.mxu0 %vm2447_vm2, %v4447_v24  ;;  %5975 = vmatpush1.msra.mxu1 %v5855_v32  ;;  %15156 = vst [vmem:[#allocation71_spill] sm:$0xff] %v13827_v51  ;;  %15166 = vst [vmem:[#allocation81_spill] sm:$0xff] %v13855_v41  ;;  %v13863_v59 = vld [vmem:[#allocation17 + $0x140] sm:$0xff]  ;;  %v13865_v32 = vld [vmem:[#allocation17 + $0x48] sm:$0xff] }
 0x63a   :  { %6008 = vmatprep.mubr.f32.mxu1 %v13658_v52  ;;  %v6080_v57 = vpop.permute.xlu1 %6079  ;;  %6163 = vmatprep.mubr.f32.mxu0 %v13658_v52  ;;  %15168 = vst [vmem:[#allocation83_spill] sm:$0xff] %v13863_v59  ;;  %15169 = vst [vmem:[#allocation84_spill] sm:$0xff] %v13865_v32 }
 0x63b   :  { %v6086_v23 = vsel %vm1922_vm0, %v6078_v10, %v6080_v57 }
 0x63c   :  { %v6076_v14 = vpop.permute.xlu0 %6075  ;;  %11334 = vmatmul.mubr.msk.f32.vlgmr.msra.gmra.mxu1 %vm2447_vm2, %v4446_v55  ;;  %6129 = vmatprep.subr.mxu0 %v6086_v23  ;;  %v13847_v55 = vld [vmem:[#allocation17 + $0xd0] sm:$0xff]  ;;  %v13875_v23 = vld [vmem:[#allocation17 + $0x138] sm:$0xff] }
 0x63d   :  { %v6085_v34 = vsel %vm1922_vm0, %v6076_v14, %v6078_v10  ;;  %6014 = vmatprep.mubr.f32.mxu1 %v13658_v52  ;;  %15163 = vst [vmem:[#allocation78_spill] sm:$0xff] %v13847_v55  ;;  %v13867_v10 = vld [vmem:[#allocation17 + $0x1b8] sm:$0xff]  ;;  %15172 = vst [vmem:[#allocation87_spill] sm:$0xff] %v13875_v23  ;;  %v13877_v14 = vld [vmem:[#allocation17 + $0x40] sm:$0xff] }
 0x63e   :  { %6130 = vmatpush1.msra.mxu0 %v6085_v34  ;;  %v6084_v9 = vpop.permute.xlu1 %6083  ;;  %15170 = vst [vmem:[#allocation85_spill] sm:$0xff] %v13867_v10  ;;  %15173 = vst [vmem:[#allocation88_spill] sm:$0xff] %v13877_v14  ;;  %v13883_v34 = vld [vmem:[#allocation17 + $0xb8] sm:$0xff] }
 0x63f   :  { %11336 = vmatmul.mubr.msk.f32.vlgmr.msra.gmra.mxu0 %vm2447_vm2, %v4448_v26  ;;  %15175 = vst [vmem:[#allocation90_spill] sm:$0xff] %v13883_v34 }
 0x640   :  { %v6082_v60 = vpop.permute.xlu0 %6081  ;;  %11335 = vmatmul.mubr.msk.f32.gmra.mxu1 %vm2447_vm2, %v4447_v24  ;;  %6169 = vmatprep.mubr.f32.mxu0 %v13658_v52  ;;  %v13859_v24 = vld [vmem:[#allocation17 + $0xc8] sm:$0xff] }
 0x641   :  { %v6088_v33 = vsel %vm1922_vm0, %v6082_v60, %v6084_v9  ;;  %v6087_v12 = vsel %vm1922_vm0, %v6080_v57, %v6082_v60  ;;  %6240 = vmatprep.mubr.f32.mxu1 %v13658_v52  ;;  %15167 = vst [vmem:[#allocation82_spill] sm:$0xff] %v13859_v24  ;;  %v13871_v57 = vld [vmem:[#allocation17 + $0xc0] sm:$0xff]  ;;  %v13887_v9 = vld [vmem:[#allocation17 + $0x130] sm:$0xff]  ;;  %v13889_v60 = vld [vmem:[#allocation17 + $0x38] sm:$0xff] }
 0x642   :  { %6206 = vmatprep.subr.mxu1 %v6088_v33  ;;  %v6310_v61 = vpop.permute.xlu1 %6309  ;;  %15171 = vst [vmem:[#allocation86_spill] sm:$0xff] %v13871_v57  ;;  %15176 = vst [vmem:[#allocation91_spill] sm:$0xff] %v13887_v9  ;;  %v13895_v33 = vld [vmem:[#allocation17 + $0xb0] sm:$0xff] }
 0x643   :  { %6207 = vmatpush1.msra.mxu1 %v6087_v12  ;;  %11337 = vmatmul.mubr.msk.f32.gmra.mxu0 %vm2447_vm2, %v4449_v53  ;;  %15177 = vst [vmem:[#allocation92_spill] sm:$0xff] %v13889_v60  ;;  %15179 = vst [vmem:[#allocation94_spill] sm:$0xff] %v13895_v33  ;;  %v13899_v12 = vld [vmem:[#allocation17 + $0x128] sm:$0xff] }
 0x644   :  { %v6312_v13 = vpop.permute.xlu0 %6311  ;;  %11338 = vmatmul.mubr.msk.f32.vlgmr.msra.gmra.mxu1 %vm2447_vm2, %v4448_v26  ;;  %6395 = vmatprep.mubr.f32.mxu0 %v13658_v52  ;;  %v13879_v26 = vld [vmem:[#allocation17 + $0x1b0] sm:$0xff]  ;;  %15180 = vst [vmem:[#allocation95_spill] sm:$0xff] %v13899_v12 }
 0x645   :  { %v6318_v50 = vsel %vm15077_vm4, %v6310_v61, %v6312_v13  ;;  %6246 = vmatprep.mubr.f32.mxu1 %v13658_v52  ;;  %15174 = vst [vmem:[#allocation89_spill] sm:$0xff] %v13879_v26 }
 0x646   :  { %6361 = vmatprep.subr.mxu0 %v6318_v50  ;;  %v6314_v15 = vpop.permute.xlu1 %6313  ;;  %v13907_v50 = vld [vmem:[#allocation17 + $0xa8] sm:$0xff] }
 0x647   :  { %v6319_v0 = vsel %vm15077_vm4, %v6312_v13, %v6314_v15  ;;  %v13903_v13 = vld [vmem:[#allocation17 + $0x1a0] sm:$0xff]  ;;  %15183 = vst [vmem:[#allocation98_spill] sm:$0xff] %v13907_v50 }
 0x648   :  { %v6316_v7 = vpop.permute.xlu0 %6315  ;;  %11339 = vmatmul.mubr.msk.f32.gmra.mxu1 %vm2447_vm2, %v4449_v53  ;;  %v13891_v53 = vld [vmem:[#allocation17 + $0x1a8] sm:$0xff]  ;;  %15182 = vst [vmem:[#allocation97_spill] sm:$0xff] %v13903_v13 }
 0x649   :  { %v6320_v37 = vsel %vm15077_vm4, %v6314_v15, %v6316_v7  ;;  %6472 = vmatprep.mubr.f32.mxu1 %v13658_v52  ;;  %15178 = vst [vmem:[#allocation93_spill] sm:$0xff] %v13891_v53  ;;  %v13911_v15 = vld [vmem:[#allocation17 + $0x120] sm:$0xff]  ;;  %v13913_v7 = vld [vmem:[#allocation17 + $0x28] sm:$0xff] }
 0x64a   :  { %6438 = vmatprep.subr.mxu1 %v6320_v37  ;;  %v6308_v11 = vpop.permute.xlu1 %6307  ;;  %15184 = vst [vmem:[#allocation99_spill] sm:$0xff] %v13911_v15  ;;  %15185 = vst [vmem:[#allocation100_spill] sm:$0xff] %v13913_v7  ;;  %v13915_v37 = vld [vmem:[#allocation17 + $0x198] sm:$0xff] }
 0x64b   :  { %6439 = vmatpush1.msra.mxu1 %v6319_v0  ;;  %v6317_v58 = vsel %vm15077_vm4, %v6308_v11, %v6310_v61  ;;  %v13901_v61 = vld [vmem:[#allocation17 + $0x30] sm:$0xff]  ;;  %15186 = vst [vmem:[#allocation101_spill] sm:$0xff] %v13915_v37  ;;  %v13923_v0 = vld [vmem:[#allocation17 + $0x20] sm:$0xff]  ;;  %v13925_v11 = vld [vmem:[#allocation17 + $0x118] sm:$0xff]  ;;  %vm15080_vm4 = vcmask 982016  }
 0x64c   :  { %11346 = vmatmul.mubr.msk.f32.vlgmr.msra.gmra.mxu1 %vm2447_vm2, %v4450_v22  ;;  %6362 = vmatpush1.msra.mxu0 %v6317_v58  ;;  %15181 = vst [vmem:[#allocation96_spill] sm:$0xff] %v13901_v61  ;;  %15188 = vst [vmem:[#allocation103_spill] sm:$0xff] %v13923_v0  ;;  %v13928_v58 = vld [vmem:[#allocation17 + $0x98] sm:$0xff] }
 0x64d   :  { %11344 = vmatmul.mubr.msk.f32.vlgmr.msra.gmra.mxu0 %vm2447_vm2, %v4450_v22  ;;  %6478 = vmatprep.mubr.f32.mxu1 %v13658_v52  ;;  %v13919_v22 = vld [vmem:[#allocation17 + $0xa0] sm:$0xff]  ;;  %15189 = vst [vmem:[#allocation104_spill] sm:$0xff] %v13925_v11  ;;  %15190 = vst [vmem:[#allocation105_spill] sm:$0xff] %v13928_v58 }
 0x64e   :  { %6401 = vmatprep.mubr.f32.mxu0 %v13658_v52  ;;  %11442 = vmatprep.subr.mxu1 %v13779_v16  ;;  %v13791_v52 = vld [vmem:[#allocation17 + $0x170] sm:$0xff]  ;;  %15187 = vst [vmem:[#allocation102_spill] sm:$0xff] %v13919_v22 }
 0x64f   :  { %11443 = vmatpush3.msra.mxu1 %v13782_v62  ;;  %11404 = vmatprep.subr.mxu0 %v13787_v48  ;;  %15144 = vst [vmem:[#allocation59_spill] sm:$0xff] %v13791_v52 }
 0x650   :  { %11347 = vmatmul.mubr.msk.f32.gmra.mxu1 %vm2447_vm2, %v4451_v5  ;;  %11444 = vmatprep.subr.mxu1 %v13784_v36 }
 0x651   :  { %11345 = vmatmul.mubr.msk.f32.gmra.mxu0 %vm2447_vm2, %v4451_v5  ;;  %11445 = vmatpush3.msra.mxu1 %v13791_v52  ;;  %v13931_v5 = vld [vmem:[#allocation17 + $0x190] sm:$0xff] }
 0x652   :  { %11405 = vmatpush3.msra.mxu0 %v13793_v49  ;;  %11446 = vmatprep.subr.mxu1 %v13795_v56  ;;  %15191 = vst [vmem:[#allocation106_spill] sm:$0xff] %v13931_v5 }
 0x653   :  { %11406 = vmatprep.subr.mxu0 %v13799_v44  ;;  %11447 = vmatpush3.msra.mxu1 %v13803_v40 }
 0x654   :  { %11407 = vmatpush3.msra.mxu0 %v13805_v38  ;;  %11448 = vmatprep.subr.mxu1 %v13807_v2 }
 0x655   :  { %11408 = vmatprep.subr.mxu0 %v13811_v28  ;;  %11449 = vmatpush3.msra.mxu1 %v13815_v19 }
 0x656   :  { %11409 = vmatpush3.msra.mxu0 %v13817_v20  ;;  %11450 = vmatprep.subr.mxu1 %v13819_v17 }
 0x657   :  { %11410 = vmatprep.subr.mxu0 %v13823_v45  ;;  %11451 = vmatpush3.msra.mxu1 %v13827_v51 }
 0x658   :  { %11411 = vmatpush3.msra.mxu0 %v13829_v54  ;;  %11452 = vmatprep.subr.mxu1 %v13831_v35 }
 0x659   :  { %11412 = vmatprep.subr.mxu0 %v13835_v42  ;;  %11453 = vmatpush3.msra.mxu1 %v13839_v63 }
 0x65a   :  { %11413 = vmatpush3.msra.mxu0 %v13841_v6  ;;  %11454 = vmatprep.subr.mxu1 %v13843_v21 }
 0x65b   :  { %11414 = vmatprep.subr.mxu0 %v13847_v55  ;;  %11455 = vmatpush3.msra.mxu1 %v13851_v1 }
 0x65c   :  { %11415 = vmatpush3.msra.mxu0 %v13853_v31  ;;  %11456 = vmatprep.subr.mxu1 %v13855_v41 }
 0x65d   :  { %11416 = vmatprep.subr.mxu0 %v13859_v24  ;;  %11457 = vmatpush3.msra.mxu1 %v13863_v59 }
 0x65e   :  { %11417 = vmatpush3.msra.mxu0 %v13865_v32  ;;  %11458 = vmatprep.subr.mxu1 %v13867_v10 }
 0x65f   :  { %11418 = vmatprep.subr.mxu0 %v13871_v57  ;;  %11459 = vmatpush3.msra.mxu1 %v13875_v23 }
 0x660   :  { %11419 = vmatpush3.msra.mxu0 %v13877_v14  ;;  %11460 = vmatprep.subr.mxu1 %v13879_v26 }
 0x661   :  { %11420 = vmatprep.subr.mxu0 %v13883_v34  ;;  %11461 = vmatpush3.msra.mxu1 %v13887_v9 }
 0x662   :  { %11421 = vmatpush3.msra.mxu0 %v13889_v60  ;;  %11462 = vmatprep.subr.mxu1 %v13891_v53 }
 0x663   :  { %11422 = vmatprep.subr.mxu0 %v13895_v33  ;;  %11463 = vmatpush3.msra.mxu1 %v13899_v12 }
 0x664   :  { %11423 = vmatpush3.msra.mxu0 %v13901_v61  ;;  %11464 = vmatprep.subr.mxu1 %v13903_v13 }
 0x665   :  { %11424 = vmatprep.subr.mxu0 %v13907_v50  ;;  %11465 = vmatpush3.msra.mxu1 %v13911_v15 }
 0x666   :  { %11425 = vmatpush3.msra.mxu0 %v13913_v7  ;;  %11466 = vmatprep.subr.mxu1 %v13915_v37 }
 0x667   :  { %11426 = vmatprep.subr.mxu0 %v13919_v22  ;;  %11467 = vmatpush3.msra.mxu1 %v13925_v11 }
 0x668   :  { %11427 = vmatpush3.msra.mxu0 %v13923_v0  ;;  %11468 = vmatprep.subr.mxu1 %v13931_v5 }
 0x669   :  { %11428 = vmatprep.subr.mxu0 %v13928_v58  ;;  %11469 = vmatpush3.msra.mxu1 %v13937_v46 }
 0x66a   :  { %11429 = vmatpush3.msra.mxu0 %v13934_v27  ;;  %11470 = vmatprep.subr.mxu1 %v13943_v8 }
 0x66b   :  { %11430 = vmatprep.subr.mxu0 %v13940_v29  ;;  %11471 = vmatpush3.msra.mxu1 %v13949_v3  ;;  %v13964_v29 = vld [vmem:[#allocation17 + $0x80] sm:$0xff] }
 0x66c   :  { %11431 = vmatpush3.msra.mxu0 %v13946_v39  ;;  %11472 = vmatprep.subr.mxu1 %v13955_v4  ;;  %15202 = vst [vmem:[#allocation117_spill] sm:$0xff] %v13964_v29  ;;  %v13968_v39 = vld [vmem:[#allocation17] sm:$0xff] }
 0x66d   :  { %11432 = vmatprep.subr.mxu0 %v13952_v25  ;;  %11473 = vmatpush3.msra.mxu1 %v13961_v47  ;;  %15203 = vst [vmem:[#allocation118_spill] sm:$0xff] %v13968_v39 }
 0x66e   :  { %11433 = vmatpush3.msra.mxu0 %v13958_v43  ;;  %11515 = vmatprep.subr.mxu1 %v13779_v16 }
 0x66f   :  { %11434 = vmatprep.subr.mxu0 %v13964_v29 }
 0x670   :  { %11435 = vmatpush3.msra.mxu0 %v13968_v39 }
 0x671   :  { %11480 = vmatprep.subr.mxu0 %v13787_v48 }
 0x6c4   :  { %v4621_v25 = vpop.f32.mrf.mxu0 }
 0x6c6   :  { %v4623_v4 = vpop.f32.mrf.mxu0 }
 0x6c8   :  { %v13973_v3 = vpop.f32.mrf.mxu0 }
 0x6ca   :  { %v13975_v8 = vpop.f32.mrf.mxu0 }
 0x6cc   :  { %v4698_v43 = vpop.f32.mrf.mxu1 }
 0x6cd   :  { %v4781_v27 = vpop.f32.mrf.mxu0 }
 0x6ce   :  { %v4700_v46 = vpop.f32.mrf.mxu1  ;;  %v4782_v40 = vadd.f32 %v4781_v27, %v4621_v25 }
 0x6cf   :  { %v4783_v47 = vpop.f32.mrf.mxu0 }
 0x6d0   :  { %v4704_v58 = vpop.f32.mrf.mxu1  ;;  %v4784_v56 = vadd.f32 %v4783_v47, %v4623_v4 }
 0x6d1   :  { %v13977_v29 = vpop.f32.mrf.mxu0 }
 0x6d2   :  { %15204 = vst [vmem:[#allocation119_spill] sm:$0xff] %v13977_v29  ;;  %v4706_v5 = vpop.f32.mrf.mxu1 }
 0x6d3   :  { %v4789_v0 = vpop.f32.mrf.mxu0 }
 0x6d4   :  { %v4858_v16 = vpop.f32.mrf.mxu1 }
 0x6d5   :  { %v5005_v11 = vpop.f32.mrf.mxu0  ;;  %v4859_v2 = vadd.f32 %v4858_v16, %v4698_v43 }
 0x6d6   :  { %v4860_v39 = vpop.f32.mrf.mxu1  ;;  %v5093_v36 = vadd.f32 %v5005_v11, %v4782_v40 }
 0x6d7   :  { %v5007_v22 = vpop.f32.mrf.mxu0  ;;  %v4861_v44 = vadd.f32 %v4860_v39, %v4700_v46 }
 0x6d8   :  { %v4864_v48 = vpop.f32.mrf.mxu1 }
 0x6d9   :  { %v13979_v37 = vpop.f32.mrf.mxu0 }
 0x6da   :  { %15205 = vst [vmem:[#allocation120_spill] sm:$0xff] %v13979_v37  ;;  %v4866_v7 = vpop.f32.mrf.mxu1 }
 0x6db   :  { %v5013_v15 = vpop.f32.mrf.mxu0 }
 0x6dc   :  { %v5082_v50 = vpop.f32.mrf.mxu1 }
 0x6dd   :  { %v5237_v13 = vpop.f32.mrf.mxu0  ;;  %v5095_v52 = vadd.f32 %v5082_v50, %v4859_v2  ;;  %v15214_v2 = vld [vmem:[#allocation119_spill] sm:$0xff] }
 0x6de   :  { %v5084_v61 = vpop.f32.mrf.mxu1  ;;  %v5325_v37 = vadd.f32 %v5237_v13, %v5093_v36  ;;  %v4788_v36 = vadd.f32 %v15214_v2, %v13973_v3  ;;  %v6503_v2 = vpop.permute.xlu1 %6502 }
 0x6df   :  { %v5239_v12 = vpop.f32.mrf.mxu0  ;;  %v5096_v62 = vadd.f32 %v5084_v61, %v4861_v44 }
 0x6e0   :  { %v5088_v33 = vpop.f32.mrf.mxu1 }
 0x6e1   :  { %v13981_v53 = vpop.f32.mrf.mxu0 }
 0x6e2   :  { %15206 = vst [vmem:[#allocation121_spill] sm:$0xff] %v13981_v53  ;;  %v5090_v60 = vpop.f32.mrf.mxu1 }
 0x6e3   :  { %v13983_v9 = vpop.f32.mrf.mxu0 }
 0x6e4   :  { %15207 = vst [vmem:[#allocation122_spill] sm:$0xff] %v13983_v9  ;;  %v5314_v34 = vpop.f32.mrf.mxu1 }
 0x6e5   :  { %v5469_v26 = vpop.f32.mrf.mxu0  ;;  %v5327_v53 = vadd.f32 %v5314_v34, %v5095_v52 }
 0x6e6   :  { %v5316_v14 = vpop.f32.mrf.mxu1  ;;  %v5557_v4 = vadd.f32 %v5469_v26, %v5325_v37 }
 0x6e7   :  { %v5471_v23 = vpop.f32.mrf.mxu0  ;;  %v5328_v9 = vadd.f32 %v5316_v14, %v5096_v62 }
 0x6e8   :  { %v5320_v57 = vpop.f32.mrf.mxu1 }
 0x6e9   :  { %v13985_v10 = vpop.f32.mrf.mxu0 }
 0x6ea   :  { %15208 = vst [vmem:[#allocation123_spill] sm:$0xff] %v13985_v10  ;;  %v5322_v32 = vpop.f32.mrf.mxu1  ;;  %v5094_v10 = vadd.f32 %v5007_v22, %v4784_v56 }
 0x6eb   :  { %v13987_v59 = vpop.f32.mrf.mxu0 }
 0x6ec   :  { %15209 = vst [vmem:[#allocation124_spill] sm:$0xff] %v13987_v59  ;;  %v5546_v24 = vpop.f32.mrf.mxu1  ;;  %v4867_v59 = vadd.f32 %v4866_v7, %v4706_v5  ;;  %v5326_v29 = vadd.f32 %v5239_v12, %v5094_v10  ;;  %v15215_v10 = vld [vmem:[#allocation122_spill] sm:$0xff] }
 0x6ed   :  { %v5701_v41 = vpop.f32.mrf.mxu0  ;;  %v5559_v16 = vadd.f32 %v5546_v24, %v5327_v53 }
 0x6ee   :  { %v5548_v31 = vpop.f32.mrf.mxu1  ;;  %v5100_v39 = vadd.f32 %v5090_v60, %v4867_v59  ;;  %v5558_v44 = vadd.f32 %v5471_v23, %v5326_v29  ;;  %v5789_v14 = vadd.f32 %v5701_v41, %v5557_v4  ;;  %v15218_v41 = vld [vmem:[#allocation121_spill] sm:$0xff] }
 0x6ef   :  { %v5703_v1 = vpop.f32.mrf.mxu0  ;;  %v5560_v46 = vadd.f32 %v5548_v31, %v5328_v9  ;;  %v15216_v31 = vld [vmem:[#allocation120_spill] sm:$0xff] }
 0x6f0   :  { %v5552_v55 = vpop.f32.mrf.mxu1  ;;  %v5332_v62 = vadd.f32 %v5322_v32, %v5100_v39  ;;  %v5790_v24 = vadd.f32 %v5703_v1, %v5558_v44  ;;  %v5097_v9 = vadd.f32 %v15216_v31, %v4788_v36  ;;  %v15229_v31 = vld [vmem:[#allocation62_spill] sm:$0xff] }
 0x6f1   :  { %v13989_v21 = vpop.f32.mrf.mxu0 }
 0x6f2   :  { %15210 = vst [vmem:[#allocation125_spill] sm:$0xff] %v13989_v21  ;;  %v5554_v6 = vpop.f32.mrf.mxu1 }
 0x6f3   :  { %v13991_v63 = vpop.f32.mrf.mxu0  ;;  %v5564_v60 = vadd.f32 %v5554_v6, %v5332_v62 }
 0x6f4   :  { %15211 = vst [vmem:[#allocation126_spill] sm:$0xff] %v13991_v63  ;;  %v5778_v42 = vpop.f32.mrf.mxu1  ;;  %v4865_v63 = vadd.f32 %v4864_v48, %v4704_v58 }
 0x6f5   :  { %v5933_v35 = vpop.f32.mrf.mxu0  ;;  %v5791_v40 = vadd.f32 %v5778_v42, %v5559_v16  ;;  %v15217_v42 = vld [vmem:[#allocation124_spill] sm:$0xff] }
 0x6f6   :  { %v5780_v54 = vpop.f32.mrf.mxu1  ;;  %v5099_v43 = vadd.f32 %v5088_v33, %v4865_v63 }
 0x6f7   :  { %v5935_v51 = vpop.f32.mrf.mxu0 }
 0x6f8   :  { %v5784_v45 = vpop.f32.mrf.mxu1  ;;  %v5331_v56 = vadd.f32 %v5320_v57, %v5099_v43  ;;  %v6022_v33 = vadd.f32 %v5935_v51, %v5790_v24 }
 0x6f9   :  { %v13993_v18 = vpop.f32.mrf.mxu0  ;;  %v15222_v5 = vld [vmem:[#allocation125_spill] sm:$0xff] }
 0x6fa   :  { %15212 = vst [vmem:[#allocation127_spill] sm:$0xff] %v13993_v18  ;;  %v5786_v20 = vpop.f32.mrf.mxu1  ;;  %v5563_v34 = vadd.f32 %v5552_v55, %v5331_v56 }
 0x6fb   :  { %v13995_v19 = vpop.f32.mrf.mxu0  ;;  %v5796_v12 = vadd.f32 %v5786_v20, %v5564_v60  ;;  %v15232_v60 = vld [vmem:[#allocation65_spill] sm:$0xff] }
 0x6fc   :  { %v6010_v17 = vpop.f32.mrf.mxu1  ;;  %15213 = vst [vmem:[#allocation128_spill] sm:$0xff] %v13995_v19  ;;  %v4790_v19 = vadd.f32 %v4789_v0, %v13975_v8  ;;  %v5792_v8 = vadd.f32 %v5780_v54, %v5560_v46  ;;  %v5795_v53 = vadd.f32 %v5784_v45, %v5563_v34  ;;  %v5329_v54 = vadd.f32 %v15218_v41, %v5097_v9  ;;  %v15231_v9 = vld [vmem:[#allocation64_spill] sm:$0xff] }
 0x6fd   :  { %v6023_v59 = vadd.f32 %v6010_v17, %v5791_v40  ;;  %v15219_v17 = vld [vmem:[#allocation126_spill] sm:$0xff]  ;;  %v15241_v41 = vld [vmem:[#allocation72_spill] sm:$0xff] }
 0x6fe   :  { %v6012_v28 = vpop.f32.mrf.mxu1  ;;  %v5098_v47 = vadd.f32 %v5013_v15, %v4790_v19  ;;  %v6021_v19 = vadd.f32 %v5933_v35, %v5789_v14  ;;  %v15224_v14 = vld [vmem:[#allocation57_spill] sm:$0xff] }
 0x6ff   :  { %v6165_v30 = vpop.f32.mrf.mxu0  ;;  %v6024_v29 = vadd.f32 %v6012_v28, %v5792_v8  ;;  %v15220_v28 = vld [vmem:[#allocation123_spill] sm:$0xff] }
 0x700   :  { %v6016_v38 = vpop.f32.mrf.mxu1  ;;  %v5330_v63 = vadd.f32 %v15215_v10, %v5098_v47  ;;  %v6253_v61 = vadd.f32 %v6165_v30, %v6021_v19  ;;  %v5561_v7 = vadd.f32 %v15220_v28, %v5329_v54  ;;  %v15225_v10 = vld [vmem:[#allocation58_spill] sm:$0xff]  ;;  %v15242_v54 = vld [vmem:[#allocation73_spill] sm:$0xff]  ;;  %v15253_v28 = vld [vmem:[#allocation84_spill] sm:$0xff] }
 0x701   :  { %v6167_v21 = vpop.f32.mrf.mxu0  ;;  %v6027_v50 = vadd.f32 %v6016_v38, %v5795_v53  ;;  %v15237_v53 = vld [vmem:[#allocation68_spill] sm:$0xff] }
 0x702   :  { %v6018_v49 = vpop.f32.mrf.mxu1  ;;  %v5562_v23 = vadd.f32 %v15217_v42, %v5330_v63  ;;  %v6254_v15 = vadd.f32 %v6167_v21, %v6022_v33  ;;  %v5793_v48 = vadd.f32 %v15222_v5, %v5561_v7  ;;  %v15226_v63 = vld [vmem:[#allocation60_spill] sm:$0xff]  ;;  %v15235_v42 = vld [vmem:[#allocation67_spill] sm:$0xff]  ;;  %v15238_v33 = vld [vmem:[#allocation54_spill] sm:$0xff] }
 0x703   :  { %v13998_v27 = vpop.f32.mrf.mxu0  ;;  %v6028_v37 = vadd.f32 %v6018_v49, %v5796_v12  ;;  %v15221_v0 = vld [vmem:[#allocation128_spill] sm:$0xff]  ;;  %v15223_v49 = vld [vmem:[#allocation127_spill] sm:$0xff]  ;;  %v15243_v12 = vld [vmem:[#allocation74_spill] sm:$0xff] }
 0x704   :  { %v6242_v18 = vpop.f32.mrf.mxu1  ;;  %v5794_v13 = vadd.f32 %v15219_v17, %v5562_v23  ;;  %v6025_v47 = vadd.f32 %v15223_v49, %v5793_v48  ;;  %v15236_v23 = vld [vmem:[#allocation69_spill] sm:$0xff]  ;;  %v15247_v17 = vld [vmem:[#allocation78_spill] sm:$0xff]  ;;  %v15265_v5 = vld [vmem:[#allocation96_spill] sm:$0xff] }
 0x705   :  { %v6173_v57 = vpop.f32.mrf.mxu0  ;;  %v6255_v3 = vadd.f32 %v6242_v18, %v6023_v59  ;;  %v6498_v18 = vpop.permute.xlu0 %6497  ;;  %v15227_v59 = vld [vmem:[#allocation59_spill] sm:$0xff]  ;;  %v15254_v7 = vld [vmem:[#allocation85_spill] sm:$0xff] }
 0x706   :  { %v6244_v25 = vpop.f32.mrf.mxu1  ;;  %v6026_v11 = vadd.f32 %v15221_v0, %v5794_v13  ;;  %v6257_v36 = vadd.f32 %v13998_v27, %v6025_v47  ;;  %v15230_v27 = vld [vmem:[#allocation63_spill] sm:$0xff]  ;;  %v15266_v48 = vld [vmem:[#allocation97_spill] sm:$0xff]  ;;  %v15276_v47 = vld [vmem:[#allocation108_spill] sm:$0xff] }
 0x707   :  { %v6256_v1 = vadd.f32 %v6244_v25, %v6024_v29  ;;  %v15233_v29 = vld [vmem:[#allocation56_spill] sm:$0xff]  ;;  %v15248_v13 = vld [vmem:[#allocation79_spill] sm:$0xff]  ;;  %v15275_v49 = vld [vmem:[#allocation105_spill] sm:$0xff] }
 0x708   :  { %v6248_v52 = vpop.f32.mrf.mxu1  ;;  %v6258_v21 = vadd.f32 %v6173_v57, %v6026_v11  ;;  %v15234_v57 = vld [vmem:[#allocation66_spill] sm:$0xff]  ;;  %v15260_v0 = vld [vmem:[#allocation91_spill] sm:$0xff]  ;;  %v15261_v11 = vld [vmem:[#allocation92_spill] sm:$0xff] }
 0x709   :  { %v6259_v58 = vadd.f32 %v6248_v52, %v6027_v50  ;;  %v15249_v50 = vld [vmem:[#allocation80_spill] sm:$0xff] }
 0x70a   :  { %v6250_v26 = vpop.f32.mrf.mxu1 }
 0x70b   :  { %v6260_v43 = vadd.f32 %v6250_v26, %v6028_v37  ;;  %v15228_v26 = vld [vmem:[#allocation61_spill] sm:$0xff]  ;;  %v15255_v37 = vld [vmem:[#allocation86_spill] sm:$0xff] }
 0x70c   :  { %v6474_v32 = vpop.f32.mrf.mxu1 }
 0x70d   :  { %v6397_v55 = vpop.f32.mrf.mxu0  ;;  %v6487_v6 = vadd.f32 %v6474_v32, %v6255_v3  ;;  %v15239_v3 = vld [vmem:[#allocation70_spill] sm:$0xff]  ;;  %v15240_v32 = vld [vmem:[#allocation71_spill] sm:$0xff] }
 0x70e   :  { %v6476_v35 = vpop.f32.mrf.mxu1  ;;  %v6485_v45 = vadd.f32 %v6397_v55, %v6253_v61  ;;  %v15244_v61 = vld [vmem:[#allocation75_spill] sm:$0xff]  ;;  %v15246_v55 = vld [vmem:[#allocation77_spill] sm:$0xff] }
 0x70f   :  { %v6488_v22 = vadd.f32 %v6476_v35, %v6256_v1  ;;  %v6399_v51 = vpop.f32.mrf.mxu0  ;;  %v6507_v25 = vadd.f32 %v6498_v18, %v6487_v6  ;;  %v15245_v1 = vld [vmem:[#allocation76_spill] sm:$0xff]  ;;  %v15251_v6 = vld [vmem:[#allocation82_spill] sm:$0xff]  ;;  %v15252_v35 = vld [vmem:[#allocation83_spill] sm:$0xff] }
 0x710   :  { %v6480_v20 = vpop.f32.mrf.mxu1  ;;  %v6486_v30 = vadd.f32 %v6399_v51, %v6254_v15  ;;  %v6505_v44 = vadd.f32 %v6498_v18, %v6485_v45  ;;  %v15250_v15 = vld [vmem:[#allocation81_spill] sm:$0xff]  ;;  %v15257_v45 = vld [vmem:[#allocation88_spill] sm:$0xff] }
 0x711   :  { %v6508_v16 = vadd.f32 %v6498_v18, %v6488_v22  ;;  %v6403_v38 = vpop.f32.mrf.mxu0  ;;  %v6491_v39 = vadd.f32 %v6480_v20, %v6259_v58  ;;  %v15256_v22 = vld [vmem:[#allocation87_spill] sm:$0xff]  ;;  %v15258_v51 = vld [vmem:[#allocation89_spill] sm:$0xff]  ;;  %v15263_v20 = vld [vmem:[#allocation94_spill] sm:$0xff] }
 0x712   :  { %v6506_v4 = vadd.f32 %v6498_v18, %v6486_v30  ;;  %v6482_v46 = vpop.f32.mrf.mxu1  ;;  %v6489_v24 = vadd.f32 %v6403_v38, %v6257_v36  ;;  %v15259_v18 = vld [vmem:[#allocation90_spill] sm:$0xff]  ;;  %v15262_v58 = vld [vmem:[#allocation93_spill] sm:$0xff]  ;;  %v15264_v30 = vld [vmem:[#allocation95_spill] sm:$0xff] }
 0x713   :  { %v6492_v56 = vadd.f32 %v6482_v46, %v6260_v43  ;;  %6716 = vmatprep.mubr.f32.mxu1 %v6508_v16  ;;  %v6405_v40 = vpop.f32.mrf.mxu0  ;;  %v6511_v8 = vadd.f32 %v6503_v2, %v6491_v39  ;;  %v15267_v43 = vld [vmem:[#allocation98_spill] sm:$0xff]  ;;  %v15268_v16 = vld [vmem:[#allocation99_spill] sm:$0xff]  ;;  %v15269_v38 = vld [vmem:[#allocation100_spill] sm:$0xff] }
 0x714   :  { %6717 = vmatmul.mubr.f32.vlgmr.msra.gmra.mxu1 %v6507_v25  ;;  %v6490_v52 = vadd.f32 %v6405_v40, %v6258_v21  ;;  %6641 = vmatprep.mubr.f32.mxu0 %v6506_v4  ;;  %v6509_v19 = vadd.f32 %v6503_v2, %v6489_v24  ;;  %v15270_v21 = vld [vmem:[#allocation101_spill] sm:$0xff]  ;;  %v15271_v25 = vld [vmem:[#allocation102_spill] sm:$0xff]  ;;  %v15272_v39 = vld [vmem:[#allocation104_spill] sm:$0xff] }
 0x715   :  { %v6512_v62 = vadd.f32 %v6503_v2, %v6492_v56  ;;  %11516 = vmatpush3.msra.mxu1 %v15224_v14  ;;  %6642 = vmatmul.mubr.f32.vlgmr.msra.gmra.mxu0 %v6505_v44  ;;  %v15273_v4 = vld [vmem:[#allocation103_spill] sm:$0xff]  ;;  %v15274_v46 = vld [vmem:[#allocation106_spill] sm:$0xff]  ;;  %v15279_v40 = vld [vmem:[#allocation109_spill] sm:$0xff] }
 0x716   :  { %11517 = vmatprep.subr.mxu1 %v15225_v10  ;;  %11481 = vmatpush3.msra.mxu0 %v15226_v63  ;;  %v6510_v34 = vadd.f32 %v6503_v2, %v6490_v52  ;;  %v15277_v44 = vld [vmem:[#allocation107_spill] sm:$0xff]  ;;  %v15278_v56 = vld [vmem:[#allocation110_spill] sm:$0xff]  ;;  %v15280_v2 = vld [vmem:[#allocation112_spill] sm:$0xff] }
 0x717   :  { %11518 = vmatpush3.msra.mxu1 %v15227_v59  ;;  %6721 = vmatprep.mubr.f32.mxu1 %v6512_v62  ;;  %v15281_v52 = vld [vmem:[#allocation111_spill] sm:$0xff]  ;;  %v15282_v36 = vld [vmem:[#allocation114_spill] sm:$0xff]  ;;  %v15283_v62 = vld [vmem:[#allocation113_spill] sm:$0xff] }
 0x718   :  { %11519 = vmatprep.subr.mxu1 %v15228_v26  ;;  %6722 = vmatmul.mubr.f32.gmra.mxu1 %v6511_v8  ;;  %v15284_v14 = vld [vmem:[#allocation116_spill] sm:$0xff]  ;;  %v15285_v8 = vld [vmem:[#allocation115_spill] sm:$0xff]  ;;  %v15287_v63 = vld [vmem:[#allocation117_spill] sm:$0xff] }
 0x719   :  { %11482 = vmatprep.subr.mxu0 %v15229_v31  ;;  %11520 = vmatpush3.msra.mxu1 %v15230_v27  ;;  %v15286_v10 = vld [vmem:[#allocation55_spill] sm:$0xff]  ;;  %v15288_v24 = vld [vmem:[#allocation118_spill] sm:$0xff] }
 0x71a   :  { %11483 = vmatpush3.msra.mxu0 %v15231_v9  ;;  %11521 = vmatprep.subr.mxu1 %v15232_v60 }
 0x71b   :  { %6861 = vmatprep.mubr.f32.mxu1 %v15233_v29  ;;  %6646 = vmatprep.mubr.f32.mxu0 %v6510_v34  ;;  %v15289_v34 = vld [vmem:[#allocation53_spill] sm:$0xff] }
 0x71c   :  { %11484 = vmatprep.subr.mxu0 %v15234_v57  ;;  %11522 = vmatpush3.msra.mxu1 %v15235_v42 }
 0x71d   :  { %6647 = vmatmul.mubr.f32.gmra.mxu0 %v6509_v19  ;;  %11523 = vmatprep.subr.mxu1 %v15236_v23  ;;  %v6901_v23 = vld [vmem:[#allocation16] sm:$0xff] }
 0x71e   :  { %11485 = vmatpush3.msra.mxu0 %v15237_v53  ;;  %6791 = vmatprep.mubr.f32.mxu0 %v15238_v33 }
 0x71f   :  { %11486 = vmatprep.subr.mxu0 %v15239_v3  ;;  %11524 = vmatpush3.msra.mxu1 %v15240_v32 }
 0x720   :  { %11487 = vmatpush3.msra.mxu0 %v15241_v41  ;;  %11525 = vmatprep.subr.mxu1 %v15242_v54  ;;  %v15290_v41 = vld [vmem:[#allocation46_spill] sm:$0xff] }
 0x721   :  { %11488 = vmatprep.subr.mxu0 %v15243_v12  ;;  %11526 = vmatpush3.msra.mxu1 %v15244_v61  ;;  %v14080_v54 = vrot.slane %v6901_v23, %v15290_v41 }
 0x722   :  { %11489 = vmatpush3.msra.mxu0 %v15245_v1  ;;  %11527 = vmatprep.subr.mxu1 %v15246_v55  ;;  %v15291_v55 = vld [vmem:[#allocation48_spill] sm:$0xff] }
 0x723   :  { %11490 = vmatprep.subr.mxu0 %v15247_v17  ;;  %11528 = vmatpush3.msra.mxu1 %v15248_v13  ;;  %v7329_v17 = vrot.slane %v6901_v23, %v15291_v55 }
 0x724   :  { %11491 = vmatpush3.msra.mxu0 %v15249_v50  ;;  %11529 = vmatprep.subr.mxu1 %v15250_v15  ;;  %v15292_v50 = vld [vmem:[#allocation45_spill] sm:$0xff] }
 0x725   :  { %11492 = vmatprep.subr.mxu0 %v15251_v6  ;;  %11530 = vmatpush3.msra.mxu1 %v15252_v35  ;;  %v6916_v15 = vrot.slane %v6901_v23, %v15292_v50  ;;  %v15293_v6 = vld [vmem:[#allocation50_spill] sm:$0xff] }
 0x726   :  { %11493 = vmatpush3.msra.mxu0 %v15253_v28  ;;  %11531 = vmatprep.subr.mxu1 %v15254_v7  ;;  %v7553_v35 = vrot.slane %v6901_v23, %v15293_v6  ;;  %v15294_v28 = vld [vmem:[#allocation47_spill] sm:$0xff] }
 0x727   :  { %11494 = vmatprep.subr.mxu0 %v15255_v37  ;;  %11532 = vmatpush3.msra.mxu1 %v15256_v22  ;;  %v7217_v7 = vrot.slane %v6901_v23, %v15294_v28  ;;  %v11364_v37 = vld [vmem:[#allocation16 + $0x8] ss:$0 sm:$0xff]  ;;  %v15295_v22 = vld [vmem:[#allocation49_spill] sm:$0xff] }
 0x728   :  { %11495 = vmatpush3.msra.mxu0 %v15257_v45  ;;  %11533 = vmatprep.subr.mxu1 %v15258_v51  ;;  %v7441_v45 = vrot.slane %v6901_v23, %v15295_v22  ;;  %v15296_v51 = vld [vmem:[#allocation51_spill] sm:$0xff] }
 0x729   :  { %11496 = vmatprep.subr.mxu0 %v15259_v18  ;;  %11534 = vmatpush3.msra.mxu1 %v15260_v0  ;;  %v7664_v18 = vrot.slane %v6901_v23, %v15296_v51 }
 0x72a   :  { %11497 = vmatpush3.msra.mxu0 %v15261_v11  ;;  %11535 = vmatprep.subr.mxu1 %v15262_v58 }
 0x72b   :  { %11498 = vmatprep.subr.mxu0 %v15263_v20  ;;  %11536 = vmatpush3.msra.mxu1 %v15264_v30 }
 0x72c   :  { %11499 = vmatpush3.msra.mxu0 %v15265_v5  ;;  %11537 = vmatprep.subr.mxu1 %v15266_v48 }
 0x72d   :  { %11500 = vmatprep.subr.mxu0 %v15267_v43  ;;  %11538 = vmatpush3.msra.mxu1 %v15268_v16  ;;  %v15297_v43 = vld [vmem:[#allocation52_spill] sm:$0xff] }
 0x72e   :  { %11501 = vmatpush3.msra.mxu0 %v15269_v38  ;;  %11539 = vmatprep.subr.mxu1 %v15270_v21  ;;  %v6908_v16 = vrot.slane %v6901_v23, %v15297_v43 }
 0x72f   :  { %11502 = vmatprep.subr.mxu0 %v15271_v25  ;;  %11540 = vmatpush3.msra.mxu1 %v15272_v39 }
 0x730   :  { %11503 = vmatpush3.msra.mxu0 %v15273_v4  ;;  %11541 = vmatprep.subr.mxu1 %v15274_v46 }
 0x731   :  { %11504 = vmatprep.subr.mxu0 %v15275_v49  ;;  %11542 = vmatpush3.msra.mxu1 %v15276_v47 }
 0x732   :  { %11505 = vmatpush3.msra.mxu0 %v15277_v44  ;;  %11543 = vmatprep.subr.mxu1 %v15278_v56 }
 0x733   :  { %11506 = vmatprep.subr.mxu0 %v15279_v40  ;;  %11544 = vmatpush3.msra.mxu1 %v15280_v2 }
 0x734   :  { %11507 = vmatpush3.msra.mxu0 %v15281_v52  ;;  %11545 = vmatprep.subr.mxu1 %v15282_v36 }
 0x735   :  { %11508 = vmatprep.subr.mxu0 %v15283_v62  ;;  %11546 = vmatpush3.msra.mxu1 %v15284_v14 }
 0x736   :  { %11509 = vmatpush3.msra.mxu0 %v15285_v8  ;;  %6862 = vmatmul.mubr.f32.vlgmr.msra.gmra.mxu1 %v15286_v10 }
 0x737   :  { %11510 = vmatprep.subr.mxu0 %v15287_v63 }
 0x738   :  { %11511 = vmatpush3.msra.mxu0 %v15288_v24 }
 0x739   :  { %6792 = vmatmul.mubr.f32.vlgmr.msra.gmra.mxu0 %v15289_v34 }
 0x7d4   :  { %v11474_v59 = vpop.f32.mrf.mxu1 }
 0x7d5   :  { %v11436_v26 = vpop.f32.mrf.mxu0 }
 0x7d6   :  { %v11475_v31 = vpop.f32.mrf.mxu1 }
 0x7d7   :  { %v11476_v27 = vadd.f32 %v11475_v31, %v11474_v59  ;;  %v11437_v9 = vpop.f32.mrf.mxu0  ;;  %v6885_v59 = vld [vmem:[%s15298_s10 + $0x10] sm:$0xff] }
 0x7d8   :  { %v11477_v60 = vpop.f32.mrf.mxu1  ;;  %v11438_v19 = vadd.f32 %v11437_v9, %v11436_v26  ;;  %11614 = vmatprep.mubr.msk.f32.mxu0 %vm1027_vm11, %v6885_v59  ;;  %v6883_v9 = vld [vmem:[%s15298_s10] sm:$0xff]  ;;  %v6886_v59 = vld [vmem:[%s15298_s10 + $0x18] sm:$0xff] }
 0x7d9   :  { %11621 = vmatprep.mubr.msk.f32.mxu1 %vm1027_vm11, %v6883_v9 }
 0x7da   :  { %v6719_v57 = vadd.f32 %v11476_v27, %v11438_v19  ;;  %v11478_v42 = vpop.f32.mrf.mxu1 }
 0x7db   :  { %v11479_v32 = vadd.f32 %v11478_v42, %v11477_v60  ;;  %v6884_v60 = vld [vmem:[%s15298_s10 + $0x8] sm:$0xff] }
 0x7dc   :  { %v6867_v53 = vmax.f32 %v6719_v57, 0.0 }
 0x7dd   :  { %v11439_v3 = vpop.f32.mrf.mxu0 }
 0x7de   :  { %6871 = vrot.lane.b32.xlu1 %v6867_v53, %s12234_s15  ;;  %v6889_v53 = vld [vmem:[%s15298_s10 + $0x30] sm:$0xff] }
 0x7df   :  { %v11440_v12 = vpop.f32.mrf.mxu0 }
 0x7e0   :  { %v11441_v61 = vadd.f32 %v11440_v12, %v11439_v3 }
 0x7e2   :  { %v6724_v1 = vadd.f32 %v11479_v32, %v11441_v61  ;;  %7108 = vrot.lane.b32.xlu1 %v14080_v54, %s12220_s12 }
 0x7e4   :  { %v6868_v13 = vmax.f32 %v6724_v1, 0.0 }
 0x7e6   :  { %6873 = vrot.lane.b32.xlu0 %v6868_v13, %s12234_s15  ;;  %7331 = vrot.lane.b32.xlu1 %v7329_v17, %s12234_s15 }
 0x7ea   :  { %6918 = vrot.lane.b32.xlu0 %v6916_v15, %s12219_s17  ;;  %7555 = vrot.lane.b32.xlu1 %v7553_v35, %s12221_s7 }
 0x7ee   :  { %7219 = vrot.lane.b32.xlu0 %v7217_v7, %s12201_s29  ;;  %7777 = vrot.lane.b32.xlu1 %v11364_v37, %s12222_s11 }
 0x7f2   :  { %7443 = vrot.lane.b32.xlu0 %v7441_v45, %s12235_s28 }
 0x7f6   :  { %7666 = vrot.lane.b32.xlu0 %v7664_v18, %s12218_s4 }
 0x850   :  { %v6872_v0 = vpop.permute.xlu1 %6871 }
 0x851   :  { %6878 = vst.msk [vmem:[#allocation4] sm:$0xff] %vm6877_vm9, %v6872_v0 }
 0x852   :  { %6880 = vst.msk [vmem:[#allocation4 + $0x8] sm:$0xff] %vm6879_vm13, %v6872_v0 }
 0x854   :  { %v7109_v38 = vpop.permute.xlu1 %7108 }
 0x858   :  { %v6874_v11 = vpop.permute.xlu0 %6873  ;;  %v14104_v20 = vld [vmem:[#allocation4] sm:$0xff]  ;;  %v7332_v44 = vpop.permute.xlu1 %7331 }
 0x859   :  { %6881 = vst.msk [vmem:[#allocation4 + $0x10] sm:$0xff] %vm6877_vm9, %v6874_v11  ;;  %v14102_v58 = vld [vmem:[#allocation4 + $0x8] sm:$0xff]  ;;  %v7111_v46 = vmul.f32 %v7109_v38, %v14104_v20  ;;  %v6909_v49 = vmul.f32 %v6908_v16, %v14104_v20  ;;  %v7334_v52 = vmul.f32 %v7332_v44, %v14104_v20 }
 0x85a   :  { %6882 = vst.msk [vmem:[#allocation4 + $0x18] sm:$0xff] %vm6879_vm13, %v6874_v11  ;;  %v7112_v39 = vmul.f32 %v7109_v38, %v14102_v58  ;;  %v7335_v40 = vmul.f32 %v7332_v44, %v14102_v58 }
 0x85c   :  { %v6919_v30 = vpop.permute.xlu0 %6918  ;;  %v7556_v62 = vpop.permute.xlu1 %7555 }
 0x85d   :  { %v6922_v5 = vmul.f32 %v6919_v30, %v14102_v58  ;;  %v6921_v48 = vmul.f32 %v6919_v30, %v14104_v20  ;;  %v7559_v8 = vmul.f32 %v7556_v62, %v14102_v58  ;;  %v7558_v24 = vmul.f32 %v7556_v62, %v14104_v20 }
 0x85f   :  { %6931 = vrot.lane.b32.xlu1 %v6922_v5, %s12226_s13  ;;  %6929 = vrot.lane.b32.xlu0 %v6921_v48, %s12226_s13  ;;  %v7884_v5 = vld [vmem:[#allocation14 + $0x8] sm:$0xff]  ;;  %v7899_v48 = vld [vmem:[#allocation20] sm:$0xff] }
 0x860   :  { %v14111_v21 = vld [vmem:[#allocation4 + $0x10] sm:$0xff]  ;;  %v7220_v4 = vpop.permute.xlu0 %7219  ;;  %v7778_v7 = vpop.permute.xlu1 %7777 }
 0x861   :  { %v6910_v25 = vmul.f32 %v6908_v16, %v14111_v21  ;;  %v7223_v47 = vmul.f32 %v7220_v4, %v14102_v58  ;;  %v7222_v56 = vmul.f32 %v7220_v4, %v14104_v20  ;;  %v6912_v27 = vld [vmem:[#allocation4 + $0x18] sm:$0xff]  ;;  %v6923_v57 = vmul.f32 %v6919_v30, %v14111_v21 }
 0x862   :  { %v6924_v19 = vmul.f32 %v6919_v30, %v6912_v27  ;;  %v7114_v42 = vmul.f32 %v7109_v38, %v6912_v27  ;;  %v7113_v23 = vmul.f32 %v7109_v38, %v14111_v21  ;;  %v7225_v3 = vmul.f32 %v7220_v4, %v6912_v27  ;;  %v7900_v30 = vld [vmem:[#allocation20 + $0x8] sm:$0xff]  ;;  %v7883_v16 = vld [vmem:[#allocation14] sm:$0xff]  ;;  %v7997_v38 = vld [vmem:[#allocation23] sm:$0xff] }
 0x863   :  { %11617 = vmatprep.subr.mxu1 %v6910_v25  ;;  %7121 = vrot.lane.b32.xlu1 %v7112_v39, %s12225_s3  ;;  %v7224_v32 = vmul.f32 %v7220_v4, %v14111_v21  ;;  %v7337_v12 = vmul.f32 %v7332_v44, %v6912_v27  ;;  %v7336_v61 = vmul.f32 %v7332_v44, %v14111_v21 }
 0x864   :  { %7119 = vrot.lane.b32.xlu0 %v7111_v46, %s12225_s3  ;;  %11618 = vmatpush3.msra.mxu1 %v6910_v25  ;;  %v7444_v2 = vpop.permute.xlu0 %7443  ;;  %v7561_v13 = vmul.f32 %v7556_v62, %v6912_v27  ;;  %v7560_v15 = vmul.f32 %v7556_v62, %v14111_v21  ;;  %v7783_v45 = vmul.f32 %v7778_v7, %v6912_v27 }
 0x865   :  { %11619 = vmatprep.subr.mxu1 %v6909_v49  ;;  %v7447_v36 = vmul.f32 %v7444_v2, %v14102_v58  ;;  %v7446_v14 = vmul.f32 %v7444_v2, %v14104_v20  ;;  %v7449_v1 = vmul.f32 %v7444_v2, %v6912_v27  ;;  %v7448_v17 = vmul.f32 %v7444_v2, %v14111_v21 }
 0x866   :  { %11620 = vmatpush3.msra.mxu1 %v6909_v49  ;;  %v7782_v18 = vmul.f32 %v7778_v7, %v14111_v21  ;;  %v7781_v0 = vmul.f32 %v7778_v7, %v14102_v58  ;;  %v7780_v11 = vmul.f32 %v7778_v7, %v14104_v20  ;;  %v6895_v7 = vld [vmem:[%s15298_s10 + $0x60] sm:$0xff] }
 0x867   :  { %7232 = vrot.lane.b32.xlu1 %v7223_v47, %s12236_s30  ;;  %11622 = vmatmul.mubr.msk.f32.vlgmr.msra.gmra.mxu1 %vm1027_vm11, %v6884_v60 }
 0x868   :  { %7230 = vrot.lane.b32.xlu0 %v7222_v56, %s12236_s30  ;;  %v7667_v63 = vpop.permute.xlu0 %7666  ;;  %11635 = vmatprep.mubr.msk.f32.mxu1 %vm1027_vm11, %v6889_v53 }
 0x869   :  { %v7670_v26 = vmul.f32 %v7667_v63, %v14102_v58  ;;  %v7669_v31 = vmul.f32 %v7667_v63, %v14104_v20  ;;  %v7672_v35 = vmul.f32 %v7667_v63, %v6912_v27  ;;  %v7671_v37 = vmul.f32 %v7667_v63, %v14111_v21  ;;  %v8149_v21 = vld [vmem:[#allocation29] sm:$0xff] }
 0x86b   :  { %7344 = vrot.lane.b32.xlu1 %v7335_v40, %s12237_s23 }
 0x86c   :  { %7342 = vrot.lane.b32.xlu0 %v7334_v52, %s12237_s23 }
 0x86f   :  { %7456 = vrot.lane.b32.xlu1 %v7447_v36, %s12238_s18 }
 0x870   :  { %7454 = vrot.lane.b32.xlu0 %v7446_v14, %s12238_s18 }
 0x873   :  { %7568 = vrot.lane.b32.xlu1 %v7559_v8, %s12227_s26 }
 0x874   :  { %7566 = vrot.lane.b32.xlu0 %v7558_v24, %s12227_s26 }
 0x877   :  { %7679 = vrot.lane.b32.xlu1 %v7670_v26, %s12228_s19 }
 0x878   :  { %7677 = vrot.lane.b32.xlu0 %v7669_v31, %s12228_s19  ;;  %v6887_v31 = vld [vmem:[%s15298_s10 + $0x20] sm:$0xff] }
 0x87b   :  { %6935 = vrot.lane.b32.xlu1 %v6924_v19, %s12226_s13  ;;  %v6888_v19 = vld [vmem:[%s15298_s10 + $0x28] sm:$0xff] }
 0x87c   :  { %6933 = vrot.lane.b32.xlu0 %v6923_v57, %s12226_s13 }
 0x87f   :  { %7125 = vrot.lane.b32.xlu1 %v7114_v42, %s12225_s3  ;;  %v6891_v42 = vld [vmem:[%s15298_s10 + $0x40] sm:$0xff] }
 0x880   :  { %7123 = vrot.lane.b32.xlu0 %v7113_v23, %s12225_s3 }
 0x883   :  { %7236 = vrot.lane.b32.xlu1 %v7225_v3, %s12236_s30 }
 0x884   :  { %7234 = vrot.lane.b32.xlu0 %v7224_v32, %s12236_s30  ;;  %v6890_v32 = vld [vmem:[%s15298_s10 + $0x38] sm:$0xff] }
 0x887   :  { %7348 = vrot.lane.b32.xlu1 %v7337_v12, %s12237_s23 }
 0x888   :  { %7346 = vrot.lane.b32.xlu0 %v7336_v61, %s12237_s23  ;;  %v6893_v61 = vld [vmem:[%s15298_s10 + $0x50] sm:$0xff] }
 0x88b   :  { %7460 = vrot.lane.b32.xlu1 %v7449_v1, %s12238_s18 }
 0x88c   :  { %7458 = vrot.lane.b32.xlu0 %v7448_v17, %s12238_s18 }
 0x88f   :  { %7572 = vrot.lane.b32.xlu1 %v7561_v13, %s12227_s26 }
 0x890   :  { %7570 = vrot.lane.b32.xlu0 %v7560_v15, %s12227_s26  ;;  %v6892_v15 = vld [vmem:[%s15298_s10 + $0x48] sm:$0xff] }
 0x893   :  { %7683 = vrot.lane.b32.xlu1 %v7672_v35, %s12228_s19 }
 0x894   :  { %7681 = vrot.lane.b32.xlu0 %v7671_v37, %s12228_s19 }
 0x897   :  { %7794 = vrot.lane.b32.xlu1 %v7783_v45, %s12229_s0  ;;  %v11547_v45 = vpop.f32.mrf.mxu1 }
 0x898   :  { %7792 = vrot.lane.b32.xlu0 %v7782_v18, %s12229_s0  ;;  %v11512_v18 = vpop.f32.mrf.mxu0 }
 0x89b   :  { %7790 = vrot.lane.b32.xlu1 %v7781_v0, %s12229_s0 }
 0x89c   :  { %7788 = vrot.lane.b32.xlu0 %v7780_v11, %s12229_s0 }
 0x89f   :  { %7908 = vperm.xlu1 %11777, %v7900_v30   ;;  %v6894_v30 = vld [vmem:[%s15298_s10 + $0x58] sm:$0xff] }
 0x8a0   :  { %7892 = vperm.xlu0 %11776, %v7884_v5  }
 0x8a3   :  { %7903 = vperm.xlu1 %11777, %v7899_v48   ;;  %v6897_v48 = vld [vmem:[%s15298_s10 + $0x70] sm:$0xff] }
 0x8a4   :  { %7887 = vperm.xlu0 %11776, %v7883_v16  }
 0x8a7   :  { %8000 = vperm.xlu1 %11777, %v7997_v38   ;;  %v11548_v38 = vpop.f32.mrf.mxu1 }
 0x8a8   :  { %8152 = vperm.xlu0 %11776, %v8149_v21   ;;  %v11513_v21 = vpop.f32.mrf.mxu0 }
 0x8d1   :  { %v6930_v25 = vpop.permute.xlu0 %6929  ;;  %v6932_v58 = vpop.permute.xlu1 %6931 }
 0x8d2   :  { %v6937_v63 = vsel %vm462_vm14, %v6930_v25, %v6932_v58 }
 0x8d5   :  { %v7122_v39 = vpop.permute.xlu1 %7121 }
 0x8d6   :  { %v7120_v20 = vpop.permute.xlu0 %7119 }
 0x8d7   :  { %v7127_v9 = vsel %vm15300_vm12, %v7120_v20, %v7122_v39  ;;  %vm15078_vm12 = vcmask 965632   ;;  %v6896_v39 = vld [vmem:[%s15298_s10 + $0x68] sm:$0xff] }
 0x8d9   :  { %v7233_v4 = vpop.permute.xlu1 %7232 }
 0x8da   :  { %v7231_v46 = vpop.permute.xlu0 %7230 }
 0x8db   :  { %v7239_v53 = vsel %vm15080_vm4, %v7231_v46, %v7233_v4  ;;  %v6899_v4 = vld [vmem:[%s15298_s10 + $0x80] sm:$0xff]  ;;  %v11549_v46 = vadd.f32 %v11548_v38, %v11547_v45  ;;  %v8268_v45 = vld [vmem:[#allocation34 + $0x140] sm:$0xff] }
 0x8dc   :  { %v8257_v38 = vld [vmem:[#allocation34 + $0xe8] sm:$0xff] }
 0x8dd   :  { %v7345_v49 = vpop.permute.xlu1 %7344 }
 0x8de   :  { %v7343_v47 = vpop.permute.xlu0 %7342 }
 0x8e1   :  { %v14183_v44 = vpop.permute.xlu1 %7456 }
 0x8e2   :  { %v14185_v56 = vpop.permute.xlu0 %7454 }
 0x8e3   :  { %v7463_v0 = vsel %vm15078_vm12, %v14185_v56, %v14183_v44 }
 0x8e5   :  { %v14187_v40 = vpop.permute.xlu1 %7568 }
 0x8e6   :  { %v14189_v2 = vpop.permute.xlu0 %7566 }
 0x8e7   :  { %v7574_v25 = vsel %vm1052_vm3, %v14189_v2, %v14187_v40  ;;  %v6898_v40 = vld [vmem:[%s15298_s10 + $0x78] sm:$0xff] }
 0x8e9   :  { %v14191_v52 = vpop.permute.xlu1 %7679 }
 0x8ea   :  { %v14193_v36 = vpop.permute.xlu0 %7677 }
 0x8ed   :  { %v6936_v62 = vpop.permute.xlu1 %6935 }
 0x8ee   :  { %v6934_v14 = vpop.permute.xlu0 %6933 }
 0x8ef   :  { %v6938_v8 = vsel %vm462_vm14, %v6934_v14, %v6936_v62 }
 0x8f0   :  { %11610 = vmatprep.subr.mxu0 %v6938_v8 }
 0x8f1   :  { %11611 = vmatpush3.msra.mxu0 %v6938_v8  ;;  %v7126_v24 = vpop.permute.xlu1 %7125  ;;  %v7897_v8 = vld [vmem:[#allocation19] sm:$0xff] }
 0x8f2   :  { %v7124_v26 = vpop.permute.xlu0 %7123  ;;  %11612 = vmatprep.subr.mxu0 %v6937_v63 }
 0x8f3   :  { %11613 = vmatpush3.msra.mxu0 %v6937_v63  ;;  %v7128_v27 = vsel %vm15299_vm7, %v7124_v26, %v7126_v24  ;;  %vm15079_vm7 = vcmask 973824   ;;  %v7996_v26 = vld [vmem:[#allocation22] sm:$0xff] }
 0x8f4   :  { %11624 = vmatprep.subr.mxu0 %v7128_v27  ;;  %11615 = vmatmul.mubr.msk.f32.vlgmr.msra.gmra.mxu0 %vm1027_vm11, %v6886_v59  ;;  %v7351_v17 = vsel %vm15079_vm7, %v7343_v47, %v7345_v49  ;;  %v11514_v49 = vadd.f32 %v11513_v21, %v11512_v18  ;;  %v6900_v59 = vld [vmem:[%s15298_s10 + $0x88] sm:$0xff]  ;;  %v8256_v21 = vld [vmem:[#allocation34 + $0xe0] sm:$0xff] }
 0x8f5   :  { %11625 = vmatpush3.msra.mxu0 %v7128_v27  ;;  %v7237_v60 = vpop.permute.xlu1 %7236  ;;  %11628 = vmatprep.mubr.msk.f32.mxu0 %vm1027_vm11, %v6887_v31 }
 0x8f6   :  { %v7235_v57 = vpop.permute.xlu0 %7234  ;;  %11626 = vmatprep.subr.mxu0 %v7127_v9  ;;  %v6864_v62 = vadd.f32 %v11549_v46, %v11514_v49 }
 0x8f7   :  { %11627 = vmatpush3.msra.mxu0 %v7127_v9  ;;  %v7240_v23 = vsel %vm15080_vm4, %v7235_v57, %v7237_v60  ;;  %v14299_v9 = vld [vmem:[#allocation8 + $0x18] sm:$0xff]  ;;  %v8289_v60 = vld [vmem:[#allocation34 + $0x1e8] sm:$0xff]  ;;  %vm15304_vm4 = vcmask 269312  }
 0x8f8   :  { %11631 = vmatprep.subr.mxu1 %v7240_v23  ;;  %11629 = vmatmul.mubr.msk.f32.vlgmr.msra.gmra.mxu0 %vm1027_vm11, %v6888_v19  ;;  %v8288_v19 = vld [vmem:[#allocation34 + $0x1e0] sm:$0xff]  ;;  %v8285_v57 = vld [vmem:[#allocation34 + $0x1c8] sm:$0xff]  ;;  %v9300_v49 = vrot.slane %v14299_v9, %v15291_v55 }
 0x8f9   :  { %11632 = vmatpush3.msra.mxu1 %v7240_v23  ;;  %v7349_v3 = vpop.permute.xlu1 %7348  ;;  %11642 = vmatprep.mubr.msk.f32.mxu0 %vm1027_vm11, %v6891_v42  ;;  %v8520_v23 = vrot.slane %v14299_v9, %v15292_v50 }
 0x8fa   :  { %v7347_v12 = vpop.permute.xlu0 %7346  ;;  %11633 = vmatprep.subr.mxu1 %v7239_v53 }
 0x8fb   :  { %11634 = vmatpush3.msra.mxu1 %v7239_v53  ;;  %v7352_v1 = vsel %vm15079_vm7, %v7347_v12, %v7349_v3  ;;  %v8284_v53 = vld [vmem:[#allocation34 + $0x1c0] sm:$0xff]  ;;  %v8281_v3 = vld [vmem:[#allocation34 + $0x1a8] sm:$0xff] }
 0x8fc   :  { %11638 = vmatprep.subr.mxu0 %v7352_v1  ;;  %11636 = vmatmul.mubr.msk.f32.vlgmr.msra.gmra.mxu1 %vm1027_vm11, %v6890_v32  ;;  %v8280_v32 = vld [vmem:[#allocation34 + $0x1a0] sm:$0xff] }
 0x8fd   :  { %11639 = vmatpush3.msra.mxu0 %v7352_v1  ;;  %v7461_v13 = vpop.permute.xlu1 %7460  ;;  %11649 = vmatprep.mubr.msk.f32.mxu1 %vm1027_vm11, %v6893_v61  ;;  %v8277_v1 = vld [vmem:[#allocation34 + $0x188] sm:$0xff] }
 0x8fe   :  { %v7459_v35 = vpop.permute.xlu0 %7458  ;;  %11640 = vmatprep.subr.mxu0 %v7351_v17 }
 0x8ff   :  { %11641 = vmatpush3.msra.mxu0 %v7351_v17  ;;  %v7464_v37 = vsel %vm15078_vm12, %v7459_v35, %v7461_v13  ;;  %vm15301_vm12 = vcmask 908288   ;;  %v8276_v17 = vld [vmem:[#allocation34 + $0x180] sm:$0xff]  ;;  %v8273_v13 = vld [vmem:[#allocation34 + $0x168] sm:$0xff]  ;;  %v8874_v35 = vrot.slane %v14299_v9, %v15290_v41 }
 0x900   :  { %11645 = vmatprep.subr.mxu1 %v7464_v37  ;;  %11643 = vmatmul.mubr.msk.f32.vlgmr.msra.gmra.mxu0 %vm1027_vm11, %v6892_v15  ;;  %vm15302_vm7 = vmmov %vm15301_vm12 }
 0x901   :  { %11646 = vmatpush3.msra.mxu1 %v7464_v37  ;;  %v7573_v11 = vpop.permute.xlu1 %7572  ;;  %11656 = vmatprep.mubr.msk.f32.mxu0 %vm1027_vm11, %v6895_v7  ;;  %v7685_v44 = vsel %vm15302_vm7, %v14193_v36, %v14191_v52  ;;  %v7898_v36 = vld [vmem:[#allocation19 + $0x8] sm:$0xff]  ;;  %vm12239_vm7 = vmmov 0   ;;  %v8272_v7 = vld [vmem:[#allocation34 + $0x160] sm:$0xff] }
 0x902   :  { %v7571_v5 = vpop.permute.xlu0 %7570  ;;  %11647 = vmatprep.subr.mxu1 %v7463_v0  ;;  %v8269_v37 = vld [vmem:[#allocation34 + $0x148] sm:$0xff] }
 0x903   :  { %11648 = vmatpush3.msra.mxu1 %v7463_v0  ;;  %v7575_v16 = vsel %vm1052_vm3, %v7571_v5, %v7573_v11  ;;  %v8265_v11 = vld [vmem:[#allocation34 + $0x128] sm:$0xff] }
 0x904   :  { %11652 = vmatprep.subr.mxu0 %v7575_v16  ;;  %11650 = vmatmul.mubr.msk.f32.vlgmr.msra.gmra.mxu1 %vm1027_vm11, %v6894_v30  ;;  %v8261_v30 = vld [vmem:[#allocation34 + $0x108] sm:$0xff] }
 0x905   :  { %11653 = vmatpush3.msra.mxu0 %v7575_v16  ;;  %v7684_v58 = vpop.permute.xlu1 %7683  ;;  %11663 = vmatprep.mubr.msk.f32.mxu1 %vm1027_vm11, %v6897_v48  ;;  %v9087_v48 = vrot.slane %v14299_v9, %v15294_v28  ;;  %v8260_v16 = vld [vmem:[#allocation34 + $0x100] sm:$0xff] }
 0x906   :  { %v7682_v20 = vpop.permute.xlu0 %7681  ;;  %11654 = vmatprep.subr.mxu0 %v7574_v25 }
 0x907   :  { %11655 = vmatpush3.msra.mxu0 %v7574_v25  ;;  %v7686_v47 = vsel %vm15301_vm12, %v7682_v20, %v7684_v58  ;;  %v8252_v20 = vld [vmem:[#allocation34 + $0xc0] sm:$0xff]  ;;  %vm15303_vm12 = vcmask 261120  }
 0x908   :  { %11659 = vmatprep.subr.mxu1 %v7686_v47  ;;  %11657 = vmatmul.mubr.msk.f32.vlgmr.msra.gmra.mxu0 %vm1027_vm11, %v6896_v39  ;;  %v8253_v39 = vld [vmem:[#allocation34 + $0xc8] sm:$0xff] }
 0x909   :  { %11660 = vmatpush3.msra.mxu1 %v7686_v47  ;;  %v7795_v56 = vpop.permute.xlu1 %7794  ;;  %11670 = vmatprep.mubr.msk.f32.mxu0 %vm1027_vm11, %v6899_v4  ;;  %v8249_v4 = vld [vmem:[#allocation34 + $0xa8] sm:$0xff]  ;;  %v8248_v47 = vld [vmem:[#allocation34 + $0xa0] sm:$0xff] }
 0x90a   :  { %v7793_v2 = vpop.permute.xlu0 %7792  ;;  %11661 = vmatprep.subr.mxu1 %v7685_v44 }
 0x90b   :  { %11662 = vmatpush3.msra.mxu1 %v7685_v44  ;;  %v7797_v14 = vsel %vm1486_vm6, %v7793_v2, %v7795_v56  ;;  %v8245_v44 = vld [vmem:[#allocation34 + $0x88] sm:$0xff]  ;;  %v8244_v56 = vld [vmem:[#allocation34 + $0x80] sm:$0xff] }
 0x90c   :  { %11664 = vmatmul.mubr.msk.f32.vlgmr.msra.gmra.mxu1 %vm1027_vm11, %v6898_v40  ;;  %11666 = vmatprep.subr.mxu0 %v7797_v14 }
 0x90d   :  { %11673 = vmatprep.subr.mxu1 %v6864_v62  ;;  %11667 = vmatpush3.msra.mxu0 %v7797_v14  ;;  %v7791_v52 = vpop.permute.xlu1 %7790  ;;  %v8240_v14 = vld [vmem:[#allocation34 + $0x60] sm:$0xff] }
 0x90e   :  { %11674 = vmatpush3.msra.mxu1 %v6864_v62  ;;  %v7789_v63 = vpop.permute.xlu0 %7788  ;;  %11675 = vmatprep.mubr.msk.f32.mxu1 %vm2447_vm2, %v7897_v8  ;;  %v8241_v62 = vld [vmem:[#allocation34 + $0x68] sm:$0xff] }
 0x90f   :  { %8107 = vmatprep.subr.mxu1 %v15233_v29  ;;  %v7796_v24 = vsel %vm1486_vm6, %v7789_v63, %v7791_v52  ;;  %v14279_v29 = vld [vmem:[#allocation5] sm:$0xff]  ;;  %v8236_v63 = vld [vmem:[#allocation34 + $0x40] sm:$0xff] }
 0x910   :  { %11668 = vmatprep.subr.mxu0 %v7796_v24  ;;  %11676 = vmatmul.mubr.msk.f32.vlgmr.msra.gmra.mxu1 %vm2447_vm2, %v7898_v36  ;;  %v8237_v8 = vld [vmem:[#allocation34 + $0x48] sm:$0xff]  ;;  %v9513_v36 = vrot.slane %v14299_v9, %v15295_v22 }
 0x911   :  { %8108 = vmatpush1.msra.mxu1 %v15286_v10  ;;  %11669 = vmatpush3.msra.mxu0 %v7796_v24  ;;  %v14291_v10 = vld [vmem:[#allocation8 + $0x10] sm:$0xff]  ;;  %v8233_v24 = vld [vmem:[#allocation34 + $0x28] sm:$0xff] }
 0x912   :  { %11671 = vmatmul.mubr.msk.f32.vlgmr.msra.gmra.mxu0 %vm1027_vm11, %v6900_v59  ;;  %8036 = vmatprep.subr.mxu0 %v15238_v33  ;;  %v14289_v33 = vld [vmem:[#allocation8] sm:$0xff]  ;;  %v8516_v42 = vrot.slane %v14291_v10, %v15292_v50  ;;  %v8870_v15 = vrot.slane %v14291_v10, %v15290_v41  ;;  %v9083_v5 = vrot.slane %v14291_v10, %v15294_v28 }
 0x913   :  { %8037 = vmatpush1.msra.mxu0 %v15289_v34  ;;  %8141 = vmatprep.mubr.f32.mxu1 %v14279_v29  ;;  %v14293_v34 = vld [vmem:[#allocation8 + $0x8] sm:$0xff]  ;;  %v8508_v31 = vrot.slane %v14289_v33, %v15292_v50  ;;  %v8862_v12 = vrot.slane %v14289_v33, %v15290_v41  ;;  %v9075_v18 = vrot.slane %v14289_v33, %v15294_v28 }
 0x914   :  { %11370 = vmatmul.mubr.msk.f32.vlgmr.msra.gmra.mxu1 %vm2447_vm2, %v7996_v26  ;;  %8070 = vmatprep.mubr.f32.mxu0 %v14279_v29  ;;  %v8512_v27 = vrot.slane %v14293_v34, %v15292_v50  ;;  %v8866_v61 = vrot.slane %v14293_v34, %v15290_v41  ;;  %v9079_v0 = vrot.slane %v14293_v34, %v15294_v28  ;;  %v8264_v41 = vld [vmem:[#allocation34 + $0x120] sm:$0xff] }
 0x915   :  { %11678 = vmatprep.subr.mxu0 %v14279_v29  ;;  %8356 = vmatprep.mubr.f32.mxu1 %v14279_v29  ;;  %v9288_v25 = vrot.slane %v14289_v33, %v15291_v55  ;;  %v9292_v58 = vrot.slane %v14293_v34, %v15291_v55  ;;  %v9296_v46 = vrot.slane %v14291_v10, %v15291_v55 }
 0x916   :  { %11369 = vmatmul.mubr.msk.f32.vlgmr.msra.gmra.mxu0 %vm2447_vm2, %v7996_v26  ;;  %8292 = vmatprep.subr.mxu1 %v8289_v60  ;;  %v9501_v40 = vrot.slane %v14289_v33, %v15295_v22  ;;  %v9505_v2 = vrot.slane %v14293_v34, %v15295_v22  ;;  %v9509_v52 = vrot.slane %v14291_v10, %v15295_v22 }
 0x917   :  { %11682 = vmatprep.mubr.msk.f32.mxu0 %vm12239_vm7, %v14279_v29  ;;  %8525 = vrot.lane.b32.xlu0 %v8508_v31, %s12219_s17  ;;  %v9714_v59 = vrot.slane %v14289_v33, %v15293_v6  ;;  %v9718_v26 = vrot.slane %v14293_v34, %v15293_v6  ;;  %v9722_v31 = vrot.slane %v14291_v10, %v15293_v6 }
 0x918   :  { %8527 = vrot.lane.b32.xlu1 %v8512_v27, %s12219_s17  ;;  %8293 = vmatpush1.msra.mxu1 %v8288_v19  ;;  %v9726_v27 = vrot.slane %v14299_v9, %v15293_v6  ;;  %v9927_v60 = vrot.slane %v14289_v33, %v15296_v51  ;;  %v9931_v19 = vrot.slane %v14293_v34, %v15296_v51  ;;  %v11389_v33 = vld [vmem:[#allocation8 + $0x28] ss:$0 sm:$0xff]  ;;  %v11391_v34 = vld [vmem:[#allocation8 + $0x38] ss:$0 sm:$0xff] }
 0x919   :  { %8294 = vmatprep.subr.mxu1 %v8285_v57  ;;  %v9935_v57 = vrot.slane %v14291_v10, %v15296_v51 }
 0x91a   :  { %8295 = vmatpush1.msra.mxu1 %v8284_v53 }
 0x91b   :  { %8529 = vrot.lane.b32.xlu0 %v8516_v42, %s12219_s17  ;;  %8296 = vmatprep.subr.mxu1 %v8281_v3  ;;  %v9939_v42 = vrot.slane %v14299_v9, %v15296_v51 }
 0x91c   :  { %8531 = vrot.lane.b32.xlu1 %v8520_v23, %s12219_s17  ;;  %8297 = vmatpush1.msra.mxu1 %v8280_v32  ;;  %v11388_v23 = vld [vmem:[#allocation8 + $0x20] ss:$0 sm:$0xff] }
 0x91d   :  { %8298 = vmatprep.subr.mxu1 %v8277_v1 }
 0x91e   :  { %8299 = vmatpush1.msra.mxu1 %v8276_v17 }
 0x91f   :  { %8879 = vrot.lane.b32.xlu0 %v8862_v12, %s12220_s12  ;;  %8300 = vmatprep.subr.mxu1 %v8273_v13 }
 0x920   :  { %8881 = vrot.lane.b32.xlu1 %v8866_v61, %s12220_s12  ;;  %8301 = vmatpush1.msra.mxu1 %v8272_v7 }
 0x921   :  { %8302 = vmatprep.subr.mxu1 %v8269_v37 }
 0x922   :  { %8303 = vmatpush1.msra.mxu1 %v8268_v45 }
 0x923   :  { %8883 = vrot.lane.b32.xlu0 %v8870_v15, %s12220_s12  ;;  %8304 = vmatprep.subr.mxu1 %v8265_v11 }
 0x924   :  { %8885 = vrot.lane.b32.xlu1 %v8874_v35, %s12220_s12  ;;  %8305 = vmatpush1.msra.mxu1 %v8264_v41 }
 0x925   :  { %8306 = vmatprep.subr.mxu1 %v8261_v30 }
 0x926   :  { %8307 = vmatpush1.msra.mxu1 %v8260_v16 }
 0x927   :  { %9092 = vrot.lane.b32.xlu0 %v9075_v18, %s12221_s7  ;;  %8308 = vmatprep.subr.mxu1 %v8257_v38  ;;  %v11623_v10 = vpop.f32.mrf.mxu1 }
 0x928   :  { %9094 = vrot.lane.b32.xlu1 %v9079_v0, %s12221_s7  ;;  %8309 = vmatpush1.msra.mxu1 %v8256_v21 }
 0x929   :  { %8310 = vmatprep.subr.mxu1 %v8253_v39  ;;  %v7094_v9 = vpop.f32.mrf.mxu1 }
 0x92a   :  { %8311 = vmatpush1.msra.mxu1 %v8252_v20  ;;  %v7893_v20 = vpop.permute.xlu0 %7892 }
 0x92b   :  { %9096 = vrot.lane.b32.xlu0 %v9083_v5, %s12221_s7  ;;  %8312 = vmatprep.subr.mxu1 %v8249_v4 }
 0x92c   :  { %9098 = vrot.lane.b32.xlu1 %v9087_v48, %s12221_s7  ;;  %8313 = vmatpush1.msra.mxu1 %v8248_v47 }
 0x92d   :  { %8314 = vmatprep.subr.mxu1 %v8245_v44 }
 0x92e   :  { %8315 = vmatpush1.msra.mxu1 %v8244_v56 }
 0x92f   :  { %9305 = vrot.lane.b32.xlu0 %v9288_v25, %s12218_s4  ;;  %8316 = vmatprep.subr.mxu1 %v8241_v62 }
 0x930   :  { %9307 = vrot.lane.b32.xlu1 %v9292_v58, %s12218_s4  ;;  %8317 = vmatpush1.msra.mxu1 %v8240_v14  ;;  %v7909_v58 = vpop.permute.xlu1 %7908 }
 0x931   :  { %8318 = vmatprep.subr.mxu1 %v8237_v8  ;;  %v7888_v8 = vpop.permute.xlu0 %7887 }
 0x932   :  { %8319 = vmatpush1.msra.mxu1 %v8236_v63 }
 0x933   :  { %9309 = vrot.lane.b32.xlu0 %v9296_v46, %s12218_s4  ;;  %8320 = vmatprep.subr.mxu1 %v8233_v24 }
 0x934   :  { %9311 = vrot.lane.b32.xlu1 %v9300_v49, %s12218_s4 }
 0x937   :  { %9518 = vrot.lane.b32.xlu0 %v9501_v40, %s12222_s11 }
 0x938   :  { %9520 = vrot.lane.b32.xlu1 %v9505_v2, %s12222_s11 }
 0x93b   :  { %9522 = vrot.lane.b32.xlu0 %v9509_v52, %s12222_s11  ;;  %v7904_v52 = vpop.permute.xlu1 %7903 }
 0x93c   :  { %9524 = vrot.lane.b32.xlu1 %v9513_v36, %s12222_s11 }
 0x93f   :  { %9731 = vrot.lane.b32.xlu0 %v9714_v59, %s12196_s8 }
 0x940   :  { %9733 = vrot.lane.b32.xlu1 %v9718_v26, %s12196_s8 }
 0x943   :  { %9735 = vrot.lane.b32.xlu0 %v9722_v31, %s12196_s8 }
 0x944   :  { %9737 = vrot.lane.b32.xlu1 %v9726_v27, %s12196_s8  ;;  %v8148_v27 = vld [vmem:[#allocation28] sm:$0xff] }
 0x947   :  { %9944 = vrot.lane.b32.xlu0 %v9927_v60, %s12223_s27  ;;  %v8291_v60 = vld [vmem:[#allocation34 + $0x1f8] sm:$0xff] }
 0x948   :  { %9946 = vrot.lane.b32.xlu1 %v9931_v19, %s12223_s27  ;;  %v8290_v19 = vld [vmem:[#allocation34 + $0x1f0] sm:$0xff] }
 0x94b   :  { %9948 = vrot.lane.b32.xlu0 %v9935_v57, %s12223_s27  ;;  %v8287_v57 = vld [vmem:[#allocation34 + $0x1d8] sm:$0xff] }
 0x94c   :  { %9950 = vrot.lane.b32.xlu1 %v9939_v42, %s12223_s27  ;;  %v8286_v42 = vld [vmem:[#allocation34 + $0x1d0] sm:$0xff] }
 0x94f   :  { %10159 = vrot.lane.b32.xlu0 %v11389_v33, %s12224_s14  ;;  %v8283_v33 = vld [vmem:[#allocation34 + $0x1b8] sm:$0xff] }
 0x950   :  { %10157 = vrot.lane.b32.xlu1 %v11388_v23, %s12224_s14  ;;  %v8282_v23 = vld [vmem:[#allocation34 + $0x1b0] sm:$0xff] }
 0x953   :  { %10163 = vrot.lane.b32.xlu0 %v11391_v34, %s12224_s14  ;;  %v8279_v34 = vld [vmem:[#allocation34 + $0x198] sm:$0xff] }
 0x957   :  { %10557 = vrot.lane.b32.xlu0 %v14080_v54, %s12220_s12 }
 0x9b4   :  { %v11616_v53 = vpop.f32.mrf.mxu0 }
 0x9b5   :  { %v7100_v12 = vadd.f32 %v11623_v10, %v11616_v53  ;;  %v8278_v10 = vld [vmem:[#allocation34 + $0x190] sm:$0xff]  ;;  %v8275_v53 = vld [vmem:[#allocation34 + $0x178] sm:$0xff] }
 0x9b6   :  { %v7013_v3 = vpop.f32.mrf.mxu0 }
 0x9b7   :  { %v7095_v61 = vadd.f32 %v7094_v9, %v7013_v3  ;;  %v8274_v3 = vld [vmem:[#allocation34 + $0x170] sm:$0xff]  ;;  %v8271_v9 = vld [vmem:[#allocation34 + $0x158] sm:$0xff] }
 0x9b8   :  { %v11630_v32 = vpop.f32.mrf.mxu0 }
 0x9b9   :  { %v7213_v13 = vadd.f32 %v11630_v32, %v7100_v12  ;;  %v8270_v32 = vld [vmem:[#allocation34 + $0x150] sm:$0xff]  ;;  %v8267_v12 = vld [vmem:[#allocation34 + $0x138] sm:$0xff] }
 0x9ba   :  { %v7203_v17 = vpop.f32.mrf.mxu0 }
 0x9bb   :  { %v7212_v15 = vadd.f32 %v7203_v17, %v7095_v61  ;;  %v8266_v61 = vld [vmem:[#allocation34 + $0x130] sm:$0xff] }
 0x9bc   :  { %v11637_v1 = vpop.f32.mrf.mxu1  ;;  %v8262_v17 = vld [vmem:[#allocation34 + $0x110] sm:$0xff] }
 0x9bd   :  { %v7325_v37 = vadd.f32 %v11637_v1, %v7213_v13  ;;  %v8263_v1 = vld [vmem:[#allocation34 + $0x118] sm:$0xff] }
 0x9be   :  { %v7315_v35 = vpop.f32.mrf.mxu1  ;;  %v8259_v13 = vld [vmem:[#allocation34 + $0xf8] sm:$0xff] }
 0x9bf   :  { %v7324_v45 = vadd.f32 %v7315_v35, %v7212_v15  ;;  %v8258_v15 = vld [vmem:[#allocation34 + $0xf0] sm:$0xff]  ;;  %v8255_v35 = vld [vmem:[#allocation34 + $0xd8] sm:$0xff] }
 0x9c0   :  { %v11644_v7 = vpop.f32.mrf.mxu0 }
 0x9c1   :  { %v7437_v11 = vadd.f32 %v11644_v7, %v7325_v37  ;;  %v8254_v7 = vld [vmem:[#allocation34 + $0xd0] sm:$0xff]  ;;  %v8251_v37 = vld [vmem:[#allocation34 + $0xb8] sm:$0xff] }
 0x9c2   :  { %v7427_v0 = vpop.f32.mrf.mxu0 }
 0x9c3   :  { %v7436_v41 = vadd.f32 %v7427_v0, %v7324_v45  ;;  %v8250_v45 = vld [vmem:[#allocation34 + $0xb0] sm:$0xff] }
 0x9c4   :  { %v11651_v18 = vpop.f32.mrf.mxu1  ;;  %v8246_v0 = vld [vmem:[#allocation34 + $0x90] sm:$0xff] }
 0x9c5   :  { %v7549_v5 = vadd.f32 %v11651_v18, %v7437_v11  ;;  %v8247_v18 = vld [vmem:[#allocation34 + $0x98] sm:$0xff] }
 0x9c6   :  { %v7539_v54 = vpop.f32.mrf.mxu1  ;;  %v8243_v11 = vld [vmem:[#allocation34 + $0x78] sm:$0xff] }
 0x9c7   :  { %v7548_v48 = vadd.f32 %v7539_v54, %v7436_v41  ;;  %v8242_v41 = vld [vmem:[#allocation34 + $0x70] sm:$0xff]  ;;  %v8239_v54 = vld [vmem:[#allocation34 + $0x58] sm:$0xff] }
 0x9c8   :  { %v11658_v30 = vpop.f32.mrf.mxu0 }
 0x9c9   :  { %v7660_v21 = vadd.f32 %v11658_v30, %v7549_v5  ;;  %v8238_v30 = vld [vmem:[#allocation34 + $0x50] sm:$0xff]  ;;  %v8235_v5 = vld [vmem:[#allocation34 + $0x38] sm:$0xff] }
 0x9ca   :  { %v7650_v38 = vpop.f32.mrf.mxu0 }
 0x9cb   :  { %v7659_v39 = vadd.f32 %v7650_v38, %v7548_v48  ;;  %v8153_v48 = vpop.permute.xlu0 %8152  ;;  %v8232_v38 = vld [vmem:[#allocation34 + $0x20] sm:$0xff] }
 0x9cc   :  { %v11665_v16 = vpop.f32.mrf.mxu1  ;;  %8321 = vmatpush1.msra.mxu1 %v8232_v38 }
 0x9cd   :  { %v7771_v46 = vadd.f32 %v11665_v16, %v7660_v21  ;;  %v14389_v16 = vpop.permute.xlu1 %8000  ;;  %v8234_v21 = vld [vmem:[#allocation34 + $0x30] sm:$0xff] }
 0x9ce   :  { %v7761_v25 = vpop.f32.mrf.mxu1 }
 0x9cf   :  { %v7770_v44 = vadd.f32 %v7761_v25, %v7659_v39  ;;  %v8229_v25 = vld [vmem:[#allocation34 + $0x8] sm:$0xff]  ;;  %v8228_v39 = vld [vmem:[#allocation34] sm:$0xff] }
 0x9d0   :  { %v11677_v4 = vpop.f32.mrf.mxu1  ;;  %8322 = vmatprep.subr.mxu1 %v8229_v25 }
 0x9d1   :  { %v7989_v2 = vadd.f32 %v11677_v4, %v7909_v58  ;;  %v8231_v58 = vld [vmem:[#allocation34 + $0x18] sm:$0xff]  ;;  %v11390_v4 = vld [vmem:[#allocation8 + $0x30] ss:$0 sm:$0xff]  ;;  %8323 = vmatpush1.msra.mxu1 %v8228_v39 }
 0x9d2   :  { %v11672_v49 = vpop.f32.mrf.mxu0  ;;  %v7983_v56 = vpop.f32.mrf.mxu1  ;;  %10161 = vrot.lane.b32.xlu1 %v11390_v4, %s12224_s14 }
 0x9d3   :  { %v7882_v47 = vadd.f32 %v11672_v49, %v7771_v46  ;;  %v7984_v63 = vadd.f32 %v7983_v56, %v7904_v52  ;;  %v14391_v46 = vpop.permute.xlu0 %8525  ;;  %v14393_v49 = vpop.permute.xlu1 %8527 }
 0x9d4   :  { %v7872_v40 = vpop.f32.mrf.mxu0  ;;  %v8143_v38 = vpop.f32.mrf.mxu1 }
 0x9d5   :  { %v7896_v62 = vadd.f32 %v7893_v20, %v7882_v47  ;;  %v7881_v14 = vadd.f32 %v7872_v40, %v7770_v44  ;;  %v8230_v20 = vld [vmem:[#allocation34 + $0x10] sm:$0xff] }
 0x9d6   :  { %v14396_v47 = vld [vmem:[#allocation16] sm:$0xff] }
 0x9d7   :  { %v7993_v36 = vadd.f32 %v7989_v2, %v7896_v62  ;;  %v7895_v24 = vadd.f32 %v7888_v8, %v7881_v14  ;;  %v10391_v44 = vrot.slane %v14396_v47, %v15292_v50  ;;  %v14400_v56 = vpop.permute.xlu0 %8529  ;;  %v14402_v40 = vpop.permute.xlu1 %8531  ;;  %v10647_v2 = vrot.slane %v14396_v47, %v15294_v28 }
 0x9d9   :  { %v7995_v59 = vmax.f32 %v7993_v36, 0.0  ;;  %v7992_v26 = vadd.f32 %v7984_v63, %v7895_v24  ;;  %10393 = vrot.lane.b32.xlu1 %v10391_v44, %s12219_s17  ;;  %v8144_v44 = vadd.f32 %v8143_v38, %v14389_v16  ;;  %v10923_v38 = vrot.slane %v14396_v47, %v15293_v6 }
 0x9db   :  { %v7994_v31 = vmax.f32 %v7992_v26, 0.0  ;;  %11679 = vmatpush3.msra.mxu0 %v7995_v59  ;;  %v14407_v62 = vpop.permute.xlu0 %8879  ;;  %v14409_v14 = vpop.permute.xlu1 %8881 }
 0x9dc   :  { %11680 = vmatprep.subr.mxu0 %v14279_v29 }
 0x9dd   :  { %11681 = vmatpush3.msra.mxu0 %v7994_v31  ;;  %10649 = vrot.lane.b32.xlu1 %v10647_v2, %s12201_s29 }
 0x9de   :  { %11683 = vmatmul.mubr.msk.f32.vlgmr.msra.gmra.mxu0 %vm1027_vm11, %v8148_v27  ;;  %8363 = vmatprep.subr.mxu0 %v8291_v60 }
 0x9df   :  { %8364 = vmatpush1.msra.mxu0 %v8290_v19  ;;  %8427 = vmatprep.mubr.f32.mxu0 %v14279_v29  ;;  %v14412_v8 = vpop.permute.xlu0 %8883  ;;  %v14414_v52 = vpop.permute.xlu1 %8885 }
 0x9e0   :  { %8365 = vmatprep.subr.mxu0 %v8287_v57  ;;  %v14419_v50 = vsel %vm809_vm10, %v14409_v14, %v14412_v8 }
 0x9e1   :  { %8366 = vmatpush1.msra.mxu0 %v8286_v42 }
 0x9e2   :  { %8367 = vmatprep.subr.mxu0 %v8283_v33 }
 0x9e3   :  { %8368 = vmatpush1.msra.mxu0 %v8282_v23  ;;  %v14421_v36 = vpop.permute.xlu0 %9092  ;;  %v14423_v63 = vpop.permute.xlu1 %9094 }
 0x9e4   :  { %8369 = vmatprep.subr.mxu0 %v8279_v34 }
 0x9e5   :  { %8370 = vmatpush1.msra.mxu0 %v8278_v10 }
 0x9e6   :  { %8371 = vmatprep.subr.mxu0 %v8275_v53 }
 0x9e7   :  { %8372 = vmatpush1.msra.mxu0 %v8274_v3  ;;  %v14425_v28 = vpop.permute.xlu0 %9096  ;;  %v14427_v24 = vpop.permute.xlu1 %9098 }
 0x9e8   :  { %8373 = vmatprep.subr.mxu0 %v8271_v9  ;;  %v14432_v59 = vsel %vm1027_vm11, %v14423_v63, %v14425_v28 }
 0x9e9   :  { %8374 = vmatpush1.msra.mxu0 %v8270_v32 }
 0x9ea   :  { %8375 = vmatprep.subr.mxu0 %v8267_v12 }
 0x9eb   :  { %8376 = vmatpush1.msra.mxu0 %v8266_v61  ;;  %v14434_v26 = vpop.permute.xlu0 %9305  ;;  %v14436_v31 = vpop.permute.xlu1 %9307 }
 0x9ec   :  { %8377 = vmatprep.subr.mxu0 %v8263_v1 }
 0x9ed   :  { %8378 = vmatpush1.msra.mxu0 %v8262_v17 }
 0x9ee   :  { %8379 = vmatprep.subr.mxu0 %v8259_v13 }
 0x9ef   :  { %8380 = vmatpush1.msra.mxu0 %v8258_v15  ;;  %v14438_v27 = vpop.permute.xlu0 %9309  ;;  %v14440_v60 = vpop.permute.xlu1 %9311 }
 0x9f0   :  { %8381 = vmatprep.subr.mxu0 %v8255_v35  ;;  %v14445_v19 = vsel %vm348_vm5, %v14436_v31, %v14438_v27 }
 0x9f1   :  { %8382 = vmatpush1.msra.mxu0 %v8254_v7 }
 0x9f2   :  { %8383 = vmatprep.subr.mxu0 %v8251_v37 }
 0x9f3   :  { %8384 = vmatpush1.msra.mxu0 %v8250_v45  ;;  %v14447_v57 = vpop.permute.xlu0 %9518  ;;  %v14449_v42 = vpop.permute.xlu1 %9520 }
 0x9f4   :  { %8385 = vmatprep.subr.mxu0 %v8247_v18  ;;  %v8072_v45 = vpop.f32.mrf.mxu0 }
 0x9f5   :  { %8386 = vmatpush1.msra.mxu0 %v8246_v0 }
 0x9f6   :  { %8387 = vmatprep.subr.mxu0 %v8243_v11  ;;  %v8074_v18 = vpop.f32.mrf.mxu0 }
 0x9f7   :  { %8388 = vmatpush1.msra.mxu0 %v8242_v41  ;;  %v14451_v33 = vpop.permute.xlu0 %9522  ;;  %v14453_v23 = vpop.permute.xlu1 %9524 }
 0x9f8   :  { %8389 = vmatprep.subr.mxu0 %v8239_v54  ;;  %v14458_v34 = vsel %vm332_vm1, %v14449_v42, %v14451_v33 }
 0x9f9   :  { %8390 = vmatpush1.msra.mxu0 %v8238_v30 }
 0x9fa   :  { %8391 = vmatprep.subr.mxu0 %v8235_v5 }
 0x9fb   :  { %8392 = vmatpush1.msra.mxu0 %v8234_v21  ;;  %v14460_v10 = vpop.permute.xlu0 %9731  ;;  %v14462_v53 = vpop.permute.xlu1 %9733 }
 0x9fc   :  { %8393 = vmatprep.subr.mxu0 %v8231_v58  ;;  %v8145_v21 = vpop.f32.mrf.mxu1  ;;  %v8075_v58 = vadd.f32 %v8074_v18, %v14389_v16  ;;  %v10831_v18 = vrot.slane %v14396_v47, %v15295_v22 }
 0x9fd   :  { %8394 = vmatpush1.msra.mxu0 %v8230_v20 }
 0x9ff   :  { %v14464_v3 = vpop.permute.xlu0 %9735  ;;  %v14471_v32 = vpop.permute.xlu1 %9737 }
 0xa00   :  { %v14469_v9 = vsel %vm15303_vm12, %v14462_v53, %v14464_v3  ;;  %vm15305_vm12 = vcmask 277504  }
 0xa03   :  { %v14473_v12 = vpop.permute.xlu0 %9944  ;;  %v14477_v1 = vpop.permute.xlu1 %9946 }
 0xa07   :  { %v14475_v61 = vpop.permute.xlu0 %9948  ;;  %v14484_v13 = vpop.permute.xlu1 %9950 }
 0xa08   :  { %v14482_v17 = vsel %vm15304_vm4, %v14477_v1, %v14475_v61  ;;  %vm15306_vm4 = vcmask 261120  }
 0xa0b   :  { %v14486_v15 = vpop.permute.xlu1 %10157  ;;  %v14488_v35 = vpop.permute.xlu0 %10159 }
 0xa0f   :  { %v14500_v54 = vpop.permute.xlu0 %10163 }
 0xa13   :  { %v10558_v30 = vpop.permute.xlu0 %10557 }
 0xa44   :  { %v14490_v7 = vpop.permute.xlu1 %10161 }
 0xa45   :  { %v14495_v37 = vsel %vm15305_vm12, %v14488_v35, %v14490_v7 }
 0xa4b   :  { %v10394_v22 = vpop.permute.xlu1 %10393 }
 0xa9e   :  { %v8224_v0 = vpop.f32.mrf.mxu0 }
 0xa9f   :  { %v8225_v11 = vadd.f32 %v8224_v0, %v8153_v48  ;;  %v8073_v48 = vadd.f32 %v8072_v45, %v14389_v16  ;;  %v10739_v45 = vrot.slane %v14396_v47, %v15291_v55  ;;  %v11402_v55 = vld [vmem:[#allocation16 + $0x8] ss:$0 sm:$0xff] }
 0xaa0   :  { %v11684_v41 = vpop.f32.mrf.mxu0 }
 0xaa1   :  { %10365 = vrot.lane.b32.xlu0 %v8225_v11, %s12234_s15  ;;  %8357 = vmatmul.mubr.f32.vlgmr.msra.gmra.mxu1 %v8225_v11 }
 0xaa2   :  { %8428 = vmatmul.mubr.f32.vlgmr.msra.gmra.mxu0 %v8225_v11  ;;  %8636 = vmatprep.mubr.f32.mxu1 %v14279_v29  ;;  %v8146_v11 = vadd.f32 %v8145_v21, %v14389_v16  ;;  %v11015_v16 = vrot.slane %v14396_v47, %v15296_v51 }
 0xaa3   :  { %8707 = vmatprep.mubr.f32.mxu0 %v14279_v29 }
 0xb13   :  { %v10366_v5 = vpop.permute.xlu0 %10365 }
 0xb14   :  { %10368 = vst.msk [vmem:[#allocation5] sm:$0xff] %vm6877_vm9, %v10366_v5  ;;  %vm15307_vm9 = vcmask 269312  }
 0xb15   :  { %10369 = vst.msk [vmem:[#allocation5 + $0x8] sm:$0xff] %vm6879_vm13, %v10366_v5  ;;  %vm15309_vm13 = vmmov %vm15307_vm9 }
 0xb1b   :  { %v14523_v21 = vld [vmem:[#allocation5] sm:$0xff] }
 0xb1c   :  { %v10560_v51 = vmul.f32 %v10558_v30, %v14523_v21 }
 0xb61   :  { %v8358_v25 = vpop.f32.mrf.mxu1 }
 0xb62   :  { %v8434_v39 = vadd.f32 %v8358_v25, %v8073_v48  ;;  %v8429_v20 = vpop.f32.mrf.mxu0  ;;  %v14526_v48 = vld [vmem:[#allocation5 + $0x8] sm:$0xff]  ;;  %v10396_v25 = vmul.f32 %v10394_v22, %v14523_v21 }
 0xb63   :  { %v8360_v4 = vpop.f32.mrf.mxu1  ;;  %v8436_v41 = vadd.f32 %v8429_v20, %v8144_v44  ;;  %v10397_v6 = vmul.f32 %v10394_v22, %v14526_v48 }
 0xb64   :  { %v8435_v2 = vadd.f32 %v8360_v4, %v8075_v58  ;;  %8442 = vrot.lane.b32.xlu0 %v8434_v39, %s12218_s4  ;;  %v8431_v0 = vpop.f32.mrf.mxu0  ;;  %v14534_v58 = vpop.permute.xlu1 %10649  ;;  %v10561_v39 = vmul.f32 %v10558_v30, %v14526_v48  ;;  %v9952_v30 = vsel %vm15307_vm9, %v14473_v12, %v14477_v1  ;;  %vm15311_vm9 = vcmask 7168  }
 0xb65   :  { %v8437_v5 = vadd.f32 %v8431_v0, %v8146_v11  ;;  %v10652_v20 = vmul.f32 %v14534_v58, %v14523_v21  ;;  %v9739_v0 = vsel %vm15306_vm4, %v14460_v10, %v14462_v53 }
 0xb66   :  { %8444 = vrot.lane.b32.xlu1 %v8435_v2, %s12218_s4 }
 0xb68   :  { %8446 = vrot.lane.b32.xlu0 %v8436_v41, %s12218_s4 }
 0xb6a   :  { %8448 = vrot.lane.b32.xlu1 %v8437_v5, %s12218_s4 }
 0xb6c   :  { %10741 = vrot.lane.b32.xlu0 %v10739_v45, %s12234_s15 }
 0xb6e   :  { %10833 = vrot.lane.b32.xlu1 %v10831_v18, %s12235_s28 }
 0xb70   :  { %10925 = vrot.lane.b32.xlu0 %v10923_v38, %s12221_s7 }
 0xb72   :  { %11017 = vrot.lane.b32.xlu1 %v11015_v16, %s12218_s4 }
 0xb74   :  { %11109 = vrot.lane.b32.xlu0 %v11402_v55, %s12222_s11 }
 0xb76   :  { %10400 = vrot.lane.b32.xlu1 %v10396_v25, %s12226_s13 }
 0xb78   :  { %10402 = vrot.lane.b32.xlu0 %v10397_v6, %s12226_s13 }
 0xb7a   :  { %10564 = vrot.lane.b32.xlu1 %v10560_v51, %s12225_s3  ;;  %v10165_v51 = vsel %vm15305_vm12, %v14486_v15, %v14488_v35 }
 0xb7c   :  { %10566 = vrot.lane.b32.xlu0 %v10561_v39, %s12225_s3 }
 0xb7e   :  { %10656 = vrot.lane.b32.xlu1 %v10652_v20, %s12236_s30 }
 0xbd6   :  { %v8443_v4 = vpop.permute.xlu0 %8442 }
 0xbd7   :  { %8458 = vst.msk [vmem:[#allocation3] sm:$0xff] %vm2335_vm15, %v8443_v4  ;;  %vm15308_vm15 = vmmov %vm15306_vm4 }
 0xbd8   :  { %v8445_v44 = vpop.permute.xlu1 %8444  ;;  %v9741_v6 = vsel %vm15308_vm15, %v14464_v3, %v14471_v32  ;;  %vm15310_vm4 = vmmov %vm15305_vm12 }
 0xbd9   :  { %v14544_v2 = vsel %vm348_vm5, %v8443_v4, %v8445_v44  ;;  %v10167_v39 = vsel %vm15310_vm4, %v14490_v7, %v14500_v54  ;;  %vm15312_vm15 = vmmov %vm15311_vm9 }
 0xbda   :  { %v8447_v11 = vpop.permute.xlu0 %8446  ;;  %v14556_v5 = vmul.f32 %v9739_v0, %v14544_v2  ;;  %v14559_v45 = vmul.f32 %v9952_v30, %v14544_v2  ;;  %v14615_v30 = vmul.f32 %v10165_v51, %v14544_v2 }
 0xbdb   :  { %v14553_v41 = vsel %vm348_vm5, %v8445_v44, %v8447_v11 }
 0xbdc   :  { %v8449_v18 = vpop.permute.xlu1 %8448  ;;  %v14567_v53 = vmul.f32 %v14482_v17, %v14553_v41  ;;  %v9954_v17 = vsel %vm15309_vm13, %v14475_v61, %v14484_v13  ;;  %v14600_v61 = vmul.f32 %v14495_v37, %v14553_v41  ;;  %vm15313_vm13 = vmmov %vm15311_vm9 }
 0xbdd   :  { %v14562_v38 = vsel %vm348_vm5, %v8447_v11, %v8449_v18  ;;  %8462 = vst.msk [vmem:[#allocation3 + $0x20] sm:$0xff] %vm348_vm5, %v8449_v18 }
 0xbde   :  { %v14569_v1 = vpop.permute.xlu0 %10741  ;;  %v14571_v16 = vld [vmem:[#allocation3] sm:$0xff]  ;;  %v14596_v3 = vmul.f32 %v9741_v6, %v14562_v38  ;;  %v14607_v35 = vmul.f32 %v9954_v17, %v14562_v38  ;;  %v14610_v7 = vmul.f32 %v10167_v39, %v14562_v38 }
 0xbdf   :  { %v8895_v55 = vmul.f32 %v14407_v62, %v14571_v16  ;;  %v8541_v22 = vmul.f32 %v14391_v46, %v14571_v16  ;;  %v9321_v4 = vmul.f32 %v14434_v26, %v14571_v16  ;;  %v9108_v44 = vmul.f32 %v14421_v36, %v14571_v16 }
 0xbe0   :  { %v14577_v25 = vpop.permute.xlu1 %10833  ;;  %v9747_v11 = vmul.f32 %v14460_v10, %v14571_v16  ;;  %v9534_v18 = vmul.f32 %v14447_v57, %v14571_v16  ;;  %v10173_v17 = vmul.f32 %v14486_v15, %v14571_v16  ;;  %v9960_v51 = vmul.f32 %v14473_v12, %v14571_v16 }
 0xbe1   :  { %8905 = vrot.lane.b32.xlu0 %v8895_v55, %s12225_s3  ;;  %8551 = vrot.lane.b32.xlu1 %v8541_v22, %s12226_s13 }
 0xbe2   :  { %v14593_v20 = vpop.permute.xlu0 %10925 }
 0xbe4   :  { %v14612_v0 = vpop.permute.xlu1 %11017  ;;  %v8504_v39 = vld [vmem:[#allocation3 + $0x20] sm:$0xff] }
 0xbe5   :  { %9331 = vrot.lane.b32.xlu0 %v9321_v4, %s12228_s19  ;;  %9118 = vrot.lane.b32.xlu1 %v9108_v44, %s12227_s26  ;;  %v8899_v10 = vmul.f32 %v14414_v52, %v8504_v39  ;;  %v8545_v4 = vmul.f32 %v14402_v40, %v8504_v39  ;;  %v9325_v44 = vmul.f32 %v14440_v60, %v8504_v39 }
 0xbe6   :  { %v14619_v37 = vpop.permute.xlu0 %11109  ;;  %v9112_v15 = vmul.f32 %v14427_v24, %v8504_v39  ;;  %v9751_v12 = vmul.f32 %v14471_v32, %v8504_v39  ;;  %v8534_v32 = vsel %vm15312_vm15, %v14393_v49, %v14400_v56 }
 0xbe8   :  { %v10401_v55 = vpop.permute.xlu1 %10400 }
 0xbe9   :  { %9757 = vrot.lane.b32.xlu0 %v9747_v11, %s12230_s16  ;;  %9544 = vrot.lane.b32.xlu1 %v9534_v18, %s12229_s0  ;;  %v9538_v11 = vmul.f32 %v14453_v23, %v8504_v39  ;;  %v10177_v18 = vmul.f32 %v14500_v54, %v8504_v39  ;;  %v8897_v54 = vmul.f32 %v14419_v50, %v14553_v41 }
 0xbea   :  { %v10403_v22 = vpop.permute.xlu0 %10402 }
 0xbeb   :  { %v14628_v6 = vsel %vm462_vm14, %v10401_v55, %v10403_v22  ;;  %v9964_v55 = vmul.f32 %v14484_v13, %v8504_v39  ;;  %v8533_v22 = vsel %vm15311_vm9, %v14391_v46, %v14393_v49  ;;  %v8535_v13 = vsel %vm15313_vm13, %v14400_v56, %v14402_v40 }
 0xbec   :  { %v8544_v46 = vmul.f32 %v8535_v13, %v14562_v38  ;;  %v8887_v49 = vsel %vm809_vm10, %v14407_v62, %v14409_v14  ;;  %v8889_v39 = vsel %vm809_vm10, %v14412_v8, %v14414_v52  ;;  %v9100_v40 = vsel %vm1027_vm11, %v14421_v36, %v14423_v63  ;;  %v11790_v13 = vld [vmem:[#allocation8 + $0x8] sm:$0xff] }
 0xbed   :  { %10183 = vrot.lane.b32.xlu0 %v10173_v17, %s12233_s21  ;;  %9970 = vrot.lane.b32.xlu1 %v9960_v51, %s12231_s9  ;;  %v8543_v17 = vmul.f32 %v8534_v32, %v14553_v41  ;;  %v8542_v51 = vmul.f32 %v8533_v22, %v14544_v2  ;;  %v8896_v56 = vmul.f32 %v8887_v49, %v14544_v2 }
 0xbee   :  { %v9109_v50 = vmul.f32 %v9100_v40, %v14544_v2  ;;  %v9110_v62 = vmul.f32 %v14432_v59, %v14553_v41  ;;  %v9102_v14 = vsel %vm1027_vm11, %v14425_v28, %v14427_v24  ;;  %v9323_v8 = vmul.f32 %v14445_v19, %v14553_v41 }
 0xbef   :  { %v9111_v52 = vmul.f32 %v9102_v14, %v14562_v38  ;;  %v9313_v36 = vsel %vm348_vm5, %v14434_v26, %v14436_v31  ;;  %v9315_v63 = vsel %vm348_vm5, %v14438_v27, %v14440_v60  ;;  %v9526_v24 = vsel %vm332_vm1, %v14447_v57, %v14449_v42  ;;  %v11792_v14 = vld [vmem:[#allocation8 + $0x18] sm:$0xff] }
 0xbf0   :  { %v9324_v59 = vmul.f32 %v9315_v63, %v14562_v38  ;;  %v9322_v28 = vmul.f32 %v9313_v36, %v14544_v2  ;;  %v9535_v19 = vmul.f32 %v9526_v24, %v14544_v2  ;;  %v9536_v26 = vmul.f32 %v14458_v34, %v14553_v41  ;;  %v11793_v36 = vld [vmem:[#allocation8 + $0x10] sm:$0xff] }
 0xbf1   :  { %8913 = vrot.lane.b32.xlu0 %v8899_v10, %s12225_s3  ;;  %8559 = vrot.lane.b32.xlu1 %v8545_v4, %s12226_s13  ;;  %v8898_v10 = vmul.f32 %v8889_v39, %v14562_v38  ;;  %v9528_v31 = vsel %vm332_vm1, %v14451_v33, %v14453_v23  ;;  %v9749_v27 = vmul.f32 %v14469_v9, %v14553_v41  ;;  %vm15314_vm1 = vcmask 1031168  }
 0xbf2   :  { %v9537_v60 = vmul.f32 %v9528_v31, %v14562_v38  ;;  %v10653_v57 = vmul.f32 %v14534_v58, %v14526_v48  ;;  %v10744_v42 = vmul.f32 %v14569_v1, %v14523_v21  ;;  %v10745_v33 = vmul.f32 %v14569_v1, %v14526_v48  ;;  %v10350_v1 = vld [vmem:[#allocation26] sm:$0xff]  ;;  %vm15315_vm5 = vmmov %vm15314_vm1 }
 0xbf3   :  { %v10836_v23 = vmul.f32 %v14577_v25, %v14523_v21  ;;  %v10837_v34 = vmul.f32 %v14577_v25, %v14526_v48  ;;  %v10928_v9 = vmul.f32 %v14593_v20, %v14523_v21  ;;  %v10929_v58 = vmul.f32 %v14593_v20, %v14526_v48  ;;  %v11196_v20 = vld [vmem:[#allocation32] sm:$0xff]  ;;  %vm15316_vm10 = vmmov %vm15314_vm1 }
 0xbf4   :  { %v11113_v25 = vmul.f32 %v14619_v37, %v14526_v48  ;;  %v8495_v63 = vrot.slane %v11793_v36, %v15297_v43  ;;  %vm15317_vm11 = vmmov %vm15314_vm1 }
 0xbf5   :  { %9339 = vrot.lane.b32.xlu0 %v9325_v44, %s12228_s19  ;;  %9126 = vrot.lane.b32.xlu1 %v9112_v15, %s12227_s26 }
 0xbf9   :  { %9765 = vrot.lane.b32.xlu0 %v9751_v12, %s12230_s16  ;;  %9552 = vrot.lane.b32.xlu1 %v9538_v11, %s12229_s0 }
 0xbfd   :  { %10191 = vrot.lane.b32.xlu0 %v10177_v18, %s12233_s21  ;;  %9978 = vrot.lane.b32.xlu1 %v9964_v55, %s12231_s9 }
 0xc01   :  { %8555 = vrot.lane.b32.xlu0 %v8543_v17, %s12226_s13  ;;  %8553 = vrot.lane.b32.xlu1 %v8542_v51, %s12226_s13 }
 0xc05   :  { %8909 = vrot.lane.b32.xlu1 %v8897_v54, %s12225_s3  ;;  %8557 = vrot.lane.b32.xlu0 %v8544_v46, %s12226_s13  ;;  %v8491_v54 = vrot.slane %v11790_v13, %v15297_v43  ;;  %v11791_v46 = vld [vmem:[#allocation8] sm:$0xff] }
 0xc06   :  { %v8487_v49 = vrot.slane %v11791_v46, %v15297_v43 }
 0xc09   :  { %8911 = vrot.lane.b32.xlu1 %v8898_v10, %s12225_s3  ;;  %8907 = vrot.lane.b32.xlu0 %v8896_v56, %s12225_s3  ;;  %s15330_s3 = sld [smem:[#allocation140_spill]] }
 0xc0d   :  { %9120 = vrot.lane.b32.xlu1 %v9109_v50, %s12227_s26  ;;  %9122 = vrot.lane.b32.xlu0 %v9110_v62, %s12227_s26  ;;  %v8464_v50 = vld [vmem:[#allocation25 + $0x8] sm:$0xff]  ;;  %v8501_v62 = vmul.f32 %v8491_v54, %v14544_v2 }
 0xc11   :  { %9335 = vrot.lane.b32.xlu1 %v9323_v8, %s12228_s19  ;;  %9124 = vrot.lane.b32.xlu0 %v9111_v52, %s12227_s26  ;;  %v8499_v8 = vrot.slane %v11792_v14, %v15297_v43  ;;  %v8500_v52 = vmul.f32 %v8487_v49, %v14571_v16  ;;  %v8502_v16 = vmul.f32 %v8495_v63, %v14553_v41 }
 0xc13   :  { %v8503_v2 = vmul.f32 %v8499_v8, %v14562_v38 }
 0xc15   :  { %9337 = vrot.lane.b32.xlu1 %v9324_v59, %s12228_s19  ;;  %9333 = vrot.lane.b32.xlu0 %v9322_v28, %s12228_s19 }
 0xc19   :  { %9546 = vrot.lane.b32.xlu1 %v9535_v19, %s12229_s0  ;;  %9548 = vrot.lane.b32.xlu0 %v9536_v26, %s12229_s0 }
 0xc1d   :  { %9761 = vrot.lane.b32.xlu1 %v9749_v27, %s12230_s16  ;;  %9550 = vrot.lane.b32.xlu0 %v9537_v60, %s12229_s0  ;;  %v8463_v27 = vld [vmem:[#allocation25] sm:$0xff] }
 0xc21   :  { %9763 = vrot.lane.b32.xlu1 %v14596_v3, %s12230_s16  ;;  %9759 = vrot.lane.b32.xlu0 %v14556_v5, %s12230_s16  ;;  %v11020_v5 = vmul.f32 %v14612_v0, %v14523_v21  ;;  %v14771_v3 = vpop.permute.xlu1 %10564 }
 0xc25   :  { %9972 = vrot.lane.b32.xlu1 %v14559_v45, %s12231_s9  ;;  %9974 = vrot.lane.b32.xlu0 %v14567_v53, %s12231_s9  ;;  %v11021_v45 = vmul.f32 %v14612_v0, %v14526_v48  ;;  %v11112_v53 = vmul.f32 %v14619_v37, %v14523_v21 }
 0xc29   :  { %10187 = vrot.lane.b32.xlu1 %v14600_v61, %s12233_s21  ;;  %9976 = vrot.lane.b32.xlu0 %v14607_v35, %s12231_s9  ;;  %v14773_v61 = vpop.permute.xlu0 %10566  ;;  %v14775_v35 = vpop.permute.xlu1 %10656 }
 0xc2d   :  { %10189 = vrot.lane.b32.xlu1 %v14610_v7, %s12233_s21  ;;  %10185 = vrot.lane.b32.xlu0 %v14615_v30, %s12233_s21 }
 0xc31   :  { %10748 = vrot.lane.b32.xlu1 %v10744_v42, %s12237_s23  ;;  %10658 = vrot.lane.b32.xlu0 %v10653_v57, %s12236_s30 }
 0xc35   :  { %10750 = vrot.lane.b32.xlu0 %v10745_v33, %s12237_s23  ;;  %10840 = vrot.lane.b32.xlu1 %v10836_v23, %s12238_s18  ;;  %v8465_v23 = vld [vmem:[#allocation25 + $0x10] sm:$0xff] }
 0xc39   :  { %10842 = vrot.lane.b32.xlu0 %v10837_v34, %s12238_s18  ;;  %10932 = vrot.lane.b32.xlu1 %v10928_v9, %s12227_s26 }
 0xc3d   :  { %10934 = vrot.lane.b32.xlu0 %v10929_v58, %s12227_s26  ;;  %11024 = vrot.lane.b32.xlu1 %v11020_v5, %s12228_s19 }
 0xc41   :  { %11026 = vrot.lane.b32.xlu0 %v11021_v45, %s12228_s19  ;;  %11116 = vrot.lane.b32.xlu1 %v11112_v53, %s12229_s0  ;;  %v8466_v45 = vld [vmem:[#allocation25 + $0x18] sm:$0xff] }
 0xc45   :  { %11118 = vrot.lane.b32.xlu0 %v11113_v25, %s12229_s0  ;;  %10353 = vperm.xlu1 %11777, %v10350_v1  }
 0xc49   :  { %11199 = vperm.xlu0 %11776, %v11196_v20  }
 0xc53   :  { %v8906_v7 = vpop.permute.xlu0 %8905  ;;  %v8552_v0 = vpop.permute.xlu1 %8551 }
 0xc57   :  { %v14777_v30 = vpop.permute.xlu0 %9331  ;;  %v14779_v4 = vpop.permute.xlu1 %9118 }
 0xc5b   :  { %v14781_v44 = vpop.permute.xlu0 %9757  ;;  %v14783_v48 = vpop.permute.xlu1 %9544 }
 0xc5f   :  { %v14785_v37 = vpop.permute.xlu0 %10183  ;;  %v14787_v15 = vpop.permute.xlu1 %9970 }
 0xc63   :  { %v8914_v12 = vpop.permute.xlu0 %8913  ;;  %v8560_v11 = vpop.permute.xlu1 %8559 }
 0xc67   :  { %v14789_v18 = vpop.permute.xlu0 %9339  ;;  %v14791_v55 = vpop.permute.xlu1 %9126 }
 0xc6b   :  { %v14793_v22 = vpop.permute.xlu0 %9765  ;;  %v14795_v32 = vpop.permute.xlu1 %9552 }
 0xc6f   :  { %v14797_v17 = vpop.permute.xlu0 %10191  ;;  %v14799_v51 = vpop.permute.xlu1 %9978 }
 0xc73   :  { %v8556_v39 = vpop.permute.xlu0 %8555  ;;  %v8554_v10 = vpop.permute.xlu1 %8553 }
 0xc74   :  { %v8561_v56 = vsel %vm462_vm14, %v8552_v0, %v8554_v10  ;;  %v8562_v40 = vsel %vm462_vm14, %v8554_v10, %v8556_v39 }
 0xc75   :  { %8602 = vmatprep.subr.mxu1 %v8562_v40 }
 0xc76   :  { %8603 = vmatpush1.msra.mxu1 %v8561_v56 }
 0xc77   :  { %v8558_v59 = vpop.permute.xlu0 %8557  ;;  %8747 = vmatprep.subr.mxu1 %v8501_v62  ;;  %v8910_v28 = vpop.permute.xlu1 %8909  ;;  %11372 = vmatmul.mubr.msk.f32.vlgmr.msra.gmra.mxu1 %vm2447_vm2, %v8464_v50 }
 0xc78   :  { %v8563_v24 = vsel %vm462_vm14, %v8556_v39, %v8558_v59  ;;  %8748 = vmatpush1.msra.mxu1 %v8500_v52  ;;  %v8564_v19 = vsel %vm462_vm14, %v8558_v59, %v8560_v11  ;;  %8781 = vmatprep.mubr.f32.mxu1 %v14279_v29  ;;  %vm15318_vm14 = vcmask 908288   ;;  %v8467_v11 = vld [vmem:[#allocation25 + $0x20] sm:$0xff] }
 0xc79   :  { %8673 = vmatprep.subr.mxu0 %v8564_v19  ;;  %vm15319_vm12 = vmmov %vm15318_vm14 }
 0xc7a   :  { %8674 = vmatpush1.msra.mxu0 %v8563_v24  ;;  %vm15320_vm4 = vmmov %vm15319_vm12 }
 0xc7b   :  { %v8908_v26 = vpop.permute.xlu0 %8907  ;;  %11373 = vmatmul.mubr.msk.f32.vlgmr.msra.gmra.mxu0 %vm2447_vm2, %v8464_v50  ;;  %8818 = vmatprep.subr.mxu0 %v8503_v2  ;;  %v8912_v31 = vpop.permute.xlu1 %8911  ;;  %vm15321_vm9 = vmmov %vm15320_vm4  ;;  %v10385_v2 = vrot.slane %v14396_v47, %v15297_v43 }
 0xc7c   :  { %v8915_v60 = vsel %vm15314_vm1, %v8906_v7, %v8908_v26  ;;  %8819 = vmatpush1.msra.mxu0 %v8502_v16  ;;  %v8916_v57 = vsel %vm15315_vm5, %v8908_v26, %v8910_v28  ;;  %v8918_v42 = vsel %vm15316_vm10, %v8912_v31, %v8914_v12  ;;  %11374 = vmatmul.mubr.msk.f32.vlgmr.msra.gmra.mxu1 %vm2447_vm2, %v8463_v27  ;;  %vm15326_vm5 = vcmask 982016  }
 0xc7d   :  { %8956 = vmatprep.subr.mxu1 %v8916_v57  ;;  %9027 = vmatprep.subr.mxu0 %v8918_v42  ;;  %v8917_v41 = vsel %vm15317_vm11, %v8910_v28, %v8912_v31  ;;  %v10386_v47 = vmul.f32 %v10385_v2, %v14523_v21  ;;  %v10568_v42 = vsel %vm15314_vm1, %v14771_v3, %v14773_v61  ;;  %vm15327_vm10 = vcmask 973824  }
 0xc7e   :  { %8852 = vmatprep.mubr.f32.mxu0 %v14279_v29  ;;  %8957 = vmatpush1.msra.mxu1 %v8915_v60  ;;  %vm15328_vm11 = vcmask 965632  }
 0xc7f   :  { %v9123_v38 = vpop.permute.xlu0 %9122  ;;  %11375 = vmatmul.mubr.msk.f32.vlgmr.msra.gmra.mxu0 %vm2447_vm2, %v8463_v27  ;;  %v9121_v33 = vpop.permute.xlu1 %9120  ;;  %8990 = vmatprep.mubr.f32.mxu1 %v14279_v29  ;;  %v8471_v27 = vld [vmem:[#allocation25 + $0x40] sm:$0xff] }
 0xc80   :  { %9028 = vmatpush1.msra.mxu0 %v8917_v41  ;;  %v9128_v34 = vsel %vm1052_vm3, %v14779_v4, %v9121_v33  ;;  %v9129_v9 = vsel %vm1052_vm3, %v9121_v33, %v9123_v38  ;;  %9061 = vmatprep.mubr.f32.mxu0 %v14279_v29  ;;  %v10372_v41 = vld [vmem:[#allocation31 + $0x10] sm:$0xff] }
 0xc81   :  { %9169 = vmatprep.subr.mxu1 %v9129_v9  ;;  %11376 = vmatmul.mubr.msk.f32.vlgmr.msra.gmra.mxu1 %vm2447_vm2, %v8465_v23 }
 0xc82   :  { %9170 = vmatpush1.msra.mxu1 %v9128_v34  ;;  %9203 = vmatprep.mubr.f32.mxu1 %v14279_v29  ;;  %v10375_v34 = vld [vmem:[#allocation31 + $0x28] sm:$0xff] }
 0xc83   :  { %v9125_v58 = vpop.permute.xlu0 %9124  ;;  %v9336_v5 = vpop.permute.xlu1 %9335  ;;  %11377 = vmatmul.mubr.msk.f32.vlgmr.msra.gmra.mxu0 %vm2447_vm2, %v8465_v23 }
 0xc84   :  { %v9130_v53 = vsel %vm1052_vm3, %v9123_v38, %v9125_v58  ;;  %v9131_v1 = vsel %vm1052_vm3, %v9125_v58, %v14791_v55  ;;  %9274 = vmatprep.mubr.f32.mxu0 %v14279_v29  ;;  %v10373_v38 = vld [vmem:[#allocation31 + $0x18] sm:$0xff] }
 0xc85   :  { %9240 = vmatprep.subr.mxu0 %v9131_v1  ;;  %11378 = vmatmul.mubr.msk.f32.vlgmr.msra.gmra.mxu1 %vm2447_vm2, %v8466_v45  ;;  %v10377_v1 = vld [vmem:[#allocation31 + $0x38] sm:$0xff] }
 0xc86   :  { %9241 = vmatpush1.msra.mxu0 %v9130_v53  ;;  %9416 = vmatprep.mubr.f32.mxu1 %v14279_v29 }
 0xc87   :  { %v9334_v25 = vpop.permute.xlu0 %9333  ;;  %v9338_v20 = vpop.permute.xlu1 %9337  ;;  %11379 = vmatmul.mubr.msk.f32.vlgmr.msra.gmra.mxu0 %vm2447_vm2, %v8466_v45  ;;  %v10376_v45 = vld [vmem:[#allocation31 + $0x30] sm:$0xff] }
 0xc88   :  { %v9341_v7 = vsel %vm15318_vm14, %v14777_v30, %v9334_v25  ;;  %v9343_v0 = vsel %vm15319_vm12, %v9336_v5, %v9338_v20  ;;  %v9342_v4 = vsel %vm15320_vm4, %v9334_v25, %v9336_v5  ;;  %v9344_v12 = vsel %vm15321_vm9, %v9338_v20, %v14789_v18  ;;  %9487 = vmatprep.mubr.f32.mxu0 %v14279_v29  ;;  %v8468_v18 = vld [vmem:[#allocation25 + $0x28] sm:$0xff]  ;;  %vm15329_vm14 = vmmov %vm15320_vm4 }
 0xc89   :  { %9382 = vmatprep.subr.mxu1 %v9342_v4  ;;  %9453 = vmatprep.subr.mxu0 %v9344_v12 }
 0xc8a   :  { %9383 = vmatpush1.msra.mxu1 %v9341_v7  ;;  %9454 = vmatpush1.msra.mxu0 %v9343_v0  ;;  %v10378_v0 = vld [vmem:[#allocation31 + $0x40] sm:$0xff] }
 0xc8b   :  { %v9549_v55 = vpop.permute.xlu0 %9548  ;;  %v9547_v13 = vpop.permute.xlu1 %9546  ;;  %11380 = vmatmul.mubr.msk.f32.vlgmr.msra.gmra.mxu1 %vm2447_vm2, %v8467_v11  ;;  %11381 = vmatmul.mubr.msk.f32.vlgmr.msra.gmra.mxu0 %vm2447_vm2, %v8467_v11 }
 0xc8c   :  { %v9554_v30 = vsel %vm1486_vm6, %v14783_v48, %v9547_v13  ;;  %v9555_v54 = vsel %vm1486_vm6, %v9547_v13, %v9549_v55  ;;  %9629 = vmatprep.mubr.f32.mxu1 %v14279_v29  ;;  %9700 = vmatprep.mubr.f32.mxu0 %v14279_v29 }
 0xc8d   :  { %9595 = vmatprep.subr.mxu1 %v9555_v54 }
 0xc8e   :  { %9596 = vmatpush1.msra.mxu1 %v9554_v30 }
 0xc8f   :  { %v9551_v46 = vpop.permute.xlu0 %9550  ;;  %v9762_v49 = vpop.permute.xlu1 %9761  ;;  %11382 = vmatmul.mubr.msk.f32.vlgmr.msra.gmra.mxu1 %vm2447_vm2, %v8468_v18 }
 0xc90   :  { %v9556_v39 = vsel %vm1486_vm6, %v9549_v55, %v9551_v46  ;;  %v9557_v10 = vsel %vm1486_vm6, %v9551_v46, %v14795_v32  ;;  %9842 = vmatprep.mubr.f32.mxu1 %v14279_v29  ;;  %v8469_v32 = vld [vmem:[#allocation25 + $0x30] sm:$0xff] }
 0xc91   :  { %9666 = vmatprep.subr.mxu0 %v9557_v10 }
 0xc92   :  { %9667 = vmatpush1.msra.mxu0 %v9556_v39 }
 0xc93   :  { %v9760_v48 = vpop.permute.xlu0 %9759  ;;  %11383 = vmatmul.mubr.msk.f32.vlgmr.msra.gmra.mxu0 %vm2447_vm2, %v8468_v18  ;;  %v9764_v56 = vpop.permute.xlu1 %9763 }
 0xc94   :  { %v9767_v40 = vsel %vm1704_vm8, %v14781_v44, %v9760_v48  ;;  %v9769_v50 = vsel %vm1704_vm8, %v9762_v49, %v9764_v56  ;;  %v9768_v62 = vsel %vm1704_vm8, %v9760_v48, %v9762_v49  ;;  %v9770_v14 = vsel %vm1704_vm8, %v9764_v56, %v14793_v22  ;;  %9913 = vmatprep.mubr.f32.mxu0 %v14279_v29  ;;  %v8470_v22 = vld [vmem:[#allocation25 + $0x38] sm:$0xff] }
 0xc95   :  { %9808 = vmatprep.subr.mxu1 %v9768_v62  ;;  %9879 = vmatprep.subr.mxu0 %v9770_v14  ;;  %vm15322_vm8 = vcmask 769024  }
 0xc96   :  { %9809 = vmatpush1.msra.mxu1 %v9767_v40  ;;  %9880 = vmatpush1.msra.mxu0 %v9769_v50  ;;  %vm15323_vm15 = vmmov %vm15322_vm8 }
 0xc97   :  { %v9975_v8 = vpop.permute.xlu0 %9974  ;;  %11384 = vmatmul.mubr.msk.f32.vlgmr.msra.gmra.mxu1 %vm2447_vm2, %v8469_v32  ;;  %11385 = vmatmul.mubr.msk.f32.vlgmr.msra.gmra.mxu0 %vm2447_vm2, %v8469_v32  ;;  %v9973_v44 = vpop.permute.xlu1 %9972  ;;  %vm15324_vm13 = vmmov %vm15322_vm8 }
 0xc98   :  { %v9980_v52 = vsel %vm1922_vm0, %v14787_v15, %v9973_v44  ;;  %v9981_v36 = vsel %vm1922_vm0, %v9973_v44, %v9975_v8  ;;  %10055 = vmatprep.mubr.f32.mxu1 %v14279_v29  ;;  %10126 = vmatprep.mubr.f32.mxu0 %v14279_v29 }
 0xc99   :  { %10021 = vmatprep.subr.mxu1 %v9981_v36 }
 0xc9a   :  { %10022 = vmatpush1.msra.mxu1 %v9980_v52 }
 0xc9b   :  { %v9977_v63 = vpop.permute.xlu0 %9976  ;;  %11386 = vmatmul.mubr.msk.f32.vlgmr.msra.gmra.mxu1 %vm2447_vm2, %v8470_v22  ;;  %v10188_v59 = vpop.permute.xlu1 %10187 }
 0xc9c   :  { %v9982_v28 = vsel %vm1922_vm0, %v9975_v8, %v9977_v63  ;;  %v9983_v24 = vsel %vm1922_vm0, %v9977_v63, %v14799_v51  ;;  %10268 = vmatprep.mubr.f32.mxu1 %v14279_v29  ;;  %vm15325_vm0 = vmmov %vm15322_vm8 }
 0xc9d   :  { %10092 = vmatprep.subr.mxu0 %v9983_v24 }
 0xc9e   :  { %10093 = vmatpush1.msra.mxu0 %v9982_v28 }
 0xc9f   :  { %v10186_v15 = vpop.permute.xlu0 %10185  ;;  %11387 = vmatmul.mubr.msk.f32.vlgmr.msra.gmra.mxu0 %vm2447_vm2, %v8470_v22  ;;  %v10190_v19 = vpop.permute.xlu1 %10189 }
 0xca0   :  { %v10193_v16 = vsel %vm15322_vm8, %v14785_v37, %v10186_v15  ;;  %v10195_v26 = vsel %vm15323_vm15, %v10188_v59, %v10190_v19  ;;  %v10194_v31 = vsel %vm15324_vm13, %v10186_v15, %v10188_v59  ;;  %v10196_v51 = vsel %vm15325_vm0, %v10190_v19, %v14797_v17  ;;  %10339 = vmatprep.mubr.f32.mxu0 %v14279_v29  ;;  %v10371_v37 = vld [vmem:[#allocation31 + $0x8] sm:$0xff]  ;;  %v10370_v17 = vld [vmem:[#allocation31] sm:$0xff] }
 0xca1   :  { %10234 = vmatprep.subr.mxu1 %v10194_v31  ;;  %10305 = vmatprep.subr.mxu0 %v10196_v51 }
 0xca2   :  { %10235 = vmatpush1.msra.mxu1 %v10193_v16  ;;  %10306 = vmatpush1.msra.mxu0 %v10195_v26 }
 0xca3   :  { %v10659_v60 = vpop.permute.xlu0 %10658  ;;  %11392 = vmatmul.mubr.msk.f32.vlgmr.msra.gmra.mxu1 %vm2447_vm2, %v8471_v27  ;;  %11393 = vmatmul.mubr.msk.f32.vlgmr.msra.gmra.mxu0 %vm2447_vm2, %v8471_v27  ;;  %v10749_v43 = vpop.permute.xlu1 %10748 }
 0xca4   :  { %11685 = vmatprep.subr.mxu1 %v14279_v29  ;;  %11690 = vmatprep.subr.mxu0 %v14279_v29 }
 0xca5   :  { %11686 = vmatpush3.msra.mxu1 %v14628_v6  ;;  %11691 = vmatpush3.msra.mxu0 %v10386_v47  ;;  %v10660_v6 = vsel %vm15326_vm5, %v14775_v35, %v10659_v60  ;;  %v10374_v35 = vld [vmem:[#allocation31 + $0x20] sm:$0xff] }
 0xca6   :  { %11687 = vmatprep.mubr.msk.f32.mxu1 %vm12239_vm7, %v14279_v29  ;;  %11692 = vmatprep.mubr.msk.f32.mxu0 %vm12239_vm7, %v14279_v29 }
 0xca7   :  { %11695 = vmatprep.subr.mxu1 %v14279_v29  ;;  %11700 = vmatprep.subr.mxu0 %v14279_v29  ;;  %v10751_v21 = vpop.permute.xlu0 %10750  ;;  %v10841_v57 = vpop.permute.xlu1 %10840 }
 0xca8   :  { %11688 = vmatmul.mubr.msk.f32.vlgmr.msra.gmra.mxu1 %vm2447_vm2, %v10371_v37  ;;  %11693 = vmatmul.mubr.msk.f32.vlgmr.msra.gmra.mxu0 %vm2447_vm2, %v10370_v17  ;;  %v10752_v3 = vsel %vm15327_vm10, %v10749_v43, %v10751_v21 }
 0xca9   :  { %11696 = vmatpush3.msra.mxu1 %v10568_v42  ;;  %11701 = vmatpush3.msra.mxu0 %v10660_v6 }
 0xcaa   :  { %11697 = vmatprep.mubr.msk.f32.mxu1 %vm12239_vm7, %v14279_v29  ;;  %11705 = vmatprep.subr.mxu1 %v14279_v29 }
 0xcab   :  { %v10843_v33 = vpop.permute.xlu0 %10842  ;;  %v10933_v23 = vpop.permute.xlu1 %10932  ;;  %11702 = vmatprep.mubr.msk.f32.mxu0 %vm12239_vm7, %v14279_v29  ;;  %11710 = vmatprep.subr.mxu0 %v14279_v29 }
 0xcac   :  { %v10844_v61 = vsel %vm15328_vm11, %v10841_v57, %v10843_v33  ;;  %11698 = vmatmul.mubr.msk.f32.vlgmr.msra.gmra.mxu1 %vm2447_vm2, %v10372_v41  ;;  %11703 = vmatmul.mubr.msk.f32.vlgmr.msra.gmra.mxu0 %vm2447_vm2, %v10373_v38 }
 0xcad   :  { %11706 = vmatpush3.msra.mxu1 %v10752_v3  ;;  %11711 = vmatpush3.msra.mxu0 %v10844_v61 }
 0xcae   :  { %11707 = vmatprep.mubr.msk.f32.mxu1 %vm12239_vm7, %v14279_v29  ;;  %11715 = vmatprep.subr.mxu1 %v14279_v29 }
 0xcaf   :  { %v10935_v9 = vpop.permute.xlu0 %10934  ;;  %11712 = vmatprep.mubr.msk.f32.mxu0 %vm12239_vm7, %v14279_v29  ;;  %11720 = vmatprep.subr.mxu0 %v14279_v29  ;;  %v11025_v5 = vpop.permute.xlu1 %11024 }
 0xcb0   :  { %v10936_v58 = vsel %vm1052_vm3, %v10933_v23, %v10935_v9  ;;  %11708 = vmatmul.mubr.msk.f32.vlgmr.msra.gmra.mxu1 %vm2447_vm2, %v10374_v35  ;;  %11713 = vmatmul.mubr.msk.f32.vlgmr.msra.gmra.mxu0 %vm2447_vm2, %v10375_v34 }
 0xcb1   :  { %11716 = vmatpush3.msra.mxu1 %v10936_v58  ;;  %11717 = vmatprep.mubr.msk.f32.mxu1 %vm12239_vm7, %v14279_v29 }
 0xcb2   :  { %11722 = vmatprep.mubr.msk.f32.mxu0 %vm12239_vm7, %v14279_v29  ;;  %11725 = vmatprep.subr.mxu1 %v14279_v29 }
 0xcb3   :  { %v11027_v53 = vpop.permute.xlu0 %11026  ;;  %v11117_v20 = vpop.permute.xlu1 %11116 }
 0xcb4   :  { %v11028_v25 = vsel %vm15329_vm14, %v11025_v5, %v11027_v53  ;;  %11718 = vmatmul.mubr.msk.f32.vlgmr.msra.gmra.mxu1 %vm2447_vm2, %v10376_v45 }
 0xcb5   :  { %11721 = vmatpush3.msra.mxu0 %v11028_v25  ;;  %11727 = vmatprep.mubr.msk.f32.mxu1 %vm12239_vm7, %v14279_v29 }
 0xcb6   :  { %11723 = vmatmul.mubr.msk.f32.vlgmr.msra.gmra.mxu0 %vm2447_vm2, %v10377_v1 }
 0xcb7   :  { %v11119_v7 = vpop.permute.xlu0 %11118 }
 0xcb8   :  { %v11120_v4 = vsel %vm1486_vm6, %v11117_v20, %v11119_v7 }
 0xcb9   :  { %11726 = vmatpush3.msra.mxu1 %v11120_v4 }
 0xcba   :  { %11728 = vmatmul.mubr.msk.f32.vlgmr.msra.gmra.mxu1 %vm2447_vm2, %v10378_v0 }
 0xcc0   :  { %v10354_v20 = vpop.permute.xlu1 %10353 }
 0xd37   :  { %v8638_v12 = vpop.f32.mrf.mxu1 }
 0xd39   :  { %v8640_v11 = vpop.f32.mrf.mxu1 }
 0xd3b   :  { %v8709_v55 = vpop.f32.mrf.mxu0 }
 0xd3c   :  { %v8783_v30 = vpop.f32.mrf.mxu1 }
 0xd3d   :  { %v8711_v13 = vpop.f32.mrf.mxu0  ;;  %v8784_v8 = vadd.f32 %v8783_v30, %v8638_v12 }
 0xd3e   :  { %v8785_v18 = vpop.f32.mrf.mxu1 }
 0xd3f   :  { %v8854_v54 = vpop.f32.mrf.mxu0  ;;  %v8786_v22 = vadd.f32 %v8785_v18, %v8640_v11 }
 0xd40   :  { %v8855_v44 = vadd.f32 %v8854_v54, %v8709_v55 }
 0xd41   :  { %v8856_v46 = vpop.f32.mrf.mxu0  ;;  %v8992_v49 = vpop.f32.mrf.mxu1 }
 0xd42   :  { %v8857_v63 = vadd.f32 %v8856_v46, %v8711_v13  ;;  %v9068_v59 = vadd.f32 %v8992_v49, %v8784_v8 }
 0xd43   :  { %v9063_v29 = vpop.f32.mrf.mxu0  ;;  %v8994_v39 = vpop.f32.mrf.mxu1 }
 0xd44   :  { %v9070_v24 = vadd.f32 %v9063_v29, %v8855_v44  ;;  %v9069_v2 = vadd.f32 %v8994_v39, %v8786_v22 }
 0xd45   :  { %v9065_v10 = vpop.f32.mrf.mxu0  ;;  %v9205_v48 = vpop.f32.mrf.mxu1 }
 0xd46   :  { %v9071_v16 = vadd.f32 %v9065_v10, %v8857_v63  ;;  %v9281_v26 = vadd.f32 %v9205_v48, %v9068_v59 }
 0xd47   :  { %v9276_v56 = vpop.f32.mrf.mxu0  ;;  %v9207_v40 = vpop.f32.mrf.mxu1 }
 0xd48   :  { %v9283_v51 = vadd.f32 %v9276_v56, %v9070_v24  ;;  %v9282_v43 = vadd.f32 %v9207_v40, %v9069_v2 }
 0xd49   :  { %v9278_v50 = vpop.f32.mrf.mxu0 }
 0xd4a   :  { %v9284_v47 = vadd.f32 %v9278_v50, %v9071_v16 }
 0xd4b   :  { %v9418_v62 = vpop.f32.mrf.mxu1  ;;  %v9489_v14 = vpop.f32.mrf.mxu0 }
 0xd4c   :  { %v9494_v37 = vadd.f32 %v9418_v62, %v9281_v26  ;;  %v9496_v17 = vadd.f32 %v9489_v14, %v9283_v51  ;;  %v11200_v51 = vpop.permute.xlu0 %11199 }
 0xd4d   :  { %v9420_v32 = vpop.f32.mrf.mxu1  ;;  %v9491_v52 = vpop.f32.mrf.mxu0 }
 0xd4e   :  { %v9495_v42 = vadd.f32 %v9420_v32, %v9282_v43  ;;  %v9497_v6 = vadd.f32 %v9491_v52, %v9284_v47 }
 0xd4f   :  { %v9631_v36 = vpop.f32.mrf.mxu1 }
 0xd50   :  { %v9707_v41 = vadd.f32 %v9631_v36, %v9494_v37 }
 0xd51   :  { %v9633_v15 = vpop.f32.mrf.mxu1 }
 0xd52   :  { %v9708_v23 = vadd.f32 %v9633_v15, %v9495_v42 }
 0xd53   :  { %v9702_v28 = vpop.f32.mrf.mxu0 }
 0xd54   :  { %v9709_v38 = vadd.f32 %v9702_v28, %v9496_v17 }
 0xd55   :  { %v9704_v19 = vpop.f32.mrf.mxu0 }
 0xd56   :  { %v9710_v3 = vadd.f32 %v9704_v19, %v9497_v6 }
 0xd57   :  { %v9844_v31 = vpop.f32.mrf.mxu1  ;;  %v9915_v27 = vpop.f32.mrf.mxu0 }
 0xd58   :  { %v9920_v61 = vadd.f32 %v9844_v31, %v9707_v41  ;;  %v9922_v35 = vadd.f32 %v9915_v27, %v9709_v38 }
 0xd59   :  { %v9846_v60 = vpop.f32.mrf.mxu1  ;;  %v9917_v21 = vpop.f32.mrf.mxu0 }
 0xd5a   :  { %v9921_v58 = vadd.f32 %v9846_v60, %v9708_v23  ;;  %v9923_v5 = vadd.f32 %v9917_v21, %v9710_v3 }
 0xd5b   :  { %v10057_v57 = vpop.f32.mrf.mxu1 }
 0xd5c   :  { %v10133_v45 = vadd.f32 %v10057_v57, %v9920_v61 }
 0xd5d   :  { %v10059_v34 = vpop.f32.mrf.mxu1 }
 0xd5e   :  { %v10134_v7 = vadd.f32 %v10059_v34, %v9921_v58 }
 0xd5f   :  { %v10128_v33 = vpop.f32.mrf.mxu0 }
 0xd60   :  { %v10135_v53 = vadd.f32 %v10128_v33, %v9922_v35 }
 0xd61   :  { %v10130_v9 = vpop.f32.mrf.mxu0 }
 0xd62   :  { %v10136_v0 = vadd.f32 %v10130_v9, %v9923_v5 }
 0xd63   :  { %v10270_v1 = vpop.f32.mrf.mxu1  ;;  %v10341_v25 = vpop.f32.mrf.mxu0 }
 0xd64   :  { %v10346_v4 = vadd.f32 %v10270_v1, %v10133_v45  ;;  %v10348_v12 = vadd.f32 %v10341_v25, %v10135_v53 }
 0xd65   :  { %v10272_v11 = vpop.f32.mrf.mxu1  ;;  %v10343_v55 = vpop.f32.mrf.mxu0 }
 0xd66   :  { %v10356_v13 = vadd.f32 %v10354_v20, %v10346_v4  ;;  %v10358_v30 = vadd.f32 %v10354_v20, %v10348_v12  ;;  %v10347_v54 = vadd.f32 %v10272_v11, %v10134_v7  ;;  %v10349_v18 = vadd.f32 %v10343_v55, %v10136_v0 }
 0xd68   :  { %10360 = vst [vmem:[%s14977_s25] sm:$0xff] %v10356_v13  ;;  %10362 = vst [vmem:[%s14977_s25 + $0x10] sm:$0xff] %v10358_v30  ;;  %v10357_v46 = vadd.f32 %v10354_v20, %v10347_v54  ;;  %v10359_v49 = vadd.f32 %v10354_v20, %v10349_v18  ;;  %v10475_v29 = vpop.f32.mrf.mxu1  ;;  %v10548_v39 = vpop.f32.mrf.mxu0 }
 0xd69   :  { %v10549_v10 = vadd.f32 %v10548_v39, %v10475_v29 }
 0xd6a   :  { %10361 = vst [vmem:[%s14977_s25 + $0x8] sm:$0xff] %v10357_v46  ;;  %10363 = vst [vmem:[%s14977_s25 + $0x18] sm:$0xff] %v10359_v49  ;;  %v11689_v48 = vpop.f32.mrf.mxu1  ;;  %v11694_v56 = vpop.f32.mrf.mxu0 }
 0xd6c   :  { %v10639_v40 = vpop.f32.mrf.mxu1  ;;  %v10731_v50 = vpop.f32.mrf.mxu0 }
 0xd6d   :  { %v10643_v62 = vadd.f32 %v10639_v40, %v10549_v10 }
 0xd6e   :  { %v11699_v14 = vpop.f32.mrf.mxu1  ;;  %v11704_v32 = vpop.f32.mrf.mxu0 }
 0xd6f   :  { %v10735_v8 = vadd.f32 %v10731_v50, %v10643_v62 }
 0xd70   :  { %v10823_v44 = vpop.f32.mrf.mxu1  ;;  %v10915_v52 = vpop.f32.mrf.mxu0 }
 0xd71   :  { %v10827_v36 = vadd.f32 %v10823_v44, %v10735_v8 }
 0xd72   :  { %v11709_v22 = vpop.f32.mrf.mxu1  ;;  %v11714_v63 = vpop.f32.mrf.mxu0 }
 0xd73   :  { %v10919_v59 = vadd.f32 %v10915_v52, %v10827_v36 }
 0xd74   :  { %v11007_v28 = vpop.f32.mrf.mxu1 }
 0xd75   :  { %v11011_v24 = vadd.f32 %v11007_v28, %v10919_v59 }
 0xd76   :  { %v11719_v15 = vpop.f32.mrf.mxu1  ;;  %v11099_v19 = vpop.f32.mrf.mxu0 }
 0xd77   :  { %v11103_v16 = vadd.f32 %v11099_v19, %v11011_v24 }
 0xd78   :  { %v11724_v2 = vpop.f32.mrf.mxu0 }
 0xd7a   :  { %v11191_v26 = vpop.f32.mrf.mxu1 }
 0xd7b   :  { %v11195_v31 = vadd.f32 %v11191_v26, %v11103_v16 }
 0xd7c   :  { %v11729_v27 = vpop.f32.mrf.mxu1 }
 0xd7d   :  { %v11202_v60 = vadd.f32 %v11200_v51, %v11195_v31 }
 0xd7f   :  { %11203 = vst [vmem:[%s15330_s3] sm:$0xff] %v11202_v60 }
 0xd80   :  { %11212 = vsyncpa [#allocation7], 1 }
 0xd81   :  { %11213 = vsyncpa [#allocation9], 1 }
 0xd82   :  { %11214 = vsyncpa [#allocation12], 1 }
 0xd83   :  { %11215 = vsyncpa [#allocation15], 1 }
 0xd84   :  { %11216 = vsyncpa [#allocation18], 1 }
 0xd85   :  { %11217 = vsyncpa [#allocation21], 1 }
 0xd86   :  { %11218 = vsyncpa [#allocation24], 1 }
 0xd87   :  { %11219 = vsyncpa [#allocation27], 1 }
 0xd88   :  { %11220 = vsyncpa [#allocation30], 1 }
 0xd89   :  { %11221 = vsyncpa [#allocation33], 1 }

</bundles_post_ra>
